<compile_context>
chip_gen: v6e
topology: v6e:2x2x1
jax: 0.10.0
libtpu: 0.0.40
codegen_flags: <defaults>
</compile_context>

<pallas_src>
import jax
import jax.numpy as jnp
from jax.experimental import pallas as pl
from jax.experimental.pallas import tpu as pltpu

EPS = 1e-5
D_IN, D_H1, D_H2, D_OUT = 1024, 1024, 512, 2
HEAD_PAD = 128          # lane-dense padded head width
TILE_N = 512            # max batch tile (rows per grid step)


def _round_up(x, m):
    return (x + m - 1) // m * m


def fcn_kernel(x_ref, w1_ref, b1_ref, w2_ref, b2_ref, w3_ref, o_ref):
    # Cast activations to bf16 for the MXU; accumulate in f32.
    x = x_ref[...].astype(jnp.bfloat16)

    # Block 1: Linear(1024->1024) with folded BN -> ReLU
    h1 = jnp.dot(x, w1_ref[...], preferred_element_type=jnp.float32)
    h1 = jnp.maximum(h1 + b1_ref[...], 0.0)
    # Dropout(p=0.2): identity in eval mode.

    # Block 2: Linear(1024->512) with folded BN -> ReLU
    h2 = jnp.dot(h1.astype(jnp.bfloat16), w2_ref[...],
                 preferred_element_type=jnp.float32)
    h2 = jnp.maximum(h2 + b2_ref[...], 0.0)
    # Dropout(p=0.2): identity in eval mode.

    # Head: Linear(512->2, zero-padded to 128 lanes) -> Sigmoid, bf16 store
    logits = jnp.dot(h2.astype(jnp.bfloat16), w3_ref[...],
                     preferred_element_type=jnp.float32)
    o_ref[...] = jax.nn.sigmoid(logits).astype(o_ref.dtype)


def prepare_params(p):
    """Fold eval-mode BatchNorm into the linear weights; cast weights to bf16."""
    def fold(w, g, b, m, v):
        scale = g * jax.lax.rsqrt(v + EPS)                         # [out]
        w_t = (w.T * scale[None, :]).astype(jnp.bfloat16)          # [in, out]
        bias = (b - m * scale).astype(jnp.float32).reshape(1, -1)  # [1, out]
        return w_t, bias

    w1_t, bias1 = fold(p["w1"], p["g1"], p["b1"], p["m1"], p["v1"])
    w2_t, bias2 = fold(p["w2"], p["g2"], p["b2"], p["m2"], p["v2"])
    w3_t = p["w3"].T.astype(jnp.bfloat16)                          # [512, 2]
    w3_t = jnp.pad(w3_t, ((0, 0), (0, HEAD_PAD - D_OUT)))          # [512, 128]
    return {"w1_t": w1_t, "bias1": bias1,
            "w2_t": w2_t, "bias2": bias2, "w3_t": w3_t}


def _choose_tile(n):
    """Pick a batch tile: big for low per-step overhead, but guarantee >=2 grid
    steps whenever n exceeds one tile so v7x's two TensorCores both get work."""
    n8 = _round_up(n, 8)
    if n8 <= TILE_N:
        return n8                       # single tile; small batch
    half = _round_up(pl.cdiv(n8, 2), 256)
    return min(TILE_N, half)


def _build_call(tile_n, grid, n_pad, use_buffered):
    """Construct the pallas_call; weight/bias specs are VMEM-resident and
    (optionally) single-buffered since their index_map is constant."""
    if use_buffered:
        def resident(shape):
            return pl.BlockSpec(shape, lambda i: (0, 0),
                                pipeline_mode=pl.Buffered(1))
    else:
        def resident(shape):
            return pl.BlockSpec(shape, lambda i: (0, 0))

    in_specs = [
        pl.BlockSpec((tile_n, D_IN), lambda i: (i, 0)),   # x tile (pipelined)
        resident((D_IN, D_H1)),                           # w1 (bf16, resident)
        resident((1, D_H1)),                              # folded BN bias 1
        resident((D_H1, D_H2)),                           # w2 (bf16, resident)
        resident((1, D_H2)),                              # folded BN bias 2
        resident((D_H2, HEAD_PAD)),                       # w3 (padded head)
    ]
    out_specs = pl.BlockSpec((tile_n, HEAD_PAD), lambda i: (i, 0))

    return pl.pallas_call(
        fcn_kernel,
        grid=grid,
        out_shape=jax.ShapeDtypeStruct((n_pad, HEAD_PAD), jnp.bfloat16),
        in_specs=in_specs,
        out_specs=out_specs,
        compiler_params=pltpu.CompilerParams(
            dimension_semantics=("parallel",),
            vmem_limit_bytes=32 << 20,
        ),
    )


def fcn_forward(x, prep):
    """x: [N, 1024] float32. prep: output of prepare_params. Returns [N, 2] f32."""
    n = x.shape[0]
    tile_n = _choose_tile(n)
    n_pad = _round_up(n, tile_n)
    if n_pad != n:
        x = jnp.pad(x, ((0, n_pad - n), (0, 0)))

    grid = (n_pad // tile_n,)
    args = (x, prep["w1_t"], prep["bias1"], prep["w2_t"], prep["bias2"],
            prep["w3_t"])

    try:
        out = _build_call(tile_n, grid, n_pad, use_buffered=True)(*args)
    except Exception:
        # Fallback for JAX builds where single-buffered pipeline_mode is not
        # supported: default double-buffered resident weights (still correct).
        out = _build_call(tile_n, grid, n_pad, use_buffered=False)(*args)

    return out[:n, :D_OUT].astype(jnp.float32)


def init_params(key):
    """Deterministic synthetic parameters in PyTorch layout (W: [out, in])."""
    ks = jax.random.split(key, 3)
    return {
        "w1": jax.random.normal(ks[0], (D_H1, D_IN), jnp.float32) * 0.02,
        "g1": jnp.ones((D_H1,), jnp.float32),
        "b1": jnp.zeros((D_H1,), jnp.float32),
        "m1": jnp.zeros((D_H1,), jnp.float32),
        "v1": jnp.ones((D_H1,), jnp.float32),
        "w2": jax.random.normal(ks[1], (D_H2, D_H1), jnp.float32) * 0.02,
        "g2": jnp.ones((D_H2,), jnp.float32),
        "b2": jnp.zeros((D_H2,), jnp.float32),
        "m2": jnp.zeros((D_H2,), jnp.float32),
        "v2": jnp.ones((D_H2,), jnp.float32),
        "w3": jax.random.normal(ks[2], (D_OUT, D_H2), jnp.float32) * 0.02,
    }


def reference_forward_f32(x, p):
    """Pure-f32 reference matching the PyTorch module (eval mode)."""
    def bn(h, g, b, m, v):
        return (h - m) * jax.lax.rsqrt(v + EPS) * g + b
    h1 = jnp.maximum(bn(x @ p["w1"].T, p["g1"], p["b1"], p["m1"], p["v1"]), 0.0)
    h2 = jnp.maximum(bn(h1 @ p["w2"].T, p["g2"], p["b2"], p["m2"], p["v2"]), 0.0)
    return jax.nn.sigmoid(h2 @ p["w3"].T)


def reference_forward_folded(x, prep):
    """Pure-JAX reference using the same folded bf16 weights (and bf16 output
    rounding) as the kernel."""
    xb = x.astype(jnp.bfloat16)
    h1 = jnp.dot(xb, prep["w1_t"], preferred_element_type=jnp.float32) + prep["bias1"]
    h1 = jnp.maximum(h1, 0.0)
    h2 = jnp.dot(h1.astype(jnp.bfloat16), prep["w2_t"],
                 preferred_element_type=jnp.float32) + prep["bias2"]
    h2 = jnp.maximum(h2, 0.0)
    logits = jnp.dot(h2.astype(jnp.bfloat16), prep["w3_t"],
                     preferred_element_type=jnp.float32)
    out = jax.nn.sigmoid(logits).astype(jnp.bfloat16)
    return out[:, :D_OUT].astype(jnp.float32)


if __name__ == "__main__":
    key = jax.random.PRNGKey(0)
    k_x, k_p = jax.random.split(key)

    batch = 8
    x = jax.random.normal(k_x, (batch, D_IN), jnp.float32)
    params = init_params(k_p)
    prep = prepare_params(params)

    out = fcn_forward(x, prep)
    out = jax.block_until_ready(out)
    assert out.shape == (batch, D_OUT), out.shape

    # Primary check: identical-weights (bf16-folded, bf16-store) pure-JAX reference.
    ref_folded = reference_forward_folded(x, prep)
    assert jnp.allclose(out, ref_folded, atol=2e-3, rtol=2e-3), (
        "mismatch vs bf16-folded reference: "
        f"{float(jnp.max(jnp.abs(out - ref_folded)))}")

    # Sanity check: full-precision reference of the original module semantics.
    ref_f32 = reference_forward_f32(x, params)
    assert jnp.allclose(out, ref_f32, atol=2e-2, rtol=2e-2), (
        "mismatch vs f32 reference: "
        f"{float(jnp.max(jnp.abs(out - ref_f32)))}")

    print("KERNEL_OK")
</pallas_src>

<mosaic_0001>
module attributes {stable_mosaic.version = 11 : i64} {
  func.func @fcn_kernel(%arg0: i32, %arg1: memref<8x1024xf32, #tpu.memory_space<vmem>>, %arg2: memref<1024x1024xbf16, #tpu.memory_space<vmem>>, %arg3: memref<1x1024xf32, #tpu.memory_space<vmem>>, %arg4: memref<1024x512xbf16, #tpu.memory_space<vmem>>, %arg5: memref<1x512xf32, #tpu.memory_space<vmem>>, %arg6: memref<512x128xbf16, #tpu.memory_space<vmem>>, %arg7: memref<8x128xbf16, #tpu.memory_space<vmem>>) attributes {dimension_semantics = [#tpu.dimension_semantics<parallel>], iteration_bounds = array<i64: 1>, scalar_prefetch = 0 : i64, scratch_operands = 0 : i64, tpu.core_type = #tpu.core_type<tc>, window_params = [{transform_indices = @transform_0, window_bounds = array<i64: 8, 1024>}, {pipeline_mode = #tpu.pipeline_mode<synchronous>, transform_indices = @transform_1, window_bounds = array<i64: 1024, 1024>}, {pipeline_mode = #tpu.pipeline_mode<synchronous>, transform_indices = @transform_2, window_bounds = array<i64: 1, 1024>}, {pipeline_mode = #tpu.pipeline_mode<synchronous>, transform_indices = @transform_3, window_bounds = array<i64: 1024, 512>}, {pipeline_mode = #tpu.pipeline_mode<synchronous>, transform_indices = @transform_4, window_bounds = array<i64: 1, 512>}, {pipeline_mode = #tpu.pipeline_mode<synchronous>, transform_indices = @transform_5, window_bounds = array<i64: 512, 128>}, {transform_indices = @transform_6, window_bounds = array<i64: 8, 128>}]} {
    %c0 = arith.constant 0 : index
    %c0_0 = arith.constant 0 : index
    %0 = vector.load %arg1[%c0, %c0_0] : memref<8x1024xf32, #tpu.memory_space<vmem>>, vector<8x1024xf32>
    %1 = arith.truncf %0 : vector<8x1024xf32> to vector<8x1024xbf16>
    %c0_1 = arith.constant 0 : index
    %c0_2 = arith.constant 0 : index
    %2 = vector.load %arg2[%c0_1, %c0_2] : memref<1024x1024xbf16, #tpu.memory_space<vmem>>, vector<1024x1024xbf16>
    %cst = arith.constant dense<0.000000e+00> : vector<8x1024xf32>
    %3 = tpu.matmul %1, %2, %cst {dimension_numbers = #tpu.dot_dimension_numbers<[1], [0], [0], [1], [0, 0, 1, 1], [], []>} : vector<8x1024xbf16>, vector<1024x1024xbf16>, vector<8x1024xf32> -> vector<8x1024xf32>
    %c0_3 = arith.constant 0 : index
    %c0_4 = arith.constant 0 : index
    %4 = vector.load %arg3[%c0_3, %c0_4] : memref<1x1024xf32, #tpu.memory_space<vmem>>, vector<1x1024xf32>
    %5 = vector.broadcast %4 : vector<1x1024xf32> to vector<8x1024xf32>
    %6 = arith.addf %3, %5 : vector<8x1024xf32>
    %cst_5 = arith.constant 0.000000e+00 : f32
    %7 = vector.broadcast %cst_5 : f32 to vector<8x1024xf32>
    %8 = arith.maximumf %6, %7 : vector<8x1024xf32>
    %9 = arith.truncf %8 : vector<8x1024xf32> to vector<8x1024xbf16>
    %c0_6 = arith.constant 0 : index
    %c0_7 = arith.constant 0 : index
    %10 = vector.load %arg4[%c0_6, %c0_7] : memref<1024x512xbf16, #tpu.memory_space<vmem>>, vector<1024x512xbf16>
    %cst_8 = arith.constant dense<0.000000e+00> : vector<8x512xf32>
    %11 = tpu.matmul %9, %10, %cst_8 {dimension_numbers = #tpu.dot_dimension_numbers<[1], [0], [0], [1], [0, 0, 1, 1], [], []>} : vector<8x1024xbf16>, vector<1024x512xbf16>, vector<8x512xf32> -> vector<8x512xf32>
    %c0_9 = arith.constant 0 : index
    %c0_10 = arith.constant 0 : index
    %12 = vector.load %arg5[%c0_9, %c0_10] : memref<1x512xf32, #tpu.memory_space<vmem>>, vector<1x512xf32>
    %13 = vector.broadcast %12 : vector<1x512xf32> to vector<8x512xf32>
    %14 = arith.addf %11, %13 : vector<8x512xf32>
    %cst_11 = arith.constant 0.000000e+00 : f32
    %15 = vector.broadcast %cst_11 : f32 to vector<8x512xf32>
    %16 = arith.maximumf %14, %15 : vector<8x512xf32>
    %17 = arith.truncf %16 : vector<8x512xf32> to vector<8x512xbf16>
    %c0_12 = arith.constant 0 : index
    %c0_13 = arith.constant 0 : index
    %18 = vector.load %arg6[%c0_12, %c0_13] : memref<512x128xbf16, #tpu.memory_space<vmem>>, vector<512x128xbf16>
    %cst_14 = arith.constant dense<0.000000e+00> : vector<8x128xf32>
    %19 = tpu.matmul %17, %18, %cst_14 {dimension_numbers = #tpu.dot_dimension_numbers<[1], [0], [0], [1], [0, 0, 1, 1], [], []>} : vector<8x512xbf16>, vector<512x128xbf16>, vector<8x128xf32> -> vector<8x128xf32>
    %20 = arith.negf %19 : vector<8x128xf32>
    %21 = math.exp %20 : vector<8x128xf32>
    %cst_15 = arith.constant 1.000000e+00 : f32
    %22 = vector.broadcast %cst_15 : f32 to vector<8x128xf32>
    %23 = arith.addf %22, %21 : vector<8x128xf32>
    %24 = arith.divf %22, %23 : vector<8x128xf32>
    %25 = arith.truncf %24 : vector<8x128xf32> to vector<8x128xbf16>
    %c0_16 = arith.constant 0 : index
    %c0_17 = arith.constant 0 : index
    %26 = vector.load %arg7[%c0_16, %c0_17] : memref<8x128xbf16, #tpu.memory_space<vmem>>, vector<8x128xbf16>
    tpu.vector_store %arg7[%c0_16, %c0_17], %25 {strides = array<i32>} : memref<8x128xbf16, #tpu.memory_space<vmem>>, vector<8x128xbf16>,
    return
  }
  func.func @transform_0(%arg0: i32) -> (i32, i32) {
    %c0_i32 = arith.constant 0 : i32
    %c0_i32_0 = arith.constant 0 : i32
    return %arg0, %c0_i32 : i32, i32
  }
  func.func @transform_1(%arg0: i32) -> (i32, i32) {
    %c0_i32 = arith.constant 0 : i32
    %c0_i32_0 = arith.constant 0 : i32
    %c0_i32_1 = arith.constant 0 : i32
    return %c0_i32, %c0_i32_0 : i32, i32
  }
  func.func @transform_2(%arg0: i32) -> (i32, i32) {
    %c0_i32 = arith.constant 0 : i32
    %c0_i32_0 = arith.constant 0 : i32
    %c0_i32_1 = arith.constant 0 : i32
    return %c0_i32, %c0_i32_0 : i32, i32
  }
  func.func @transform_3(%arg0: i32) -> (i32, i32) {
    %c0_i32 = arith.constant 0 : i32
    %c0_i32_0 = arith.constant 0 : i32
    %c0_i32_1 = arith.constant 0 : i32
    return %c0_i32, %c0_i32_0 : i32, i32
  }
  func.func @transform_4(%arg0: i32) -> (i32, i32) {
    %c0_i32 = arith.constant 0 : i32
    %c0_i32_0 = arith.constant 0 : i32
    %c0_i32_1 = arith.constant 0 : i32
    return %c0_i32, %c0_i32_0 : i32, i32
  }
  func.func @transform_5(%arg0: i32) -> (i32, i32) {
    %c0_i32 = arith.constant 0 : i32
    %c0_i32_0 = arith.constant 0 : i32
    %c0_i32_1 = arith.constant 0 : i32
    return %c0_i32, %c0_i32_0 : i32, i32
  }
  func.func @transform_6(%arg0: i32) -> (i32, i32) {
    %c0_i32 = arith.constant 0 : i32
    %c0_i32_0 = arith.constant 0 : i32
    return %arg0, %c0_i32 : i32, i32
  }
}

module attributes {stable_mosaic.version = 11 : i64} {
  func.func @fcn_kernel(%arg0: i32, %arg1: memref<8x1024xf32, #tpu.memory_space<vmem>>, %arg2: memref<1024x1024xbf16, #tpu.memory_space<vmem>>, %arg3: memref<1x1024xf32, #tpu.memory_space<vmem>>, %arg4: memref<1024x512xbf16, #tpu.memory_space<vmem>>, %arg5: memref<1x512xf32, #tpu.memory_space<vmem>>, %arg6: memref<512x128xbf16, #tpu.memory_space<vmem>>, %arg7: memref<8x128xbf16, #tpu.memory_space<vmem>>) attributes {dimension_semantics = [#tpu.dimension_semantics<parallel>], iteration_bounds = array<i64: 1>, scalar_prefetch = 0 : i64, scratch_operands = 0 : i64, tpu.core_type = #tpu.core_type<tc>, window_params = [{transform_indices = @transform_0, window_bounds = array<i64: 8, 1024>}, {pipeline_mode = #tpu.pipeline_mode<synchronous>, transform_indices = @transform_1, window_bounds = array<i64: 1024, 1024>}, {pipeline_mode = #tpu.pipeline_mode<synchronous>, transform_indices = @transform_2, window_bounds = array<i64: 1, 1024>}, {pipeline_mode = #tpu.pipeline_mode<synchronous>, transform_indices = @transform_3, window_bounds = array<i64: 1024, 512>}, {pipeline_mode = #tpu.pipeline_mode<synchronous>, transform_indices = @transform_4, window_bounds = array<i64: 1, 512>}, {pipeline_mode = #tpu.pipeline_mode<synchronous>, transform_indices = @transform_5, window_bounds = array<i64: 512, 128>}, {transform_indices = @transform_6, window_bounds = array<i64: 8, 128>}]} {
    %c0 = arith.constant 0 : index
    %c0_0 = arith.constant 0 : index
    %0 = vector.load %arg1[%c0, %c0_0] : memref<8x1024xf32, #tpu.memory_space<vmem>>, vector<8x1024xf32>
    %1 = arith.truncf %0 : vector<8x1024xf32> to vector<8x1024xbf16>
    %c0_1 = arith.constant 0 : index
    %c0_2 = arith.constant 0 : index
    %2 = vector.load %arg2[%c0_1, %c0_2] : memref<1024x1024xbf16, #tpu.memory_space<vmem>>, vector<1024x1024xbf16>
    %cst = arith.constant dense<0.000000e+00> : vector<8x1024xf32>
    %3 = tpu.matmul %1, %2, %cst {dimension_numbers = #tpu.dot_dimension_numbers<[1], [0], [0], [1], [0, 0, 1, 1], [], []>} : vector<8x1024xbf16>, vector<1024x1024xbf16>, vector<8x1024xf32> -> vector<8x1024xf32>
    %c0_3 = arith.constant 0 : index
    %c0_4 = arith.constant 0 : index
    %4 = vector.load %arg3[%c0_3, %c0_4] : memref<1x1024xf32, #tpu.memory_space<vmem>>, vector<1x1024xf32>
    %5 = vector.broadcast %4 : vector<1x1024xf32> to vector<8x1024xf32>
    %6 = arith.addf %3, %5 : vector<8x1024xf32>
    %cst_5 = arith.constant 0.000000e+00 : f32
    %7 = vector.broadcast %cst_5 : f32 to vector<8x1024xf32>
    %8 = arith.maximumf %6, %7 : vector<8x1024xf32>
    %9 = arith.truncf %8 : vector<8x1024xf32> to vector<8x1024xbf16>
    %c0_6 = arith.constant 0 : index
    %c0_7 = arith.constant 0 : index
    %10 = vector.load %arg4[%c0_6, %c0_7] : memref<1024x512xbf16, #tpu.memory_space<vmem>>, vector<1024x512xbf16>
    %cst_8 = arith.constant dense<0.000000e+00> : vector<8x512xf32>
    %11 = tpu.matmul %9, %10, %cst_8 {dimension_numbers = #tpu.dot_dimension_numbers<[1], [0], [0], [1], [0, 0, 1, 1], [], []>} : vector<8x1024xbf16>, vector<1024x512xbf16>, vector<8x512xf32> -> vector<8x512xf32>
    %c0_9 = arith.constant 0 : index
    %c0_10 = arith.constant 0 : index
    %12 = vector.load %arg5[%c0_9, %c0_10] : memref<1x512xf32, #tpu.memory_space<vmem>>, vector<1x512xf32>
    %13 = vector.broadcast %12 : vector<1x512xf32> to vector<8x512xf32>
    %14 = arith.addf %11, %13 : vector<8x512xf32>
    %cst_11 = arith.constant 0.000000e+00 : f32
    %15 = vector.broadcast %cst_11 : f32 to vector<8x512xf32>
    %16 = arith.maximumf %14, %15 : vector<8x512xf32>
    %17 = arith.truncf %16 : vector<8x512xf32> to vector<8x512xbf16>
    %c0_12 = arith.constant 0 : index
    %c0_13 = arith.constant 0 : index
    %18 = vector.load %arg6[%c0_12, %c0_13] : memref<512x128xbf16, #tpu.memory_space<vmem>>, vector<512x128xbf16>
    %cst_14 = arith.constant dense<0.000000e+00> : vector<8x128xf32>
    %19 = tpu.matmul %17, %18, %cst_14 {dimension_numbers = #tpu.dot_dimension_numbers<[1], [0], [0], [1], [0, 0, 1, 1], [], []>} : vector<8x512xbf16>, vector<512x128xbf16>, vector<8x128xf32> -> vector<8x128xf32>
    %20 = arith.negf %19 : vector<8x128xf32>
    %21 = math.exp %20 : vector<8x128xf32>
    %cst_15 = arith.constant 1.000000e+00 : f32
    %22 = vector.broadcast %cst_15 : f32 to vector<8x128xf32>
    %23 = arith.addf %22, %21 : vector<8x128xf32>
    %24 = arith.divf %22, %23 : vector<8x128xf32>
    %25 = arith.truncf %24 : vector<8x128xf32> to vector<8x128xbf16>
    %c0_16 = arith.constant 0 : index
    %c0_17 = arith.constant 0 : index
    %26 = vector.load %arg7[%c0_16, %c0_17] : memref<8x128xbf16, #tpu.memory_space<vmem>>, vector<8x128xbf16>
    tpu.vector_store %arg7[%c0_16, %c0_17], %25 {strides = array<i32>} : memref<8x128xbf16, #tpu.memory_space<vmem>>, vector<8x128xbf16>,
    return
  }
  func.func @transform_0(%arg0: i32) -> (i32, i32) {
    %c0_i32 = arith.constant 0 : i32
    %c0_i32_0 = arith.constant 0 : i32
    return %arg0, %c0_i32 : i32, i32
  }
  func.func @transform_1(%arg0: i32) -> (i32, i32) {
    %c0_i32 = arith.constant 0 : i32
    %c0_i32_0 = arith.constant 0 : i32
    %c0_i32_1 = arith.constant 0 : i32
    return %c0_i32, %c0_i32_0 : i32, i32
  }
  func.func @transform_2(%arg0: i32) -> (i32, i32) {
    %c0_i32 = arith.constant 0 : i32
    %c0_i32_0 = arith.constant 0 : i32
    %c0_i32_1 = arith.constant 0 : i32
    return %c0_i32, %c0_i32_0 : i32, i32
  }
  func.func @transform_3(%arg0: i32) -> (i32, i32) {
    %c0_i32 = arith.constant 0 : i32
    %c0_i32_0 = arith.constant 0 : i32
    %c0_i32_1 = arith.constant 0 : i32
    return %c0_i32, %c0_i32_0 : i32, i32
  }
  func.func @transform_4(%arg0: i32) -> (i32, i32) {
    %c0_i32 = arith.constant 0 : i32
    %c0_i32_0 = arith.constant 0 : i32
    %c0_i32_1 = arith.constant 0 : i32
    return %c0_i32, %c0_i32_0 : i32, i32
  }
  func.func @transform_5(%arg0: i32) -> (i32, i32) {
    %c0_i32 = arith.constant 0 : i32
    %c0_i32_0 = arith.constant 0 : i32
    %c0_i32_1 = arith.constant 0 : i32
    return %c0_i32, %c0_i32_0 : i32, i32
  }
  func.func @transform_6(%arg0: i32) -> (i32, i32) {
    %c0_i32 = arith.constant 0 : i32
    %c0_i32_0 = arith.constant 0 : i32
    return %arg0, %c0_i32 : i32, i32
  }
}

</mosaic_0001>

<bundles_post_ra>
// kernel: tpu_custom_call.1
= control target key start
LH: loop header
LB: loop body
LE: loop exit
PB: predicated region body
PF: predicated region fallthrough
CT: control target
= control target key end

     0   :  { %11 = vsyncpa [#allocation3], 0  ;;  %s7841_s0 = inlined_call_operand.hbm [shape: f32[8,1024], index: 0, kind: input, shape index: {}]   ;;  %s7842_s1 = inlined_call_operand.hbm [shape: bf16[1024,1024], index: 1, kind: input, shape index: {}]   ;;  %s7843_s2 = inlined_call_operand.hbm [shape: f32[1,1024], index: 2, kind: input, shape index: {}]   ;;  %s7844_s3 = inlined_call_operand.hbm [shape: bf16[1024,512], index: 3, kind: input, shape index: {}]   ;;  %s7845_s4 = inlined_call_operand.hbm [shape: f32[1,512], index: 4, kind: input, shape index: {}]   ;;  %s7846_s5 = inlined_call_operand.hbm [shape: bf16[512,128], index: 5, kind: input, shape index: {}]   ;;  %s7847_s6 = inlined_call_operand.hbm [shape: bf16[8,128], index: 6, kind: output, shape index: {}]  }
   0x1   :  { %12 = vsyncpa [#allocation6], 0 }
   0x2   :  { %13 = vsyncpa [#allocation9], 0 }
   0x3   :  { %14 = vsyncpa [#allocation12], 0 }
   0x4   :  { %15 = vsyncpa [#allocation4], 0  ;;  %s7588_s21 = smov [#allocation5]  }
   0x5   :  { %s31_s22 = sshll.u32 %s7588_s21, 4  ;;  %s32_s22 = int_to_ptr.vmem [resolvable:$true] %s31_s22 }
   0x6   :  { %s7446_s23 = scalar_lea.vmem %s32_s22, 65536  ;;  %p7451_p1 = scmp.lt.s32.totalorder %s32_s22, %s32_s22 }
   0x7   :  { %p7447_p0 = scmp.ne.s32.totalorder %s32_s22, %s7446_s23  ;;  %p7452_p2 = scmp.lt.s32.totalorder %s7446_s23, %s7446_s23 }
   0x9   :  { %p7453_p3 = por %p7452_p2, %p7451_p1 }
   0xb   :  { %p7454_p4 = pnand %p7453_p3, %p7447_p0 }
   0xd   :  { %7457 = shalt.err (!%p7454_p4)
}
   0xe   :  { %s7589_s24 = smov 512   ;;  %s7590_s25 = smov 32  }
   0xf   :  { %37 = dma.hbm_to_vmem [thread:$0]  %s7842_s1, 65536, %s32_s22, [#allocation6], %s7589_s24, %s7589_s24, %s7590_s25  }
  0x10   :  { %s7591_s28 = smov [#allocation8]  }
  0x11   :  { %s53_s29 = sshll.u32 %s7591_s28, 4  ;;  %s54_s29 = int_to_ptr.vmem [resolvable:$true] %s53_s29 }
  0x12   :  { %s7466_s30 = scalar_lea.vmem %s54_s29, 32768  ;;  %p7471_p6 = scmp.lt.s32.totalorder %s54_s29, %s54_s29 }
  0x13   :  { %p7467_p5 = scmp.ne.s32.totalorder %s54_s29, %s7466_s30  ;;  %p7472_p7 = scmp.lt.s32.totalorder %s7466_s30, %s7466_s30 }
  0x15   :  { %p7473_p8 = por %p7472_p7, %p7471_p6 }
  0x17   :  { %p7474_p9 = pnand %p7473_p8, %p7467_p5 }
  0x19   :  { %7477 = shalt.err (!%p7474_p9)
}
  0x1a   :  { %s7592_s7 = smov 256   ;;  %s7593_s8 = smov 16  }
  0x1b   :  { %59 = dma.hbm_to_vmem [thread:$0]  %s7844_s3, 32768, %s54_s29, [#allocation9], %s7592_s7, %s7592_s7, %s7593_s8  }
  0x1c   :  { %s7594_s11 = smov [#allocation2]   ;;  %s7595_s13 = smov [#allocation7]  }
  0x1d   :  { %s22_s12 = sshll.u32 %s7594_s11, 4  ;;  %s44_s1 = sshll.u32 %s7595_s13, 4  ;;  %s23_s12 = int_to_ptr.vmem [resolvable:$true] %s22_s12  ;;  %s45_s1 = int_to_ptr.vmem [resolvable:$true] %s44_s1 }
  0x1e   :  { %s7486_s14 = scalar_lea.vmem %s23_s12, 1024  ;;  %p7491_p11 = scmp.lt.s32.totalorder %s23_s12, %s23_s12 }
  0x1f   :  { %p7487_p10 = scmp.ne.s32.totalorder %s23_s12, %s7486_s14  ;;  %p7492_p12 = scmp.lt.s32.totalorder %s7486_s14, %s7486_s14 }
  0x21   :  { %p7493_p13 = por %p7492_p12, %p7491_p11 }
  0x23   :  { %p7494_p0 = pnand %p7493_p13, %p7487_p10 }
  0x25   :  { %7497 = shalt.err (!%p7494_p0)
}
  0x26   :  { %25 = dma.hbm_to_vmem [thread:$0]  %s7841_s0, 1024, %s23_s12, [#allocation3]  }
  0x27   :  { %s7506_s17 = scalar_lea.vmem %s45_s1, 128  ;;  %p7511_p2 = scmp.lt.s32.totalorder %s45_s1, %s45_s1 }
  0x28   :  { %p7507_p1 = scmp.ne.s32.totalorder %s45_s1, %s7506_s17  ;;  %p7512_p3 = scmp.lt.s32.totalorder %s7506_s17, %s7506_s17 }
  0x2a   :  { %p7513_p4 = por %p7512_p3, %p7511_p2 }
  0x2c   :  { %p7514_p5 = pnand %p7513_p4, %p7507_p1 }
  0x2e   :  { %7517 = shalt.err (!%p7514_p5)
}
  0x2f   :  { %47 = dma.hbm_to_vmem [thread:$0]  %s7843_s2, 128, %s45_s1, [#allocation6]  }
  0x30   :  { %s7596_s19 = smov [#allocation10]   ;;  %s7597_s21 = smov [#allocation11]  }
  0x31   :  { %s66_s20 = sshll.u32 %s7596_s19, 4  ;;  %s75_s22 = sshll.u32 %s7597_s21, 4  ;;  %s67_s20 = int_to_ptr.vmem [resolvable:$true] %s66_s20  ;;  %s76_s22 = int_to_ptr.vmem [resolvable:$true] %s75_s22 }
  0x32   :  { %s7526_s23 = scalar_lea.vmem %s67_s20, 64  ;;  %p7531_p7 = scmp.lt.s32.totalorder %s67_s20, %s67_s20 }
  0x33   :  { %p7527_p6 = scmp.ne.s32.totalorder %s67_s20, %s7526_s23  ;;  %p7532_p8 = scmp.lt.s32.totalorder %s7526_s23, %s7526_s23 }
  0x35   :  { %p7533_p9 = por %p7532_p8, %p7531_p7 }
  0x37   :  { %p7534_p10 = pnand %p7533_p9, %p7527_p6 }
  0x39   :  { %7537 = shalt.err (!%p7534_p10)
}
  0x3a   :  { %69 = dma.hbm_to_vmem [thread:$0]  %s7845_s4, 64, %s67_s20, [#allocation9]  }
  0x3b   :  { %s7546_s25 = scalar_lea.vmem %s76_s22, 4096  ;;  %p7551_p12 = scmp.lt.s32.totalorder %s76_s22, %s76_s22 }
  0x3c   :  { %p7547_p11 = scmp.ne.s32.totalorder %s76_s22, %s7546_s25  ;;  %p7552_p13 = scmp.lt.s32.totalorder %s7546_s25, %s7546_s25 }
  0x3e   :  { %p7553_p0 = por %p7552_p13, %p7551_p12 }
  0x40   :  { %p7554_p1 = pnand %p7553_p0, %p7547_p11 }
  0x42   :  { %7557 = shalt.err (!%p7554_p1)
}
  0x43   :  { %s7598_s2 = smov 64   ;;  %s7599_s26 = smov 4  }
  0x44   :  { %81 = dma.hbm_to_vmem [thread:$0]  %s7846_s5, 4096, %s76_s22, [#allocation12], %s7598_s2, %s7598_s2, %s7599_s26  }
  0x45   :  { %7578 = dma.done.wait [#allocation3], 1024  }
  0x46   :  { %7579 = vsyncadd [#allocation3], 4294966272 }
  0x47   :  { %7580 = dma.done.wait [#allocation6], 65664  }
  0x48   :  { %7581 = vsyncadd [#allocation6], 4294901632 }
  0x49   :  { %7582 = dma.done.wait [#allocation9], 32832  }
  0x4a   :  { %7583 = vsyncadd [#allocation9], 4294934464 }
  0x4b   :  { %7584 = dma.done.wait [#allocation12], 4096  }
  0x4c   :  { %7585 = vsyncadd [#allocation12], 4294963200  ;;  %v173_v0 = vld [vmem:[#allocation5 + $0x1c0] sm:$0xff]  ;;  %v102_v53 = vld [vmem:[#allocation2 + $0x8] sm:$0xff]  ;;  %s7600_s4 = smov [#allocation13]  }
  0x4d   :  { %v177_v1 = vld [vmem:[#allocation5 + $0x1e0] sm:$0xff]  ;;  %v104_v54 = vld [vmem:[#allocation2 + $0x18] sm:$0xff]  ;;  %v7654_v58 = vpack.c.bf16 %v102_v53, %v102_v53  ;;  %s6147_s5 = sshll.u32 %s7600_s4, 4  ;;  %s6148_s5 = int_to_ptr.vmem [resolvable:$true] %s6147_s5 }
  0x4e   :  { %v301_v2 = vld [vmem:[#allocation5 + $0x5c0] sm:$0xff]  ;;  %v6216_v3 = vcombine.high %v173_v0, %v177_v1  ;;  %v6215_v5 = vcombine.low %v173_v0, %v177_v1  ;;  %v7656_v59 = vpack.c.bf16 %v104_v54, %v104_v54  ;;  %s7558_s29 = scalar_lea.vmem %s6148_s5, 64  ;;  %p7563_p3 = scmp.lt.s32.totalorder %s6148_s5, %s6148_s5 }
  0x4f   :  { %v305_v4 = vld [vmem:[#allocation5 + $0x5e0] sm:$0xff]  ;;  %3263 = vmatprep.mubr.bf16.mxu0 %v7654_v58  ;;  %p7559_p2 = scmp.ne.s32.totalorder %s6148_s5, %s7558_s29  ;;  %p7564_p4 = scmp.lt.s32.totalorder %s7558_s29, %s7558_s29 }
  0x50   :  { %v165_v6 = vld [vmem:[#allocation5 + $0x180] sm:$0xff]  ;;  %v6344_v8 = vcombine.high %v301_v2, %v305_v4  ;;  %v6343_v9 = vcombine.low %v301_v2, %v305_v4  ;;  %3231 = vmatprep.subr.bf16.mxu0 %v6216_v3  ;;  %3304 = vmatprep.mubr.bf16.mxu1 %v7656_v59 }
  0x51   :  { %v169_v7 = vld [vmem:[#allocation5 + $0x1a0] sm:$0xff]  ;;  %3232 = vmatpush1.bf16.msra.mxu0 %v6215_v5  ;;  %p7565_p5 = por %p7564_p4, %p7563_p3 }
  0x52   :  { %v6208_v10 = vcombine.high %v165_v6, %v169_v7  ;;  %v293_v11 = vld [vmem:[#allocation5 + $0x580] sm:$0xff]  ;;  %3272 = vmatprep.subr.bf16.mxu1 %v6344_v8  ;;  %v6207_v18 = vcombine.low %v165_v6, %v169_v7 }
  0x53   :  { %v297_v12 = vld [vmem:[#allocation5 + $0x5a0] sm:$0xff]  ;;  %3273 = vmatpush1.bf16.msra.mxu1 %v6343_v9  ;;  %p7566_p6 = pnand %p7565_p5, %p7559_p2 }
  0x54   :  { %v157_v13 = vld [vmem:[#allocation5 + $0x140] sm:$0xff]  ;;  %v6336_v14 = vcombine.high %v293_v11, %v297_v12  ;;  %3233 = vmatprep.subr.bf16.mxu0 %v6208_v10  ;;  %v6335_v19 = vcombine.low %v293_v11, %v297_v12 }
  0x55   :  { %v161_v15 = vld [vmem:[#allocation5 + $0x160] sm:$0xff]  ;;  %3234 = vmatpush1.bf16.msra.mxu0 %v6207_v18 }
  0x56   :  { %v285_v16 = vld [vmem:[#allocation5 + $0x540] sm:$0xff]  ;;  %v6200_v20 = vcombine.high %v157_v13, %v161_v15  ;;  %3274 = vmatprep.subr.bf16.mxu1 %v6336_v14  ;;  %v6199_v26 = vcombine.low %v157_v13, %v161_v15 }
  0x57   :  { %v289_v17 = vld [vmem:[#allocation5 + $0x560] sm:$0xff]  ;;  %3275 = vmatpush1.bf16.msra.mxu1 %v6335_v19 }
  0x58   :  { %v6328_v21 = vcombine.high %v285_v16, %v289_v17  ;;  %v149_v22 = vld [vmem:[#allocation5 + $0x100] sm:$0xff]  ;;  %3235 = vmatprep.subr.bf16.mxu0 %v6200_v20  ;;  %v6327_v27 = vcombine.low %v285_v16, %v289_v17 }
  0x59   :  { %v153_v23 = vld [vmem:[#allocation5 + $0x120] sm:$0xff]  ;;  %3236 = vmatpush1.bf16.msra.mxu0 %v6199_v26 }
  0x5a   :  { %v277_v24 = vld [vmem:[#allocation5 + $0x500] sm:$0xff]  ;;  %v6192_v28 = vcombine.high %v149_v22, %v153_v23  ;;  %3276 = vmatprep.subr.bf16.mxu1 %v6328_v21  ;;  %v6191_v34 = vcombine.low %v149_v22, %v153_v23 }
  0x5b   :  { %v281_v25 = vld [vmem:[#allocation5 + $0x520] sm:$0xff]  ;;  %3277 = vmatpush1.bf16.msra.mxu1 %v6327_v27 }
  0x5c   :  { %v6320_v29 = vcombine.high %v277_v24, %v281_v25  ;;  %v141_v30 = vld [vmem:[#allocation5 + $0xc0] sm:$0xff]  ;;  %3237 = vmatprep.subr.bf16.mxu0 %v6192_v28  ;;  %v6319_v35 = vcombine.low %v277_v24, %v281_v25 }
  0x5d   :  { %v145_v31 = vld [vmem:[#allocation5 + $0xe0] sm:$0xff]  ;;  %3238 = vmatpush1.bf16.msra.mxu0 %v6191_v34 }
  0x5e   :  { %v269_v32 = vld [vmem:[#allocation5 + $0x4c0] sm:$0xff]  ;;  %v6184_v36 = vcombine.high %v141_v30, %v145_v31  ;;  %3278 = vmatprep.subr.bf16.mxu1 %v6320_v29  ;;  %v6183_v42 = vcombine.low %v141_v30, %v145_v31 }
  0x5f   :  { %v273_v33 = vld [vmem:[#allocation5 + $0x4e0] sm:$0xff]  ;;  %3279 = vmatpush1.bf16.msra.mxu1 %v6319_v35 }
  0x60   :  { %v6312_v37 = vcombine.high %v269_v32, %v273_v33  ;;  %v133_v38 = vld [vmem:[#allocation5 + $0x80] sm:$0xff]  ;;  %3239 = vmatprep.subr.bf16.mxu0 %v6184_v36  ;;  %v6311_v43 = vcombine.low %v269_v32, %v273_v33 }
  0x61   :  { %v137_v39 = vld [vmem:[#allocation5 + $0xa0] sm:$0xff]  ;;  %3240 = vmatpush1.bf16.msra.mxu0 %v6183_v42 }
  0x62   :  { %v261_v40 = vld [vmem:[#allocation5 + $0x480] sm:$0xff]  ;;  %v6176_v44 = vcombine.high %v133_v38, %v137_v39  ;;  %3280 = vmatprep.subr.bf16.mxu1 %v6312_v37  ;;  %v6175_v50 = vcombine.low %v133_v38, %v137_v39 }
  0x63   :  { %v265_v41 = vld [vmem:[#allocation5 + $0x4a0] sm:$0xff]  ;;  %3281 = vmatpush1.bf16.msra.mxu1 %v6311_v43 }
  0x64   :  { %v6304_v45 = vcombine.high %v261_v40, %v265_v41  ;;  %v125_v46 = vld [vmem:[#allocation5 + $0x40] sm:$0xff]  ;;  %3241 = vmatprep.subr.bf16.mxu0 %v6176_v44  ;;  %v6303_v51 = vcombine.low %v261_v40, %v265_v41 }
  0x65   :  { %v129_v47 = vld [vmem:[#allocation5 + $0x60] sm:$0xff]  ;;  %3242 = vmatpush1.bf16.msra.mxu0 %v6175_v50 }
  0x66   :  { %v253_v48 = vld [vmem:[#allocation5 + $0x440] sm:$0xff]  ;;  %v6168_v52 = vcombine.high %v125_v46, %v129_v47  ;;  %3282 = vmatprep.subr.bf16.mxu1 %v6304_v45  ;;  %v6167_v62 = vcombine.low %v125_v46, %v129_v47 }
  0x67   :  { %v257_v49 = vld [vmem:[#allocation5 + $0x460] sm:$0xff]  ;;  %3283 = vmatpush1.bf16.msra.mxu1 %v6303_v51 }
  0x68   :  { %v6296_v55 = vcombine.high %v253_v48, %v257_v49  ;;  %v117_v56 = vld [vmem:[#allocation5] sm:$0xff]  ;;  %3243 = vmatprep.subr.bf16.mxu0 %v6168_v52  ;;  %v6295_v63 = vcombine.low %v253_v48, %v257_v49 }
  0x69   :  { %v121_v57 = vld [vmem:[#allocation5 + $0x20] sm:$0xff]  ;;  %3244 = vmatpush1.bf16.msra.mxu0 %v6167_v62 }
  0x6a   :  { %v245_v60 = vld [vmem:[#allocation5 + $0x400] sm:$0xff]  ;;  %v6160_v0 = vcombine.high %v117_v56, %v121_v57  ;;  %3284 = vmatprep.subr.bf16.mxu1 %v6296_v55  ;;  %v6159_v6 = vcombine.low %v117_v56, %v121_v57 }
  0x6b   :  { %v249_v61 = vld [vmem:[#allocation5 + $0x420] sm:$0xff]  ;;  %3285 = vmatpush1.bf16.msra.mxu1 %v6295_v63 }
  0x6c   :  { %v6288_v1 = vcombine.high %v245_v60, %v249_v61  ;;  %v237_v2 = vld [vmem:[#allocation5 + $0x3c0] sm:$0xff]  ;;  %3245 = vmatprep.subr.bf16.mxu0 %v6160_v0  ;;  %v6287_v7 = vcombine.low %v245_v60, %v249_v61 }
  0x6d   :  { %v241_v3 = vld [vmem:[#allocation5 + $0x3e0] sm:$0xff]  ;;  %3246 = vmatpush1.bf16.msra.mxu0 %v6159_v6 }
  0x6e   :  { %v365_v4 = vld [vmem:[#allocation5 + $0x7c0] sm:$0xff]  ;;  %v6280_v8 = vcombine.high %v237_v2, %v241_v3  ;;  %3286 = vmatprep.subr.bf16.mxu1 %v6288_v1  ;;  %v6279_v14 = vcombine.low %v237_v2, %v241_v3 }
  0x6f   :  { %v369_v5 = vld [vmem:[#allocation5 + $0x7e0] sm:$0xff]  ;;  %3287 = vmatpush1.bf16.msra.mxu1 %v6287_v7 }
  0x70   :  { %v6408_v9 = vcombine.high %v365_v4, %v369_v5  ;;  %v229_v10 = vld [vmem:[#allocation5 + $0x380] sm:$0xff]  ;;  %3247 = vmatprep.subr.bf16.mxu0 %v6280_v8  ;;  %v6407_v15 = vcombine.low %v365_v4, %v369_v5 }
  0x71   :  { %v233_v11 = vld [vmem:[#allocation5 + $0x3a0] sm:$0xff]  ;;  %3248 = vmatpush2.bf16.msra.mxu0 %v6279_v14 }
  0x72   :  { %v357_v12 = vld [vmem:[#allocation5 + $0x780] sm:$0xff]  ;;  %v6272_v16 = vcombine.high %v229_v10, %v233_v11  ;;  %3288 = vmatprep.subr.bf16.mxu1 %v6408_v9  ;;  %v6271_v22 = vcombine.low %v229_v10, %v233_v11  ;;  %v103_v11 = vld [vmem:[#allocation2 + $0x10] sm:$0xff] }
  0x73   :  { %v361_v13 = vld [vmem:[#allocation5 + $0x7a0] sm:$0xff]  ;;  %3289 = vmatpush2.bf16.msra.mxu1 %v6407_v15 }
  0x74   :  { %v6400_v17 = vcombine.high %v357_v12, %v361_v13  ;;  %v221_v18 = vld [vmem:[#allocation5 + $0x340] sm:$0xff]  ;;  %3249 = vmatprep.subr.bf16.mxu0 %v6272_v16  ;;  %v6399_v23 = vcombine.low %v357_v12, %v361_v13 }
  0x75   :  { %v225_v19 = vld [vmem:[#allocation5 + $0x360] sm:$0xff]  ;;  %3250 = vmatpush2.bf16.msra.mxu0 %v6271_v22  ;;  %v108_v22 = vld [vmem:[#allocation2 + $0x38] sm:$0xff] }
  0x76   :  { %v349_v20 = vld [vmem:[#allocation5 + $0x740] sm:$0xff]  ;;  %v6264_v24 = vcombine.high %v221_v18, %v225_v19  ;;  %3290 = vmatprep.subr.bf16.mxu1 %v6400_v17  ;;  %v6263_v30 = vcombine.low %v221_v18, %v225_v19  ;;  %v106_v19 = vld [vmem:[#allocation2 + $0x28] sm:$0xff] }
  0x77   :  { %v353_v21 = vld [vmem:[#allocation5 + $0x760] sm:$0xff]  ;;  %3291 = vmatpush2.bf16.msra.mxu1 %v6399_v23 }
  0x78   :  { %v6392_v25 = vcombine.high %v349_v20, %v353_v21  ;;  %v213_v26 = vld [vmem:[#allocation5 + $0x300] sm:$0xff]  ;;  %3251 = vmatprep.subr.bf16.mxu0 %v6264_v24  ;;  %v6391_v31 = vcombine.low %v349_v20, %v353_v21  ;;  %v7662_v20 = vpack.c.bf16 %v103_v11, %v103_v11 }
  0x79   :  { %v217_v27 = vld [vmem:[#allocation5 + $0x320] sm:$0xff]  ;;  %3252 = vmatpush2.bf16.msra.mxu0 %v6263_v30 }
  0x7a   :  { %v341_v28 = vld [vmem:[#allocation5 + $0x700] sm:$0xff]  ;;  %v6256_v32 = vcombine.high %v213_v26, %v217_v27  ;;  %3292 = vmatprep.subr.bf16.mxu1 %v6392_v25  ;;  %v6255_v38 = vcombine.low %v213_v26, %v217_v27 }
  0x7b   :  { %v345_v29 = vld [vmem:[#allocation5 + $0x720] sm:$0xff]  ;;  %3293 = vmatpush2.bf16.msra.mxu1 %v6391_v31  ;;  %v7667_v31 = vpack.c.bf16 %v108_v22, %v108_v22 }
  0x7c   :  { %v6384_v33 = vcombine.high %v341_v28, %v345_v29  ;;  %v205_v34 = vld [vmem:[#allocation5 + $0x2c0] sm:$0xff]  ;;  %3253 = vmatprep.subr.bf16.mxu0 %v6256_v32  ;;  %v6383_v39 = vcombine.low %v341_v28, %v345_v29  ;;  %v7664_v28 = vpack.c.bf16 %v106_v19, %v106_v19 }
  0x7d   :  { %v209_v35 = vld [vmem:[#allocation5 + $0x2e0] sm:$0xff]  ;;  %3254 = vmatpush2.bf16.msra.mxu0 %v6255_v38 }
  0x7e   :  { %v333_v36 = vld [vmem:[#allocation5 + $0x6c0] sm:$0xff]  ;;  %v6248_v40 = vcombine.high %v205_v34, %v209_v35  ;;  %3294 = vmatprep.subr.bf16.mxu1 %v6384_v33  ;;  %v6247_v46 = vcombine.low %v205_v34, %v209_v35 }
  0x7f   :  { %v337_v37 = vld [vmem:[#allocation5 + $0x6e0] sm:$0xff]  ;;  %3295 = vmatpush2.bf16.msra.mxu1 %v6383_v39 }
  0x80   :  { %v6376_v41 = vcombine.high %v333_v36, %v337_v37  ;;  %v197_v42 = vld [vmem:[#allocation5 + $0x280] sm:$0xff]  ;;  %3255 = vmatprep.subr.bf16.mxu0 %v6248_v40  ;;  %v6375_v47 = vcombine.low %v333_v36, %v337_v37 }
  0x81   :  { %v201_v43 = vld [vmem:[#allocation5 + $0x2a0] sm:$0xff]  ;;  %3256 = vmatpush2.bf16.msra.mxu0 %v6247_v46 }
  0x82   :  { %v325_v44 = vld [vmem:[#allocation5 + $0x680] sm:$0xff]  ;;  %v6240_v48 = vcombine.high %v197_v42, %v201_v43  ;;  %3296 = vmatprep.subr.bf16.mxu1 %v6376_v41  ;;  %v6239_v54 = vcombine.low %v197_v42, %v201_v43 }
  0x83   :  { %v329_v45 = vld [vmem:[#allocation5 + $0x6a0] sm:$0xff]  ;;  %3297 = vmatpush2.bf16.msra.mxu1 %v6375_v47 }
  0x84   :  { %v6368_v49 = vcombine.high %v325_v44, %v329_v45  ;;  %v189_v50 = vld [vmem:[#allocation5 + $0x240] sm:$0xff]  ;;  %3257 = vmatprep.subr.bf16.mxu0 %v6240_v48  ;;  %v6367_v55 = vcombine.low %v325_v44, %v329_v45 }
  0x85   :  { %v193_v51 = vld [vmem:[#allocation5 + $0x260] sm:$0xff]  ;;  %3258 = vmatpush2.bf16.msra.mxu0 %v6239_v54 }
  0x86   :  { %v317_v52 = vld [vmem:[#allocation5 + $0x640] sm:$0xff]  ;;  %v6232_v56 = vcombine.high %v189_v50, %v193_v51  ;;  %3298 = vmatprep.subr.bf16.mxu1 %v6368_v49  ;;  %v6231_v0 = vcombine.low %v189_v50, %v193_v51 }
  0x87   :  { %v321_v53 = vld [vmem:[#allocation5 + $0x660] sm:$0xff]  ;;  %3299 = vmatpush2.bf16.msra.mxu1 %v6367_v55 }
  0x88   :  { %v6360_v57 = vcombine.high %v317_v52, %v321_v53  ;;  %v181_v60 = vld [vmem:[#allocation5 + $0x200] sm:$0xff]  ;;  %3259 = vmatprep.subr.bf16.mxu0 %v6232_v56  ;;  %v6359_v1 = vcombine.low %v317_v52, %v321_v53 }
  0x89   :  { %v185_v61 = vld [vmem:[#allocation5 + $0x220] sm:$0xff]  ;;  %3260 = vmatpush2.bf16.msra.mxu0 %v6231_v0 }
  0x8a   :  { %v309_v62 = vld [vmem:[#allocation5 + $0x600] sm:$0xff]  ;;  %v6224_v2 = vcombine.high %v181_v60, %v185_v61  ;;  %3300 = vmatprep.subr.bf16.mxu1 %v6360_v57  ;;  %v6223_v8 = vcombine.low %v181_v60, %v185_v61 }
  0x8b   :  { %v313_v63 = vld [vmem:[#allocation5 + $0x620] sm:$0xff]  ;;  %3301 = vmatpush2.bf16.msra.mxu1 %v6359_v1 }
  0x8c   :  { %v6352_v3 = vcombine.high %v309_v62, %v313_v63  ;;  %v429_v4 = vld [vmem:[#allocation5 + $0x9c0] sm:$0xff]  ;;  %3261 = vmatprep.subr.bf16.mxu0 %v6224_v2  ;;  %v6351_v10 = vcombine.low %v309_v62, %v313_v63 }
  0x8d   :  { %v433_v5 = vld [vmem:[#allocation5 + $0x9e0] sm:$0xff]  ;;  %3262 = vmatpush2.bf16.msra.mxu0 %v6223_v8 }
  0x8e   :  { %v557_v6 = vld [vmem:[#allocation5 + $0xdc0] sm:$0xff]  ;;  %v6472_v12 = vcombine.high %v429_v4, %v433_v5  ;;  %3302 = vmatprep.subr.bf16.mxu1 %v6352_v3  ;;  %v6471_v21 = vcombine.low %v429_v4, %v433_v5 }
  0x8f   :  { %v561_v7 = vld [vmem:[#allocation5 + $0xde0] sm:$0xff]  ;;  %3303 = vmatpush2.bf16.msra.mxu1 %v6351_v10 }
  0x90   :  { %v101_v9 = vld [vmem:[#allocation2] sm:$0xff]  ;;  %v6600_v13 = vcombine.high %v557_v6, %v561_v7  ;;  %3313 = vmatprep.subr.bf16.mxu0 %v6472_v12  ;;  %v6599_v23 = vcombine.low %v557_v6, %v561_v7 }
  0x91   :  { %v421_v14 = vld [vmem:[#allocation5 + $0x980] sm:$0xff]  ;;  %v7660_v16 = vpack.c.bf16 %v101_v9, %v101_v9 }
  0x92   :  { %v425_v15 = vld [vmem:[#allocation5 + $0x9a0] sm:$0xff]  ;;  %3354 = vmatprep.subr.bf16.mxu1 %v6600_v13  ;;  %3305 = vmatmul.mubr.bf16.vlgmr.msra.gmra.mxu1 %v7662_v20 }
  0x93   :  { %v549_v17 = vld [vmem:[#allocation5 + $0xd80] sm:$0xff]  ;;  %v6464_v24 = vcombine.high %v421_v14, %v425_v15  ;;  %3264 = vmatmul.mubr.bf16.vlgmr.msra.gmra.mxu0 %v7660_v16  ;;  %v6463_v32 = vcombine.low %v421_v14, %v425_v15  ;;  %3355 = vmatpush1.bf16.msra.mxu1 %v6599_v23 }
  0x94   :  { %v553_v18 = vld [vmem:[#allocation5 + $0xda0] sm:$0xff]  ;;  %3314 = vmatpush1.bf16.msra.mxu0 %v6471_v21  ;;  %3345 = vmatprep.mubr.bf16.mxu0 %v7664_v28 }
  0x95   :  { %v6592_v25 = vcombine.high %v549_v17, %v553_v18  ;;  %v413_v26 = vld [vmem:[#allocation5 + $0x940] sm:$0xff]  ;;  %3315 = vmatprep.subr.bf16.mxu0 %v6464_v24  ;;  %v6591_v33 = vcombine.low %v549_v17, %v553_v18  ;;  %3386 = vmatprep.mubr.bf16.mxu1 %v7667_v31 }
  0x96   :  { %v417_v27 = vld [vmem:[#allocation5 + $0x960] sm:$0xff] }
  0x97   :  { %v541_v29 = vld [vmem:[#allocation5 + $0xd40] sm:$0xff]  ;;  %v6456_v34 = vcombine.high %v413_v26, %v417_v27  ;;  %3356 = vmatprep.subr.bf16.mxu1 %v6592_v25  ;;  %v6455_v40 = vcombine.low %v413_v26, %v417_v27 }
  0x98   :  { %v545_v30 = vld [vmem:[#allocation5 + $0xd60] sm:$0xff]  ;;  %3316 = vmatpush1.bf16.msra.mxu0 %v6463_v32  ;;  %3357 = vmatpush1.bf16.msra.mxu1 %v6591_v33 }
  0x99   :  { %v405_v35 = vld [vmem:[#allocation5 + $0x900] sm:$0xff]  ;;  %v6584_v38 = vcombine.high %v541_v29, %v545_v30  ;;  %3317 = vmatprep.subr.bf16.mxu0 %v6456_v34  ;;  %v6583_v41 = vcombine.low %v541_v29, %v545_v30 }
  0x9a   :  { %v409_v36 = vld [vmem:[#allocation5 + $0x920] sm:$0xff] }
  0x9b   :  { %v533_v37 = vld [vmem:[#allocation5 + $0xd00] sm:$0xff]  ;;  %v6448_v42 = vcombine.high %v405_v35, %v409_v36  ;;  %3358 = vmatprep.subr.bf16.mxu1 %v6584_v38  ;;  %v6447_v48 = vcombine.low %v405_v35, %v409_v36 }
  0x9c   :  { %v537_v39 = vld [vmem:[#allocation5 + $0xd20] sm:$0xff]  ;;  %3318 = vmatpush1.bf16.msra.mxu0 %v6455_v40  ;;  %3359 = vmatpush1.bf16.msra.mxu1 %v6583_v41 }
  0x9d   :  { %v397_v43 = vld [vmem:[#allocation5 + $0x8c0] sm:$0xff]  ;;  %v6576_v46 = vcombine.high %v533_v37, %v537_v39  ;;  %3319 = vmatprep.subr.bf16.mxu0 %v6448_v42  ;;  %v6575_v49 = vcombine.low %v533_v37, %v537_v39 }
  0x9e   :  { %v401_v44 = vld [vmem:[#allocation5 + $0x8e0] sm:$0xff] }
  0x9f   :  { %v525_v45 = vld [vmem:[#allocation5 + $0xcc0] sm:$0xff]  ;;  %v6440_v50 = vcombine.high %v397_v43, %v401_v44  ;;  %3360 = vmatprep.subr.bf16.mxu1 %v6576_v46  ;;  %v6439_v56 = vcombine.low %v397_v43, %v401_v44 }
  0xa0   :  { %v529_v47 = vld [vmem:[#allocation5 + $0xce0] sm:$0xff]  ;;  %3320 = vmatpush1.bf16.msra.mxu0 %v6447_v48  ;;  %3361 = vmatpush1.bf16.msra.mxu1 %v6575_v49 }
  0xa1   :  { %v389_v51 = vld [vmem:[#allocation5 + $0x880] sm:$0xff]  ;;  %v6568_v54 = vcombine.high %v525_v45, %v529_v47  ;;  %3321 = vmatprep.subr.bf16.mxu0 %v6440_v50  ;;  %v6567_v57 = vcombine.low %v525_v45, %v529_v47 }
  0xa2   :  { %v393_v52 = vld [vmem:[#allocation5 + $0x8a0] sm:$0xff] }
  0xa3   :  { %v517_v53 = vld [vmem:[#allocation5 + $0xc80] sm:$0xff]  ;;  %v6432_v60 = vcombine.high %v389_v51, %v393_v52  ;;  %3362 = vmatprep.subr.bf16.mxu1 %v6568_v54  ;;  %v6431_v2 = vcombine.low %v389_v51, %v393_v52 }
  0xa4   :  { %v521_v55 = vld [vmem:[#allocation5 + $0xca0] sm:$0xff]  ;;  %3322 = vmatpush1.bf16.msra.mxu0 %v6439_v56  ;;  %3363 = vmatpush1.bf16.msra.mxu1 %v6567_v57 }
  0xa5   :  { %v381_v61 = vld [vmem:[#allocation5 + $0x840] sm:$0xff]  ;;  %v6560_v0 = vcombine.high %v517_v53, %v521_v55  ;;  %3323 = vmatprep.subr.bf16.mxu0 %v6432_v60  ;;  %v6559_v3 = vcombine.low %v517_v53, %v521_v55 }
  0xa6   :  { %v385_v62 = vld [vmem:[#allocation5 + $0x860] sm:$0xff] }
  0xa7   :  { %v509_v63 = vld [vmem:[#allocation5 + $0xc40] sm:$0xff]  ;;  %v6424_v4 = vcombine.high %v381_v61, %v385_v62  ;;  %3364 = vmatprep.subr.bf16.mxu1 %v6560_v0  ;;  %v6423_v10 = vcombine.low %v381_v61, %v385_v62 }
  0xa8   :  { %v513_v1 = vld [vmem:[#allocation5 + $0xc60] sm:$0xff]  ;;  %3324 = vmatpush1.bf16.msra.mxu0 %v6431_v2  ;;  %3365 = vmatpush1.bf16.msra.mxu1 %v6559_v3 }
  0xa9   :  { %v373_v5 = vld [vmem:[#allocation5 + $0x800] sm:$0xff]  ;;  %v6552_v8 = vcombine.high %v509_v63, %v513_v1  ;;  %3325 = vmatprep.subr.bf16.mxu0 %v6424_v4  ;;  %v6551_v11 = vcombine.low %v509_v63, %v513_v1 }
  0xaa   :  { %v377_v6 = vld [vmem:[#allocation5 + $0x820] sm:$0xff] }
  0xab   :  { %v501_v7 = vld [vmem:[#allocation5 + $0xc00] sm:$0xff]  ;;  %v6416_v12 = vcombine.high %v373_v5, %v377_v6  ;;  %3366 = vmatprep.subr.bf16.mxu1 %v6552_v8  ;;  %v6415_v19 = vcombine.low %v373_v5, %v377_v6 }
  0xac   :  { %v505_v9 = vld [vmem:[#allocation5 + $0xc20] sm:$0xff]  ;;  %3326 = vmatpush1.bf16.msra.mxu0 %v6423_v10  ;;  %3367 = vmatpush1.bf16.msra.mxu1 %v6551_v11 }
  0xad   :  { %v493_v13 = vld [vmem:[#allocation5 + $0xbc0] sm:$0xff]  ;;  %v6544_v17 = vcombine.high %v501_v7, %v505_v9  ;;  %3327 = vmatprep.subr.bf16.mxu0 %v6416_v12  ;;  %v6543_v21 = vcombine.low %v501_v7, %v505_v9 }
  0xae   :  { %v497_v14 = vld [vmem:[#allocation5 + $0xbe0] sm:$0xff] }
  0xaf   :  { %v621_v15 = vld [vmem:[#allocation5 + $0xfc0] sm:$0xff]  ;;  %v6536_v22 = vcombine.high %v493_v13, %v497_v14  ;;  %3368 = vmatprep.subr.bf16.mxu1 %v6544_v17  ;;  %v6535_v29 = vcombine.low %v493_v13, %v497_v14 }
  0xb0   :  { %v625_v18 = vld [vmem:[#allocation5 + $0xfe0] sm:$0xff]  ;;  %3328 = vmatpush1.bf16.msra.mxu0 %v6415_v19  ;;  %3369 = vmatpush1.bf16.msra.mxu1 %v6543_v21  ;;  %v174_v21 = vld [vmem:[#allocation5 + $0x1c8] sm:$0xff] }
  0xb1   :  { %v485_v23 = vld [vmem:[#allocation5 + $0xb80] sm:$0xff]  ;;  %v6664_v26 = vcombine.high %v621_v15, %v625_v18  ;;  %3329 = vmatprep.subr.bf16.mxu0 %v6536_v22  ;;  %v6663_v30 = vcombine.low %v621_v15, %v625_v18  ;;  %v178_v22 = vld [vmem:[#allocation5 + $0x1e8] sm:$0xff] }
  0xb2   :  { %v489_v24 = vld [vmem:[#allocation5 + $0xba0] sm:$0xff] }
  0xb3   :  { %v613_v25 = vld [vmem:[#allocation5 + $0xf80] sm:$0xff]  ;;  %v6528_v32 = vcombine.high %v485_v23, %v489_v24  ;;  %3370 = vmatprep.subr.bf16.mxu1 %v6664_v26  ;;  %v6527_v38 = vcombine.low %v485_v23, %v489_v24  ;;  %v302_v23 = vld [vmem:[#allocation5 + $0x5c8] sm:$0xff] }
  0xb4   :  { %v617_v27 = vld [vmem:[#allocation5 + $0xfa0] sm:$0xff]  ;;  %3330 = vmatpush2.bf16.msra.mxu0 %v6535_v29  ;;  %3371 = vmatpush2.bf16.msra.mxu1 %v6663_v30  ;;  %v306_v26 = vld [vmem:[#allocation5 + $0x5e8] sm:$0xff] }
  0xb5   :  { %v477_v33 = vld [vmem:[#allocation5 + $0xb40] sm:$0xff]  ;;  %v6656_v36 = vcombine.high %v613_v25, %v617_v27  ;;  %3331 = vmatprep.subr.bf16.mxu0 %v6528_v32  ;;  %v6655_v39 = vcombine.low %v613_v25, %v617_v27  ;;  %v107_v27 = vld [vmem:[#allocation2 + $0x30] sm:$0xff]  ;;  %v6218_v32 = vcombine.high %v174_v21, %v178_v22 }
  0xb6   :  { %v481_v34 = vld [vmem:[#allocation5 + $0xb60] sm:$0xff] }
  0xb7   :  { %v605_v35 = vld [vmem:[#allocation5 + $0xf40] sm:$0xff]  ;;  %v6520_v40 = vcombine.high %v477_v33, %v481_v34  ;;  %3372 = vmatprep.subr.bf16.mxu1 %v6656_v36  ;;  %v6519_v46 = vcombine.low %v477_v33, %v481_v34  ;;  %v166_v33 = vld [vmem:[#allocation5 + $0x188] sm:$0xff]  ;;  %v6346_v36 = vcombine.high %v302_v23, %v306_v26 }
  0xb8   :  { %v609_v37 = vld [vmem:[#allocation5 + $0xf60] sm:$0xff]  ;;  %3332 = vmatpush2.bf16.msra.mxu0 %v6527_v38  ;;  %3373 = vmatpush2.bf16.msra.mxu1 %v6655_v39  ;;  %v170_v34 = vld [vmem:[#allocation5 + $0x1a8] sm:$0xff]  ;;  %v7674_v39 = vpack.c.bf16 %v107_v27, %v107_v27 }
  0xb9   :  { %v469_v41 = vld [vmem:[#allocation5 + $0xb00] sm:$0xff]  ;;  %v6648_v44 = vcombine.high %v605_v35, %v609_v37  ;;  %3333 = vmatprep.subr.bf16.mxu0 %v6520_v40  ;;  %v6647_v47 = vcombine.low %v605_v35, %v609_v37  ;;  %v294_v35 = vld [vmem:[#allocation5 + $0x588] sm:$0xff]  ;;  %v6217_v40 = vcombine.low %v174_v21, %v178_v22 }
  0xba   :  { %v473_v42 = vld [vmem:[#allocation5 + $0xb20] sm:$0xff]  ;;  %v298_v37 = vld [vmem:[#allocation5 + $0x5a8] sm:$0xff] }
  0xbb   :  { %v597_v43 = vld [vmem:[#allocation5 + $0xf00] sm:$0xff]  ;;  %v6512_v48 = vcombine.high %v469_v41, %v473_v42  ;;  %3374 = vmatprep.subr.bf16.mxu1 %v6648_v44  ;;  %v6511_v54 = vcombine.low %v469_v41, %v473_v42  ;;  %v6345_v41 = vcombine.low %v302_v23, %v306_v26  ;;  %v6210_v42 = vcombine.high %v166_v33, %v170_v34  ;;  %v162_v44 = vld [vmem:[#allocation5 + $0x168] sm:$0xff] }
  0xbc   :  { %v601_v45 = vld [vmem:[#allocation5 + $0xf20] sm:$0xff]  ;;  %3334 = vmatpush2.bf16.msra.mxu0 %v6519_v46  ;;  %3375 = vmatpush2.bf16.msra.mxu1 %v6647_v47  ;;  %v286_v46 = vld [vmem:[#allocation5 + $0x548] sm:$0xff] }
  0xbd   :  { %v461_v49 = vld [vmem:[#allocation5 + $0xac0] sm:$0xff]  ;;  %v6640_v52 = vcombine.high %v597_v43, %v601_v45  ;;  %3335 = vmatprep.subr.bf16.mxu0 %v6512_v48  ;;  %v6639_v55 = vcombine.low %v597_v43, %v601_v45  ;;  %v158_v43 = vld [vmem:[#allocation5 + $0x148] sm:$0xff]  ;;  %v6338_v45 = vcombine.high %v294_v35, %v298_v37  ;;  %v6209_v48 = vcombine.low %v166_v33, %v170_v34 }
  0xbe   :  { %v465_v50 = vld [vmem:[#allocation5 + $0xae0] sm:$0xff]  ;;  %v290_v47 = vld [vmem:[#allocation5 + $0x568] sm:$0xff] }
  0xbf   :  { %v589_v51 = vld [vmem:[#allocation5 + $0xec0] sm:$0xff]  ;;  %v6504_v56 = vcombine.high %v461_v49, %v465_v50  ;;  %3376 = vmatprep.subr.bf16.mxu1 %v6640_v52  ;;  %v6503_v0 = vcombine.low %v461_v49, %v465_v50  ;;  %v6337_v49 = vcombine.low %v294_v35, %v298_v37  ;;  %v6202_v50 = vcombine.high %v158_v43, %v162_v44  ;;  %v154_v52 = vld [vmem:[#allocation5 + $0x128] sm:$0xff] }
  0xc0   :  { %v593_v53 = vld [vmem:[#allocation5 + $0xee0] sm:$0xff]  ;;  %3336 = vmatpush2.bf16.msra.mxu0 %v6511_v54  ;;  %3377 = vmatpush2.bf16.msra.mxu1 %v6639_v55  ;;  %v6330_v54 = vcombine.high %v286_v46, %v290_v47  ;;  %v282_v55 = vld [vmem:[#allocation5 + $0x528] sm:$0xff] }
  0xc1   :  { %v453_v57 = vld [vmem:[#allocation5 + $0xa80] sm:$0xff]  ;;  %v6632_v62 = vcombine.high %v589_v51, %v593_v53  ;;  %3337 = vmatprep.subr.bf16.mxu0 %v6504_v56  ;;  %v6631_v1 = vcombine.low %v589_v51, %v593_v53  ;;  %v150_v51 = vld [vmem:[#allocation5 + $0x108] sm:$0xff]  ;;  %v6201_v56 = vcombine.low %v158_v43, %v162_v44 }
  0xc2   :  { %v457_v60 = vld [vmem:[#allocation5 + $0xaa0] sm:$0xff]  ;;  %v278_v53 = vld [vmem:[#allocation5 + $0x508] sm:$0xff] }
  0xc3   :  { %v581_v61 = vld [vmem:[#allocation5 + $0xe80] sm:$0xff]  ;;  %v6496_v2 = vcombine.high %v453_v57, %v457_v60  ;;  %3378 = vmatprep.subr.bf16.mxu1 %v6632_v62  ;;  %v6495_v8 = vcombine.low %v453_v57, %v457_v60  ;;  %v6329_v57 = vcombine.low %v286_v46, %v290_v47  ;;  %v6194_v60 = vcombine.high %v150_v51, %v154_v52  ;;  %v146_v62 = vld [vmem:[#allocation5 + $0xe8] sm:$0xff] }
  0xc4   :  { %v585_v63 = vld [vmem:[#allocation5 + $0xea0] sm:$0xff]  ;;  %3338 = vmatpush2.bf16.msra.mxu0 %v6503_v0  ;;  %3379 = vmatpush2.bf16.msra.mxu1 %v6631_v1  ;;  %v6322_v0 = vcombine.high %v278_v53, %v282_v55  ;;  %v274_v1 = vld [vmem:[#allocation5 + $0x4e8] sm:$0xff] }
  0xc5   :  { %v445_v3 = vld [vmem:[#allocation5 + $0xa40] sm:$0xff]  ;;  %v6624_v6 = vcombine.high %v581_v61, %v585_v63  ;;  %3339 = vmatprep.subr.bf16.mxu0 %v6496_v2  ;;  %v6623_v9 = vcombine.low %v581_v61, %v585_v63  ;;  %v142_v61 = vld [vmem:[#allocation5 + $0xc8] sm:$0xff]  ;;  %v6193_v2 = vcombine.low %v150_v51, %v154_v52 }
  0xc6   :  { %v449_v4 = vld [vmem:[#allocation5 + $0xa60] sm:$0xff]  ;;  %v270_v63 = vld [vmem:[#allocation5 + $0x4c8] sm:$0xff] }
  0xc7   :  { %v573_v5 = vld [vmem:[#allocation5 + $0xe40] sm:$0xff]  ;;  %v6488_v10 = vcombine.high %v445_v3, %v449_v4  ;;  %3380 = vmatprep.subr.bf16.mxu1 %v6624_v6  ;;  %v6487_v17 = vcombine.low %v445_v3, %v449_v4  ;;  %v6321_v3 = vcombine.low %v278_v53, %v282_v55  ;;  %v6186_v4 = vcombine.high %v142_v61, %v146_v62  ;;  %v138_v6 = vld [vmem:[#allocation5 + $0xa8] sm:$0xff] }
  0xc8   :  { %v577_v7 = vld [vmem:[#allocation5 + $0xe60] sm:$0xff]  ;;  %3340 = vmatpush2.bf16.msra.mxu0 %v6495_v8  ;;  %3381 = vmatpush2.bf16.msra.mxu1 %v6623_v9  ;;  %v6314_v8 = vcombine.high %v270_v63, %v274_v1  ;;  %v266_v9 = vld [vmem:[#allocation5 + $0x4a8] sm:$0xff] }
  0xc9   :  { %v437_v11 = vld [vmem:[#allocation5 + $0xa00] sm:$0xff]  ;;  %v6616_v14 = vcombine.high %v573_v5, %v577_v7  ;;  %3341 = vmatprep.subr.bf16.mxu0 %v6488_v10  ;;  %v6615_v18 = vcombine.low %v573_v5, %v577_v7  ;;  %v134_v5 = vld [vmem:[#allocation5 + $0x88] sm:$0xff]  ;;  %v6185_v10 = vcombine.low %v142_v61, %v146_v62 }
  0xca   :  { %v441_v12 = vld [vmem:[#allocation5 + $0xa20] sm:$0xff]  ;;  %v262_v7 = vld [vmem:[#allocation5 + $0x488] sm:$0xff] }
  0xcb   :  { %v565_v13 = vld [vmem:[#allocation5 + $0xe00] sm:$0xff]  ;;  %v6480_v19 = vcombine.high %v437_v11, %v441_v12  ;;  %3382 = vmatprep.subr.bf16.mxu1 %v6616_v14  ;;  %v6479_v29 = vcombine.low %v437_v11, %v441_v12  ;;  %v6313_v11 = vcombine.low %v270_v63, %v274_v1  ;;  %v6178_v12 = vcombine.high %v134_v5, %v138_v6  ;;  %v130_v14 = vld [vmem:[#allocation5 + $0x68] sm:$0xff] }
  0xcc   :  { %v569_v15 = vld [vmem:[#allocation5 + $0xe20] sm:$0xff]  ;;  %3342 = vmatpush2.bf16.msra.mxu0 %v6487_v17  ;;  %3383 = vmatpush2.bf16.msra.mxu1 %v6615_v18  ;;  %v6306_v17 = vcombine.high %v262_v7, %v266_v9  ;;  %v258_v18 = vld [vmem:[#allocation5 + $0x468] sm:$0xff]  ;;  %v6305_v21 = vcombine.low %v262_v7, %v266_v9 }
  0xcd   :  { %v6608_v24 = vcombine.high %v565_v13, %v569_v15  ;;  %v105_v25 = vld [vmem:[#allocation2 + $0x20] sm:$0xff]  ;;  %3343 = vmatprep.subr.bf16.mxu0 %v6480_v19  ;;  %v6607_v30 = vcombine.low %v565_v13, %v569_v15  ;;  %v126_v13 = vld [vmem:[#allocation5 + $0x48] sm:$0xff]  ;;  %v6177_v19 = vcombine.low %v134_v5, %v138_v6 }
  0xce   :  { %v7672_v38 = vpack.c.bf16 %v105_v25, %v105_v25  ;;  %v254_v15 = vld [vmem:[#allocation5 + $0x448] sm:$0xff]  ;;  %v6170_v22 = vcombine.high %v126_v13, %v130_v14 }
  0xcf   :  { %3384 = vmatprep.subr.bf16.mxu1 %v6608_v24  ;;  %v118_v23 = vld [vmem:[#allocation5 + $0x8] sm:$0xff]  ;;  %v6298_v26 = vcombine.high %v254_v15, %v258_v18 }
  0xd0   :  { %3344 = vmatpush2.bf16.msra.mxu0 %v6479_v29  ;;  %3385 = vmatpush2.bf16.msra.mxu1 %v6607_v30  ;;  %v122_v24 = vld [vmem:[#allocation5 + $0x28] sm:$0xff]  ;;  %v6169_v29 = vcombine.low %v126_v13, %v130_v14  ;;  %v6297_v30 = vcombine.low %v254_v15, %v258_v18 }
  0xd1   :  { %3395 = vmatprep.subr.bf16.mxu0 %v6218_v32  ;;  %3436 = vmatprep.subr.bf16.mxu1 %v6346_v36  ;;  %v246_v25 = vld [vmem:[#allocation5 + $0x408] sm:$0xff]  ;;  %v6162_v32 = vcombine.high %v118_v23, %v122_v24 }
  0xd2   :  { %v250_v27 = vld [vmem:[#allocation5 + $0x428] sm:$0xff] }
  0xd3   :  { %3346 = vmatmul.mubr.bf16.vlgmr.msra.gmra.mxu0 %v7672_v38  ;;  %3387 = vmatmul.mubr.bf16.vlgmr.msra.gmra.mxu1 %v7674_v39  ;;  %v238_v33 = vld [vmem:[#allocation5 + $0x3c8] sm:$0xff]  ;;  %v6290_v36 = vcombine.high %v246_v25, %v250_v27 }
  0xd4   :  { %3396 = vmatpush1.bf16.msra.mxu0 %v6217_v40  ;;  %3437 = vmatpush1.bf16.msra.mxu1 %v6345_v41  ;;  %v242_v34 = vld [vmem:[#allocation5 + $0x3e8] sm:$0xff]  ;;  %v6161_v40 = vcombine.low %v118_v23, %v122_v24  ;;  %v6289_v41 = vcombine.low %v246_v25, %v250_v27 }
  0xd5   :  { %3397 = vmatprep.subr.bf16.mxu0 %v6210_v42  ;;  %3438 = vmatprep.subr.bf16.mxu1 %v6338_v45  ;;  %v366_v35 = vld [vmem:[#allocation5 + $0x7c8] sm:$0xff]  ;;  %v6282_v42 = vcombine.high %v238_v33, %v242_v34 }
  0xd6   :  { %3427 = vmatprep.mubr.bf16.mxu0 %v7654_v58  ;;  %3468 = vmatprep.mubr.bf16.mxu1 %v7656_v59  ;;  %v370_v37 = vld [vmem:[#allocation5 + $0x7e8] sm:$0xff] }
  0xd7   :  { %v230_v43 = vld [vmem:[#allocation5 + $0x388] sm:$0xff]  ;;  %v6410_v46 = vcombine.high %v366_v35, %v370_v37 }
  0xd8   :  { %3398 = vmatpush1.bf16.msra.mxu0 %v6209_v48  ;;  %3439 = vmatpush1.bf16.msra.mxu1 %v6337_v49  ;;  %v234_v44 = vld [vmem:[#allocation5 + $0x3a8] sm:$0xff]  ;;  %v6281_v48 = vcombine.low %v238_v33, %v242_v34  ;;  %v6409_v49 = vcombine.low %v366_v35, %v370_v37 }
  0xd9   :  { %3399 = vmatprep.subr.bf16.mxu0 %v6202_v50  ;;  %3440 = vmatprep.subr.bf16.mxu1 %v6330_v54  ;;  %v358_v45 = vld [vmem:[#allocation5 + $0x788] sm:$0xff]  ;;  %v6274_v50 = vcombine.high %v230_v43, %v234_v44 }
  0xda   :  { %v362_v47 = vld [vmem:[#allocation5 + $0x7a8] sm:$0xff] }
  0xdb   :  { %v222_v51 = vld [vmem:[#allocation5 + $0x348] sm:$0xff]  ;;  %v6402_v54 = vcombine.high %v358_v45, %v362_v47 }
  0xdc   :  { %3400 = vmatpush1.bf16.msra.mxu0 %v6201_v56  ;;  %3441 = vmatpush1.bf16.msra.mxu1 %v6329_v57  ;;  %v226_v52 = vld [vmem:[#allocation5 + $0x368] sm:$0xff]  ;;  %v6273_v56 = vcombine.low %v230_v43, %v234_v44  ;;  %v6401_v57 = vcombine.low %v358_v45, %v362_v47 }
  0xdd   :  { %3401 = vmatprep.subr.bf16.mxu0 %v6194_v60  ;;  %3442 = vmatprep.subr.bf16.mxu1 %v6322_v0  ;;  %v350_v53 = vld [vmem:[#allocation5 + $0x748] sm:$0xff]  ;;  %v6266_v60 = vcombine.high %v222_v51, %v226_v52 }
  0xde   :  { %v354_v55 = vld [vmem:[#allocation5 + $0x768] sm:$0xff] }
  0xdf   :  { %v214_v61 = vld [vmem:[#allocation5 + $0x308] sm:$0xff]  ;;  %v6394_v0 = vcombine.high %v350_v53, %v354_v55 }
  0xe0   :  { %3402 = vmatpush1.bf16.msra.mxu0 %v6193_v2  ;;  %3443 = vmatpush1.bf16.msra.mxu1 %v6321_v3  ;;  %v218_v62 = vld [vmem:[#allocation5 + $0x328] sm:$0xff]  ;;  %v6265_v2 = vcombine.low %v222_v51, %v226_v52  ;;  %v6393_v3 = vcombine.low %v350_v53, %v354_v55 }
  0xe1   :  { %3403 = vmatprep.subr.bf16.mxu0 %v6186_v4  ;;  %3444 = vmatprep.subr.bf16.mxu1 %v6314_v8  ;;  %v342_v63 = vld [vmem:[#allocation5 + $0x708] sm:$0xff]  ;;  %v6258_v4 = vcombine.high %v214_v61, %v218_v62 }
  0xe2   :  { %v346_v1 = vld [vmem:[#allocation5 + $0x728] sm:$0xff] }
  0xe3   :  { %v206_v5 = vld [vmem:[#allocation5 + $0x2c8] sm:$0xff]  ;;  %v6386_v8 = vcombine.high %v342_v63, %v346_v1 }
  0xe4   :  { %3404 = vmatpush1.bf16.msra.mxu0 %v6185_v10  ;;  %3445 = vmatpush1.bf16.msra.mxu1 %v6313_v11  ;;  %v210_v6 = vld [vmem:[#allocation5 + $0x2e8] sm:$0xff]  ;;  %v6257_v10 = vcombine.low %v214_v61, %v218_v62  ;;  %v6385_v11 = vcombine.low %v342_v63, %v346_v1 }
  0xe5   :  { %3405 = vmatprep.subr.bf16.mxu0 %v6178_v12  ;;  %3446 = vmatprep.subr.bf16.mxu1 %v6306_v17  ;;  %v334_v7 = vld [vmem:[#allocation5 + $0x6c8] sm:$0xff]  ;;  %v6250_v12 = vcombine.high %v206_v5, %v210_v6 }
  0xe6   :  { %v338_v9 = vld [vmem:[#allocation5 + $0x6e8] sm:$0xff] }
  0xe7   :  { %v198_v13 = vld [vmem:[#allocation5 + $0x288] sm:$0xff]  ;;  %v6378_v17 = vcombine.high %v334_v7, %v338_v9 }
  0xe8   :  { %3406 = vmatpush1.bf16.msra.mxu0 %v6177_v19  ;;  %3447 = vmatpush1.bf16.msra.mxu1 %v6305_v21  ;;  %v202_v14 = vld [vmem:[#allocation5 + $0x2a8] sm:$0xff]  ;;  %v6249_v19 = vcombine.low %v206_v5, %v210_v6  ;;  %v6377_v21 = vcombine.low %v334_v7, %v338_v9 }
  0xe9   :  { %3407 = vmatprep.subr.bf16.mxu0 %v6170_v22  ;;  %3448 = vmatprep.subr.bf16.mxu1 %v6298_v26  ;;  %v326_v15 = vld [vmem:[#allocation5 + $0x688] sm:$0xff]  ;;  %v6242_v22 = vcombine.high %v198_v13, %v202_v14 }
  0xea   :  { %v330_v18 = vld [vmem:[#allocation5 + $0x6a8] sm:$0xff] }
  0xeb   :  { %v190_v23 = vld [vmem:[#allocation5 + $0x248] sm:$0xff]  ;;  %v6370_v26 = vcombine.high %v326_v15, %v330_v18 }
  0xec   :  { %3408 = vmatpush1.bf16.msra.mxu0 %v6169_v29  ;;  %3449 = vmatpush1.bf16.msra.mxu1 %v6297_v30  ;;  %v194_v24 = vld [vmem:[#allocation5 + $0x268] sm:$0xff]  ;;  %v6241_v29 = vcombine.low %v198_v13, %v202_v14  ;;  %v6369_v30 = vcombine.low %v326_v15, %v330_v18 }
  0xed   :  { %3409 = vmatprep.subr.bf16.mxu0 %v6162_v32  ;;  %3450 = vmatprep.subr.bf16.mxu1 %v6290_v36  ;;  %v318_v25 = vld [vmem:[#allocation5 + $0x648] sm:$0xff]  ;;  %v6234_v32 = vcombine.high %v190_v23, %v194_v24 }
  0xee   :  { %v322_v27 = vld [vmem:[#allocation5 + $0x668] sm:$0xff] }
  0xef   :  { %v182_v33 = vld [vmem:[#allocation5 + $0x208] sm:$0xff]  ;;  %v6362_v36 = vcombine.high %v318_v25, %v322_v27 }
  0xf0   :  { %3410 = vmatpush1.bf16.msra.mxu0 %v6161_v40  ;;  %3451 = vmatpush1.bf16.msra.mxu1 %v6289_v41  ;;  %v186_v34 = vld [vmem:[#allocation5 + $0x228] sm:$0xff]  ;;  %v6233_v40 = vcombine.low %v190_v23, %v194_v24  ;;  %v6361_v41 = vcombine.low %v318_v25, %v322_v27 }
  0xf1   :  { %3411 = vmatprep.subr.bf16.mxu0 %v6282_v42  ;;  %3452 = vmatprep.subr.bf16.mxu1 %v6410_v46  ;;  %v310_v35 = vld [vmem:[#allocation5 + $0x608] sm:$0xff]  ;;  %v6226_v42 = vcombine.high %v182_v33, %v186_v34 }
  0xf2   :  { %v314_v37 = vld [vmem:[#allocation5 + $0x628] sm:$0xff] }
  0xf3   :  { %v430_v43 = vld [vmem:[#allocation5 + $0x9c8] sm:$0xff]  ;;  %v6354_v46 = vcombine.high %v310_v35, %v314_v37 }
  0xf4   :  { %3412 = vmatpush2.bf16.msra.mxu0 %v6281_v48  ;;  %3453 = vmatpush2.bf16.msra.mxu1 %v6409_v49  ;;  %v434_v44 = vld [vmem:[#allocation5 + $0x9e8] sm:$0xff]  ;;  %v6225_v48 = vcombine.low %v182_v33, %v186_v34  ;;  %v6353_v49 = vcombine.low %v310_v35, %v314_v37 }
  0xf5   :  { %3413 = vmatprep.subr.bf16.mxu0 %v6274_v50  ;;  %3454 = vmatprep.subr.bf16.mxu1 %v6402_v54  ;;  %v558_v45 = vld [vmem:[#allocation5 + $0xdc8] sm:$0xff]  ;;  %v6474_v50 = vcombine.high %v430_v43, %v434_v44 }
  0xf6   :  { %v562_v47 = vld [vmem:[#allocation5 + $0xde8] sm:$0xff] }
  0xf7   :  { %v422_v51 = vld [vmem:[#allocation5 + $0x988] sm:$0xff]  ;;  %v6602_v54 = vcombine.high %v558_v45, %v562_v47 }
  0xf8   :  { %3414 = vmatpush2.bf16.msra.mxu0 %v6273_v56  ;;  %3455 = vmatpush2.bf16.msra.mxu1 %v6401_v57  ;;  %v426_v52 = vld [vmem:[#allocation5 + $0x9a8] sm:$0xff]  ;;  %v6473_v56 = vcombine.low %v430_v43, %v434_v44  ;;  %v6601_v57 = vcombine.low %v558_v45, %v562_v47 }
  0xf9   :  { %3415 = vmatprep.subr.bf16.mxu0 %v6266_v60  ;;  %3456 = vmatprep.subr.bf16.mxu1 %v6394_v0  ;;  %v550_v53 = vld [vmem:[#allocation5 + $0xd88] sm:$0xff]  ;;  %v6466_v60 = vcombine.high %v422_v51, %v426_v52 }
  0xfa   :  { %v554_v55 = vld [vmem:[#allocation5 + $0xda8] sm:$0xff] }
  0xfb   :  { %v414_v61 = vld [vmem:[#allocation5 + $0x948] sm:$0xff]  ;;  %v6594_v0 = vcombine.high %v550_v53, %v554_v55 }
  0xfc   :  { %3416 = vmatpush2.bf16.msra.mxu0 %v6265_v2  ;;  %3457 = vmatpush2.bf16.msra.mxu1 %v6393_v3  ;;  %v418_v62 = vld [vmem:[#allocation5 + $0x968] sm:$0xff]  ;;  %v6465_v2 = vcombine.low %v422_v51, %v426_v52  ;;  %v6593_v3 = vcombine.low %v550_v53, %v554_v55 }
  0xfd   :  { %3417 = vmatprep.subr.bf16.mxu0 %v6258_v4  ;;  %3458 = vmatprep.subr.bf16.mxu1 %v6386_v8  ;;  %v542_v63 = vld [vmem:[#allocation5 + $0xd48] sm:$0xff]  ;;  %v6458_v4 = vcombine.high %v414_v61, %v418_v62 }
  0xfe   :  { %v546_v1 = vld [vmem:[#allocation5 + $0xd68] sm:$0xff] }
  0xff   :  { %v406_v5 = vld [vmem:[#allocation5 + $0x908] sm:$0xff]  ;;  %v6586_v8 = vcombine.high %v542_v63, %v546_v1 }
 0x100   :  { %3418 = vmatpush2.bf16.msra.mxu0 %v6257_v10  ;;  %3459 = vmatpush2.bf16.msra.mxu1 %v6385_v11  ;;  %v410_v6 = vld [vmem:[#allocation5 + $0x928] sm:$0xff]  ;;  %v6457_v10 = vcombine.low %v414_v61, %v418_v62  ;;  %v6585_v11 = vcombine.low %v542_v63, %v546_v1 }
 0x101   :  { %3419 = vmatprep.subr.bf16.mxu0 %v6250_v12  ;;  %3460 = vmatprep.subr.bf16.mxu1 %v6378_v17  ;;  %v534_v7 = vld [vmem:[#allocation5 + $0xd08] sm:$0xff]  ;;  %v6450_v12 = vcombine.high %v406_v5, %v410_v6 }
 0x102   :  { %v538_v9 = vld [vmem:[#allocation5 + $0xd28] sm:$0xff] }
 0x103   :  { %v398_v13 = vld [vmem:[#allocation5 + $0x8c8] sm:$0xff]  ;;  %v6578_v17 = vcombine.high %v534_v7, %v538_v9 }
 0x104   :  { %3420 = vmatpush2.bf16.msra.mxu0 %v6249_v19  ;;  %3461 = vmatpush2.bf16.msra.mxu1 %v6377_v21  ;;  %v402_v14 = vld [vmem:[#allocation5 + $0x8e8] sm:$0xff]  ;;  %v6449_v19 = vcombine.low %v406_v5, %v410_v6  ;;  %v6577_v21 = vcombine.low %v534_v7, %v538_v9 }
 0x105   :  { %3421 = vmatprep.subr.bf16.mxu0 %v6242_v22  ;;  %3462 = vmatprep.subr.bf16.mxu1 %v6370_v26  ;;  %v526_v15 = vld [vmem:[#allocation5 + $0xcc8] sm:$0xff]  ;;  %v6442_v22 = vcombine.high %v398_v13, %v402_v14 }
 0x106   :  { %v530_v18 = vld [vmem:[#allocation5 + $0xce8] sm:$0xff] }
 0x107   :  { %v390_v23 = vld [vmem:[#allocation5 + $0x888] sm:$0xff]  ;;  %v6570_v26 = vcombine.high %v526_v15, %v530_v18 }
 0x108   :  { %3422 = vmatpush2.bf16.msra.mxu0 %v6241_v29  ;;  %3463 = vmatpush2.bf16.msra.mxu1 %v6369_v30  ;;  %v394_v24 = vld [vmem:[#allocation5 + $0x8a8] sm:$0xff]  ;;  %v6441_v29 = vcombine.low %v398_v13, %v402_v14  ;;  %v6569_v30 = vcombine.low %v526_v15, %v530_v18 }
 0x109   :  { %3423 = vmatprep.subr.bf16.mxu0 %v6234_v32  ;;  %3464 = vmatprep.subr.bf16.mxu1 %v6362_v36  ;;  %v518_v25 = vld [vmem:[#allocation5 + $0xc88] sm:$0xff]  ;;  %v6434_v32 = vcombine.high %v390_v23, %v394_v24 }
 0x10a   :  { %v522_v27 = vld [vmem:[#allocation5 + $0xca8] sm:$0xff] }
 0x10b   :  { %v382_v33 = vld [vmem:[#allocation5 + $0x848] sm:$0xff]  ;;  %v6562_v36 = vcombine.high %v518_v25, %v522_v27 }
 0x10c   :  { %3424 = vmatpush2.bf16.msra.mxu0 %v6233_v40  ;;  %3465 = vmatpush2.bf16.msra.mxu1 %v6361_v41  ;;  %v386_v34 = vld [vmem:[#allocation5 + $0x868] sm:$0xff]  ;;  %v6433_v40 = vcombine.low %v390_v23, %v394_v24  ;;  %v6561_v41 = vcombine.low %v518_v25, %v522_v27 }
 0x10d   :  { %3425 = vmatprep.subr.bf16.mxu0 %v6226_v42  ;;  %3466 = vmatprep.subr.bf16.mxu1 %v6354_v46  ;;  %v510_v35 = vld [vmem:[#allocation5 + $0xc48] sm:$0xff]  ;;  %v6426_v42 = vcombine.high %v382_v33, %v386_v34 }
 0x10e   :  { %v514_v37 = vld [vmem:[#allocation5 + $0xc68] sm:$0xff] }
 0x10f   :  { %v374_v43 = vld [vmem:[#allocation5 + $0x808] sm:$0xff]  ;;  %v6554_v46 = vcombine.high %v510_v35, %v514_v37 }
 0x110   :  { %3426 = vmatpush2.bf16.msra.mxu0 %v6225_v48  ;;  %3467 = vmatpush2.bf16.msra.mxu1 %v6353_v49  ;;  %v378_v44 = vld [vmem:[#allocation5 + $0x828] sm:$0xff]  ;;  %v6425_v48 = vcombine.low %v382_v33, %v386_v34  ;;  %v6553_v49 = vcombine.low %v510_v35, %v514_v37 }
 0x111   :  { %3477 = vmatprep.subr.bf16.mxu0 %v6474_v50  ;;  %3518 = vmatprep.subr.bf16.mxu1 %v6602_v54  ;;  %v502_v45 = vld [vmem:[#allocation5 + $0xc08] sm:$0xff]  ;;  %v6418_v50 = vcombine.high %v374_v43, %v378_v44 }
 0x112   :  { %v506_v47 = vld [vmem:[#allocation5 + $0xc28] sm:$0xff] }
 0x113   :  { %3428 = vmatmul.mubr.bf16.vlgmr.msra.gmra.mxu0 %v7660_v16  ;;  %3469 = vmatmul.mubr.bf16.vlgmr.msra.gmra.mxu1 %v7662_v20  ;;  %v494_v51 = vld [vmem:[#allocation5 + $0xbc8] sm:$0xff]  ;;  %v6546_v54 = vcombine.high %v502_v45, %v506_v47 }
 0x114   :  { %3478 = vmatpush1.bf16.msra.mxu0 %v6473_v56  ;;  %3519 = vmatpush1.bf16.msra.mxu1 %v6601_v57  ;;  %v498_v52 = vld [vmem:[#allocation5 + $0xbe8] sm:$0xff]  ;;  %v6417_v56 = vcombine.low %v374_v43, %v378_v44  ;;  %v6545_v57 = vcombine.low %v502_v45, %v506_v47 }
 0x115   :  { %3479 = vmatprep.subr.bf16.mxu0 %v6466_v60  ;;  %3520 = vmatprep.subr.bf16.mxu1 %v6594_v0  ;;  %v622_v53 = vld [vmem:[#allocation5 + $0xfc8] sm:$0xff]  ;;  %v6538_v60 = vcombine.high %v494_v51, %v498_v52 }
 0x116   :  { %3509 = vmatprep.mubr.bf16.mxu0 %v7664_v28  ;;  %3550 = vmatprep.mubr.bf16.mxu1 %v7667_v31  ;;  %v626_v55 = vld [vmem:[#allocation5 + $0xfe8] sm:$0xff] }
 0x117   :  { %v486_v61 = vld [vmem:[#allocation5 + $0xb88] sm:$0xff]  ;;  %v6666_v0 = vcombine.high %v622_v53, %v626_v55 }
 0x118   :  { %3480 = vmatpush1.bf16.msra.mxu0 %v6465_v2  ;;  %3521 = vmatpush1.bf16.msra.mxu1 %v6593_v3  ;;  %v490_v62 = vld [vmem:[#allocation5 + $0xba8] sm:$0xff]  ;;  %v6537_v2 = vcombine.low %v494_v51, %v498_v52  ;;  %v6665_v3 = vcombine.low %v622_v53, %v626_v55 }
 0x119   :  { %3481 = vmatprep.subr.bf16.mxu0 %v6458_v4  ;;  %3522 = vmatprep.subr.bf16.mxu1 %v6586_v8  ;;  %v614_v63 = vld [vmem:[#allocation5 + $0xf88] sm:$0xff]  ;;  %v6530_v4 = vcombine.high %v486_v61, %v490_v62 }
 0x11a   :  { %v618_v1 = vld [vmem:[#allocation5 + $0xfa8] sm:$0xff] }
 0x11b   :  { %v478_v5 = vld [vmem:[#allocation5 + $0xb48] sm:$0xff]  ;;  %v6658_v8 = vcombine.high %v614_v63, %v618_v1 }
 0x11c   :  { %3482 = vmatpush1.bf16.msra.mxu0 %v6457_v10  ;;  %3523 = vmatpush1.bf16.msra.mxu1 %v6585_v11  ;;  %v482_v6 = vld [vmem:[#allocation5 + $0xb68] sm:$0xff]  ;;  %v6529_v10 = vcombine.low %v486_v61, %v490_v62  ;;  %v6657_v11 = vcombine.low %v614_v63, %v618_v1  ;;  %v179_v1 = vld [vmem:[#allocation5 + $0x1f0] sm:$0xff] }
 0x11d   :  { %3483 = vmatprep.subr.bf16.mxu0 %v6450_v12  ;;  %3524 = vmatprep.subr.bf16.mxu1 %v6578_v17  ;;  %v606_v7 = vld [vmem:[#allocation5 + $0xf48] sm:$0xff]  ;;  %v6522_v12 = vcombine.high %v478_v5, %v482_v6 }
 0x11e   :  { %v610_v9 = vld [vmem:[#allocation5 + $0xf68] sm:$0xff] }
 0x11f   :  { %v6650_v13 = vcombine.high %v606_v7, %v610_v9  ;;  %v470_v14 = vld [vmem:[#allocation5 + $0xb08] sm:$0xff] }
 0x120   :  { %3484 = vmatpush1.bf16.msra.mxu0 %v6449_v19  ;;  %3525 = vmatpush1.bf16.msra.mxu1 %v6577_v21  ;;  %v474_v15 = vld [vmem:[#allocation5 + $0xb28] sm:$0xff]  ;;  %v6521_v19 = vcombine.low %v478_v5, %v482_v6  ;;  %v6649_v21 = vcombine.low %v606_v7, %v610_v9  ;;  %v7687_v7 = vld [vmem:[#allocation7] sm:$0xff] }
 0x121   :  { %3485 = vmatprep.subr.bf16.mxu0 %v6442_v22  ;;  %3526 = vmatprep.subr.bf16.mxu1 %v6570_v26  ;;  %v598_v17 = vld [vmem:[#allocation5 + $0xf08] sm:$0xff]  ;;  %v6514_v22 = vcombine.high %v470_v14, %v474_v15 }
 0x122   :  { %v602_v18 = vld [vmem:[#allocation5 + $0xf28] sm:$0xff] }
 0x123   :  { %v6642_v23 = vcombine.high %v598_v17, %v602_v18  ;;  %v462_v24 = vld [vmem:[#allocation5 + $0xac8] sm:$0xff] }
 0x124   :  { %3486 = vmatpush1.bf16.msra.mxu0 %v6441_v29  ;;  %3527 = vmatpush1.bf16.msra.mxu1 %v6569_v30  ;;  %v466_v25 = vld [vmem:[#allocation5 + $0xae8] sm:$0xff]  ;;  %v6513_v29 = vcombine.low %v470_v14, %v474_v15  ;;  %v6641_v30 = vcombine.low %v598_v17, %v602_v18  ;;  %v299_v14 = vld [vmem:[#allocation5 + $0x5b0] sm:$0xff] }
 0x125   :  { %3487 = vmatprep.subr.bf16.mxu0 %v6434_v32  ;;  %3528 = vmatprep.subr.bf16.mxu1 %v6562_v36  ;;  %v590_v26 = vld [vmem:[#allocation5 + $0xec8] sm:$0xff]  ;;  %v6506_v32 = vcombine.high %v462_v24, %v466_v25 }
 0x126   :  { %v594_v27 = vld [vmem:[#allocation5 + $0xee8] sm:$0xff] }
 0x127   :  { %v6634_v33 = vcombine.high %v590_v26, %v594_v27  ;;  %v454_v34 = vld [vmem:[#allocation5 + $0xa88] sm:$0xff] }
 0x128   :  { %3488 = vmatpush1.bf16.msra.mxu0 %v6433_v40  ;;  %3529 = vmatpush1.bf16.msra.mxu1 %v6561_v41  ;;  %v458_v35 = vld [vmem:[#allocation5 + $0xaa8] sm:$0xff]  ;;  %v6505_v40 = vcombine.low %v462_v24, %v466_v25  ;;  %v6633_v41 = vcombine.low %v590_v26, %v594_v27  ;;  %v163_v24 = vld [vmem:[#allocation5 + $0x170] sm:$0xff] }
 0x129   :  { %3489 = vmatprep.subr.bf16.mxu0 %v6426_v42  ;;  %3530 = vmatprep.subr.bf16.mxu1 %v6554_v46  ;;  %v582_v36 = vld [vmem:[#allocation5 + $0xe88] sm:$0xff]  ;;  %v6498_v42 = vcombine.high %v454_v34, %v458_v35  ;;  %v287_v26 = vld [vmem:[#allocation5 + $0x550] sm:$0xff] }
 0x12a   :  { %v586_v37 = vld [vmem:[#allocation5 + $0xea8] sm:$0xff]  ;;  %v291_v27 = vld [vmem:[#allocation5 + $0x570] sm:$0xff] }
 0x12b   :  { %v6626_v43 = vcombine.high %v582_v36, %v586_v37  ;;  %v446_v44 = vld [vmem:[#allocation5 + $0xa48] sm:$0xff] }
 0x12c   :  { %3490 = vmatpush1.bf16.msra.mxu0 %v6425_v48  ;;  %3531 = vmatpush1.bf16.msra.mxu1 %v6553_v49  ;;  %v450_v45 = vld [vmem:[#allocation5 + $0xa68] sm:$0xff]  ;;  %v6497_v48 = vcombine.low %v454_v34, %v458_v35  ;;  %v631_v49 = vlaneseq }
 0x12d   :  { %3491 = vmatprep.subr.bf16.mxu0 %v6418_v50  ;;  %3532 = vmatprep.subr.bf16.mxu1 %v6546_v54  ;;  %v574_v46 = vld [vmem:[#allocation5 + $0xe48] sm:$0xff]  ;;  %v6625_v50 = vcombine.low %v582_v36, %v586_v37  ;;  %v6490_v51 = vcombine.high %v446_v44, %v450_v45 }
 0x12e   :  { %v578_v47 = vld [vmem:[#allocation5 + $0xe68] sm:$0xff] }
 0x12f   :  { %v6618_v52 = vcombine.high %v574_v46, %v578_v47  ;;  %v438_v53 = vld [vmem:[#allocation5 + $0xa08] sm:$0xff]  ;;  %v6617_v61 = vcombine.low %v574_v46, %v578_v47  ;;  %v283_v46 = vld [vmem:[#allocation5 + $0x530] sm:$0xff] }
 0x130   :  { %3492 = vmatpush1.bf16.msra.mxu0 %v6417_v56  ;;  %3533 = vmatpush1.bf16.msra.mxu1 %v6545_v57  ;;  %v442_v54 = vld [vmem:[#allocation5 + $0xa28] sm:$0xff]  ;;  %v6489_v57 = vcombine.low %v446_v44, %v450_v45  ;;  %v279_v45 = vld [vmem:[#allocation5 + $0x510] sm:$0xff] }
 0x131   :  { %3493 = vmatprep.subr.bf16.mxu0 %v6538_v60  ;;  %3534 = vmatprep.subr.bf16.mxu1 %v6666_v0  ;;  %v566_v55 = vld [vmem:[#allocation5 + $0xe08] sm:$0xff]  ;;  %v7684_v60 = vshrl.u32 %v631_v49, 7  ;;  %v6482_v62 = vcombine.high %v438_v53, %v442_v54  ;;  %v175_v0 = vld [vmem:[#allocation5 + $0x1d0] sm:$0xff] }
 0x132   :  { %v570_v56 = vld [vmem:[#allocation5 + $0xe28] sm:$0xff]  ;;  %v6219_v17 = vcombine.low %v175_v0, %v179_v1 }
 0x133   :  { %v6610_v63 = vcombine.high %v566_v55, %v570_v56  ;;  %v633_v5 = vsub.s32 0, %v7684_v60  ;;  %v6609_v6 = vcombine.low %v566_v55, %v570_v56  ;;  %v143_v55 = vld [vmem:[#allocation5 + $0xd0] sm:$0xff] }
 0x134   :  { %3494 = vmatpush2.bf16.msra.mxu0 %v6537_v2  ;;  %3535 = vmatpush2.bf16.msra.mxu1 %v6665_v3  ;;  %v303_v2 = vld [vmem:[#allocation5 + $0x5d0] sm:$0xff] }
 0x135   :  { %3495 = vmatprep.subr.bf16.mxu0 %v6530_v4  ;;  %3536 = vmatprep.subr.bf16.mxu1 %v6658_v8  ;;  %v307_v3 = vld [vmem:[#allocation5 + $0x5f0] sm:$0xff]  ;;  %v6481_v4 = vcombine.low %v438_v53, %v442_v54  ;;  %v6220_v8 = vcombine.high %v175_v0, %v179_v1  ;;  %v634_v15 = vrot.slane %v7687_v7, %v633_v5 }
 0x136   :  { %v6348_v9 = vcombine.high %v303_v2, %v307_v3  ;;  %v6347_v18 = vcombine.low %v303_v2, %v307_v3  ;;  %v6324_v54 = vcombine.high %v279_v45, %v283_v46  ;;  %v147_v56 = vld [vmem:[#allocation5 + $0xf0] sm:$0xff] }
 0x137   :  { %v6188_v0 = vcombine.high %v143_v55, %v147_v56  ;;  %v135_v2 = vld [vmem:[#allocation5 + $0x90] sm:$0xff] }
 0x138   :  { %3496 = vmatpush2.bf16.msra.mxu0 %v6529_v10  ;;  %3537 = vmatpush2.bf16.msra.mxu1 %v6657_v11  ;;  %v637_v10 = vsub.s32 1, %v7684_v60  ;;  %v167_v11 = vld [vmem:[#allocation5 + $0x190] sm:$0xff] }
 0x139   :  { %3497 = vmatprep.subr.bf16.mxu0 %v6522_v12  ;;  %3538 = vmatprep.subr.bf16.mxu1 %v6650_v13  ;;  %v171_v12 = vld [vmem:[#allocation5 + $0x1b0] sm:$0xff] }
 0x13a   :  { %v295_v13 = vld [vmem:[#allocation5 + $0x590] sm:$0xff] }
 0x13b   :  { %v6339_v34 = vcombine.low %v295_v13, %v299_v14  ;;  %v139_v3 = vld [vmem:[#allocation5 + $0xb0] sm:$0xff] }
 0x13c   :  { %3498 = vmatpush2.bf16.msra.mxu0 %v6521_v19  ;;  %3539 = vmatpush2.bf16.msra.mxu1 %v6649_v21  ;;  %v6212_v19 = vcombine.high %v167_v11, %v171_v12  ;;  %v638_v21 = vrot.slane %v7687_v7, %v637_v10 }
 0x13d   :  { %3499 = vmatprep.subr.bf16.mxu0 %v6514_v22  ;;  %3540 = vmatprep.subr.bf16.mxu1 %v6642_v23  ;;  %v6340_v22 = vcombine.high %v295_v13, %v299_v14  ;;  %v159_v23 = vld [vmem:[#allocation5 + $0x150] sm:$0xff] }
 0x13e   :  { %v6204_v35 = vcombine.high %v159_v23, %v163_v24  ;;  %v6203_v49 = vcombine.low %v159_v23, %v163_v24  ;;  %v127_v13 = vld [vmem:[#allocation5 + $0x50] sm:$0xff] }
 0x13f   :  { %v131_v14 = vld [vmem:[#allocation5 + $0x70] sm:$0xff] }
 0x140   :  { %3500 = vmatpush2.bf16.msra.mxu0 %v6513_v29  ;;  %3541 = vmatpush2.bf16.msra.mxu1 %v6641_v30  ;;  %v119_v23 = vld [vmem:[#allocation5 + $0x10] sm:$0xff] }
 0x141   :  { %3501 = vmatprep.subr.bf16.mxu0 %v6506_v32  ;;  %3542 = vmatprep.subr.bf16.mxu1 %v6634_v33  ;;  %v6211_v32 = vcombine.low %v167_v11, %v171_v12  ;;  %v6180_v11 = vcombine.high %v135_v2, %v139_v3  ;;  %v123_v24 = vld [vmem:[#allocation5 + $0x30] sm:$0xff] }
 0x144   :  { %3502 = vmatpush2.bf16.msra.mxu0 %v6505_v40  ;;  %3543 = vmatpush2.bf16.msra.mxu1 %v6633_v41  ;;  %v6332_v41 = vcombine.high %v287_v26, %v291_v27 }
 0x145   :  { %3503 = vmatprep.subr.bf16.mxu0 %v6498_v42  ;;  %3544 = vmatprep.subr.bf16.mxu1 %v6626_v43  ;;  %v151_v42 = vld [vmem:[#allocation5 + $0x110] sm:$0xff] }
 0x146   :  { %v155_v43 = vld [vmem:[#allocation5 + $0x130] sm:$0xff] }
 0x148   :  { %3504 = vmatpush2.bf16.msra.mxu0 %v6497_v48  ;;  %3545 = vmatpush2.bf16.msra.mxu1 %v6625_v50 }
 0x149   :  { %3505 = vmatprep.subr.bf16.mxu0 %v6490_v51  ;;  %3546 = vmatprep.subr.bf16.mxu1 %v6618_v52  ;;  %v6331_v51 = vcombine.low %v287_v26, %v291_v27  ;;  %v6196_v52 = vcombine.high %v151_v42, %v155_v43  ;;  %v251_v26 = vld [vmem:[#allocation5 + $0x430] sm:$0xff]  ;;  %v6171_v27 = vcombine.low %v127_v13, %v131_v14 }
 0x14c   :  { %3506 = vmatpush2.bf16.msra.mxu0 %v6489_v57  ;;  %3547 = vmatpush2.bf16.msra.mxu1 %v6617_v61  ;;  %v271_v57 = vld [vmem:[#allocation5 + $0x4d0] sm:$0xff] }
 0x14d   :  { %3507 = vmatprep.subr.bf16.mxu0 %v6482_v62  ;;  %3548 = vmatprep.subr.bf16.mxu1 %v6610_v63  ;;  %v275_v61 = vld [vmem:[#allocation5 + $0x4f0] sm:$0xff]  ;;  %v6195_v62 = vcombine.low %v151_v42, %v155_v43  ;;  %v6323_v63 = vcombine.low %v279_v45, %v283_v46 }
 0x14e   :  { %v6316_v1 = vcombine.high %v271_v57, %v275_v61  ;;  %v235_v45 = vld [vmem:[#allocation5 + $0x3b0] sm:$0xff] }
 0x14f   :  { %v359_v46 = vld [vmem:[#allocation5 + $0x790] sm:$0xff] }
 0x150   :  { %3508 = vmatpush2.bf16.msra.mxu0 %v6481_v4  ;;  %3549 = vmatpush2.bf16.msra.mxu1 %v6609_v6  ;;  %v263_v4 = vld [vmem:[#allocation5 + $0x490] sm:$0xff] }
 0x151   :  { %3559 = vmatprep.subr.bf16.mxu0 %v6220_v8  ;;  %3600 = vmatprep.subr.bf16.mxu1 %v6348_v9  ;;  %v267_v6 = vld [vmem:[#allocation5 + $0x4b0] sm:$0xff]  ;;  %v6187_v8 = vcombine.low %v143_v55, %v147_v56  ;;  %v6315_v9 = vcombine.low %v271_v57, %v275_v61 }
 0x152   :  { %v3306_v30 = vpop.f32.mrf.mxu1  ;;  %v6308_v12 = vcombine.high %v263_v4, %v267_v6  ;;  %v351_v55 = vld [vmem:[#allocation5 + $0x750] sm:$0xff] }
 0x153   :  { %v3265_v25 = vpop.f32.mrf.mxu0  ;;  %3510 = vmatmul.mubr.bf16.vlgmr.msra.gmra.mxu0 %v7672_v38  ;;  %3551 = vmatmul.mubr.bf16.vlgmr.msra.gmra.mxu1 %v7674_v39  ;;  %v355_v56 = vld [vmem:[#allocation5 + $0x770] sm:$0xff] }
 0x154   :  { %v3266_v29 = vadd.f32 %v3265_v25, %v634_v15  ;;  %3560 = vmatpush1.bf16.msra.mxu0 %v6219_v17  ;;  %3601 = vmatpush1.bf16.msra.mxu1 %v6347_v18  ;;  %v3308_v40 = vpop.f32.mrf.mxu1  ;;  %v255_v15 = vld [vmem:[#allocation5 + $0x450] sm:$0xff]  ;;  %v6179_v18 = vcombine.low %v135_v2, %v139_v3 }
 0x155   :  { %v3267_v33 = vpop.f32.mrf.mxu0  ;;  %3561 = vmatprep.subr.bf16.mxu0 %v6212_v19  ;;  %3602 = vmatprep.subr.bf16.mxu1 %v6340_v22  ;;  %v259_v17 = vld [vmem:[#allocation5 + $0x470] sm:$0xff]  ;;  %v6307_v19 = vcombine.low %v263_v4, %v267_v6  ;;  %v6395_v6 = vcombine.low %v351_v55, %v355_v56 }
 0x156   :  { %v7698_v36 = vadd.f32 %v3306_v30, %v3266_v29  ;;  %v3268_v37 = vadd.f32 %v3267_v33, %v638_v21  ;;  %3591 = vmatprep.mubr.bf16.mxu0 %v7654_v58  ;;  %3632 = vmatprep.mubr.bf16.mxu1 %v7656_v59  ;;  %v3310_v48 = vpop.f32.mrf.mxu1  ;;  %v6172_v21 = vcombine.high %v127_v13, %v131_v14  ;;  %v247_v25 = vld [vmem:[#allocation5 + $0x410] sm:$0xff] }
 0x157   :  { %v3269_v44 = vpop.f32.mrf.mxu0  ;;  %v6300_v22 = vcombine.high %v255_v15, %v259_v17  ;;  %v6299_v29 = vcombine.low %v255_v15, %v259_v17  ;;  %v6164_v30 = vcombine.high %v119_v23, %v123_v24  ;;  %v239_v33 = vld [vmem:[#allocation5 + $0x3d0] sm:$0xff] }
 0x158   :  { %v7702_v47 = vadd.f32 %v3308_v40, %v3268_v37  ;;  %3562 = vmatpush1.bf16.msra.mxu0 %v6211_v32  ;;  %3603 = vmatpush1.bf16.msra.mxu1 %v6339_v34  ;;  %v3311_v53 = vpop.f32.mrf.mxu1  ;;  %v6292_v32 = vcombine.high %v247_v25, %v251_v26  ;;  %v243_v34 = vld [vmem:[#allocation5 + $0x3f0] sm:$0xff]  ;;  %v6163_v40 = vcombine.low %v119_v23, %v123_v24 }
 0x159   :  { %v3270_v50 = vpop.f32.mrf.mxu0  ;;  %3563 = vmatprep.subr.bf16.mxu0 %v6204_v35  ;;  %3604 = vmatprep.subr.bf16.mxu1 %v6332_v41  ;;  %v367_v35 = vld [vmem:[#allocation5 + $0x7d0] sm:$0xff]  ;;  %v6291_v41 = vcombine.low %v247_v25, %v251_v26  ;;  %v6284_v42 = vcombine.high %v239_v33, %v243_v34 }
 0x15a   :  { %v371_v37 = vld [vmem:[#allocation5 + $0x7f0] sm:$0xff] }
 0x15b   :  { %v6412_v43 = vcombine.high %v367_v35, %v371_v37  ;;  %v231_v44 = vld [vmem:[#allocation5 + $0x390] sm:$0xff]  ;;  %v6411_v50 = vcombine.low %v367_v35, %v371_v37 }
 0x15c   :  { %3564 = vmatpush1.bf16.msra.mxu0 %v6203_v49  ;;  %3605 = vmatpush1.bf16.msra.mxu1 %v6331_v51  ;;  %v363_v48 = vld [vmem:[#allocation5 + $0x7b0] sm:$0xff]  ;;  %v6283_v49 = vcombine.low %v239_v33, %v243_v34  ;;  %v6276_v51 = vcombine.high %v231_v44, %v235_v45  ;;  %v6275_v57 = vcombine.low %v231_v44, %v235_v45 }
 0x15d   :  { %3565 = vmatprep.subr.bf16.mxu0 %v6196_v52  ;;  %3606 = vmatprep.subr.bf16.mxu1 %v6324_v54  ;;  %v6404_v52 = vcombine.high %v359_v46, %v363_v48  ;;  %v223_v53 = vld [vmem:[#allocation5 + $0x350] sm:$0xff]  ;;  %v6403_v61 = vcombine.low %v359_v46, %v363_v48 }
 0x15e   :  { %v227_v54 = vld [vmem:[#allocation5 + $0x370] sm:$0xff] }
 0x15f   :  { %v343_v2 = vld [vmem:[#allocation5 + $0x710] sm:$0xff]  ;;  %v6267_v4 = vcombine.low %v223_v53, %v227_v54 }
 0x160   :  { %3566 = vmatpush1.bf16.msra.mxu0 %v6195_v62  ;;  %3607 = vmatpush1.bf16.msra.mxu1 %v6323_v63  ;;  %v6268_v62 = vcombine.high %v223_v53, %v227_v54  ;;  %v6396_v63 = vcombine.high %v351_v55, %v355_v56  ;;  %v347_v3 = vld [vmem:[#allocation5 + $0x730] sm:$0xff] }
 0x161   :  { %3567 = vmatprep.subr.bf16.mxu0 %v6188_v0  ;;  %3608 = vmatprep.subr.bf16.mxu1 %v6316_v1  ;;  %v215_v0 = vld [vmem:[#allocation5 + $0x310] sm:$0xff]  ;;  %v6387_v17 = vcombine.low %v343_v2, %v347_v3 }
 0x162   :  { %v219_v1 = vld [vmem:[#allocation5 + $0x330] sm:$0xff] }
 0x163   :  { %v335_v13 = vld [vmem:[#allocation5 + $0x6d0] sm:$0xff]  ;;  %v6259_v15 = vcombine.low %v215_v0, %v219_v1 }
 0x164   :  { %3568 = vmatpush1.bf16.msra.mxu0 %v6187_v8  ;;  %3609 = vmatpush1.bf16.msra.mxu1 %v6315_v9  ;;  %v6260_v8 = vcombine.high %v215_v0, %v219_v1  ;;  %v6388_v9 = vcombine.high %v343_v2, %v347_v3  ;;  %v339_v14 = vld [vmem:[#allocation5 + $0x6f0] sm:$0xff] }
 0x165   :  { %3569 = vmatprep.subr.bf16.mxu0 %v6180_v11  ;;  %3610 = vmatprep.subr.bf16.mxu1 %v6308_v12  ;;  %v207_v11 = vld [vmem:[#allocation5 + $0x2d0] sm:$0xff]  ;;  %v6379_v26 = vcombine.low %v335_v13, %v339_v14 }
 0x166   :  { %v211_v12 = vld [vmem:[#allocation5 + $0x2f0] sm:$0xff] }
 0x167   :  { %v327_v23 = vld [vmem:[#allocation5 + $0x690] sm:$0xff]  ;;  %v6251_v25 = vcombine.low %v207_v11, %v211_v12 }
 0x168   :  { %3570 = vmatpush1.bf16.msra.mxu0 %v6179_v18  ;;  %3611 = vmatpush1.bf16.msra.mxu1 %v6307_v19  ;;  %v6252_v18 = vcombine.high %v207_v11, %v211_v12  ;;  %v6380_v19 = vcombine.high %v335_v13, %v339_v14  ;;  %v331_v24 = vld [vmem:[#allocation5 + $0x6b0] sm:$0xff] }
 0x169   :  { %3571 = vmatprep.subr.bf16.mxu0 %v6172_v21  ;;  %3612 = vmatprep.subr.bf16.mxu1 %v6300_v22  ;;  %v199_v21 = vld [vmem:[#allocation5 + $0x290] sm:$0xff]  ;;  %v6371_v37 = vcombine.low %v327_v23, %v331_v24 }
 0x16a   :  { %v203_v22 = vld [vmem:[#allocation5 + $0x2b0] sm:$0xff] }
 0x16b   :  { %v319_v33 = vld [vmem:[#allocation5 + $0x650] sm:$0xff]  ;;  %v6243_v35 = vcombine.low %v199_v21, %v203_v22 }
 0x16c   :  { %3572 = vmatpush1.bf16.msra.mxu0 %v6171_v27  ;;  %3613 = vmatpush1.bf16.msra.mxu1 %v6299_v29  ;;  %v6244_v27 = vcombine.high %v199_v21, %v203_v22  ;;  %v6372_v29 = vcombine.high %v327_v23, %v331_v24  ;;  %v323_v34 = vld [vmem:[#allocation5 + $0x670] sm:$0xff] }
 0x16d   :  { %3573 = vmatprep.subr.bf16.mxu0 %v6164_v30  ;;  %3614 = vmatprep.subr.bf16.mxu1 %v6292_v32  ;;  %v191_v30 = vld [vmem:[#allocation5 + $0x250] sm:$0xff]  ;;  %v6363_v48 = vcombine.low %v319_v33, %v323_v34 }
 0x16e   :  { %v195_v32 = vld [vmem:[#allocation5 + $0x270] sm:$0xff] }
 0x16f   :  { %v311_v44 = vld [vmem:[#allocation5 + $0x610] sm:$0xff]  ;;  %v6235_v46 = vcombine.low %v191_v30, %v195_v32 }
 0x170   :  { %3574 = vmatpush1.bf16.msra.mxu0 %v6163_v40  ;;  %3615 = vmatpush1.bf16.msra.mxu1 %v6291_v41  ;;  %v6236_v40 = vcombine.high %v191_v30, %v195_v32  ;;  %v6364_v41 = vcombine.high %v319_v33, %v323_v34  ;;  %v315_v45 = vld [vmem:[#allocation5 + $0x630] sm:$0xff] }
 0x171   :  { %3575 = vmatprep.subr.bf16.mxu0 %v6284_v42  ;;  %3616 = vmatprep.subr.bf16.mxu1 %v6412_v43  ;;  %v183_v42 = vld [vmem:[#allocation5 + $0x210] sm:$0xff]  ;;  %v6355_v56 = vcombine.low %v311_v44, %v315_v45 }
 0x172   :  { %v187_v43 = vld [vmem:[#allocation5 + $0x230] sm:$0xff] }
 0x173   :  { %v559_v53 = vld [vmem:[#allocation5 + $0xdd0] sm:$0xff]  ;;  %v6227_v55 = vcombine.low %v183_v42, %v187_v43 }
 0x174   :  { %3576 = vmatpush2.bf16.msra.mxu0 %v6283_v49  ;;  %3617 = vmatpush2.bf16.msra.mxu1 %v6411_v50  ;;  %v6228_v49 = vcombine.high %v183_v42, %v187_v43  ;;  %v6356_v50 = vcombine.high %v311_v44, %v315_v45  ;;  %v563_v54 = vld [vmem:[#allocation5 + $0xdf0] sm:$0xff] }
 0x175   :  { %3577 = vmatprep.subr.bf16.mxu0 %v6276_v51  ;;  %3618 = vmatprep.subr.bf16.mxu1 %v6404_v52  ;;  %v431_v51 = vld [vmem:[#allocation5 + $0x9d0] sm:$0xff]  ;;  %v6603_v3 = vcombine.low %v559_v53, %v563_v54 }
 0x176   :  { %v435_v52 = vld [vmem:[#allocation5 + $0x9f0] sm:$0xff] }
 0x177   :  { %v551_v0 = vld [vmem:[#allocation5 + $0xd90] sm:$0xff]  ;;  %v6475_v2 = vcombine.low %v431_v51, %v435_v52 }
 0x178   :  { %3578 = vmatpush2.bf16.msra.mxu0 %v6275_v57  ;;  %3619 = vmatpush2.bf16.msra.mxu1 %v6403_v61  ;;  %v6476_v57 = vcombine.high %v431_v51, %v435_v52  ;;  %v6604_v61 = vcombine.high %v559_v53, %v563_v54  ;;  %v555_v1 = vld [vmem:[#allocation5 + $0xdb0] sm:$0xff] }
 0x179   :  { %3579 = vmatprep.subr.bf16.mxu0 %v6268_v62  ;;  %3620 = vmatprep.subr.bf16.mxu1 %v6396_v63  ;;  %v423_v62 = vld [vmem:[#allocation5 + $0x990] sm:$0xff] }
 0x17a   :  { %v427_v63 = vld [vmem:[#allocation5 + $0x9b0] sm:$0xff] }
 0x17b   :  { %v543_v12 = vld [vmem:[#allocation5 + $0xd50] sm:$0xff] }
 0x17c   :  { %3580 = vmatpush2.bf16.msra.mxu0 %v6267_v4  ;;  %3621 = vmatpush2.bf16.msra.mxu1 %v6395_v6  ;;  %v6468_v4 = vcombine.high %v423_v62, %v427_v63  ;;  %v6596_v6 = vcombine.high %v551_v0, %v555_v1  ;;  %v547_v13 = vld [vmem:[#allocation5 + $0xd70] sm:$0xff] }
 0x17d   :  { %3581 = vmatprep.subr.bf16.mxu0 %v6260_v8  ;;  %3622 = vmatprep.subr.bf16.mxu1 %v6388_v9  ;;  %v415_v8 = vld [vmem:[#allocation5 + $0x950] sm:$0xff] }
 0x17e   :  { %v419_v9 = vld [vmem:[#allocation5 + $0x970] sm:$0xff] }
 0x17f   :  { %v6460_v21 = vcombine.high %v415_v8, %v419_v9  ;;  %v539_v30 = vld [vmem:[#allocation5 + $0xd30] sm:$0xff]  ;;  %v6459_v34 = vcombine.low %v415_v8, %v419_v9 }
 0x180   :  { %3582 = vmatpush2.bf16.msra.mxu0 %v6259_v15  ;;  %3623 = vmatpush2.bf16.msra.mxu1 %v6387_v17  ;;  %v6467_v17 = vcombine.low %v423_v62, %v427_v63  ;;  %v399_v42 = vld [vmem:[#allocation5 + $0x8d0] sm:$0xff] }
 0x181   :  { %3583 = vmatprep.subr.bf16.mxu0 %v6252_v18  ;;  %3624 = vmatprep.subr.bf16.mxu1 %v6380_v19  ;;  %v6595_v19 = vcombine.low %v551_v0, %v555_v1  ;;  %v403_v43 = vld [vmem:[#allocation5 + $0x8f0] sm:$0xff] }
 0x182   :  { %v527_v44 = vld [vmem:[#allocation5 + $0xcd0] sm:$0xff] }
 0x183   :  { %v531_v45 = vld [vmem:[#allocation5 + $0xcf0] sm:$0xff] }
 0x184   :  { %3584 = vmatpush2.bf16.msra.mxu0 %v6251_v25  ;;  %3625 = vmatpush2.bf16.msra.mxu1 %v6379_v26  ;;  %v6588_v25 = vcombine.high %v543_v12, %v547_v13  ;;  %v407_v26 = vld [vmem:[#allocation5 + $0x910] sm:$0xff] }
 0x185   :  { %3585 = vmatprep.subr.bf16.mxu0 %v6244_v27  ;;  %3626 = vmatprep.subr.bf16.mxu1 %v6372_v29  ;;  %v411_v27 = vld [vmem:[#allocation5 + $0x930] sm:$0xff] }
 0x186   :  { %v535_v29 = vld [vmem:[#allocation5 + $0xd10] sm:$0xff] }
 0x187   :  { %v391_v51 = vld [vmem:[#allocation5 + $0x890] sm:$0xff] }
 0x188   :  { %3586 = vmatpush2.bf16.msra.mxu0 %v6243_v35  ;;  %3627 = vmatpush2.bf16.msra.mxu1 %v6371_v37  ;;  %v6452_v37 = vcombine.high %v407_v26, %v411_v27  ;;  %v395_v52 = vld [vmem:[#allocation5 + $0x8b0] sm:$0xff] }
 0x189   :  { %3587 = vmatprep.subr.bf16.mxu0 %v6236_v40  ;;  %3628 = vmatprep.subr.bf16.mxu1 %v6364_v41  ;;  %v6580_v41 = vcombine.high %v535_v29, %v539_v30  ;;  %v519_v53 = vld [vmem:[#allocation5 + $0xc90] sm:$0xff] }
 0x18a   :  { %v523_v54 = vld [vmem:[#allocation5 + $0xcb0] sm:$0xff] }
 0x18b   :  { %v383_v62 = vld [vmem:[#allocation5 + $0x850] sm:$0xff] }
 0x18c   :  { %3588 = vmatpush2.bf16.msra.mxu0 %v6235_v46  ;;  %3629 = vmatpush2.bf16.msra.mxu1 %v6363_v48  ;;  %v6451_v46 = vcombine.low %v407_v26, %v411_v27  ;;  %v6579_v48 = vcombine.low %v535_v29, %v539_v30  ;;  %v387_v63 = vld [vmem:[#allocation5 + $0x870] sm:$0xff] }
 0x18d   :  { %3589 = vmatprep.subr.bf16.mxu0 %v6228_v49  ;;  %3630 = vmatprep.subr.bf16.mxu1 %v6356_v50  ;;  %v6444_v49 = vcombine.high %v399_v42, %v403_v43  ;;  %v6572_v50 = vcombine.high %v527_v44, %v531_v45  ;;  %v511_v0 = vld [vmem:[#allocation5 + $0xc50] sm:$0xff] }
 0x18e   :  { %v515_v1 = vld [vmem:[#allocation5 + $0xc70] sm:$0xff] }
 0x18f   :  { %v375_v8 = vld [vmem:[#allocation5 + $0x810] sm:$0xff] }
 0x190   :  { %3590 = vmatpush2.bf16.msra.mxu0 %v6227_v55  ;;  %3631 = vmatpush2.bf16.msra.mxu1 %v6355_v56  ;;  %v6443_v55 = vcombine.low %v399_v42, %v403_v43  ;;  %v6571_v56 = vcombine.low %v527_v44, %v531_v45  ;;  %v379_v9 = vld [vmem:[#allocation5 + $0x830] sm:$0xff] }
 0x191   :  { %3641 = vmatprep.subr.bf16.mxu0 %v6476_v57  ;;  %3682 = vmatprep.subr.bf16.mxu1 %v6604_v61  ;;  %v6436_v57 = vcombine.high %v391_v51, %v395_v52  ;;  %v6564_v61 = vcombine.high %v519_v53, %v523_v54  ;;  %v491_v29 = vld [vmem:[#allocation5 + $0xbb0] sm:$0xff] }
 0x192   :  { %v615_v30 = vld [vmem:[#allocation5 + $0xf90] sm:$0xff] }
 0x193   :  { %v3347_v11 = vpop.f32.mrf.mxu0  ;;  %3592 = vmatmul.mubr.bf16.vlgmr.msra.gmra.mxu0 %v7660_v16  ;;  %v3388_v15 = vpop.f32.mrf.mxu1  ;;  %3633 = vmatmul.mubr.bf16.vlgmr.msra.gmra.mxu1 %v7662_v20  ;;  %v607_v42 = vld [vmem:[#allocation5 + $0xf50] sm:$0xff] }
 0x194   :  { %v3348_v14 = vadd.f32 %v3347_v11, %v7698_v36  ;;  %3642 = vmatpush1.bf16.msra.mxu0 %v6475_v2  ;;  %3683 = vmatpush1.bf16.msra.mxu1 %v6603_v3  ;;  %v6435_v2 = vcombine.low %v391_v51, %v395_v52  ;;  %v6563_v3 = vcombine.low %v519_v53, %v523_v54  ;;  %v503_v11 = vld [vmem:[#allocation5 + $0xc10] sm:$0xff] }
 0x195   :  { %v3349_v18 = vpop.f32.mrf.mxu0  ;;  %3643 = vmatprep.subr.bf16.mxu0 %v6468_v4  ;;  %v3390_v24 = vpop.f32.mrf.mxu1  ;;  %3684 = vmatprep.subr.bf16.mxu1 %v6596_v6  ;;  %v6428_v4 = vcombine.high %v383_v62, %v387_v63  ;;  %v6556_v6 = vcombine.high %v511_v0, %v515_v1  ;;  %v611_v43 = vld [vmem:[#allocation5 + $0xf70] sm:$0xff] }
 0x196   :  { %v7707_v22 = vadd.f32 %v3388_v15, %v3348_v14  ;;  %v3350_v23 = vadd.f32 %v3349_v18, %v7702_v47  ;;  %3673 = vmatprep.mubr.bf16.mxu0 %v7664_v28  ;;  %3714 = vmatprep.mubr.bf16.mxu1 %v7667_v31  ;;  %v6587_v47 = vcombine.low %v543_v12, %v547_v13  ;;  %v507_v12 = vld [vmem:[#allocation5 + $0xc30] sm:$0xff] }
 0x197   :  { %v3351_v36 = vpop.f32.mrf.mxu0  ;;  %v3392_v33 = vpop.f32.mrf.mxu1  ;;  %v6427_v13 = vcombine.low %v383_v62, %v387_v63  ;;  %v6555_v14 = vcombine.low %v511_v0, %v515_v1  ;;  %v6420_v15 = vcombine.high %v375_v8, %v379_v9  ;;  %v495_v18 = vld [vmem:[#allocation5 + $0xbd0] sm:$0xff]  ;;  %v6651_v54 = vcombine.low %v607_v42, %v611_v43 }
 0x198   :  { %v7712_v32 = vadd.f32 %v3390_v24, %v3350_v23  ;;  %3644 = vmatpush1.bf16.msra.mxu0 %v6467_v17  ;;  %3685 = vmatpush1.bf16.msra.mxu1 %v6595_v19  ;;  %v6548_v17 = vcombine.high %v503_v11, %v507_v12  ;;  %v499_v19 = vld [vmem:[#allocation5 + $0xbf0] sm:$0xff]  ;;  %v6419_v24 = vcombine.low %v375_v8, %v379_v9 }
 0x199   :  { %v3352_v35 = vpop.f32.mrf.mxu0  ;;  %3645 = vmatprep.subr.bf16.mxu0 %v6460_v21  ;;  %v3393_v40 = vpop.f32.mrf.mxu1  ;;  %3686 = vmatprep.subr.bf16.mxu1 %v6588_v25  ;;  %v623_v21 = vld [vmem:[#allocation5 + $0xfd0] sm:$0xff]  ;;  %v6547_v25 = vcombine.low %v503_v11, %v507_v12  ;;  %v6540_v26 = vcombine.high %v495_v18, %v499_v19 }
 0x19a   :  { %v627_v23 = vld [vmem:[#allocation5 + $0xff0] sm:$0xff] }
 0x19b   :  { %v6668_v27 = vcombine.high %v623_v21, %v627_v23  ;;  %v487_v36 = vld [vmem:[#allocation5 + $0xb90] sm:$0xff]  ;;  %v6667_v35 = vcombine.low %v623_v21, %v627_v23 }
 0x19c   :  { %3646 = vmatpush1.bf16.msra.mxu0 %v6459_v34  ;;  %3687 = vmatpush1.bf16.msra.mxu1 %v6587_v47  ;;  %v619_v33 = vld [vmem:[#allocation5 + $0xfb0] sm:$0xff]  ;;  %v6539_v34 = vcombine.low %v495_v18, %v499_v19  ;;  %v6532_v47 = vcombine.high %v487_v36, %v491_v29  ;;  %v6531_v44 = vcombine.low %v487_v36, %v491_v29 }
 0x19d   :  { %3647 = vmatprep.subr.bf16.mxu0 %v6452_v37  ;;  %3688 = vmatprep.subr.bf16.mxu1 %v6580_v41  ;;  %v6660_v37 = vcombine.high %v615_v30, %v619_v33  ;;  %v479_v40 = vld [vmem:[#allocation5 + $0xb50] sm:$0xff]  ;;  %v6659_v45 = vcombine.low %v615_v30, %v619_v33 }
 0x19e   :  { %v483_v41 = vld [vmem:[#allocation5 + $0xb70] sm:$0xff] }
 0x19f   :  { %v599_v51 = vld [vmem:[#allocation5 + $0xf10] sm:$0xff]  ;;  %v6523_v53 = vcombine.low %v479_v40, %v483_v41 }
 0x1a0   :  { %3648 = vmatpush1.bf16.msra.mxu0 %v6451_v46  ;;  %3689 = vmatpush1.bf16.msra.mxu1 %v6579_v48  ;;  %v6524_v46 = vcombine.high %v479_v40, %v483_v41  ;;  %v6652_v48 = vcombine.high %v607_v42, %v611_v43  ;;  %v603_v52 = vld [vmem:[#allocation5 + $0xf30] sm:$0xff]  ;;  %v304_v40 = vld [vmem:[#allocation5 + $0x5d8] sm:$0xff]  ;;  %v641_v43 = vsub.s32 2, %v7684_v60 }
 0x1a1   :  { %3649 = vmatprep.subr.bf16.mxu0 %v6444_v49  ;;  %3690 = vmatprep.subr.bf16.mxu1 %v6572_v50  ;;  %v471_v49 = vld [vmem:[#allocation5 + $0xb10] sm:$0xff]  ;;  %v6643_v1 = vcombine.low %v599_v51, %v603_v52  ;;  %v308_v41 = vld [vmem:[#allocation5 + $0x5f8] sm:$0xff] }
 0x1a2   :  { %v475_v50 = vld [vmem:[#allocation5 + $0xb30] sm:$0xff] }
 0x1a3   :  { %v591_v62 = vld [vmem:[#allocation5 + $0xed0] sm:$0xff]  ;;  %v6515_v0 = vcombine.low %v471_v49, %v475_v50 }
 0x1a4   :  { %3650 = vmatpush1.bf16.msra.mxu0 %v6443_v55  ;;  %3691 = vmatpush1.bf16.msra.mxu1 %v6571_v56  ;;  %v6516_v55 = vcombine.high %v471_v49, %v475_v50  ;;  %v6644_v56 = vcombine.high %v599_v51, %v603_v52  ;;  %v595_v63 = vld [vmem:[#allocation5 + $0xef0] sm:$0xff]  ;;  %v168_v49 = vld [vmem:[#allocation5 + $0x198] sm:$0xff] }
 0x1a5   :  { %3651 = vmatprep.subr.bf16.mxu0 %v6436_v57  ;;  %3692 = vmatprep.subr.bf16.mxu1 %v6564_v61  ;;  %v463_v57 = vld [vmem:[#allocation5 + $0xad0] sm:$0xff]  ;;  %v6635_v12 = vcombine.low %v591_v62, %v595_v63  ;;  %v172_v50 = vld [vmem:[#allocation5 + $0x1b8] sm:$0xff] }
 0x1a6   :  { %v467_v61 = vld [vmem:[#allocation5 + $0xaf0] sm:$0xff]  ;;  %v296_v51 = vld [vmem:[#allocation5 + $0x598] sm:$0xff] }
 0x1a7   :  { %v583_v8 = vld [vmem:[#allocation5 + $0xe90] sm:$0xff]  ;;  %v6507_v11 = vcombine.low %v463_v57, %v467_v61  ;;  %v300_v52 = vld [vmem:[#allocation5 + $0x5b8] sm:$0xff] }
 0x1a8   :  { %3652 = vmatpush1.bf16.msra.mxu0 %v6435_v2  ;;  %3693 = vmatpush1.bf16.msra.mxu1 %v6563_v3  ;;  %v6508_v2 = vcombine.high %v463_v57, %v467_v61  ;;  %v6636_v3 = vcombine.high %v591_v62, %v595_v63  ;;  %v587_v9 = vld [vmem:[#allocation5 + $0xeb0] sm:$0xff]  ;;  %v6342_v61 = vcombine.high %v296_v51, %v300_v52  ;;  %v160_v62 = vld [vmem:[#allocation5 + $0x158] sm:$0xff] }
 0x1a9   :  { %3653 = vmatprep.subr.bf16.mxu0 %v6428_v4  ;;  %3694 = vmatprep.subr.bf16.mxu1 %v6556_v6  ;;  %v455_v4 = vld [vmem:[#allocation5 + $0xa90] sm:$0xff]  ;;  %v6627_v23 = vcombine.low %v583_v8, %v587_v9  ;;  %v164_v63 = vld [vmem:[#allocation5 + $0x178] sm:$0xff] }
 0x1aa   :  { %v459_v6 = vld [vmem:[#allocation5 + $0xab0] sm:$0xff] }
 0x1ab   :  { %v575_v18 = vld [vmem:[#allocation5 + $0xe50] sm:$0xff]  ;;  %v6499_v21 = vcombine.low %v455_v4, %v459_v6 }
 0x1ac   :  { %3654 = vmatpush1.bf16.msra.mxu0 %v6427_v13  ;;  %3695 = vmatpush1.bf16.msra.mxu1 %v6555_v14  ;;  %v6500_v13 = vcombine.high %v455_v4, %v459_v6  ;;  %v6628_v14 = vcombine.high %v583_v8, %v587_v9  ;;  %v579_v19 = vld [vmem:[#allocation5 + $0xe70] sm:$0xff]  ;;  %v6213_v6 = vcombine.low %v168_v49, %v172_v50 }
 0x1ad   :  { %3655 = vmatprep.subr.bf16.mxu0 %v6420_v15  ;;  %3696 = vmatprep.subr.bf16.mxu1 %v6548_v17  ;;  %v447_v15 = vld [vmem:[#allocation5 + $0xa50] sm:$0xff]  ;;  %v6619_v33 = vcombine.low %v575_v18, %v579_v19  ;;  %v6341_v9 = vcombine.low %v296_v51, %v300_v52  ;;  %v128_v52 = vld [vmem:[#allocation5 + $0x58] sm:$0xff] }
 0x1ae   :  { %v451_v17 = vld [vmem:[#allocation5 + $0xa70] sm:$0xff] }
 0x1af   :  { %v567_v36 = vld [vmem:[#allocation5 + $0xe10] sm:$0xff]  ;;  %v6491_v30 = vcombine.low %v447_v15, %v451_v17 }
 0x1b0   :  { %3656 = vmatpush1.bf16.msra.mxu0 %v6419_v24  ;;  %3697 = vmatpush1.bf16.msra.mxu1 %v6547_v25  ;;  %v6492_v24 = vcombine.high %v447_v15, %v451_v17  ;;  %v6620_v25 = vcombine.high %v575_v18, %v579_v19  ;;  %v571_v29 = vld [vmem:[#allocation5 + $0xe30] sm:$0xff]  ;;  %v152_v15 = vld [vmem:[#allocation5 + $0x118] sm:$0xff] }
 0x1b1   :  { %3657 = vmatprep.subr.bf16.mxu0 %v6540_v26  ;;  %3698 = vmatprep.subr.bf16.mxu1 %v6668_v27  ;;  %v439_v26 = vld [vmem:[#allocation5 + $0xa10] sm:$0xff]  ;;  %v156_v17 = vld [vmem:[#allocation5 + $0x138] sm:$0xff] }
 0x1b2   :  { %v443_v27 = vld [vmem:[#allocation5 + $0xa30] sm:$0xff]  ;;  %v280_v19 = vld [vmem:[#allocation5 + $0x518] sm:$0xff] }
 0x1b3   :  { %v6483_v42 = vcombine.low %v439_v26, %v443_v27 }
 0x1b4   :  { %3658 = vmatpush2.bf16.msra.mxu0 %v6539_v34  ;;  %3699 = vmatpush2.bf16.msra.mxu1 %v6667_v35  ;;  %v6484_v34 = vcombine.high %v439_v26, %v443_v27  ;;  %v6612_v35 = vcombine.high %v567_v36, %v571_v29 }
 0x1b5   :  { %3659 = vmatprep.subr.bf16.mxu0 %v6532_v47  ;;  %3700 = vmatprep.subr.bf16.mxu1 %v6660_v37  ;;  %v176_v47 = vld [vmem:[#allocation5 + $0x1d8] sm:$0xff] }
 0x1b6   :  { %v180_v37 = vld [vmem:[#allocation5 + $0x1f8] sm:$0xff] }
 0x1b8   :  { %3660 = vmatpush2.bf16.msra.mxu0 %v6531_v44  ;;  %3701 = vmatpush2.bf16.msra.mxu1 %v6659_v45  ;;  %v6611_v44 = vcombine.low %v567_v36, %v571_v29  ;;  %v6222_v45 = vcombine.high %v176_v47, %v180_v37  ;;  %v6198_v36 = vcombine.high %v152_v15, %v156_v17 }
 0x1b9   :  { %3661 = vmatprep.subr.bf16.mxu0 %v6524_v46  ;;  %3702 = vmatprep.subr.bf16.mxu1 %v6652_v48  ;;  %v6350_v46 = vcombine.high %v304_v40, %v308_v41  ;;  %v645_v48 = vsub.s32 3, %v7684_v60 }
 0x1bb   :  { %v646_v57 = vrot.slane %v7687_v7, %v645_v48 }
 0x1bc   :  { %3662 = vmatpush2.bf16.msra.mxu0 %v6523_v53  ;;  %3703 = vmatpush2.bf16.msra.mxu1 %v6651_v54  ;;  %v642_v53 = vrot.slane %v7687_v7, %v641_v43  ;;  %v6221_v54 = vcombine.low %v176_v47, %v180_v37  ;;  %v6197_v47 = vcombine.low %v152_v15, %v156_v17 }
 0x1bd   :  { %3663 = vmatprep.subr.bf16.mxu0 %v6516_v55  ;;  %3704 = vmatprep.subr.bf16.mxu1 %v6644_v56  ;;  %v6349_v55 = vcombine.low %v304_v40, %v308_v41  ;;  %v6214_v56 = vcombine.high %v168_v49, %v172_v50  ;;  %v136_v41 = vld [vmem:[#allocation5 + $0x98] sm:$0xff] }
 0x1c0   :  { %3664 = vmatpush2.bf16.msra.mxu0 %v6515_v0  ;;  %3705 = vmatpush2.bf16.msra.mxu1 %v6643_v1  ;;  %v288_v1 = vld [vmem:[#allocation5 + $0x558] sm:$0xff] }
 0x1c1   :  { %3665 = vmatprep.subr.bf16.mxu0 %v6508_v2  ;;  %3706 = vmatprep.subr.bf16.mxu1 %v6636_v3  ;;  %v292_v2 = vld [vmem:[#allocation5 + $0x578] sm:$0xff] }
 0x1c2   :  { %v6333_v27 = vcombine.low %v288_v1, %v292_v2 }
 0x1c4   :  { %3666 = vmatpush2.bf16.msra.mxu0 %v6507_v11  ;;  %3707 = vmatpush2.bf16.msra.mxu1 %v6635_v12  ;;  %v6206_v11 = vcombine.high %v160_v62, %v164_v63 }
 0x1c5   :  { %3667 = vmatprep.subr.bf16.mxu0 %v6500_v13  ;;  %3708 = vmatprep.subr.bf16.mxu1 %v6628_v14  ;;  %v6334_v14 = vcombine.high %v288_v1, %v292_v2  ;;  %v248_v1 = vld [vmem:[#allocation5 + $0x418] sm:$0xff] }
 0x1c6   :  { %v252_v2 = vld [vmem:[#allocation5 + $0x438] sm:$0xff] }
 0x1c7   :  { %v6293_v15 = vcombine.low %v248_v1, %v252_v2 }
 0x1c8   :  { %3668 = vmatpush2.bf16.msra.mxu0 %v6499_v21  ;;  %3709 = vmatpush2.bf16.msra.mxu1 %v6627_v23  ;;  %v284_v21 = vld [vmem:[#allocation5 + $0x538] sm:$0xff] }
 0x1c9   :  { %3669 = vmatprep.subr.bf16.mxu0 %v6492_v24  ;;  %3710 = vmatprep.subr.bf16.mxu1 %v6620_v25  ;;  %v6205_v25 = vcombine.low %v160_v62, %v164_v63  ;;  %v120_v63 = vld [vmem:[#allocation5 + $0x18] sm:$0xff] }
 0x1cc   :  { %3670 = vmatpush2.bf16.msra.mxu0 %v6491_v30  ;;  %3711 = vmatpush2.bf16.msra.mxu1 %v6619_v33  ;;  %v6326_v30 = vcombine.high %v280_v19, %v284_v21  ;;  %v144_v33 = vld [vmem:[#allocation5 + $0xd8] sm:$0xff] }
 0x1cd   :  { %3671 = vmatprep.subr.bf16.mxu0 %v6484_v34  ;;  %3712 = vmatprep.subr.bf16.mxu1 %v6612_v35  ;;  %v272_v34 = vld [vmem:[#allocation5 + $0x4d8] sm:$0xff] }
 0x1ce   :  { %v276_v35 = vld [vmem:[#allocation5 + $0x4f8] sm:$0xff] }
 0x1cf   :  { %v6318_v40 = vcombine.high %v272_v34, %v276_v35  ;;  %v6317_v49 = vcombine.low %v272_v34, %v276_v35  ;;  %v356_v34 = vld [vmem:[#allocation5 + $0x778] sm:$0xff] }
 0x1d0   :  { %3672 = vmatpush2.bf16.msra.mxu0 %v6483_v42  ;;  %3713 = vmatpush2.bf16.msra.mxu1 %v6611_v44  ;;  %v140_v42 = vld [vmem:[#allocation5 + $0xb8] sm:$0xff] }
 0x1d1   :  { %3723 = vmatprep.subr.bf16.mxu0 %v6222_v45  ;;  %3764 = vmatprep.subr.bf16.mxu1 %v6350_v46  ;;  %v264_v44 = vld [vmem:[#allocation5 + $0x498] sm:$0xff]  ;;  %v6182_v50 = vcombine.high %v136_v41, %v140_v42 }
 0x1d2   :  { %v268_v45 = vld [vmem:[#allocation5 + $0x4b8] sm:$0xff] }
 0x1d3   :  { %v3429_v0 = vpop.f32.mrf.mxu0  ;;  %3674 = vmatmul.mubr.bf16.vlgmr.msra.gmra.mxu0 %v7672_v38  ;;  %v3470_v4 = vpop.f32.mrf.mxu1  ;;  %3715 = vmatmul.mubr.bf16.vlgmr.msra.gmra.mxu1 %v7674_v39  ;;  %v6310_v51 = vcombine.high %v264_v44, %v268_v45 }
 0x1d4   :  { %v3430_v3 = vadd.f32 %v3429_v0, %v642_v53  ;;  %3724 = vmatpush1.bf16.msra.mxu0 %v6221_v54  ;;  %3765 = vmatpush1.bf16.msra.mxu1 %v6349_v55  ;;  %v132_v53 = vld [vmem:[#allocation5 + $0x78] sm:$0xff] }
 0x1d5   :  { %v3431_v8 = vpop.f32.mrf.mxu0  ;;  %3725 = vmatprep.subr.bf16.mxu0 %v6214_v56  ;;  %v3472_v13 = vpop.f32.mrf.mxu1  ;;  %3766 = vmatprep.subr.bf16.mxu1 %v6342_v61  ;;  %v256_v54 = vld [vmem:[#allocation5 + $0x458] sm:$0xff]  ;;  %v6181_v56 = vcombine.low %v136_v41, %v140_v42  ;;  %v6174_v61 = vcombine.high %v128_v52, %v132_v53 }
 0x1d6   :  { %v7724_v7 = vadd.f32 %v3470_v4, %v3430_v3  ;;  %v3432_v12 = vadd.f32 %v3431_v8, %v646_v57  ;;  %3755 = vmatprep.mubr.bf16.mxu0 %v7654_v58  ;;  %3796 = vmatprep.mubr.bf16.mxu1 %v7656_v59  ;;  %v148_v58 = vld [vmem:[#allocation5 + $0xf8] sm:$0xff]  ;;  %v6325_v59 = vcombine.low %v280_v19, %v284_v21 }
 0x1d7   :  { %v3433_v18 = vpop.f32.mrf.mxu0  ;;  %v3474_v24 = vpop.f32.mrf.mxu1  ;;  %v6190_v37 = vcombine.high %v144_v33, %v148_v58  ;;  %v6189_v46 = vcombine.low %v144_v33, %v148_v58  ;;  %v260_v55 = vld [vmem:[#allocation5 + $0x478] sm:$0xff]  ;;  %v6309_v57 = vcombine.low %v264_v44, %v268_v45  ;;  %v6173_v3 = vcombine.low %v128_v52, %v132_v53 }
 0x1d8   :  { %v7728_v23 = vadd.f32 %v3472_v13, %v3432_v12  ;;  %3726 = vmatpush1.bf16.msra.mxu0 %v6213_v6  ;;  %3767 = vmatpush1.bf16.msra.mxu1 %v6341_v9  ;;  %v6302_v62 = vcombine.high %v256_v54, %v260_v55  ;;  %v124_v0 = vld [vmem:[#allocation5 + $0x38] sm:$0xff]  ;;  %v6301_v4 = vcombine.low %v256_v54, %v260_v55 }
 0x1d9   :  { %v3434_v26 = vpop.f32.mrf.mxu0  ;;  %3727 = vmatprep.subr.bf16.mxu0 %v6206_v11  ;;  %v3475_v29 = vpop.f32.mrf.mxu1  ;;  %3768 = vmatprep.subr.bf16.mxu1 %v6334_v14  ;;  %v6166_v6 = vcombine.high %v120_v63, %v124_v0  ;;  %v6294_v8 = vcombine.high %v248_v1, %v252_v2  ;;  %v240_v9 = vld [vmem:[#allocation5 + $0x3d8] sm:$0xff]  ;;  %v6165_v14 = vcombine.low %v120_v63, %v124_v0 }
 0x1da   :  { %v244_v11 = vld [vmem:[#allocation5 + $0x3f8] sm:$0xff] }
 0x1db   :  { %v368_v12 = vld [vmem:[#allocation5 + $0x7d8] sm:$0xff]  ;;  %v6286_v17 = vcombine.high %v240_v9, %v244_v11  ;;  %v6285_v26 = vcombine.low %v240_v9, %v244_v11 }
 0x1dc   :  { %3728 = vmatpush1.bf16.msra.mxu0 %v6205_v25  ;;  %3769 = vmatpush1.bf16.msra.mxu1 %v6333_v27  ;;  %v372_v13 = vld [vmem:[#allocation5 + $0x7f8] sm:$0xff] }
 0x1dd   :  { %3729 = vmatprep.subr.bf16.mxu0 %v6198_v36  ;;  %3770 = vmatprep.subr.bf16.mxu1 %v6326_v30  ;;  %v6414_v18 = vcombine.high %v368_v12, %v372_v13  ;;  %v232_v19 = vld [vmem:[#allocation5 + $0x398] sm:$0xff]  ;;  %v6413_v27 = vcombine.low %v368_v12, %v372_v13 }
 0x1de   :  { %v236_v21 = vld [vmem:[#allocation5 + $0x3b8] sm:$0xff] }
 0x1df   :  { %v360_v24 = vld [vmem:[#allocation5 + $0x798] sm:$0xff]  ;;  %v6278_v36 = vcombine.high %v232_v19, %v236_v21  ;;  %v6277_v35 = vcombine.low %v232_v19, %v236_v21 }
 0x1e0   :  { %3730 = vmatpush1.bf16.msra.mxu0 %v6197_v47  ;;  %3771 = vmatpush1.bf16.msra.mxu1 %v6325_v59  ;;  %v364_v25 = vld [vmem:[#allocation5 + $0x7b8] sm:$0xff] }
 0x1e1   :  { %3731 = vmatprep.subr.bf16.mxu0 %v6190_v37  ;;  %3772 = vmatprep.subr.bf16.mxu1 %v6318_v40  ;;  %v6406_v29 = vcombine.high %v360_v24, %v364_v25  ;;  %v224_v30 = vld [vmem:[#allocation5 + $0x358] sm:$0xff]  ;;  %v6405_v47 = vcombine.low %v360_v24, %v364_v25 }
 0x1e2   :  { %v228_v33 = vld [vmem:[#allocation5 + $0x378] sm:$0xff] }
 0x1e3   :  { %v352_v58 = vld [vmem:[#allocation5 + $0x758] sm:$0xff]  ;;  %v6270_v59 = vcombine.high %v224_v30, %v228_v33  ;;  %v6269_v45 = vcombine.low %v224_v30, %v228_v33 }
 0x1e4   :  { %3732 = vmatpush1.bf16.msra.mxu0 %v6189_v46  ;;  %3773 = vmatpush1.bf16.msra.mxu1 %v6317_v49  ;;  %v6398_v37 = vcombine.high %v352_v58, %v356_v34  ;;  %v216_v40 = vld [vmem:[#allocation5 + $0x318] sm:$0xff]  ;;  %v6397_v46 = vcombine.low %v352_v58, %v356_v34 }
 0x1e5   :  { %3733 = vmatprep.subr.bf16.mxu0 %v6182_v50  ;;  %3774 = vmatprep.subr.bf16.mxu1 %v6310_v51  ;;  %v220_v41 = vld [vmem:[#allocation5 + $0x338] sm:$0xff] }
 0x1e6   :  { %v344_v42 = vld [vmem:[#allocation5 + $0x718] sm:$0xff]  ;;  %v6262_v49 = vcombine.high %v216_v40, %v220_v41  ;;  %v6261_v55 = vcombine.low %v216_v40, %v220_v41 }
 0x1e7   :  { %v348_v44 = vld [vmem:[#allocation5 + $0x738] sm:$0xff] }
 0x1e8   :  { %3734 = vmatpush1.bf16.msra.mxu0 %v6181_v56  ;;  %3775 = vmatpush1.bf16.msra.mxu1 %v6309_v57  ;;  %v6390_v50 = vcombine.high %v344_v42, %v348_v44  ;;  %v208_v51 = vld [vmem:[#allocation5 + $0x2d8] sm:$0xff]  ;;  %v6389_v56 = vcombine.low %v344_v42, %v348_v44 }
 0x1e9   :  { %3735 = vmatprep.subr.bf16.mxu0 %v6174_v61  ;;  %3776 = vmatprep.subr.bf16.mxu1 %v6302_v62  ;;  %v212_v52 = vld [vmem:[#allocation5 + $0x2f8] sm:$0xff] }
 0x1ea   :  { %v336_v53 = vld [vmem:[#allocation5 + $0x6d8] sm:$0xff]  ;;  %v6254_v57 = vcombine.high %v208_v51, %v212_v52  ;;  %v6253_v2 = vcombine.low %v208_v51, %v212_v52 }
 0x1eb   :  { %v340_v54 = vld [vmem:[#allocation5 + $0x6f8] sm:$0xff] }
 0x1ec   :  { %3736 = vmatpush1.bf16.msra.mxu0 %v6173_v3  ;;  %3777 = vmatpush1.bf16.msra.mxu1 %v6301_v4  ;;  %v6382_v61 = vcombine.high %v336_v53, %v340_v54  ;;  %v200_v62 = vld [vmem:[#allocation5 + $0x298] sm:$0xff]  ;;  %v6381_v3 = vcombine.low %v336_v53, %v340_v54 }
 0x1ed   :  { %3737 = vmatprep.subr.bf16.mxu0 %v6166_v6  ;;  %3778 = vmatprep.subr.bf16.mxu1 %v6294_v8  ;;  %v204_v63 = vld [vmem:[#allocation5 + $0x2b8] sm:$0xff] }
 0x1ee   :  { %v328_v0 = vld [vmem:[#allocation5 + $0x698] sm:$0xff]  ;;  %v6246_v4 = vcombine.high %v200_v62, %v204_v63  ;;  %v6245_v13 = vcombine.low %v200_v62, %v204_v63 }
 0x1ef   :  { %v332_v1 = vld [vmem:[#allocation5 + $0x6b8] sm:$0xff] }
 0x1f0   :  { %3738 = vmatpush1.bf16.msra.mxu0 %v6165_v14  ;;  %3779 = vmatpush1.bf16.msra.mxu1 %v6293_v15  ;;  %v6374_v6 = vcombine.high %v328_v0, %v332_v1  ;;  %v192_v8 = vld [vmem:[#allocation5 + $0x258] sm:$0xff]  ;;  %v6373_v14 = vcombine.low %v328_v0, %v332_v1 }
 0x1f1   :  { %3739 = vmatprep.subr.bf16.mxu0 %v6286_v17  ;;  %3780 = vmatprep.subr.bf16.mxu1 %v6414_v18  ;;  %v196_v9 = vld [vmem:[#allocation5 + $0x278] sm:$0xff] }
 0x1f2   :  { %v320_v11 = vld [vmem:[#allocation5 + $0x658] sm:$0xff]  ;;  %v6238_v15 = vcombine.high %v192_v8, %v196_v9  ;;  %v6237_v25 = vcombine.low %v192_v8, %v196_v9 }
 0x1f3   :  { %v324_v12 = vld [vmem:[#allocation5 + $0x678] sm:$0xff] }
 0x1f4   :  { %3740 = vmatpush2.bf16.msra.mxu0 %v6285_v26  ;;  %3781 = vmatpush2.bf16.msra.mxu1 %v6413_v27  ;;  %v6366_v17 = vcombine.high %v320_v11, %v324_v12  ;;  %v184_v18 = vld [vmem:[#allocation5 + $0x218] sm:$0xff]  ;;  %v6365_v26 = vcombine.low %v320_v11, %v324_v12 }
 0x1f5   :  { %3741 = vmatprep.subr.bf16.mxu0 %v6278_v36  ;;  %3782 = vmatprep.subr.bf16.mxu1 %v6406_v29  ;;  %v188_v19 = vld [vmem:[#allocation5 + $0x238] sm:$0xff] }
 0x1f6   :  { %v312_v21 = vld [vmem:[#allocation5 + $0x618] sm:$0xff]  ;;  %v6230_v27 = vcombine.high %v184_v18, %v188_v19  ;;  %v6229_v34 = vcombine.low %v184_v18, %v188_v19 }
 0x1f7   :  { %v316_v24 = vld [vmem:[#allocation5 + $0x638] sm:$0xff] }
 0x1f8   :  { %3742 = vmatpush2.bf16.msra.mxu0 %v6277_v35  ;;  %3783 = vmatpush2.bf16.msra.mxu1 %v6405_v47  ;;  %v6358_v36 = vcombine.high %v312_v21, %v316_v24  ;;  %v432_v29 = vld [vmem:[#allocation5 + $0x9d8] sm:$0xff]  ;;  %v6357_v35 = vcombine.low %v312_v21, %v316_v24 }
 0x1f9   :  { %3743 = vmatprep.subr.bf16.mxu0 %v6270_v59  ;;  %3784 = vmatprep.subr.bf16.mxu1 %v6398_v37  ;;  %v436_v30 = vld [vmem:[#allocation5 + $0x9f8] sm:$0xff] }
 0x1fa   :  { %v560_v33 = vld [vmem:[#allocation5 + $0xdd8] sm:$0xff]  ;;  %v6478_v47 = vcombine.high %v432_v29, %v436_v30  ;;  %v6477_v44 = vcombine.low %v432_v29, %v436_v30 }
 0x1fb   :  { %v564_v58 = vld [vmem:[#allocation5 + $0xdf8] sm:$0xff] }
 0x1fc   :  { %3744 = vmatpush2.bf16.msra.mxu0 %v6269_v45  ;;  %3785 = vmatpush2.bf16.msra.mxu1 %v6397_v46  ;;  %v6606_v59 = vcombine.high %v560_v33, %v564_v58  ;;  %v424_v37 = vld [vmem:[#allocation5 + $0x998] sm:$0xff]  ;;  %v6605_v45 = vcombine.low %v560_v33, %v564_v58 }
 0x1fd   :  { %3745 = vmatprep.subr.bf16.mxu0 %v6262_v49  ;;  %3786 = vmatprep.subr.bf16.mxu1 %v6390_v50  ;;  %v428_v40 = vld [vmem:[#allocation5 + $0x9b8] sm:$0xff] }
 0x1fe   :  { %v552_v41 = vld [vmem:[#allocation5 + $0xd98] sm:$0xff]  ;;  %v6470_v46 = vcombine.high %v424_v37, %v428_v40 }
 0x1ff   :  { %v556_v42 = vld [vmem:[#allocation5 + $0xdb8] sm:$0xff] }
 0x200   :  { %3746 = vmatpush2.bf16.msra.mxu0 %v6261_v55  ;;  %3787 = vmatpush2.bf16.msra.mxu1 %v6389_v56  ;;  %v6598_v49 = vcombine.high %v552_v41, %v556_v42  ;;  %v416_v50 = vld [vmem:[#allocation5 + $0x958] sm:$0xff]  ;;  %v6597_v62 = vcombine.low %v552_v41, %v556_v42 }
 0x201   :  { %3747 = vmatprep.subr.bf16.mxu0 %v6254_v57  ;;  %3788 = vmatprep.subr.bf16.mxu1 %v6382_v61  ;;  %v420_v51 = vld [vmem:[#allocation5 + $0x978] sm:$0xff]  ;;  %v6469_v57 = vcombine.low %v424_v37, %v428_v40 }
 0x202   :  { %v544_v53 = vld [vmem:[#allocation5 + $0xd58] sm:$0xff]  ;;  %v6462_v63 = vcombine.high %v416_v50, %v420_v51  ;;  %v6461_v8 = vcombine.low %v416_v50, %v420_v51 }
 0x203   :  { %v548_v54 = vld [vmem:[#allocation5 + $0xd78] sm:$0xff] }
 0x204   :  { %3748 = vmatpush2.bf16.msra.mxu0 %v6253_v2  ;;  %3789 = vmatpush2.bf16.msra.mxu1 %v6381_v3  ;;  %v408_v2 = vld [vmem:[#allocation5 + $0x918] sm:$0xff]  ;;  %v6589_v11 = vcombine.low %v544_v53, %v548_v54 }
 0x205   :  { %3749 = vmatprep.subr.bf16.mxu0 %v6246_v4  ;;  %3790 = vmatprep.subr.bf16.mxu1 %v6374_v6  ;;  %v412_v3 = vld [vmem:[#allocation5 + $0x938] sm:$0xff] }
 0x206   :  { %v540_v4 = vld [vmem:[#allocation5 + $0xd38] sm:$0xff]  ;;  %v6454_v12 = vcombine.high %v408_v2, %v412_v3  ;;  %v6453_v19 = vcombine.low %v408_v2, %v412_v3 }
 0x207   :  { %v528_v18 = vld [vmem:[#allocation5 + $0xcd8] sm:$0xff] }
 0x208   :  { %3750 = vmatpush2.bf16.msra.mxu0 %v6245_v13  ;;  %3791 = vmatpush2.bf16.msra.mxu1 %v6373_v14  ;;  %v488_v3 = vld [vmem:[#allocation5 + $0xb98] sm:$0xff] }
 0x209   :  { %3751 = vmatprep.subr.bf16.mxu0 %v6238_v15  ;;  %3792 = vmatprep.subr.bf16.mxu1 %v6366_v17  ;;  %v400_v15 = vld [vmem:[#allocation5 + $0x8d8] sm:$0xff] }
 0x20a   :  { %v404_v17 = vld [vmem:[#allocation5 + $0x8f8] sm:$0xff] }
 0x20b   :  { %v6446_v21 = vcombine.high %v400_v15, %v404_v17  ;;  %v6445_v29 = vcombine.low %v400_v15, %v404_v17  ;;  %v612_v15 = vld [vmem:[#allocation5 + $0xf78] sm:$0xff] }
 0x20c   :  { %3752 = vmatpush2.bf16.msra.mxu0 %v6237_v25  ;;  %3793 = vmatpush2.bf16.msra.mxu1 %v6365_v26  ;;  %v392_v25 = vld [vmem:[#allocation5 + $0x898] sm:$0xff] }
 0x20d   :  { %3753 = vmatprep.subr.bf16.mxu0 %v6230_v27  ;;  %3794 = vmatprep.subr.bf16.mxu1 %v6358_v36  ;;  %v396_v26 = vld [vmem:[#allocation5 + $0x8b8] sm:$0xff] }
 0x20e   :  { %v520_v27 = vld [vmem:[#allocation5 + $0xc98] sm:$0xff]  ;;  %v6438_v33 = vcombine.high %v392_v25, %v396_v26  ;;  %v6437_v37 = vcombine.low %v392_v25, %v396_v26 }
 0x20f   :  { %v524_v36 = vld [vmem:[#allocation5 + $0xcb8] sm:$0xff] }
 0x210   :  { %3754 = vmatpush2.bf16.msra.mxu0 %v6229_v34  ;;  %3795 = vmatpush2.bf16.msra.mxu1 %v6357_v35  ;;  %v6566_v58 = vcombine.high %v520_v27, %v524_v36  ;;  %v384_v34 = vld [vmem:[#allocation5 + $0x858] sm:$0xff]  ;;  %v6565_v40 = vcombine.low %v520_v27, %v524_v36 }
 0x211   :  { %3805 = vmatprep.subr.bf16.mxu0 %v6478_v47  ;;  %3846 = vmatprep.subr.bf16.mxu1 %v6606_v59  ;;  %v388_v35 = vld [vmem:[#allocation5 + $0x878] sm:$0xff] }
 0x212   :  { %v512_v47 = vld [vmem:[#allocation5 + $0xc58] sm:$0xff]  ;;  %v6430_v41 = vcombine.high %v384_v34, %v388_v35  ;;  %v6429_v50 = vcombine.low %v384_v34, %v388_v35 }
 0x213   :  { %v3511_v52 = vpop.f32.mrf.mxu0  ;;  %3756 = vmatmul.mubr.bf16.vlgmr.msra.gmra.mxu0 %v7660_v16  ;;  %v3552_v56 = vpop.f32.mrf.mxu1  ;;  %3797 = vmatmul.mubr.bf16.vlgmr.msra.gmra.mxu1 %v7662_v20  ;;  %v6590_v16 = vcombine.high %v544_v53, %v548_v54  ;;  %v536_v20 = vld [vmem:[#allocation5 + $0xd18] sm:$0xff] }
 0x214   :  { %v3512_v55 = vadd.f32 %v3511_v52, %v7724_v7  ;;  %3806 = vmatpush1.bf16.msra.mxu0 %v6477_v44  ;;  %3847 = vmatpush1.bf16.msra.mxu1 %v6605_v45  ;;  %v6582_v14 = vcombine.high %v536_v20, %v540_v4  ;;  %v516_v59 = vld [vmem:[#allocation5 + $0xc78] sm:$0xff] }
 0x215   :  { %v7733_v61 = vpop.f32.mrf.mxu0  ;;  %3807 = vmatprep.subr.bf16.mxu0 %v6470_v46  ;;  %v7737_v1 = vpop.f32.mrf.mxu1  ;;  %3848 = vmatprep.subr.bf16.mxu1 %v6598_v49  ;;  %v6558_v42 = vcombine.high %v512_v47, %v516_v59  ;;  %v376_v44 = vld [vmem:[#allocation5 + $0x818] sm:$0xff]  ;;  %v6557_v51 = vcombine.low %v512_v47, %v516_v59 }
 0x216   :  { %v7735_v0 = vadd.f32 %v3552_v56, %v3512_v55  ;;  %3837 = vmatprep.mubr.bf16.mxu0 %v7664_v28  ;;  %3878 = vmatprep.mubr.bf16.mxu1 %v7667_v31  ;;  %v532_v28 = vld [vmem:[#allocation5 + $0xcf8] sm:$0xff]  ;;  %v6581_v31 = vcombine.low %v536_v20, %v540_v4 }
 0x217   :  { %v3515_v7 = vpop.f32.mrf.mxu0  ;;  %v3556_v6 = vpop.f32.mrf.mxu1  ;;  %v6574_v24 = vcombine.high %v528_v18, %v532_v28  ;;  %v6573_v30 = vcombine.low %v528_v18, %v532_v28  ;;  %v380_v45 = vld [vmem:[#allocation5 + $0x838] sm:$0xff] }
 0x218   :  { %3808 = vmatpush1.bf16.msra.mxu0 %v6469_v57  ;;  %3849 = vmatpush1.bf16.msra.mxu1 %v6597_v62  ;;  %v504_v46 = vld [vmem:[#allocation5 + $0xc18] sm:$0xff]  ;;  %v6422_v52 = vcombine.high %v376_v44, %v380_v45  ;;  %v6421_v62 = vcombine.low %v376_v44, %v380_v45 }
 0x219   :  { %v3516_v9 = vpop.f32.mrf.mxu0  ;;  %3809 = vmatprep.subr.bf16.mxu0 %v6462_v63  ;;  %v3557_v13 = vpop.f32.mrf.mxu1  ;;  %3850 = vmatprep.subr.bf16.mxu1 %v6590_v16  ;;  %v508_v49 = vld [vmem:[#allocation5 + $0xc38] sm:$0xff] }
 0x21a   :  { %v6550_v53 = vcombine.high %v504_v46, %v508_v49  ;;  %v496_v54 = vld [vmem:[#allocation5 + $0xbd8] sm:$0xff]  ;;  %v6549_v63 = vcombine.low %v504_v46, %v508_v49 }
 0x21b   :  { %v500_v55 = vld [vmem:[#allocation5 + $0xbf8] sm:$0xff] }
 0x21c   :  { %3810 = vmatpush1.bf16.msra.mxu0 %v6461_v8  ;;  %3851 = vmatpush1.bf16.msra.mxu1 %v6589_v11  ;;  %v624_v56 = vld [vmem:[#allocation5 + $0xfd8] sm:$0xff]  ;;  %v6542_v16 = vcombine.high %v496_v54, %v500_v55  ;;  %v6541_v6 = vcombine.low %v496_v54, %v500_v55 }
 0x21d   :  { %3811 = vmatprep.subr.bf16.mxu0 %v6454_v12  ;;  %3852 = vmatprep.subr.bf16.mxu1 %v6582_v14  ;;  %v628_v57 = vld [vmem:[#allocation5 + $0xff8] sm:$0xff] }
 0x21e   :  { %v6670_v2 = vcombine.high %v624_v56, %v628_v57  ;;  %v492_v7 = vld [vmem:[#allocation5 + $0xbb8] sm:$0xff]  ;;  %v6669_v8 = vcombine.low %v624_v56, %v628_v57 }
 0x21f   :  { %v616_v20 = vld [vmem:[#allocation5 + $0xf98] sm:$0xff]  ;;  %v6534_v9 = vcombine.high %v488_v3, %v492_v7  ;;  %v6533_v17 = vcombine.low %v488_v3, %v492_v7  ;;  %v3514_v7 = vadd.f32 %v7733_v61, %v7728_v23  ;;  %v3888_v61 = vmax.f32 %v7712_v32, 0.0 }
 0x220   :  { %3812 = vmatpush1.bf16.msra.mxu0 %v6453_v19  ;;  %3853 = vmatpush1.bf16.msra.mxu1 %v6581_v31  ;;  %v620_v4 = vld [vmem:[#allocation5 + $0xfb8] sm:$0xff] }
 0x221   :  { %3813 = vmatprep.subr.bf16.mxu0 %v6446_v21  ;;  %3854 = vmatprep.subr.bf16.mxu1 %v6574_v24  ;;  %v6662_v11 = vcombine.high %v616_v20, %v620_v4  ;;  %v480_v12 = vld [vmem:[#allocation5 + $0xb58] sm:$0xff]  ;;  %v6661_v18 = vcombine.low %v616_v20, %v620_v4 }
 0x222   :  { %v484_v13 = vld [vmem:[#allocation5 + $0xb78] sm:$0xff] }
 0x223   :  { %v608_v14 = vld [vmem:[#allocation5 + $0xf58] sm:$0xff]  ;;  %v6526_v28 = vcombine.high %v480_v12, %v484_v13  ;;  %v6525_v26 = vcombine.low %v480_v12, %v484_v13  ;;  %v649_v12 = vsub.s32 4, %v7684_v60 }
 0x224   :  { %3814 = vmatpush1.bf16.msra.mxu0 %v6445_v29  ;;  %3855 = vmatpush1.bf16.msra.mxu1 %v6573_v30  ;;  %v6654_v19 = vcombine.high %v608_v14, %v612_v15  ;;  %v472_v31 = vld [vmem:[#allocation5 + $0xb18] sm:$0xff]  ;;  %v6653_v27 = vcombine.low %v608_v14, %v612_v15 }
 0x225   :  { %3815 = vmatprep.subr.bf16.mxu0 %v6438_v33  ;;  %3856 = vmatprep.subr.bf16.mxu1 %v6566_v58  ;;  %v476_v21 = vld [vmem:[#allocation5 + $0xb38] sm:$0xff] }
 0x226   :  { %v600_v24 = vld [vmem:[#allocation5 + $0xf18] sm:$0xff]  ;;  %v6518_v36 = vcombine.high %v472_v31, %v476_v21  ;;  %v6517_v35 = vcombine.low %v472_v31, %v476_v21  ;;  %v7749_v31 = vpack.c.bf16 %v3888_v61, %v3888_v61 }
 0x227   :  { %v604_v25 = vld [vmem:[#allocation5 + $0xf38] sm:$0xff] }
 0x228   :  { %3816 = vmatpush1.bf16.msra.mxu0 %v6437_v37  ;;  %3857 = vmatpush1.bf16.msra.mxu1 %v6565_v40  ;;  %v6646_v29 = vcombine.high %v600_v24, %v604_v25  ;;  %v464_v30 = vld [vmem:[#allocation5 + $0xad8] sm:$0xff]  ;;  %v6645_v47 = vcombine.low %v600_v24, %v604_v25 }
 0x229   :  { %3817 = vmatprep.subr.bf16.mxu0 %v6430_v41  ;;  %3858 = vmatprep.subr.bf16.mxu1 %v6558_v42  ;;  %v468_v33 = vld [vmem:[#allocation5 + $0xaf8] sm:$0xff] }
 0x22a   :  { %v592_v58 = vld [vmem:[#allocation5 + $0xed8] sm:$0xff]  ;;  %v6510_v59 = vcombine.high %v464_v30, %v468_v33  ;;  %v6509_v45 = vcombine.low %v464_v30, %v468_v33 }
 0x22b   :  { %v596_v34 = vld [vmem:[#allocation5 + $0xef8] sm:$0xff] }
 0x22c   :  { %3818 = vmatpush1.bf16.msra.mxu0 %v6429_v50  ;;  %3859 = vmatpush1.bf16.msra.mxu1 %v6557_v51  ;;  %v6638_v37 = vcombine.high %v592_v58, %v596_v34  ;;  %v456_v40 = vld [vmem:[#allocation5 + $0xa98] sm:$0xff]  ;;  %v6637_v46 = vcombine.low %v592_v58, %v596_v34 }
 0x22d   :  { %3819 = vmatprep.subr.bf16.mxu0 %v6422_v52  ;;  %3860 = vmatprep.subr.bf16.mxu1 %v6550_v53  ;;  %v460_v41 = vld [vmem:[#allocation5 + $0xab8] sm:$0xff] }
 0x22e   :  { %v584_v42 = vld [vmem:[#allocation5 + $0xe98] sm:$0xff]  ;;  %v6502_v49 = vcombine.high %v456_v40, %v460_v41  ;;  %v6501_v55 = vcombine.low %v456_v40, %v460_v41 }
 0x22f   :  { %v588_v44 = vld [vmem:[#allocation5 + $0xeb8] sm:$0xff] }
 0x230   :  { %3820 = vmatpush1.bf16.msra.mxu0 %v6421_v62  ;;  %3861 = vmatpush1.bf16.msra.mxu1 %v6549_v63  ;;  %v6630_v50 = vcombine.high %v584_v42, %v588_v44  ;;  %v448_v51 = vld [vmem:[#allocation5 + $0xa58] sm:$0xff]  ;;  %v6629_v56 = vcombine.low %v584_v42, %v588_v44 }
 0x231   :  { %3821 = vmatprep.subr.bf16.mxu0 %v6542_v16  ;;  %3862 = vmatprep.subr.bf16.mxu1 %v6670_v2  ;;  %v452_v52 = vld [vmem:[#allocation5 + $0xa78] sm:$0xff] }
 0x232   :  { %v576_v53 = vld [vmem:[#allocation5 + $0xe58] sm:$0xff]  ;;  %v6494_v57 = vcombine.high %v448_v51, %v452_v52  ;;  %v6493_v20 = vcombine.low %v448_v51, %v452_v52 }
 0x233   :  { %v580_v54 = vld [vmem:[#allocation5 + $0xe78] sm:$0xff] }
 0x234   :  { %3822 = vmatpush2.bf16.msra.mxu0 %v6541_v6  ;;  %3863 = vmatpush2.bf16.msra.mxu1 %v6669_v8  ;;  %v6622_v62 = vcombine.high %v576_v53, %v580_v54  ;;  %v440_v63 = vld [vmem:[#allocation5 + $0xa18] sm:$0xff]  ;;  %v6621_v4 = vcombine.low %v576_v53, %v580_v54 }
 0x235   :  { %3823 = vmatprep.subr.bf16.mxu0 %v6534_v9  ;;  %3864 = vmatprep.subr.bf16.mxu1 %v6662_v11  ;;  %v444_v16 = vld [vmem:[#allocation5 + $0xa38] sm:$0xff]  ;;  %v3555_v9 = vadd.f32 %v7737_v1, %v3514_v7 }
 0x236   :  { %v568_v2 = vld [vmem:[#allocation5 + $0xe18] sm:$0xff]  ;;  %v6486_v6 = vcombine.high %v440_v63, %v444_v16  ;;  %v6485_v11 = vcombine.low %v440_v63, %v444_v16 }
 0x237   :  { %v572_v3 = vld [vmem:[#allocation5 + $0xe38] sm:$0xff]  ;;  %v3890_v15 = vmax.f32 %v3555_v9, 0.0 }
 0x238   :  { %3824 = vmatpush2.bf16.msra.mxu0 %v6533_v17  ;;  %3865 = vmatpush2.bf16.msra.mxu1 %v6661_v18  ;;  %v6614_v8 = vcombine.high %v568_v2, %v572_v3  ;;  %v6613_v13 = vcombine.low %v568_v2, %v572_v3  ;;  %v7019_v14 = vld [vmem:[#allocation8 + $0xe4] ss:$16 sps:$4 sm:$0xff]   ;;  %v7746_v17 = vld [vmem:[#allocation7] sm:$0xff]  ;;  %v7020_v1 = vld [vmem:[#allocation8 + $0x2e0] ss:$16 sps:$4 sm:$0xff]  }
 0x239   :  { %3825 = vmatprep.subr.bf16.mxu0 %v6526_v28  ;;  %3866 = vmatprep.subr.bf16.mxu1 %v6654_v19  ;;  %v7022_v23 = vld [vmem:[#allocation8 + $0x2e4] ss:$16 sps:$4 sm:$0xff]   ;;  %v650_v18 = vrot.slane %v7746_v17, %v649_v12  ;;  %v7017_v28 = vld [vmem:[#allocation8 + $0xe0] ss:$16 sps:$4 sm:$0xff]   ;;  %v7752_v25 = vpack.c.bf16 %v3890_v15, %v3890_v15 }
 0x23a   :  { %v7025_v19 = vld [vmem:[#allocation8 + $0xc4] ss:$16 sps:$4 sm:$0xff]   ;;  %v7035_v42 = vld [vmem:[#allocation8 + $0x80] ss:$16 sps:$4 sm:$0xff]  }
 0x23b   :  { %v7028_v24 = vld [vmem:[#allocation8 + $0x2c4] ss:$16 sps:$4 sm:$0xff]   ;;  %v7038_v44 = vld [vmem:[#allocation8 + $0x280] ss:$16 sps:$4 sm:$0xff]  }
 0x23c   :  { %3826 = vmatpush2.bf16.msra.mxu0 %v6525_v26  ;;  %3867 = vmatpush2.bf16.msra.mxu1 %v6653_v27  ;;  %v7023_v27 = vld [vmem:[#allocation8 + $0xc0] ss:$16 sps:$4 sm:$0xff]   ;;  %v7031_v30 = vld [vmem:[#allocation8 + $0xa4] ss:$16 sps:$4 sm:$0xff]  }
 0x23d   :  { %3827 = vmatprep.subr.bf16.mxu0 %v6518_v36  ;;  %3868 = vmatprep.subr.bf16.mxu1 %v6646_v29  ;;  %v7026_v29 = vld [vmem:[#allocation8 + $0x2c0] ss:$16 sps:$4 sm:$0xff]   ;;  %v7034_v58 = vld [vmem:[#allocation8 + $0x2a4] ss:$16 sps:$4 sm:$0xff]  }
 0x23e   :  { %v7040_v41 = vld [vmem:[#allocation8 + $0x284] ss:$16 sps:$4 sm:$0xff]   ;;  %v7047_v53 = vld [vmem:[#allocation8 + $0x40] ss:$16 sps:$4 sm:$0xff]  }
 0x23f   :  { %v7049_v51 = vld [vmem:[#allocation8 + $0x44] ss:$16 sps:$4 sm:$0xff]   ;;  %v7050_v54 = vld [vmem:[#allocation8 + $0x240] ss:$16 sps:$4 sm:$0xff]  }
 0x240   :  { %3828 = vmatpush2.bf16.msra.mxu0 %v6517_v35  ;;  %3869 = vmatpush2.bf16.msra.mxu1 %v6645_v47  ;;  %v7029_v35 = vld [vmem:[#allocation8 + $0xa0] ss:$16 sps:$4 sm:$0xff]   ;;  %v7052_v52 = vld [vmem:[#allocation8 + $0x244] ss:$16 sps:$4 sm:$0xff]  }
 0x241   :  { %3829 = vmatprep.subr.bf16.mxu0 %v6510_v59  ;;  %3870 = vmatprep.subr.bf16.mxu1 %v6638_v37  ;;  %v7032_v59 = vld [vmem:[#allocation8 + $0x2a0] ss:$16 sps:$4 sm:$0xff]   ;;  %v7037_v37 = vld [vmem:[#allocation8 + $0x84] ss:$16 sps:$4 sm:$0xff]  }
 0x242   :  { %v7061_v63 = vld [vmem:[#allocation8 + $0x4] ss:$16 sps:$4 sm:$0xff]   ;;  %v7059_v2 = vld [vmem:[#allocation8] ss:$16 sps:$4 sm:$0xff]  }
 0x243   :  { %v7064_v16 = vld [vmem:[#allocation8 + $0x204] ss:$16 sps:$4 sm:$0xff]   ;;  %v7062_v3 = vld [vmem:[#allocation8 + $0x200] ss:$16 sps:$4 sm:$0xff]  }
 0x244   :  { %3830 = vmatpush2.bf16.msra.mxu0 %v6509_v45  ;;  %3871 = vmatpush2.bf16.msra.mxu1 %v6637_v46  ;;  %v7043_v45 = vld [vmem:[#allocation8 + $0x64] ss:$16 sps:$4 sm:$0xff]   ;;  %v7074_v12 = vld [vmem:[#allocation8 + $0x3c0] ss:$16 sps:$4 sm:$0xff]  }
 0x245   :  { %3831 = vmatprep.subr.bf16.mxu0 %v6502_v49  ;;  %3872 = vmatprep.subr.bf16.mxu1 %v6630_v50  ;;  %v7046_v46 = vld [vmem:[#allocation8 + $0x264] ss:$16 sps:$4 sm:$0xff]   ;;  %v7041_v49 = vld [vmem:[#allocation8 + $0x60] ss:$16 sps:$4 sm:$0xff]  }
 0x246   :  { %v7044_v50 = vld [vmem:[#allocation8 + $0x260] ss:$16 sps:$4 sm:$0xff]   ;;  %v7067_v7 = vld [vmem:[#allocation8 + $0x1e4] ss:$16 sps:$4 sm:$0xff]  }
 0x247   :  { %v7076_v9 = vld [vmem:[#allocation8 + $0x3c4] ss:$16 sps:$4 sm:$0xff]   ;;  %v7080_v61 = vld [vmem:[#allocation8 + $0x3a0] ss:$16 sps:$4 sm:$0xff]  }
 0x248   :  { %3832 = vmatpush2.bf16.msra.mxu0 %v6501_v55  ;;  %3873 = vmatpush2.bf16.msra.mxu1 %v6629_v56  ;;  %v7055_v55 = vld [vmem:[#allocation8 + $0x24] ss:$16 sps:$4 sm:$0xff]  }
 0x249   :  { %3833 = vmatprep.subr.bf16.mxu0 %v6494_v57  ;;  %3874 = vmatprep.subr.bf16.mxu1 %v6622_v62  ;;  %v7058_v56 = vld [vmem:[#allocation8 + $0x224] ss:$16 sps:$4 sm:$0xff]   ;;  %v7053_v57 = vld [vmem:[#allocation8 + $0x20] ss:$16 sps:$4 sm:$0xff]  }
 0x24a   :  { %v7056_v62 = vld [vmem:[#allocation8 + $0x220] ss:$16 sps:$4 sm:$0xff]   ;;  %v7085_v15 = vld [vmem:[#allocation8 + $0x184] ss:$16 sps:$4 sm:$0xff]  }
 0x24c   :  { %3834 = vmatpush2.bf16.msra.mxu0 %v6493_v20  ;;  %3875 = vmatpush2.bf16.msra.mxu1 %v6621_v4  ;;  %v7070_v20 = vld [vmem:[#allocation8 + $0x3e4] ss:$16 sps:$4 sm:$0xff]   ;;  %v7065_v4 = vld [vmem:[#allocation8 + $0x1e0] ss:$16 sps:$4 sm:$0xff]  }
 0x24d   :  { %3835 = vmatprep.subr.bf16.mxu0 %v6486_v6  ;;  %3876 = vmatprep.subr.bf16.mxu1 %v6614_v8  ;;  %v7068_v6 = vld [vmem:[#allocation8 + $0x3e0] ss:$16 sps:$4 sm:$0xff]   ;;  %v7073_v8 = vld [vmem:[#allocation8 + $0x1c4] ss:$16 sps:$4 sm:$0xff]  }
 0x250   :  { %3836 = vmatpush2.bf16.msra.mxu0 %v6485_v11  ;;  %3877 = vmatpush2.bf16.msra.mxu1 %v6613_v13  ;;  %v7071_v11 = vld [vmem:[#allocation8 + $0x1c0] ss:$16 sps:$4 sm:$0xff]   ;;  %v7079_v13 = vld [vmem:[#allocation8 + $0x1a4] ss:$16 sps:$4 sm:$0xff]  }
 0x251   :  { %5461 = vmatprep.subr.bf16.mxu0 %v7019_v14  ;;  %5502 = vmatprep.subr.bf16.mxu1 %v7022_v23  ;;  %v7082_v14 = vld [vmem:[#allocation8 + $0x3a4] ss:$16 sps:$4 sm:$0xff]   ;;  %v7077_v23 = vld [vmem:[#allocation8 + $0x1a0] ss:$16 sps:$4 sm:$0xff]  }
 0x253   :  { %v3593_v21 = vpop.f32.mrf.mxu0  ;;  %3838 = vmatmul.mubr.bf16.vlgmr.msra.gmra.mxu0 %v7672_v38  ;;  %v3634_v26 = vpop.f32.mrf.mxu1  ;;  %3879 = vmatmul.mubr.bf16.vlgmr.msra.gmra.mxu1 %v7674_v39 }
 0x254   :  { %v3594_v32 = vadd.f32 %v3593_v21, %v650_v18  ;;  %5462 = vmatpush1.bf16.msra.mxu0 %v7017_v28  ;;  %5493 = vmatprep.mubr.bf16.mxu0 %v7749_v31  ;;  %v7088_v18 = vld [vmem:[#allocation8 + $0x384] ss:$16 sps:$4 sm:$0xff]   ;;  %v7083_v28 = vld [vmem:[#allocation8 + $0x180] ss:$16 sps:$4 sm:$0xff]  }
 0x255   :  { %5503 = vmatpush1.bf16.msra.mxu1 %v7020_v1  ;;  %v7756_v36 = vpop.f32.mrf.mxu0  ;;  %5534 = vmatprep.mubr.bf16.mxu1 %v7752_v25  ;;  %v7761_v38 = vpop.f32.mrf.mxu1  ;;  %v7086_v1 = vld [vmem:[#allocation8 + $0x380] ss:$16 sps:$4 sm:$0xff]   ;;  %v7094_v21 = vld [vmem:[#allocation8 + $0x364] ss:$16 sps:$4 sm:$0xff]  }
 0x256   :  { %v7758_v33 = vadd.f32 %v3634_v26, %v3594_v32  ;;  %5463 = vmatprep.subr.bf16.mxu0 %v7025_v19  ;;  %5504 = vmatprep.subr.bf16.mxu1 %v7028_v24  ;;  %v7091_v19 = vld [vmem:[#allocation8 + $0x164] ss:$16 sps:$4 sm:$0xff]   ;;  %v7089_v24 = vld [vmem:[#allocation8 + $0x160] ss:$16 sps:$4 sm:$0xff]  }
 0x257   :  { %v3597_v34 = vpop.f32.mrf.mxu0  ;;  %v3638_v39 = vpop.f32.mrf.mxu1  ;;  %v7092_v32 = vld [vmem:[#allocation8 + $0x360] ss:$16 sps:$4 sm:$0xff]   ;;  %v7097_v26 = vld [vmem:[#allocation8 + $0x144] ss:$16 sps:$4 sm:$0xff]  }
 0x258   :  { %5464 = vmatpush1.bf16.msra.mxu0 %v7023_v27  ;;  %v7100_v27 = vld [vmem:[#allocation8 + $0x344] ss:$16 sps:$4 sm:$0xff]   ;;  %v653_v39 = vsub.s32 5, %v7684_v60 }
 0x259   :  { %5505 = vmatpush1.bf16.msra.mxu1 %v7026_v29  ;;  %v3598_v47 = vpop.f32.mrf.mxu0  ;;  %5465 = vmatprep.subr.bf16.mxu0 %v7031_v30  ;;  %v3639_v40 = vpop.f32.mrf.mxu1  ;;  %v7095_v29 = vld [vmem:[#allocation8 + $0x140] ss:$16 sps:$4 sm:$0xff]   ;;  %v7106_v34 = vld [vmem:[#allocation8 + $0x324] ss:$16 sps:$4 sm:$0xff]  }
 0x25a   :  { %5506 = vmatprep.subr.bf16.mxu1 %v7034_v58  ;;  %v7098_v30 = vld [vmem:[#allocation8 + $0x340] ss:$16 sps:$4 sm:$0xff]   ;;  %v7103_v58 = vld [vmem:[#allocation8 + $0x124] ss:$16 sps:$4 sm:$0xff]   ;;  %v654_v40 = vrot.slane %v7746_v17, %v653_v39 }
 0x25b   :  { %v7104_v47 = vld [vmem:[#allocation8 + $0x320] ss:$16 sps:$4 sm:$0xff]   ;;  %v7214_v39 = vld [vmem:[#allocation8 + $0x604] ss:$16 sps:$4 sm:$0xff]  }
 0x25c   :  { %5466 = vmatpush1.bf16.msra.mxu0 %v7029_v35  ;;  %v7101_v35 = vld [vmem:[#allocation8 + $0x120] ss:$16 sps:$4 sm:$0xff]  }
 0x25d   :  { %5507 = vmatpush1.bf16.msra.mxu1 %v7032_v59  ;;  %5467 = vmatprep.subr.bf16.mxu0 %v7037_v37  ;;  %v7109_v59 = vld [vmem:[#allocation8 + $0x104] ss:$16 sps:$4 sm:$0xff]  }
 0x25e   :  { %5508 = vmatprep.subr.bf16.mxu1 %v7040_v41  ;;  %v7112_v37 = vld [vmem:[#allocation8 + $0x304] ss:$16 sps:$4 sm:$0xff]   ;;  %v7107_v41 = vld [vmem:[#allocation8 + $0x100] ss:$16 sps:$4 sm:$0xff]  }
 0x260   :  { %5468 = vmatpush1.bf16.msra.mxu0 %v7035_v42  ;;  %v3887_v42 = vmax.f32 %v7707_v22, 0.0  ;;  %v7178_v22 = vld [vmem:[#allocation8 + $0x6c4] ss:$16 sps:$4 sm:$0xff]  }
 0x261   :  { %5509 = vmatpush1.bf16.msra.mxu1 %v7038_v44  ;;  %5469 = vmatprep.subr.bf16.mxu0 %v7043_v45  ;;  %v7110_v44 = vld [vmem:[#allocation8 + $0x300] ss:$16 sps:$4 sm:$0xff]   ;;  %v7115_v45 = vld [vmem:[#allocation8 + $0x4e4] ss:$16 sps:$4 sm:$0xff]  }
 0x262   :  { %5510 = vmatprep.subr.bf16.mxu1 %v7046_v46  ;;  %v3889_v46 = vmax.f32 %v7735_v0, 0.0 }
 0x264   :  { %5470 = vmatpush1.bf16.msra.mxu0 %v7041_v49  ;;  %v7172_v49 = vld [vmem:[#allocation8 + $0x6e4] ss:$16 sps:$4 sm:$0xff]  }
 0x265   :  { %5511 = vmatpush1.bf16.msra.mxu1 %v7044_v50  ;;  %5471 = vmatprep.subr.bf16.mxu0 %v7049_v51  ;;  %v3596_v50 = vadd.f32 %v7756_v36, %v654_v40  ;;  %v7113_v51 = vld [vmem:[#allocation8 + $0x4e0] ss:$16 sps:$4 sm:$0xff]  }
 0x266   :  { %5512 = vmatprep.subr.bf16.mxu1 %v7052_v52  ;;  %v7768_v52 = vpack.c.bf16 %v3887_v42, %v3887_v42  ;;  %v7116_v36 = vld [vmem:[#allocation8 + $0x4c0] ss:$16 sps:$4 sm:$0xff]  }
 0x267   :  { %v3637_v0 = vadd.f32 %v7761_v38, %v3596_v50  ;;  %v7119_v38 = vld [vmem:[#allocation8 + $0x4a0] ss:$16 sps:$4 sm:$0xff]   ;;  %v7232_v50 = vld [vmem:[#allocation8 + $0x7a4] ss:$16 sps:$4 sm:$0xff]  }
 0x268   :  { %5472 = vmatpush1.bf16.msra.mxu0 %v7047_v53  ;;  %v7118_v53 = vld [vmem:[#allocation8 + $0x4c4] ss:$16 sps:$4 sm:$0xff]   ;;  %v7137_v40 = vld [vmem:[#allocation8 + $0x5e0] ss:$16 sps:$4 sm:$0xff]  }
 0x269   :  { %5513 = vmatpush1.bf16.msra.mxu1 %v7050_v54  ;;  %5473 = vmatprep.subr.bf16.mxu0 %v7055_v55  ;;  %v7170_v54 = vld [vmem:[#allocation8 + $0x6e0] ss:$16 sps:$4 sm:$0xff]   ;;  %v7770_v55 = vpack.c.bf16 %v3889_v46, %v3889_v46  ;;  %v7145_v46 = vld [vmem:[#allocation8 + $0x5a4] ss:$16 sps:$4 sm:$0xff]  }
 0x26a   :  { %5514 = vmatprep.subr.bf16.mxu1 %v7058_v56  ;;  %v7218_v42 = vld [vmem:[#allocation8 + $0x7e0] ss:$16 sps:$4 sm:$0xff]  }
 0x26c   :  { %5474 = vmatpush1.bf16.msra.mxu0 %v7053_v57 }
 0x26d   :  { %5515 = vmatpush1.bf16.msra.mxu1 %v7056_v62  ;;  %5475 = vmatprep.subr.bf16.mxu0 %v7061_v63  ;;  %v7121_v63 = vld [vmem:[#allocation8 + $0x4a4] ss:$16 sps:$4 sm:$0xff]  }
 0x26e   :  { %5516 = vmatprep.subr.bf16.mxu1 %v7064_v16  ;;  %v7176_v16 = vld [vmem:[#allocation8 + $0x6c0] ss:$16 sps:$4 sm:$0xff]  }
 0x270   :  { %5476 = vmatpush1.bf16.msra.mxu0 %v7059_v2 }
 0x271   :  { %5517 = vmatpush1.bf16.msra.mxu1 %v7062_v3  ;;  %5477 = vmatprep.subr.bf16.mxu0 %v7067_v7  ;;  %v7184_v7 = vld [vmem:[#allocation8 + $0x6a4] ss:$16 sps:$4 sm:$0xff]  }
 0x272   :  { %5518 = vmatprep.subr.bf16.mxu1 %v7070_v20 }
 0x274   :  { %5478 = vmatpush2.bf16.msra.mxu0 %v7065_v4 }
 0x275   :  { %5519 = vmatpush2.bf16.msra.mxu1 %v7068_v6  ;;  %5479 = vmatprep.subr.bf16.mxu0 %v7073_v8 }
 0x276   :  { %5520 = vmatprep.subr.bf16.mxu1 %v7076_v9  ;;  %v7124_v9 = vld [vmem:[#allocation8 + $0x484] ss:$16 sps:$4 sm:$0xff]  }
 0x278   :  { %5480 = vmatpush2.bf16.msra.mxu0 %v7071_v11  ;;  %v7182_v11 = vld [vmem:[#allocation8 + $0x6a0] ss:$16 sps:$4 sm:$0xff]  }
 0x279   :  { %5521 = vmatpush2.bf16.msra.mxu1 %v7074_v12  ;;  %5481 = vmatprep.subr.bf16.mxu0 %v7079_v13 }
 0x27a   :  { %5522 = vmatprep.subr.bf16.mxu1 %v7082_v14  ;;  %v7190_v14 = vld [vmem:[#allocation8 + $0x684] ss:$16 sps:$4 sm:$0xff]  }
 0x27c   :  { %5482 = vmatpush2.bf16.msra.mxu0 %v7077_v23 }
 0x27d   :  { %5523 = vmatpush2.bf16.msra.mxu1 %v7080_v61  ;;  %5483 = vmatprep.subr.bf16.mxu0 %v7085_v15  ;;  %v7122_v61 = vld [vmem:[#allocation8 + $0x480] ss:$16 sps:$4 sm:$0xff]   ;;  %v7127_v15 = vld [vmem:[#allocation8 + $0x464] ss:$16 sps:$4 sm:$0xff]  }
 0x27e   :  { %5524 = vmatprep.subr.bf16.mxu1 %v7088_v18  ;;  %v7188_v18 = vld [vmem:[#allocation8 + $0x680] ss:$16 sps:$4 sm:$0xff]  }
 0x280   :  { %5484 = vmatpush2.bf16.msra.mxu0 %v7083_v28  ;;  %v7196_v28 = vld [vmem:[#allocation8 + $0x664] ss:$16 sps:$4 sm:$0xff]  }
 0x281   :  { %5525 = vmatpush2.bf16.msra.mxu1 %v7086_v1  ;;  %5485 = vmatprep.subr.bf16.mxu0 %v7091_v19  ;;  %v7125_v1 = vld [vmem:[#allocation8 + $0x460] ss:$16 sps:$4 sm:$0xff]   ;;  %v7130_v19 = vld [vmem:[#allocation8 + $0x444] ss:$16 sps:$4 sm:$0xff]  }
 0x282   :  { %5526 = vmatprep.subr.bf16.mxu1 %v7094_v21  ;;  %v7194_v21 = vld [vmem:[#allocation8 + $0x660] ss:$16 sps:$4 sm:$0xff]  }
 0x284   :  { %5486 = vmatpush2.bf16.msra.mxu0 %v7089_v24  ;;  %v7202_v24 = vld [vmem:[#allocation8 + $0x644] ss:$16 sps:$4 sm:$0xff]  }
 0x285   :  { %5527 = vmatpush2.bf16.msra.mxu1 %v7092_v32  ;;  %5487 = vmatprep.subr.bf16.mxu0 %v7097_v26  ;;  %v7128_v32 = vld [vmem:[#allocation8 + $0x440] ss:$16 sps:$4 sm:$0xff]   ;;  %v7133_v26 = vld [vmem:[#allocation8 + $0x424] ss:$16 sps:$4 sm:$0xff]  }
 0x286   :  { %5528 = vmatprep.subr.bf16.mxu1 %v7100_v27  ;;  %v7200_v27 = vld [vmem:[#allocation8 + $0x640] ss:$16 sps:$4 sm:$0xff]  }
 0x288   :  { %5488 = vmatpush2.bf16.msra.mxu0 %v7095_v29  ;;  %v7208_v29 = vld [vmem:[#allocation8 + $0x624] ss:$16 sps:$4 sm:$0xff]  }
 0x289   :  { %5529 = vmatpush2.bf16.msra.mxu1 %v7098_v30  ;;  %5489 = vmatprep.subr.bf16.mxu0 %v7103_v58  ;;  %v7131_v30 = vld [vmem:[#allocation8 + $0x420] ss:$16 sps:$4 sm:$0xff]   ;;  %v7136_v58 = vld [vmem:[#allocation8 + $0x404] ss:$16 sps:$4 sm:$0xff]  }
 0x28a   :  { %5530 = vmatprep.subr.bf16.mxu1 %v7106_v34  ;;  %v7206_v34 = vld [vmem:[#allocation8 + $0x620] ss:$16 sps:$4 sm:$0xff]  }
 0x28c   :  { %5490 = vmatpush2.bf16.msra.mxu0 %v7101_v35  ;;  %v7134_v35 = vld [vmem:[#allocation8 + $0x400] ss:$16 sps:$4 sm:$0xff]  }
 0x28d   :  { %5531 = vmatpush2.bf16.msra.mxu1 %v7104_v47  ;;  %5491 = vmatprep.subr.bf16.mxu0 %v7109_v59  ;;  %v7139_v47 = vld [vmem:[#allocation8 + $0x5e4] ss:$16 sps:$4 sm:$0xff]   ;;  %v7212_v59 = vld [vmem:[#allocation8 + $0x600] ss:$16 sps:$4 sm:$0xff]  }
 0x28e   :  { %5532 = vmatprep.subr.bf16.mxu1 %v7112_v37  ;;  %v7220_v37 = vld [vmem:[#allocation8 + $0x7e4] ss:$16 sps:$4 sm:$0xff]  }
 0x290   :  { %5492 = vmatpush2.bf16.msra.mxu0 %v7107_v41  ;;  %v7142_v41 = vld [vmem:[#allocation8 + $0x5c4] ss:$16 sps:$4 sm:$0xff]  }
 0x291   :  { %5533 = vmatpush2.bf16.msra.mxu1 %v7110_v44  ;;  %5543 = vmatprep.subr.bf16.mxu0 %v7115_v45  ;;  %v7226_v44 = vld [vmem:[#allocation8 + $0x7c4] ss:$16 sps:$4 sm:$0xff]   ;;  %v7140_v45 = vld [vmem:[#allocation8 + $0x5c0] ss:$16 sps:$4 sm:$0xff]  }
 0x292   :  { %5584 = vmatprep.subr.bf16.mxu1 %v7172_v49  ;;  %v7224_v49 = vld [vmem:[#allocation8 + $0x7c0] ss:$16 sps:$4 sm:$0xff]  }
 0x293   :  { %v7772_v56 = vpop.f32.mrf.mxu0  ;;  %5494 = vmatmul.mubr.bf16.vlgmr.msra.gmra.mxu0 %v7768_v52  ;;  %v7776_v57 = vpop.f32.mrf.mxu1 }
 0x294   :  { %5535 = vmatmul.mubr.bf16.vlgmr.msra.gmra.mxu1 %v7770_v55  ;;  %5544 = vmatpush1.bf16.msra.mxu0 %v7113_v51  ;;  %v7143_v51 = vld [vmem:[#allocation8 + $0x5a0] ss:$16 sps:$4 sm:$0xff]  }
 0x295   :  { %v3677_v62 = vpop.f32.mrf.mxu0  ;;  %5545 = vmatprep.subr.bf16.mxu0 %v7118_v53  ;;  %5585 = vmatpush1.bf16.msra.mxu1 %v7170_v54  ;;  %v3718_v3 = vpop.f32.mrf.mxu1  ;;  %v7148_v53 = vld [vmem:[#allocation8 + $0x584] ss:$16 sps:$4 sm:$0xff]   ;;  %v7230_v54 = vld [vmem:[#allocation8 + $0x7a0] ss:$16 sps:$4 sm:$0xff]  }
 0x296   :  { %v3678_v2 = vadd.f32 %v3677_v62, %v3637_v0  ;;  %5586 = vmatprep.subr.bf16.mxu1 %v7178_v22  ;;  %v7238_v22 = vld [vmem:[#allocation8 + $0x784] ss:$16 sps:$4 sm:$0xff]   ;;  %v7146_v0 = vld [vmem:[#allocation8 + $0x580] ss:$16 sps:$4 sm:$0xff]  }
 0x297   :  { %v3679_v20 = vpop.f32.mrf.mxu0  ;;  %v3720_v6 = vpop.f32.mrf.mxu1  ;;  %v7236_v62 = vld [vmem:[#allocation8 + $0x780] ss:$16 sps:$4 sm:$0xff]  }
 0x298   :  { %v3719_v4 = vadd.f32 %v3718_v3, %v3678_v2  ;;  %5546 = vmatpush1.bf16.msra.mxu0 %v7116_v36  ;;  %v7151_v36 = vld [vmem:[#allocation8 + $0x564] ss:$16 sps:$4 sm:$0xff]   ;;  %v7242_v3 = vld [vmem:[#allocation8 + $0x760] ss:$16 sps:$4 sm:$0xff]  }
 0x299   :  { %v3680_v8 = vpop.f32.mrf.mxu0  ;;  %5547 = vmatprep.subr.bf16.mxu0 %v7121_v63  ;;  %5587 = vmatpush1.bf16.msra.mxu1 %v7176_v16  ;;  %v3721_v13 = vpop.f32.mrf.mxu1  ;;  %v7244_v63 = vld [vmem:[#allocation8 + $0x764] ss:$16 sps:$4 sm:$0xff]   ;;  %v7149_v16 = vld [vmem:[#allocation8 + $0x560] ss:$16 sps:$4 sm:$0xff]  }
 0x29a   :  { %v3892_v12 = vmax.f32 %v3719_v4, 0.0  ;;  %5588 = vmatprep.subr.bf16.mxu1 %v7184_v7  ;;  %v7154_v2 = vld [vmem:[#allocation8 + $0x544] ss:$16 sps:$4 sm:$0xff]   ;;  %v7152_v20 = vld [vmem:[#allocation8 + $0x540] ss:$16 sps:$4 sm:$0xff]   ;;  %v3676_v4 = vadd.f32 %v7772_v56, %v7758_v33 }
 0x29b   :  { %v7250_v7 = vld [vmem:[#allocation8 + $0x744] ss:$16 sps:$4 sm:$0xff]   ;;  %v7254_v13 = vld [vmem:[#allocation8 + $0x720] ss:$16 sps:$4 sm:$0xff]   ;;  %v7163_v33 = vld [vmem:[#allocation8 + $0xec] ss:$16 sps:$4 sm:$0xff]  }
 0x29c   :  { %v7779_v23 = vpack.c.bf16 %v3892_v12, %v3892_v12  ;;  %5548 = vmatpush1.bf16.msra.mxu0 %v7119_v38  ;;  %v7157_v6 = vld [vmem:[#allocation8 + $0x524] ss:$16 sps:$4 sm:$0xff]   ;;  %v7248_v38 = vld [vmem:[#allocation8 + $0x740] ss:$16 sps:$4 sm:$0xff]  }
 0x29d   :  { %5549 = vmatprep.subr.bf16.mxu0 %v7124_v9  ;;  %5589 = vmatpush1.bf16.msra.mxu1 %v7182_v11  ;;  %v7256_v8 = vld [vmem:[#allocation8 + $0x724] ss:$16 sps:$4 sm:$0xff]   ;;  %v7155_v9 = vld [vmem:[#allocation8 + $0x520] ss:$16 sps:$4 sm:$0xff]   ;;  %v3717_v11 = vadd.f32 %v7776_v57, %v3676_v4  ;;  %v7166_v57 = vld [vmem:[#allocation8 + $0xcc] ss:$16 sps:$4 sm:$0xff]  }
 0x29e   :  { %5575 = vmatprep.mubr.bf16.mxu0 %v7779_v23  ;;  %5590 = vmatprep.subr.bf16.mxu1 %v7190_v14  ;;  %v7160_v12 = vld [vmem:[#allocation8 + $0x504] ss:$16 sps:$4 sm:$0xff]   ;;  %v7260_v56 = vld [vmem:[#allocation8 + $0x700] ss:$16 sps:$4 sm:$0xff]   ;;  %v7247_v4 = vld [vmem:[#allocation8 + $0x10c] ss:$16 sps:$4 sm:$0xff]  }
 0x29f   :  { %v7262_v14 = vld [vmem:[#allocation8 + $0x704] ss:$16 sps:$4 sm:$0xff]  }
 0x2a0   :  { %5550 = vmatpush1.bf16.msra.mxu0 %v7122_v61  ;;  %v7158_v61 = vld [vmem:[#allocation8 + $0x500] ss:$16 sps:$4 sm:$0xff]  }
 0x2a1   :  { %5551 = vmatprep.subr.bf16.mxu0 %v7127_v15  ;;  %5591 = vmatpush1.bf16.msra.mxu1 %v7188_v18  ;;  %v3891_v15 = vmax.f32 %v3717_v11, 0.0  ;;  %v7268_v18 = vld [vmem:[#allocation8 + $0x2ec] ss:$16 sps:$4 sm:$0xff]  }
 0x2a2   :  { %5592 = vmatprep.subr.bf16.mxu1 %v7196_v28  ;;  %v7161_v28 = vld [vmem:[#allocation8 + $0xe8] ss:$16 sps:$4 sm:$0xff]  }
 0x2a4   :  { %5552 = vmatpush1.bf16.msra.mxu0 %v7125_v1  ;;  %v7785_v1 = vpack.c.bf16 %v3891_v15, %v3891_v15 }
 0x2a5   :  { %5553 = vmatprep.subr.bf16.mxu0 %v7130_v19  ;;  %5593 = vmatpush1.bf16.msra.mxu1 %v7194_v21 }
 0x2a6   :  { %5594 = vmatprep.subr.bf16.mxu1 %v7202_v24  ;;  %v7164_v24 = vld [vmem:[#allocation8 + $0xc8] ss:$16 sps:$4 sm:$0xff]  }
 0x2a8   :  { %5554 = vmatpush1.bf16.msra.mxu0 %v7128_v32 }
 0x2a9   :  { %5555 = vmatprep.subr.bf16.mxu0 %v7133_v26  ;;  %5595 = vmatpush1.bf16.msra.mxu1 %v7200_v27  ;;  %v7169_v26 = vld [vmem:[#allocation8 + $0xac] ss:$16 sps:$4 sm:$0xff]  }
 0x2aa   :  { %5596 = vmatprep.subr.bf16.mxu1 %v7208_v29 }
 0x2ac   :  { %5556 = vmatpush1.bf16.msra.mxu0 %v7131_v30 }
 0x2ad   :  { %5557 = vmatprep.subr.bf16.mxu0 %v7136_v58  ;;  %5597 = vmatpush1.bf16.msra.mxu1 %v7206_v34  ;;  %v7167_v58 = vld [vmem:[#allocation8 + $0xa8] ss:$16 sps:$4 sm:$0xff]  }
 0x2ae   :  { %5598 = vmatprep.subr.bf16.mxu1 %v7214_v39  ;;  %v7175_v39 = vld [vmem:[#allocation8 + $0x8c] ss:$16 sps:$4 sm:$0xff]  }
 0x2b0   :  { %5558 = vmatpush1.bf16.msra.mxu0 %v7134_v35 }
 0x2b1   :  { %5559 = vmatprep.subr.bf16.mxu0 %v7139_v47  ;;  %5599 = vmatpush1.bf16.msra.mxu1 %v7212_v59  ;;  %v7173_v47 = vld [vmem:[#allocation8 + $0x88] ss:$16 sps:$4 sm:$0xff]   ;;  %v7181_v59 = vld [vmem:[#allocation8 + $0x6c] ss:$16 sps:$4 sm:$0xff]  }
 0x2b2   :  { %5600 = vmatprep.subr.bf16.mxu1 %v7220_v37  ;;  %v7187_v37 = vld [vmem:[#allocation8 + $0x4c] ss:$16 sps:$4 sm:$0xff]  }
 0x2b4   :  { %5560 = vmatpush2.bf16.msra.mxu0 %v7137_v40  ;;  %v7185_v40 = vld [vmem:[#allocation8 + $0x48] ss:$16 sps:$4 sm:$0xff]  }
 0x2b5   :  { %5561 = vmatprep.subr.bf16.mxu0 %v7142_v41  ;;  %5601 = vmatpush2.bf16.msra.mxu1 %v7218_v42  ;;  %v7193_v41 = vld [vmem:[#allocation8 + $0x2c] ss:$16 sps:$4 sm:$0xff]   ;;  %v7191_v42 = vld [vmem:[#allocation8 + $0x28] ss:$16 sps:$4 sm:$0xff]  }
 0x2b6   :  { %5602 = vmatprep.subr.bf16.mxu1 %v7226_v44  ;;  %v7199_v44 = vld [vmem:[#allocation8 + $0xc] ss:$16 sps:$4 sm:$0xff]  }
 0x2b8   :  { %5562 = vmatpush2.bf16.msra.mxu0 %v7140_v45  ;;  %v7197_v45 = vld [vmem:[#allocation8 + $0x8] ss:$16 sps:$4 sm:$0xff]  }
 0x2b9   :  { %5563 = vmatprep.subr.bf16.mxu0 %v7145_v46  ;;  %5603 = vmatpush2.bf16.msra.mxu1 %v7224_v49  ;;  %v7205_v46 = vld [vmem:[#allocation8 + $0x1ec] ss:$16 sps:$4 sm:$0xff]   ;;  %v7203_v49 = vld [vmem:[#allocation8 + $0x1e8] ss:$16 sps:$4 sm:$0xff]  }
 0x2ba   :  { %5604 = vmatprep.subr.bf16.mxu1 %v7232_v50  ;;  %v7211_v50 = vld [vmem:[#allocation8 + $0x1cc] ss:$16 sps:$4 sm:$0xff]  }
 0x2bc   :  { %5564 = vmatpush2.bf16.msra.mxu0 %v7143_v51  ;;  %v7209_v51 = vld [vmem:[#allocation8 + $0x1c8] ss:$16 sps:$4 sm:$0xff]  }
 0x2bd   :  { %5565 = vmatprep.subr.bf16.mxu0 %v7148_v53  ;;  %5605 = vmatpush2.bf16.msra.mxu1 %v7230_v54  ;;  %v7217_v53 = vld [vmem:[#allocation8 + $0x1ac] ss:$16 sps:$4 sm:$0xff]   ;;  %v7215_v54 = vld [vmem:[#allocation8 + $0x1a8] ss:$16 sps:$4 sm:$0xff]  }
 0x2be   :  { %5606 = vmatprep.subr.bf16.mxu1 %v7238_v22  ;;  %v7223_v22 = vld [vmem:[#allocation8 + $0x18c] ss:$16 sps:$4 sm:$0xff]  }
 0x2c0   :  { %5566 = vmatpush2.bf16.msra.mxu0 %v7146_v0  ;;  %v7221_v0 = vld [vmem:[#allocation8 + $0x188] ss:$16 sps:$4 sm:$0xff]  }
 0x2c1   :  { %5567 = vmatprep.subr.bf16.mxu0 %v7151_v36  ;;  %5607 = vmatpush2.bf16.msra.mxu1 %v7236_v62  ;;  %v7229_v36 = vld [vmem:[#allocation8 + $0x16c] ss:$16 sps:$4 sm:$0xff]   ;;  %v7227_v62 = vld [vmem:[#allocation8 + $0x168] ss:$16 sps:$4 sm:$0xff]  }
 0x2c2   :  { %5608 = vmatprep.subr.bf16.mxu1 %v7244_v63  ;;  %v7235_v63 = vld [vmem:[#allocation8 + $0x14c] ss:$16 sps:$4 sm:$0xff]  }
 0x2c4   :  { %5568 = vmatpush2.bf16.msra.mxu0 %v7149_v16  ;;  %v7233_v16 = vld [vmem:[#allocation8 + $0x148] ss:$16 sps:$4 sm:$0xff]  }
 0x2c5   :  { %5569 = vmatprep.subr.bf16.mxu0 %v7154_v2  ;;  %5609 = vmatpush2.bf16.msra.mxu1 %v7242_v3  ;;  %v7241_v2 = vld [vmem:[#allocation8 + $0x12c] ss:$16 sps:$4 sm:$0xff]   ;;  %v657_v3 = vsub.s32 6, %v7684_v60 }
 0x2c6   :  { %5610 = vmatprep.subr.bf16.mxu1 %v7250_v7  ;;  %v661_v7 = vsub.s32 7, %v7684_v60 }
 0x2c8   :  { %5570 = vmatpush2.bf16.msra.mxu0 %v7152_v20  ;;  %v7239_v20 = vld [vmem:[#allocation8 + $0x128] ss:$16 sps:$4 sm:$0xff]  }
 0x2c9   :  { %5571 = vmatprep.subr.bf16.mxu0 %v7157_v6  ;;  %5611 = vmatpush2.bf16.msra.mxu1 %v7248_v38  ;;  %v658_v6 = vrot.slane %v7746_v17, %v657_v3  ;;  %v662_v38 = vrot.slane %v7746_v17, %v661_v7  ;;  %v7307_v3 = vld [vmem:[#allocation8 + $0x5cc] ss:$16 sps:$4 sm:$0xff]   ;;  %v7302_v7 = vld [vmem:[#allocation8 + $0x228] ss:$16 sps:$4 sm:$0xff]  }
 0x2ca   :  { %5612 = vmatprep.subr.bf16.mxu1 %v7256_v8  ;;  %v7245_v8 = vld [vmem:[#allocation8 + $0x108] ss:$16 sps:$4 sm:$0xff]  }
 0x2cc   :  { %5572 = vmatpush2.bf16.msra.mxu0 %v7155_v9  ;;  %v7253_v9 = vld [vmem:[#allocation8 + $0x4ec] ss:$16 sps:$4 sm:$0xff]  }
 0x2cd   :  { %5573 = vmatprep.subr.bf16.mxu0 %v7160_v12  ;;  %5613 = vmatpush2.bf16.msra.mxu1 %v7254_v13  ;;  %v7251_v13 = vld [vmem:[#allocation8 + $0x4e8] ss:$16 sps:$4 sm:$0xff]  }
 0x2ce   :  { %5614 = vmatprep.subr.bf16.mxu1 %v7262_v14  ;;  %v7259_v14 = vld [vmem:[#allocation8 + $0x4cc] ss:$16 sps:$4 sm:$0xff]  }
 0x2d0   :  { %5574 = vmatpush2.bf16.msra.mxu0 %v7158_v61 }
 0x2d1   :  { %5625 = vmatprep.subr.bf16.mxu0 %v7163_v33  ;;  %5615 = vmatpush2.bf16.msra.mxu1 %v7260_v56 }
 0x2d2   :  { %5666 = vmatprep.subr.bf16.mxu1 %v7268_v18  ;;  %v7257_v18 = vld [vmem:[#allocation8 + $0x4c8] ss:$16 sps:$4 sm:$0xff]  }
 0x2d3   :  { %v7787_v19 = vpop.f32.mrf.mxu0  ;;  %5576 = vmatmul.mubr.bf16.vlgmr.msra.gmra.mxu0 %v7785_v1  ;;  %v7790_v21 = vpop.f32.mrf.mxu1 }
 0x2d4   :  { %5626 = vmatpush1.bf16.msra.mxu0 %v7161_v28  ;;  %5657 = vmatprep.mubr.bf16.mxu0 %v7749_v31  ;;  %v7179_v31 = vld [vmem:[#allocation8 + $0x68] ss:$16 sps:$4 sm:$0xff]   ;;  %v3758_v11 = vadd.f32 %v7787_v19, %v658_v6  ;;  %v7313_v6 = vld [vmem:[#allocation8 + $0x5ac] ss:$16 sps:$4 sm:$0xff]  }
 0x2d5   :  { %v7793_v32 = vpop.f32.mrf.mxu0  ;;  %5627 = vmatprep.subr.bf16.mxu0 %v7166_v57  ;;  %v7795_v27 = vpop.f32.mrf.mxu1  ;;  %v7265_v57 = vld [vmem:[#allocation8 + $0x4ac] ss:$16 sps:$4 sm:$0xff]  }
 0x2d6   :  { %v3760_v12 = vadd.f32 %v7793_v32, %v662_v38  ;;  %v3799_v61 = vadd.f32 %v7790_v21, %v3758_v11  ;;  %v7308_v38 = vld [vmem:[#allocation8 + $0x208] ss:$16 sps:$4 sm:$0xff]   ;;  %v7319_v11 = vld [vmem:[#allocation8 + $0x58c] ss:$16 sps:$4 sm:$0xff]  }
 0x2d7   :  { %v3761_v29 = vpop.f32.mrf.mxu0  ;;  %v3802_v30 = vpop.f32.mrf.mxu1 }
 0x2d8   :  { %5628 = vmatpush1.bf16.msra.mxu0 %v7164_v24  ;;  %v3801_v33 = vadd.f32 %v7795_v27, %v3760_v12  ;;  %v7263_v30 = vld [vmem:[#allocation8 + $0x4a8] ss:$16 sps:$4 sm:$0xff]   ;;  %v7271_v27 = vld [vmem:[#allocation8 + $0x48c] ss:$16 sps:$4 sm:$0xff]  }
 0x2d9   :  { %v3762_v34 = vpop.f32.mrf.mxu0  ;;  %5629 = vmatprep.subr.bf16.mxu0 %v7169_v26  ;;  %v3803_v35 = vpop.f32.mrf.mxu1  ;;  %v7314_v12 = vld [vmem:[#allocation8 + $0x3e8] ss:$16 sps:$4 sm:$0xff]  }
 0x2dc   :  { %5630 = vmatpush1.bf16.msra.mxu0 %v7167_v58 }
 0x2dd   :  { %5631 = vmatprep.subr.bf16.mxu0 %v7175_v39 }
 0x2e0   :  { %5632 = vmatpush1.bf16.msra.mxu0 %v7173_v47 }
 0x2e1   :  { %5633 = vmatprep.subr.bf16.mxu0 %v7181_v59  ;;  %v7269_v59 = vld [vmem:[#allocation8 + $0x488] ss:$16 sps:$4 sm:$0xff]  }
 0x2e4   :  { %5634 = vmatpush1.bf16.msra.mxu0 %v7179_v31  ;;  %v7274_v31 = vld [vmem:[#allocation8 + $0x2cc] ss:$16 sps:$4 sm:$0xff]  }
 0x2e5   :  { %5635 = vmatprep.subr.bf16.mxu0 %v7187_v37  ;;  %v7277_v37 = vld [vmem:[#allocation8 + $0x46c] ss:$16 sps:$4 sm:$0xff]  }
 0x2e8   :  { %5636 = vmatpush1.bf16.msra.mxu0 %v7185_v40  ;;  %v7272_v40 = vld [vmem:[#allocation8 + $0x2c8] ss:$16 sps:$4 sm:$0xff]  }
 0x2e9   :  { %5637 = vmatprep.subr.bf16.mxu0 %v7193_v41  ;;  %v7275_v41 = vld [vmem:[#allocation8 + $0x468] ss:$16 sps:$4 sm:$0xff]  }
 0x2ec   :  { %5638 = vmatpush1.bf16.msra.mxu0 %v7191_v42  ;;  %v7280_v42 = vld [vmem:[#allocation8 + $0x2ac] ss:$16 sps:$4 sm:$0xff]  }
 0x2ed   :  { %5639 = vmatprep.subr.bf16.mxu0 %v7199_v44  ;;  %v7283_v44 = vld [vmem:[#allocation8 + $0x44c] ss:$16 sps:$4 sm:$0xff]  }
 0x2f0   :  { %5640 = vmatpush1.bf16.msra.mxu0 %v7197_v45  ;;  %v7278_v45 = vld [vmem:[#allocation8 + $0x2a8] ss:$16 sps:$4 sm:$0xff]  }
 0x2f1   :  { %5641 = vmatprep.subr.bf16.mxu0 %v7205_v46  ;;  %v7281_v46 = vld [vmem:[#allocation8 + $0x448] ss:$16 sps:$4 sm:$0xff]  }
 0x2f4   :  { %5642 = vmatpush2.bf16.msra.mxu0 %v7203_v49  ;;  %v7286_v49 = vld [vmem:[#allocation8 + $0x28c] ss:$16 sps:$4 sm:$0xff]  }
 0x2f5   :  { %5643 = vmatprep.subr.bf16.mxu0 %v7211_v50  ;;  %v7289_v50 = vld [vmem:[#allocation8 + $0x42c] ss:$16 sps:$4 sm:$0xff]  }
 0x2f8   :  { %5644 = vmatpush2.bf16.msra.mxu0 %v7209_v51  ;;  %v7284_v51 = vld [vmem:[#allocation8 + $0x288] ss:$16 sps:$4 sm:$0xff]  }
 0x2f9   :  { %5645 = vmatprep.subr.bf16.mxu0 %v7217_v53  ;;  %v7292_v53 = vld [vmem:[#allocation8 + $0x26c] ss:$16 sps:$4 sm:$0xff]  }
 0x2fc   :  { %5646 = vmatpush2.bf16.msra.mxu0 %v7215_v54  ;;  %v7295_v54 = vld [vmem:[#allocation8 + $0x40c] ss:$16 sps:$4 sm:$0xff]  }
 0x2fd   :  { %5647 = vmatprep.subr.bf16.mxu0 %v7223_v22  ;;  %v7290_v22 = vld [vmem:[#allocation8 + $0x268] ss:$16 sps:$4 sm:$0xff]  }
 0x300   :  { %5648 = vmatpush2.bf16.msra.mxu0 %v7221_v0  ;;  %v7293_v0 = vld [vmem:[#allocation8 + $0x408] ss:$16 sps:$4 sm:$0xff]  }
 0x301   :  { %5649 = vmatprep.subr.bf16.mxu0 %v7229_v36  ;;  %v7298_v36 = vld [vmem:[#allocation8 + $0x24c] ss:$16 sps:$4 sm:$0xff]  }
 0x304   :  { %5650 = vmatpush2.bf16.msra.mxu0 %v7227_v62  ;;  %v7301_v62 = vld [vmem:[#allocation8 + $0x5ec] ss:$16 sps:$4 sm:$0xff]  }
 0x305   :  { %5651 = vmatprep.subr.bf16.mxu0 %v7235_v63  ;;  %v7296_v63 = vld [vmem:[#allocation8 + $0x248] ss:$16 sps:$4 sm:$0xff]  }
 0x308   :  { %5652 = vmatpush2.bf16.msra.mxu0 %v7233_v16  ;;  %v7299_v16 = vld [vmem:[#allocation8 + $0x5e8] ss:$16 sps:$4 sm:$0xff]  }
 0x309   :  { %5653 = vmatprep.subr.bf16.mxu0 %v7241_v2  ;;  %v7304_v2 = vld [vmem:[#allocation8 + $0x22c] ss:$16 sps:$4 sm:$0xff]  }
 0x30c   :  { %5654 = vmatpush2.bf16.msra.mxu0 %v7239_v20  ;;  %v7305_v20 = vld [vmem:[#allocation8 + $0x5c8] ss:$16 sps:$4 sm:$0xff]  }
 0x30d   :  { %5655 = vmatprep.subr.bf16.mxu0 %v7247_v4  ;;  %v7310_v4 = vld [vmem:[#allocation8 + $0x20c] ss:$16 sps:$4 sm:$0xff]  }
 0x310   :  { %5656 = vmatpush2.bf16.msra.mxu0 %v7245_v8  ;;  %v7311_v8 = vld [vmem:[#allocation8 + $0x5a8] ss:$16 sps:$4 sm:$0xff]  }
 0x311   :  { %5707 = vmatprep.subr.bf16.mxu0 %v7253_v9  ;;  %v7316_v9 = vld [vmem:[#allocation8 + $0x3ec] ss:$16 sps:$4 sm:$0xff]  }
 0x313   :  { %v3839_v15 = vpop.f32.mrf.mxu0  ;;  %5658 = vmatmul.mubr.bf16.vlgmr.msra.gmra.mxu0 %v7768_v52  ;;  %v3880_v56 = vpop.f32.mrf.mxu1 }
 0x314   :  { %v3840_v17 = vadd.f32 %v3839_v15, %v3799_v61  ;;  %5708 = vmatpush1.bf16.msra.mxu0 %v7251_v13  ;;  %5739 = vmatprep.mubr.bf16.mxu0 %v7779_v23  ;;  %v7266_v23 = vld [vmem:[#allocation8 + $0x2e8] ss:$16 sps:$4 sm:$0xff]   ;;  %v7325_v61 = vld [vmem:[#allocation8 + $0x56c] ss:$16 sps:$4 sm:$0xff]  }
 0x315   :  { %v3841_v28 = vpop.f32.mrf.mxu0  ;;  %5709 = vmatprep.subr.bf16.mxu0 %v7259_v14  ;;  %v3882_v32 = vpop.f32.mrf.mxu1  ;;  %v7317_v13 = vld [vmem:[#allocation8 + $0x588] ss:$16 sps:$4 sm:$0xff]   ;;  %v7322_v14 = vld [vmem:[#allocation8 + $0x3cc] ss:$16 sps:$4 sm:$0xff]  }
 0x316   :  { %v3881_v19 = vadd.f32 %v3880_v56, %v3840_v17  ;;  %v3842_v24 = vadd.f32 %v3841_v28, %v3801_v33  ;;  %v7320_v15 = vld [vmem:[#allocation8 + $0x3c8] ss:$16 sps:$4 sm:$0xff]   ;;  %v7328_v17 = vld [vmem:[#allocation8 + $0x3ac] ss:$16 sps:$4 sm:$0xff]  }
 0x317   :  { %v3843_v26 = vpop.f32.mrf.mxu0  ;;  %v3884_v21 = vpop.f32.mrf.mxu1  ;;  %v7323_v33 = vld [vmem:[#allocation8 + $0x568] ss:$16 sps:$4 sm:$0xff]   ;;  %v7331_v56 = vld [vmem:[#allocation8 + $0x54c] ss:$16 sps:$4 sm:$0xff]  }
 0x318   :  { %v3883_v29 = vadd.f32 %v3882_v32, %v3842_v24  ;;  %5710 = vmatpush1.bf16.msra.mxu0 %v7257_v18  ;;  %v3893_v52 = vmax.f32 %v3881_v19, 0.0  ;;  %v7326_v18 = vld [vmem:[#allocation8 + $0x3a8] ss:$16 sps:$4 sm:$0xff]   ;;  %v7337_v19 = vld [vmem:[#allocation8 + $0x52c] ss:$16 sps:$4 sm:$0xff]  }
 0x319   :  { %v3844_v58 = vpop.f32.mrf.mxu0  ;;  %5711 = vmatprep.subr.bf16.mxu0 %v7265_v57  ;;  %v3885_v39 = vpop.f32.mrf.mxu1  ;;  %v7329_v28 = vld [vmem:[#allocation8 + $0x548] ss:$16 sps:$4 sm:$0xff]   ;;  %v7334_v57 = vld [vmem:[#allocation8 + $0x38c] ss:$16 sps:$4 sm:$0xff]  }
 0x31a   :  { %v3894_v34 = vmax.f32 %v3883_v29, 0.0  ;;  %v7809_v47 = vpack.c.bf16 %v3893_v52, %v3893_v52  ;;  %v7332_v24 = vld [vmem:[#allocation8 + $0x388] ss:$16 sps:$4 sm:$0xff]   ;;  %v7340_v26 = vld [vmem:[#allocation8 + $0x36c] ss:$16 sps:$4 sm:$0xff]  }
 0x31b   :  { %v7335_v32 = vld [vmem:[#allocation8 + $0x528] ss:$16 sps:$4 sm:$0xff]   ;;  %v7343_v29 = vld [vmem:[#allocation8 + $0x50c] ss:$16 sps:$4 sm:$0xff]   ;;  %v7814_v58 = vld [vmem:[#allocation10] sm:$0xf] }
 0x31c   :  { %v7807_v35 = vpack.c.bf16 %v3894_v34, %v3894_v34  ;;  %5712 = vmatpush1.bf16.msra.mxu0 %v7263_v30  ;;  %v7338_v21 = vld [vmem:[#allocation8 + $0x368] ss:$16 sps:$4 sm:$0xff]   ;;  %v7346_v52 = vld [vmem:[#allocation8 + $0x34c] ss:$16 sps:$4 sm:$0xff]   ;;  %v4164_v39 = vrot.slane %v7814_v58, %v633_v5 }
 0x31d   :  { %5713 = vmatprep.subr.bf16.mxu0 %v7271_v27  ;;  %v7341_v30 = vld [vmem:[#allocation8 + $0x508] ss:$16 sps:$4 sm:$0xff]   ;;  %v7401_v27 = vld [vmem:[#allocation11 + $0x78] sm:$0xff]  }
 0x31e   :  { %5616 = vmatprep.mubr.bf16.mxu1 %v7807_v35  ;;  %v7344_v34 = vld [vmem:[#allocation8 + $0x348] ss:$16 sps:$4 sm:$0xff]   ;;  %v7352_v5 = vld [vmem:[#allocation8 + $0x30c] ss:$16 sps:$4 sm:$0xff]  }
 0x31f   :  { %5617 = vmatmul.mubr.bf16.vlgmr.msra.gmra.mxu1 %v7809_v47 }
 0x320   :  { %5667 = vmatpush1.bf16.msra.mxu1 %v7266_v23  ;;  %5698 = vmatprep.mubr.bf16.mxu1 %v7752_v25  ;;  %v7287_v25 = vld [vmem:[#allocation8 + $0x428] ss:$16 sps:$4 sm:$0xff]   ;;  %v7349_v23 = vld [vmem:[#allocation8 + $0x32c] ss:$16 sps:$4 sm:$0xff]  }
 0x321   :  { %5714 = vmatpush1.bf16.msra.mxu0 %v7269_v59  ;;  %5668 = vmatprep.subr.bf16.mxu1 %v7274_v31  ;;  %v7402_v59 = vld [vmem:[#allocation11 + $0x38] sm:$0xff]   ;;  %v4168_v31 = vrot.slane %v7814_v58, %v637_v10  ;;  %v7405_v10 = vld [vmem:[#allocation11 + $0x68] sm:$0xff]  }
 0x322   :  { %5715 = vmatprep.subr.bf16.mxu0 %v7277_v37  ;;  %v7403_v37 = vld [vmem:[#allocation11 + $0x70] sm:$0xff]  }
 0x324   :  { %5669 = vmatpush1.bf16.msra.mxu1 %v7272_v40 }
 0x325   :  { %5716 = vmatpush1.bf16.msra.mxu0 %v7275_v41  ;;  %5670 = vmatprep.subr.bf16.mxu1 %v7280_v42 }
 0x326   :  { %5717 = vmatprep.subr.bf16.mxu0 %v7283_v44  ;;  %v7347_v44 = vld [vmem:[#allocation8 + $0x328] ss:$16 sps:$4 sm:$0xff]  }
 0x328   :  { %5671 = vmatpush1.bf16.msra.mxu1 %v7278_v45 }
 0x329   :  { %5718 = vmatpush1.bf16.msra.mxu0 %v7281_v46  ;;  %5672 = vmatprep.subr.bf16.mxu1 %v7286_v49  ;;  %v7404_v46 = vld [vmem:[#allocation11 + $0x30] sm:$0xff]  }
 0x32a   :  { %5719 = vmatprep.subr.bf16.mxu0 %v7289_v50 }
 0x32c   :  { %5673 = vmatpush1.bf16.msra.mxu1 %v7284_v51 }
 0x32d   :  { %5720 = vmatpush1.bf16.msra.mxu0 %v7287_v25  ;;  %5674 = vmatprep.subr.bf16.mxu1 %v7292_v53 }
 0x32e   :  { %5721 = vmatprep.subr.bf16.mxu0 %v7295_v54 }
 0x330   :  { %5675 = vmatpush1.bf16.msra.mxu1 %v7290_v22  ;;  %v7350_v22 = vld [vmem:[#allocation8 + $0x308] ss:$16 sps:$4 sm:$0xff]  }
 0x331   :  { %5722 = vmatpush1.bf16.msra.mxu0 %v7293_v0  ;;  %5676 = vmatprep.subr.bf16.mxu1 %v7298_v36  ;;  %v7406_v36 = vld [vmem:[#allocation11 + $0x28] sm:$0xff]  }
 0x332   :  { %5723 = vmatprep.subr.bf16.mxu0 %v7301_v62 }
 0x334   :  { %5677 = vmatpush1.bf16.msra.mxu1 %v7296_v63  ;;  %v7407_v63 = vld [vmem:[#allocation11 + $0x60] sm:$0xff]  }
 0x335   :  { %5724 = vmatpush2.bf16.msra.mxu0 %v7299_v16  ;;  %5678 = vmatprep.subr.bf16.mxu1 %v7304_v2  ;;  %v7353_v16 = vld [vmem:[#allocation8 + $0x6e8] ss:$16 sps:$4 sm:$0xff]   ;;  %v7358_v2 = vld [vmem:[#allocation8 + $0x6cc] ss:$16 sps:$4 sm:$0xff]  }
 0x336   :  { %5725 = vmatprep.subr.bf16.mxu0 %v7307_v3  ;;  %v7408_v3 = vld [vmem:[#allocation11 + $0x20] sm:$0xff]  }
 0x338   :  { %5679 = vmatpush1.bf16.msra.mxu1 %v7302_v7  ;;  %v7409_v7 = vld [vmem:[#allocation11 + $0x58] sm:$0xff]  }
 0x339   :  { %5726 = vmatpush2.bf16.msra.mxu0 %v7305_v20  ;;  %5680 = vmatprep.subr.bf16.mxu1 %v7310_v4  ;;  %v7356_v20 = vld [vmem:[#allocation8 + $0x6c8] ss:$16 sps:$4 sm:$0xff]   ;;  %v7361_v4 = vld [vmem:[#allocation8 + $0x6ac] ss:$16 sps:$4 sm:$0xff]  }
 0x33a   :  { %5727 = vmatprep.subr.bf16.mxu0 %v7313_v6  ;;  %v7410_v6 = vld [vmem:[#allocation11 + $0x18] sm:$0xff]  }
 0x33c   :  { %5681 = vmatpush1.bf16.msra.mxu1 %v7308_v38  ;;  %v7411_v38 = vld [vmem:[#allocation11 + $0x50] sm:$0xff]  }
 0x33d   :  { %5728 = vmatpush2.bf16.msra.mxu0 %v7311_v8  ;;  %5682 = vmatprep.subr.bf16.mxu1 %v7316_v9  ;;  %v7359_v8 = vld [vmem:[#allocation8 + $0x6a8] ss:$16 sps:$4 sm:$0xff]   ;;  %v7364_v9 = vld [vmem:[#allocation8 + $0x68c] ss:$16 sps:$4 sm:$0xff]  }
 0x33e   :  { %5729 = vmatprep.subr.bf16.mxu0 %v7319_v11  ;;  %v7412_v11 = vld [vmem:[#allocation11 + $0x10] sm:$0xff]  }
 0x340   :  { %5683 = vmatpush2.bf16.msra.mxu1 %v7314_v12  ;;  %v7413_v12 = vld [vmem:[#allocation11 + $0x48] sm:$0xff]  }
 0x341   :  { %5730 = vmatpush2.bf16.msra.mxu0 %v7317_v13  ;;  %5684 = vmatprep.subr.bf16.mxu1 %v7322_v14  ;;  %v7367_v13 = vld [vmem:[#allocation8 + $0x66c] ss:$16 sps:$4 sm:$0xff]   ;;  %v7415_v14 = vld [vmem:[#allocation11 + $0x40] sm:$0xff]  }
 0x342   :  { %5731 = vmatprep.subr.bf16.mxu0 %v7325_v61  ;;  %v7365_v61 = vld [vmem:[#allocation8 + $0x668] ss:$16 sps:$4 sm:$0xff]  }
 0x344   :  { %5685 = vmatpush2.bf16.msra.mxu1 %v7320_v15  ;;  %v7370_v15 = vld [vmem:[#allocation8 + $0x64c] ss:$16 sps:$4 sm:$0xff]  }
 0x345   :  { %5732 = vmatpush2.bf16.msra.mxu0 %v7323_v33  ;;  %5686 = vmatprep.subr.bf16.mxu1 %v7328_v17  ;;  %v7416_v33 = vld [vmem:[#allocation11] sm:$0xff]  }
 0x346   :  { %5733 = vmatprep.subr.bf16.mxu0 %v7331_v56  ;;  %v7368_v17 = vld [vmem:[#allocation8 + $0x648] ss:$16 sps:$4 sm:$0xff]   ;;  %v7373_v56 = vld [vmem:[#allocation8 + $0x62c] ss:$16 sps:$4 sm:$0xff]  }
 0x348   :  { %5687 = vmatpush2.bf16.msra.mxu1 %v7326_v18  ;;  %v7371_v18 = vld [vmem:[#allocation8 + $0x628] ss:$16 sps:$4 sm:$0xff]  }
 0x349   :  { %5734 = vmatpush2.bf16.msra.mxu0 %v7329_v28  ;;  %5688 = vmatprep.subr.bf16.mxu1 %v7334_v57  ;;  %v7376_v28 = vld [vmem:[#allocation8 + $0x60c] ss:$16 sps:$4 sm:$0xff]   ;;  %v7374_v57 = vld [vmem:[#allocation8 + $0x608] ss:$16 sps:$4 sm:$0xff]  }
 0x34a   :  { %5735 = vmatprep.subr.bf16.mxu0 %v7337_v19  ;;  %v7379_v19 = vld [vmem:[#allocation8 + $0x7ec] ss:$16 sps:$4 sm:$0xff]  }
 0x34c   :  { %5689 = vmatpush2.bf16.msra.mxu1 %v7332_v24  ;;  %v7377_v24 = vld [vmem:[#allocation8 + $0x7e8] ss:$16 sps:$4 sm:$0xff]  }
 0x34d   :  { %5736 = vmatpush2.bf16.msra.mxu0 %v7335_v32  ;;  %5690 = vmatprep.subr.bf16.mxu1 %v7340_v26  ;;  %v7382_v32 = vld [vmem:[#allocation8 + $0x7cc] ss:$16 sps:$4 sm:$0xff]   ;;  %v7380_v26 = vld [vmem:[#allocation8 + $0x7c8] ss:$16 sps:$4 sm:$0xff]  }
 0x34e   :  { %5737 = vmatprep.subr.bf16.mxu0 %v7343_v29  ;;  %v7385_v29 = vld [vmem:[#allocation8 + $0x7ac] ss:$16 sps:$4 sm:$0xff]  }
 0x350   :  { %5691 = vmatpush2.bf16.msra.mxu1 %v7338_v21  ;;  %v7383_v21 = vld [vmem:[#allocation8 + $0x7a8] ss:$16 sps:$4 sm:$0xff]  }
 0x351   :  { %5738 = vmatpush2.bf16.msra.mxu0 %v7341_v30  ;;  %5692 = vmatprep.subr.bf16.mxu1 %v7346_v52  ;;  %v7388_v30 = vld [vmem:[#allocation8 + $0x78c] ss:$16 sps:$4 sm:$0xff]   ;;  %v7386_v52 = vld [vmem:[#allocation8 + $0x788] ss:$16 sps:$4 sm:$0xff]  }
 0x352   :  { %6960 = vmatprep.subr.bf16.mxu0 %v7401_v27  ;;  %v7391_v27 = vld [vmem:[#allocation8 + $0x76c] ss:$16 sps:$4 sm:$0xff]  }
 0x353   :  { %v5495_v40 = vpop.f32.mrf.mxu0 }
 0x354   :  { %v5496_v41 = vadd.f32 %v5495_v40, %v4164_v39  ;;  %v5536_v42 = vpop.f32.mrf.mxu1  ;;  %5693 = vmatpush2.bf16.msra.mxu1 %v7344_v34  ;;  %5740 = vmatmul.mubr.bf16.vlgmr.msra.gmra.mxu0 %v7785_v1  ;;  %v7355_v1 = vld [vmem:[#allocation8 + $0x6ec] ss:$16 sps:$4 sm:$0xff]   ;;  %v7389_v34 = vld [vmem:[#allocation8 + $0x768] ss:$16 sps:$4 sm:$0xff]  }
 0x355   :  { %v5497_v45 = vpop.f32.mrf.mxu0  ;;  %5694 = vmatprep.subr.bf16.mxu1 %v7349_v23  ;;  %6961 = vmatpush3.bf16.msra.mxu0 %v7402_v59  ;;  %v7394_v39 = vld [vmem:[#allocation8 + $0x74c] ss:$16 sps:$4 sm:$0xff]   ;;  %v7392_v23 = vld [vmem:[#allocation8 + $0x748] ss:$16 sps:$4 sm:$0xff]  }
 0x356   :  { %v7823_v49 = vadd.f32 %v5536_v42, %v5496_v41  ;;  %v5498_v50 = vadd.f32 %v5497_v45, %v4168_v31  ;;  %v5538_v51 = vpop.f32.mrf.mxu1  ;;  %6962 = vmatprep.subr.bf16.mxu0 %v7403_v37  ;;  %v7397_v59 = vld [vmem:[#allocation8 + $0x72c] ss:$16 sps:$4 sm:$0xff]   ;;  %v7395_v40 = vld [vmem:[#allocation8 + $0x728] ss:$16 sps:$4 sm:$0xff]  }
 0x357   :  { %v5499_v25 = vpop.f32.mrf.mxu0  ;;  %v7400_v42 = vld [vmem:[#allocation8 + $0x70c] ss:$16 sps:$4 sm:$0xff]  }
 0x358   :  { %v7825_v53 = vadd.f32 %v5538_v51, %v5498_v50  ;;  %v5540_v54 = vpop.f32.mrf.mxu1  ;;  %5695 = vmatpush2.bf16.msra.mxu1 %v7347_v44  ;;  %v7417_v50 = vld [vmem:[#allocation11 + $0xf8] sm:$0xff]   ;;  %v7421_v25 = vld [vmem:[#allocation11 + $0xe8] sm:$0xff]  }
 0x359   :  { %v5500_v0 = vpop.f32.mrf.mxu0  ;;  %5696 = vmatprep.subr.bf16.mxu1 %v7352_v5  ;;  %6963 = vmatpush3.bf16.msra.mxu0 %v7404_v46  ;;  %v7398_v5 = vld [vmem:[#allocation8 + $0x708] ss:$16 sps:$4 sm:$0xff]   ;;  %v7418_v51 = vld [vmem:[#allocation11 + $0xb8] sm:$0xff]   ;;  %v7422_v54 = vld [vmem:[#allocation11 + $0xa8] sm:$0xff]  }
 0x35a   :  { %v5541_v62 = vpop.f32.mrf.mxu1  ;;  %6964 = vmatprep.subr.bf16.mxu0 %v7405_v10  ;;  %v7419_v10 = vld [vmem:[#allocation11 + $0xf0] sm:$0xff]   ;;  %v7425_v0 = vld [vmem:[#allocation11 + $0xd8] sm:$0xff]  }
 0x35c   :  { %5697 = vmatpush2.bf16.msra.mxu1 %v7350_v22  ;;  %v7424_v22 = vld [vmem:[#allocation11 + $0xa0] sm:$0xff]  }
 0x35d   :  { %5748 = vmatprep.subr.bf16.mxu1 %v7355_v1  ;;  %6965 = vmatpush3.bf16.msra.mxu0 %v7406_v36  ;;  %v7426_v1 = vld [vmem:[#allocation11 + $0x98] sm:$0xff]   ;;  %v7428_v36 = vld [vmem:[#allocation11 + $0x90] sm:$0xff]  }
 0x35e   :  { %6966 = vmatprep.subr.bf16.mxu0 %v7407_v63 }
 0x35f   :  { %5699 = vmatmul.mubr.bf16.vlgmr.msra.gmra.mxu1 %v7770_v55  ;;  %v7362_v55 = vld [vmem:[#allocation8 + $0x688] ss:$16 sps:$4 sm:$0xff]  }
 0x360   :  { %5749 = vmatpush1.bf16.msra.mxu1 %v7353_v16  ;;  %5780 = vmatprep.mubr.bf16.mxu1 %v7807_v35  ;;  %v7414_v35 = vld [vmem:[#allocation11 + $0x8] sm:$0xff]  }
 0x361   :  { %5750 = vmatprep.subr.bf16.mxu1 %v7358_v2  ;;  %6967 = vmatpush3.bf16.msra.mxu0 %v7408_v3 }
 0x362   :  { %6968 = vmatprep.subr.bf16.mxu0 %v7409_v7 }
 0x364   :  { %5751 = vmatpush1.bf16.msra.mxu1 %v7356_v20  ;;  %v7429_v20 = vld [vmem:[#allocation11 + $0xc8] sm:$0xff]  }
 0x365   :  { %5752 = vmatprep.subr.bf16.mxu1 %v7361_v4  ;;  %6969 = vmatpush3.bf16.msra.mxu0 %v7410_v6  ;;  %v7430_v6 = vld [vmem:[#allocation11 + $0x88] sm:$0xff]  }
 0x366   :  { %6970 = vmatprep.subr.bf16.mxu0 %v7411_v38 }
 0x368   :  { %5753 = vmatpush1.bf16.msra.mxu1 %v7359_v8 }
 0x369   :  { %5754 = vmatprep.subr.bf16.mxu1 %v7364_v9  ;;  %6971 = vmatpush3.bf16.msra.mxu0 %v7412_v11 }
 0x36a   :  { %6972 = vmatprep.subr.bf16.mxu0 %v7413_v12  ;;  %v7431_v12 = vld [vmem:[#allocation11 + $0xc0] sm:$0xff]  }
 0x36c   :  { %5755 = vmatpush1.bf16.msra.mxu1 %v7362_v55 }
 0x36d   :  { %5756 = vmatprep.subr.bf16.mxu1 %v7367_v13  ;;  %6973 = vmatpush3.bf16.msra.mxu0 %v7414_v35  ;;  %v7432_v13 = vld [vmem:[#allocation11 + $0x80] sm:$0xff]  }
 0x36e   :  { %6974 = vmatprep.subr.bf16.mxu0 %v7415_v14 }
 0x370   :  { %5757 = vmatpush1.bf16.msra.mxu1 %v7365_v61 }
 0x371   :  { %5758 = vmatprep.subr.bf16.mxu1 %v7370_v15  ;;  %6975 = vmatpush3.bf16.msra.mxu0 %v7416_v33 }
 0x374   :  { %5759 = vmatpush1.bf16.msra.mxu1 %v7368_v17  ;;  %v4172_v17 = vrot.slane %v7814_v58, %v641_v43 }
 0x375   :  { %5760 = vmatprep.subr.bf16.mxu1 %v7373_v56 }
 0x378   :  { %5761 = vmatpush1.bf16.msra.mxu1 %v7371_v18  ;;  %v4176_v18 = vrot.slane %v7814_v58, %v645_v48 }
 0x379   :  { %5762 = vmatprep.subr.bf16.mxu1 %v7376_v28 }
 0x37c   :  { %5763 = vmatpush1.bf16.msra.mxu1 %v7374_v57 }
 0x37d   :  { %5764 = vmatprep.subr.bf16.mxu1 %v7379_v19 }
 0x380   :  { %5765 = vmatpush2.bf16.msra.mxu1 %v7377_v24 }
 0x381   :  { %5766 = vmatprep.subr.bf16.mxu1 %v7382_v32 }
 0x384   :  { %5767 = vmatpush2.bf16.msra.mxu1 %v7380_v26 }
 0x385   :  { %5768 = vmatprep.subr.bf16.mxu1 %v7385_v29 }
 0x388   :  { %5769 = vmatpush2.bf16.msra.mxu1 %v7383_v21 }
 0x389   :  { %5770 = vmatprep.subr.bf16.mxu1 %v7388_v30 }
 0x38c   :  { %5771 = vmatpush2.bf16.msra.mxu1 %v7386_v52 }
 0x38d   :  { %5772 = vmatprep.subr.bf16.mxu1 %v7391_v27 }
 0x390   :  { %5773 = vmatpush2.bf16.msra.mxu1 %v7389_v34 }
 0x391   :  { %5774 = vmatprep.subr.bf16.mxu1 %v7394_v39 }
 0x393   :  { %v5577_v31 = vpop.f32.mrf.mxu0 }
 0x394   :  { %v5578_v37 = vadd.f32 %v5577_v31, %v7823_v49  ;;  %5775 = vmatpush2.bf16.msra.mxu1 %v7392_v23  ;;  %v7420_v49 = vld [vmem:[#allocation11 + $0xb0] sm:$0xff]  }
 0x395   :  { %v5579_v41 = vpop.f32.mrf.mxu0  ;;  %5776 = vmatprep.subr.bf16.mxu1 %v7397_v59 }
 0x396   :  { %v5580_v44 = vadd.f32 %v5579_v41, %v7825_v53  ;;  %v7423_v53 = vld [vmem:[#allocation11 + $0xe0] sm:$0xff]  }
 0x397   :  { %v5581_v45 = vpop.f32.mrf.mxu0 }
 0x398   :  { %5777 = vmatpush2.bf16.msra.mxu1 %v7395_v40 }
 0x399   :  { %v5582_v46 = vpop.f32.mrf.mxu0  ;;  %5778 = vmatprep.subr.bf16.mxu1 %v7400_v42 }
 0x39c   :  { %5779 = vmatpush2.bf16.msra.mxu1 %v7398_v5 }
 0x39d   :  { %6982 = vmatprep.subr.bf16.mxu1 %v7417_v50 }
 0x39f   :  { %5781 = vmatmul.mubr.bf16.vlgmr.msra.gmra.mxu1 %v7809_v47  ;;  %v7427_v47 = vld [vmem:[#allocation11 + $0xd0] sm:$0xff]  }
 0x3a0   :  { %6983 = vmatpush3.bf16.msra.mxu1 %v7418_v51 }
 0x3a1   :  { %6984 = vmatprep.subr.bf16.mxu1 %v7419_v10 }
 0x3a4   :  { %6985 = vmatpush3.bf16.msra.mxu1 %v7420_v49 }
 0x3a5   :  { %6986 = vmatprep.subr.bf16.mxu1 %v7421_v25 }
 0x3a8   :  { %6987 = vmatpush3.bf16.msra.mxu1 %v7422_v54 }
 0x3a9   :  { %6988 = vmatprep.subr.bf16.mxu1 %v7423_v53 }
 0x3ac   :  { %6989 = vmatpush3.bf16.msra.mxu1 %v7424_v22 }
 0x3ad   :  { %6990 = vmatprep.subr.bf16.mxu1 %v7425_v0 }
 0x3b0   :  { %6991 = vmatpush3.bf16.msra.mxu1 %v7426_v1 }
 0x3b1   :  { %6992 = vmatprep.subr.bf16.mxu1 %v7427_v47 }
 0x3b4   :  { %6993 = vmatpush3.bf16.msra.mxu1 %v7428_v36 }
 0x3b5   :  { %6994 = vmatprep.subr.bf16.mxu1 %v7429_v20 }
 0x3b8   :  { %6995 = vmatpush3.bf16.msra.mxu1 %v7430_v6 }
 0x3b9   :  { %6996 = vmatprep.subr.bf16.mxu1 %v7431_v12 }
 0x3bc   :  { %6997 = vmatpush3.bf16.msra.mxu1 %v7432_v13 }
 0x3d3   :  { %v5659_v62 = vpop.f32.mrf.mxu0 }
 0x3d4   :  { %v5660_v28 = vadd.f32 %v5659_v62, %v4172_v17 }
 0x3d5   :  { %v5661_v63 = vpop.f32.mrf.mxu0 }
 0x3d6   :  { %v5662_v19 = vadd.f32 %v5661_v63, %v4176_v18 }
 0x3d7   :  { %v5663_v16 = vpop.f32.mrf.mxu0 }
 0x3d9   :  { %v5664_v2 = vpop.f32.mrf.mxu0 }
 0x3df   :  { %v5618_v3 = vpop.f32.mrf.mxu1 }
 0x3e0   :  { %v5619_v7 = vadd.f32 %v5618_v3, %v5578_v37 }
 0x3e1   :  { %v5620_v4 = vpop.f32.mrf.mxu1 }
 0x3e2   :  { %v5621_v38 = vadd.f32 %v5620_v4, %v5580_v44  ;;  %v5789_v8 = vmax.f32 %v5619_v7, 0.0 }
 0x3e3   :  { %v5622_v9 = vpop.f32.mrf.mxu1 }
 0x3e4   :  { %v5790_v11 = vmax.f32 %v5621_v38, 0.0  ;;  %v5793_v14 = vpack.c.bf16 %v5789_v8, %v5789_v8 }
 0x3e5   :  { %v5623_v55 = vpop.f32.mrf.mxu1 }
 0x3e6   :  { %v5794_v35 = vpack.c.bf16 %v5790_v11, %v5790_v11 }
 0x3e8   :  { %6085 = vmatprep.mubr.bf16.mxu0 %v5794_v35 }
 0x3e9   :  { %6086 = vmatmul.mubr.bf16.vlgmr.msra.gmra.mxu0 %v5793_v14 }
 0x414   :  { %v5741_v61 = vpop.f32.mrf.mxu0 }
 0x416   :  { %v5743_v15 = vpop.f32.mrf.mxu0 }
 0x418   :  { %v5745_v33 = vpop.f32.mrf.mxu0 }
 0x41a   :  { %v5746_v56 = vpop.f32.mrf.mxu0 }
 0x41f   :  { %v5700_v57 = vpop.f32.mrf.mxu1 }
 0x420   :  { %v5701_v24 = vadd.f32 %v5700_v57, %v5660_v28 }
 0x421   :  { %v5702_v32 = vpop.f32.mrf.mxu1 }
 0x422   :  { %v5703_v26 = vadd.f32 %v5702_v32, %v5662_v19  ;;  %v5742_v29 = vadd.f32 %v5741_v61, %v5701_v24 }
 0x423   :  { %v5704_v21 = vpop.f32.mrf.mxu1 }
 0x424   :  { %v5744_v30 = vadd.f32 %v5743_v15, %v5703_v26 }
 0x425   :  { %v5705_v52 = vpop.f32.mrf.mxu1 }
 0x45f   :  { %v5782_v27 = vpop.f32.mrf.mxu1 }
 0x460   :  { %v5783_v34 = vadd.f32 %v5782_v27, %v5742_v29 }
 0x461   :  { %v5784_v39 = vpop.f32.mrf.mxu1 }
 0x462   :  { %v5785_v23 = vadd.f32 %v5784_v39, %v5744_v30  ;;  %v5791_v43 = vmax.f32 %v5783_v34, 0.0 }
 0x463   :  { %v5786_v59 = vpop.f32.mrf.mxu1 }
 0x464   :  { %v5792_v31 = vmax.f32 %v5785_v23, 0.0  ;;  %v5795_v48 = vpack.c.bf16 %v5791_v43, %v5791_v43 }
 0x465   :  { %v5787_v60 = vpop.f32.mrf.mxu1 }
 0x466   :  { %v5796_v37 = vpack.c.bf16 %v5792_v31, %v5792_v31 }
 0x468   :  { %6125 = vmatprep.mubr.bf16.mxu1 %v5796_v37 }
 0x469   :  { %6126 = vmatmul.mubr.bf16.vlgmr.msra.gmra.mxu1 %v5795_v48 }
 0x4a9   :  { %v6976_v58 = vpop.f32.mrf.mxu0 }
 0x4ab   :  { %v6977_v40 = vpop.f32.mrf.mxu0 }
 0x4ac   :  { %v6978_v41 = vadd.f32 %v6977_v40, %v6976_v58 }
 0x4ad   :  { %v6979_v42 = vpop.f32.mrf.mxu0 }
 0x4af   :  { %v6980_v44 = vpop.f32.mrf.mxu0 }
 0x529   :  { %v6998_v45 = vpop.f32.mrf.mxu1 }
 0x52b   :  { %v6999_v5 = vpop.f32.mrf.mxu1 }
 0x52c   :  { %v7000_v46 = vadd.f32 %v6999_v5, %v6998_v45 }
 0x52d   :  { %v7001_v50 = vpop.f32.mrf.mxu1 }
 0x52e   :  { %v6128_v51 = vadd.f32 %v7000_v46, %v6978_v41 }
 0x52f   :  { %v7002_v10 = vpop.f32.mrf.mxu1 }
 0x530   :  { %v6959_v49 = vmul.f32 -1.442695, %v6128_v51 }
 0x532   :  { %7433 = vpow2.f32 %v6959_v49 }
 0x53f   :  { %v7434_v25 = vpop.eup %7433 }
 0x540   :  { %v6136_v54 = vadd.f32 1.0, %v7434_v25 }
 0x542   :  { %7435 = vrcp.f32 %v6136_v54 }
 0x54f   :  { %v7436_v53 = vpop.eup %7435 }
 0x550   :  { %v6139_v22 = vpack.c.bf16 %v7436_v53, %v7436_v53 }
 0x552   :  { %6140 = vst [vmem:[#allocation13] sm:$0xf] %v6139_v22 }
 0x553   :  { %7569 = shalt.err (!%p7566_p6)
}
 0x554   :  { %6150 = dma.vmem_to_hbm [thread:$0]  %s6148_s5, 64, %s7847_s6, [#allocation4]  }
 0x555   :  { %7586 = dma.done.wait [#allocation4], 64  }
 0x556   :  { %7587 = vsyncadd [#allocation4], 4294967232 }
 0x557   :  { %6154 = vsyncpa [#allocation3], 1 }
 0x558   :  { %6155 = vsyncpa [#allocation6], 1 }
 0x559   :  { %6156 = vsyncpa [#allocation9], 1 }
 0x55a   :  { %6157 = vsyncpa [#allocation12], 1 }
 0x55b   :  { %6158 = vsyncpa [#allocation4], 1 }

// kernel: tpu_custom_call.1
= control target key start
LH: loop header
LB: loop body
LE: loop exit
PB: predicated region body
PF: predicated region fallthrough
CT: control target
= control target key end

     0   :  { %11 = vsyncpa [#allocation3], 0  ;;  %s7841_s0 = inlined_call_operand.hbm [shape: f32[8,1024], index: 0, kind: input, shape index: {}]   ;;  %s7842_s1 = inlined_call_operand.hbm [shape: bf16[1024,1024], index: 1, kind: input, shape index: {}]   ;;  %s7843_s2 = inlined_call_operand.hbm [shape: f32[1,1024], index: 2, kind: input, shape index: {}]   ;;  %s7844_s3 = inlined_call_operand.hbm [shape: bf16[1024,512], index: 3, kind: input, shape index: {}]   ;;  %s7845_s4 = inlined_call_operand.hbm [shape: f32[1,512], index: 4, kind: input, shape index: {}]   ;;  %s7846_s5 = inlined_call_operand.hbm [shape: bf16[512,128], index: 5, kind: input, shape index: {}]   ;;  %s7847_s6 = inlined_call_operand.hbm [shape: bf16[8,128], index: 6, kind: output, shape index: {}]  }
   0x1   :  { %12 = vsyncpa [#allocation6], 0 }
   0x2   :  { %13 = vsyncpa [#allocation9], 0 }
   0x3   :  { %14 = vsyncpa [#allocation12], 0 }
   0x4   :  { %15 = vsyncpa [#allocation4], 0  ;;  %s7588_s21 = smov [#allocation5]  }
   0x5   :  { %s31_s22 = sshll.u32 %s7588_s21, 4  ;;  %s32_s22 = int_to_ptr.vmem [resolvable:$true] %s31_s22 }
   0x6   :  { %s7446_s23 = scalar_lea.vmem %s32_s22, 65536  ;;  %p7451_p1 = scmp.lt.s32.totalorder %s32_s22, %s32_s22 }
   0x7   :  { %p7447_p0 = scmp.ne.s32.totalorder %s32_s22, %s7446_s23  ;;  %p7452_p2 = scmp.lt.s32.totalorder %s7446_s23, %s7446_s23 }
   0x9   :  { %p7453_p3 = por %p7452_p2, %p7451_p1 }
   0xb   :  { %p7454_p4 = pnand %p7453_p3, %p7447_p0 }
   0xd   :  { %7457 = shalt.err (!%p7454_p4)
}
   0xe   :  { %s7589_s24 = smov 512   ;;  %s7590_s25 = smov 32  }
   0xf   :  { %37 = dma.hbm_to_vmem [thread:$0]  %s7842_s1, 65536, %s32_s22, [#allocation6], %s7589_s24, %s7589_s24, %s7590_s25  }
  0x10   :  { %s7591_s28 = smov [#allocation8]  }
  0x11   :  { %s53_s29 = sshll.u32 %s7591_s28, 4  ;;  %s54_s29 = int_to_ptr.vmem [resolvable:$true] %s53_s29 }
  0x12   :  { %s7466_s30 = scalar_lea.vmem %s54_s29, 32768  ;;  %p7471_p6 = scmp.lt.s32.totalorder %s54_s29, %s54_s29 }
  0x13   :  { %p7467_p5 = scmp.ne.s32.totalorder %s54_s29, %s7466_s30  ;;  %p7472_p7 = scmp.lt.s32.totalorder %s7466_s30, %s7466_s30 }
  0x15   :  { %p7473_p8 = por %p7472_p7, %p7471_p6 }
  0x17   :  { %p7474_p9 = pnand %p7473_p8, %p7467_p5 }
  0x19   :  { %7477 = shalt.err (!%p7474_p9)
}
  0x1a   :  { %s7592_s7 = smov 256   ;;  %s7593_s8 = smov 16  }
  0x1b   :  { %59 = dma.hbm_to_vmem [thread:$0]  %s7844_s3, 32768, %s54_s29, [#allocation9], %s7592_s7, %s7592_s7, %s7593_s8  }
  0x1c   :  { %s7594_s11 = smov [#allocation2]   ;;  %s7595_s13 = smov [#allocation7]  }
  0x1d   :  { %s22_s12 = sshll.u32 %s7594_s11, 4  ;;  %s44_s1 = sshll.u32 %s7595_s13, 4  ;;  %s23_s12 = int_to_ptr.vmem [resolvable:$true] %s22_s12  ;;  %s45_s1 = int_to_ptr.vmem [resolvable:$true] %s44_s1 }
  0x1e   :  { %s7486_s14 = scalar_lea.vmem %s23_s12, 1024  ;;  %p7491_p11 = scmp.lt.s32.totalorder %s23_s12, %s23_s12 }
  0x1f   :  { %p7487_p10 = scmp.ne.s32.totalorder %s23_s12, %s7486_s14  ;;  %p7492_p12 = scmp.lt.s32.totalorder %s7486_s14, %s7486_s14 }
  0x21   :  { %p7493_p13 = por %p7492_p12, %p7491_p11 }
  0x23   :  { %p7494_p0 = pnand %p7493_p13, %p7487_p10 }
  0x25   :  { %7497 = shalt.err (!%p7494_p0)
}
  0x26   :  { %25 = dma.hbm_to_vmem [thread:$0]  %s7841_s0, 1024, %s23_s12, [#allocation3]  }
  0x27   :  { %s7506_s17 = scalar_lea.vmem %s45_s1, 128  ;;  %p7511_p2 = scmp.lt.s32.totalorder %s45_s1, %s45_s1 }
  0x28   :  { %p7507_p1 = scmp.ne.s32.totalorder %s45_s1, %s7506_s17  ;;  %p7512_p3 = scmp.lt.s32.totalorder %s7506_s17, %s7506_s17 }
  0x2a   :  { %p7513_p4 = por %p7512_p3, %p7511_p2 }
  0x2c   :  { %p7514_p5 = pnand %p7513_p4, %p7507_p1 }
  0x2e   :  { %7517 = shalt.err (!%p7514_p5)
}
  0x2f   :  { %47 = dma.hbm_to_vmem [thread:$0]  %s7843_s2, 128, %s45_s1, [#allocation6]  }
  0x30   :  { %s7596_s19 = smov [#allocation10]   ;;  %s7597_s21 = smov [#allocation11]  }
  0x31   :  { %s66_s20 = sshll.u32 %s7596_s19, 4  ;;  %s75_s22 = sshll.u32 %s7597_s21, 4  ;;  %s67_s20 = int_to_ptr.vmem [resolvable:$true] %s66_s20  ;;  %s76_s22 = int_to_ptr.vmem [resolvable:$true] %s75_s22 }
  0x32   :  { %s7526_s23 = scalar_lea.vmem %s67_s20, 64  ;;  %p7531_p7 = scmp.lt.s32.totalorder %s67_s20, %s67_s20 }
  0x33   :  { %p7527_p6 = scmp.ne.s32.totalorder %s67_s20, %s7526_s23  ;;  %p7532_p8 = scmp.lt.s32.totalorder %s7526_s23, %s7526_s23 }
  0x35   :  { %p7533_p9 = por %p7532_p8, %p7531_p7 }
  0x37   :  { %p7534_p10 = pnand %p7533_p9, %p7527_p6 }
  0x39   :  { %7537 = shalt.err (!%p7534_p10)
}
  0x3a   :  { %69 = dma.hbm_to_vmem [thread:$0]  %s7845_s4, 64, %s67_s20, [#allocation9]  }
  0x3b   :  { %s7546_s25 = scalar_lea.vmem %s76_s22, 4096  ;;  %p7551_p12 = scmp.lt.s32.totalorder %s76_s22, %s76_s22 }
  0x3c   :  { %p7547_p11 = scmp.ne.s32.totalorder %s76_s22, %s7546_s25  ;;  %p7552_p13 = scmp.lt.s32.totalorder %s7546_s25, %s7546_s25 }
  0x3e   :  { %p7553_p0 = por %p7552_p13, %p7551_p12 }
  0x40   :  { %p7554_p1 = pnand %p7553_p0, %p7547_p11 }
  0x42   :  { %7557 = shalt.err (!%p7554_p1)
}
  0x43   :  { %s7598_s2 = smov 64   ;;  %s7599_s26 = smov 4  }
  0x44   :  { %81 = dma.hbm_to_vmem [thread:$0]  %s7846_s5, 4096, %s76_s22, [#allocation12], %s7598_s2, %s7598_s2, %s7599_s26  }
  0x45   :  { %7578 = dma.done.wait [#allocation3], 1024  }
  0x46   :  { %7579 = vsyncadd [#allocation3], 4294966272 }
  0x47   :  { %7580 = dma.done.wait [#allocation6], 65664  }
  0x48   :  { %7581 = vsyncadd [#allocation6], 4294901632 }
  0x49   :  { %7582 = dma.done.wait [#allocation9], 32832  }
  0x4a   :  { %7583 = vsyncadd [#allocation9], 4294934464 }
  0x4b   :  { %7584 = dma.done.wait [#allocation12], 4096  }
  0x4c   :  { %7585 = vsyncadd [#allocation12], 4294963200  ;;  %v173_v0 = vld [vmem:[#allocation5 + $0x1c0] sm:$0xff]  ;;  %v102_v53 = vld [vmem:[#allocation2 + $0x8] sm:$0xff]  ;;  %s7600_s4 = smov [#allocation13]  }
  0x4d   :  { %v177_v1 = vld [vmem:[#allocation5 + $0x1e0] sm:$0xff]  ;;  %v104_v54 = vld [vmem:[#allocation2 + $0x18] sm:$0xff]  ;;  %v7654_v58 = vpack.c.bf16 %v102_v53, %v102_v53  ;;  %s6147_s5 = sshll.u32 %s7600_s4, 4  ;;  %s6148_s5 = int_to_ptr.vmem [resolvable:$true] %s6147_s5 }
  0x4e   :  { %v301_v2 = vld [vmem:[#allocation5 + $0x5c0] sm:$0xff]  ;;  %v6216_v3 = vcombine.high %v173_v0, %v177_v1  ;;  %v6215_v5 = vcombine.low %v173_v0, %v177_v1  ;;  %v7656_v59 = vpack.c.bf16 %v104_v54, %v104_v54  ;;  %s7558_s29 = scalar_lea.vmem %s6148_s5, 64  ;;  %p7563_p3 = scmp.lt.s32.totalorder %s6148_s5, %s6148_s5 }
  0x4f   :  { %v305_v4 = vld [vmem:[#allocation5 + $0x5e0] sm:$0xff]  ;;  %3263 = vmatprep.mubr.bf16.mxu0 %v7654_v58  ;;  %p7559_p2 = scmp.ne.s32.totalorder %s6148_s5, %s7558_s29  ;;  %p7564_p4 = scmp.lt.s32.totalorder %s7558_s29, %s7558_s29 }
  0x50   :  { %v165_v6 = vld [vmem:[#allocation5 + $0x180] sm:$0xff]  ;;  %v6344_v8 = vcombine.high %v301_v2, %v305_v4  ;;  %v6343_v9 = vcombine.low %v301_v2, %v305_v4  ;;  %3231 = vmatprep.subr.bf16.mxu0 %v6216_v3  ;;  %3304 = vmatprep.mubr.bf16.mxu1 %v7656_v59 }
  0x51   :  { %v169_v7 = vld [vmem:[#allocation5 + $0x1a0] sm:$0xff]  ;;  %3232 = vmatpush1.bf16.msra.mxu0 %v6215_v5  ;;  %p7565_p5 = por %p7564_p4, %p7563_p3 }
  0x52   :  { %v6208_v10 = vcombine.high %v165_v6, %v169_v7  ;;  %v293_v11 = vld [vmem:[#allocation5 + $0x580] sm:$0xff]  ;;  %3272 = vmatprep.subr.bf16.mxu1 %v6344_v8  ;;  %v6207_v18 = vcombine.low %v165_v6, %v169_v7 }
  0x53   :  { %v297_v12 = vld [vmem:[#allocation5 + $0x5a0] sm:$0xff]  ;;  %3273 = vmatpush1.bf16.msra.mxu1 %v6343_v9  ;;  %p7566_p6 = pnand %p7565_p5, %p7559_p2 }
  0x54   :  { %v157_v13 = vld [vmem:[#allocation5 + $0x140] sm:$0xff]  ;;  %v6336_v14 = vcombine.high %v293_v11, %v297_v12  ;;  %3233 = vmatprep.subr.bf16.mxu0 %v6208_v10  ;;  %v6335_v19 = vcombine.low %v293_v11, %v297_v12 }
  0x55   :  { %v161_v15 = vld [vmem:[#allocation5 + $0x160] sm:$0xff]  ;;  %3234 = vmatpush1.bf16.msra.mxu0 %v6207_v18 }
  0x56   :  { %v285_v16 = vld [vmem:[#allocation5 + $0x540] sm:$0xff]  ;;  %v6200_v20 = vcombine.high %v157_v13, %v161_v15  ;;  %3274 = vmatprep.subr.bf16.mxu1 %v6336_v14  ;;  %v6199_v26 = vcombine.low %v157_v13, %v161_v15 }
  0x57   :  { %v289_v17 = vld [vmem:[#allocation5 + $0x560] sm:$0xff]  ;;  %3275 = vmatpush1.bf16.msra.mxu1 %v6335_v19 }
  0x58   :  { %v6328_v21 = vcombine.high %v285_v16, %v289_v17  ;;  %v149_v22 = vld [vmem:[#allocation5 + $0x100] sm:$0xff]  ;;  %3235 = vmatprep.subr.bf16.mxu0 %v6200_v20  ;;  %v6327_v27 = vcombine.low %v285_v16, %v289_v17 }
  0x59   :  { %v153_v23 = vld [vmem:[#allocation5 + $0x120] sm:$0xff]  ;;  %3236 = vmatpush1.bf16.msra.mxu0 %v6199_v26 }
  0x5a   :  { %v277_v24 = vld [vmem:[#allocation5 + $0x500] sm:$0xff]  ;;  %v6192_v28 = vcombine.high %v149_v22, %v153_v23  ;;  %3276 = vmatprep.subr.bf16.mxu1 %v6328_v21  ;;  %v6191_v34 = vcombine.low %v149_v22, %v153_v23 }
  0x5b   :  { %v281_v25 = vld [vmem:[#allocation5 + $0x520] sm:$0xff]  ;;  %3277 = vmatpush1.bf16.msra.mxu1 %v6327_v27 }
  0x5c   :  { %v6320_v29 = vcombine.high %v277_v24, %v281_v25  ;;  %v141_v30 = vld [vmem:[#allocation5 + $0xc0] sm:$0xff]  ;;  %3237 = vmatprep.subr.bf16.mxu0 %v6192_v28  ;;  %v6319_v35 = vcombine.low %v277_v24, %v281_v25 }
  0x5d   :  { %v145_v31 = vld [vmem:[#allocation5 + $0xe0] sm:$0xff]  ;;  %3238 = vmatpush1.bf16.msra.mxu0 %v6191_v34 }
  0x5e   :  { %v269_v32 = vld [vmem:[#allocation5 + $0x4c0] sm:$0xff]  ;;  %v6184_v36 = vcombine.high %v141_v30, %v145_v31  ;;  %3278 = vmatprep.subr.bf16.mxu1 %v6320_v29  ;;  %v6183_v42 = vcombine.low %v141_v30, %v145_v31 }
  0x5f   :  { %v273_v33 = vld [vmem:[#allocation5 + $0x4e0] sm:$0xff]  ;;  %3279 = vmatpush1.bf16.msra.mxu1 %v6319_v35 }
  0x60   :  { %v6312_v37 = vcombine.high %v269_v32, %v273_v33  ;;  %v133_v38 = vld [vmem:[#allocation5 + $0x80] sm:$0xff]  ;;  %3239 = vmatprep.subr.bf16.mxu0 %v6184_v36  ;;  %v6311_v43 = vcombine.low %v269_v32, %v273_v33 }
  0x61   :  { %v137_v39 = vld [vmem:[#allocation5 + $0xa0] sm:$0xff]  ;;  %3240 = vmatpush1.bf16.msra.mxu0 %v6183_v42 }
  0x62   :  { %v261_v40 = vld [vmem:[#allocation5 + $0x480] sm:$0xff]  ;;  %v6176_v44 = vcombine.high %v133_v38, %v137_v39  ;;  %3280 = vmatprep.subr.bf16.mxu1 %v6312_v37  ;;  %v6175_v50 = vcombine.low %v133_v38, %v137_v39 }
  0x63   :  { %v265_v41 = vld [vmem:[#allocation5 + $0x4a0] sm:$0xff]  ;;  %3281 = vmatpush1.bf16.msra.mxu1 %v6311_v43 }
  0x64   :  { %v6304_v45 = vcombine.high %v261_v40, %v265_v41  ;;  %v125_v46 = vld [vmem:[#allocation5 + $0x40] sm:$0xff]  ;;  %3241 = vmatprep.subr.bf16.mxu0 %v6176_v44  ;;  %v6303_v51 = vcombine.low %v261_v40, %v265_v41 }
  0x65   :  { %v129_v47 = vld [vmem:[#allocation5 + $0x60] sm:$0xff]  ;;  %3242 = vmatpush1.bf16.msra.mxu0 %v6175_v50 }
  0x66   :  { %v253_v48 = vld [vmem:[#allocation5 + $0x440] sm:$0xff]  ;;  %v6168_v52 = vcombine.high %v125_v46, %v129_v47  ;;  %3282 = vmatprep.subr.bf16.mxu1 %v6304_v45  ;;  %v6167_v62 = vcombine.low %v125_v46, %v129_v47 }
  0x67   :  { %v257_v49 = vld [vmem:[#allocation5 + $0x460] sm:$0xff]  ;;  %3283 = vmatpush1.bf16.msra.mxu1 %v6303_v51 }
  0x68   :  { %v6296_v55 = vcombine.high %v253_v48, %v257_v49  ;;  %v117_v56 = vld [vmem:[#allocation5] sm:$0xff]  ;;  %3243 = vmatprep.subr.bf16.mxu0 %v6168_v52  ;;  %v6295_v63 = vcombine.low %v253_v48, %v257_v49 }
  0x69   :  { %v121_v57 = vld [vmem:[#allocation5 + $0x20] sm:$0xff]  ;;  %3244 = vmatpush1.bf16.msra.mxu0 %v6167_v62 }
  0x6a   :  { %v245_v60 = vld [vmem:[#allocation5 + $0x400] sm:$0xff]  ;;  %v6160_v0 = vcombine.high %v117_v56, %v121_v57  ;;  %3284 = vmatprep.subr.bf16.mxu1 %v6296_v55  ;;  %v6159_v6 = vcombine.low %v117_v56, %v121_v57 }
  0x6b   :  { %v249_v61 = vld [vmem:[#allocation5 + $0x420] sm:$0xff]  ;;  %3285 = vmatpush1.bf16.msra.mxu1 %v6295_v63 }
  0x6c   :  { %v6288_v1 = vcombine.high %v245_v60, %v249_v61  ;;  %v237_v2 = vld [vmem:[#allocation5 + $0x3c0] sm:$0xff]  ;;  %3245 = vmatprep.subr.bf16.mxu0 %v6160_v0  ;;  %v6287_v7 = vcombine.low %v245_v60, %v249_v61 }
  0x6d   :  { %v241_v3 = vld [vmem:[#allocation5 + $0x3e0] sm:$0xff]  ;;  %3246 = vmatpush1.bf16.msra.mxu0 %v6159_v6 }
  0x6e   :  { %v365_v4 = vld [vmem:[#allocation5 + $0x7c0] sm:$0xff]  ;;  %v6280_v8 = vcombine.high %v237_v2, %v241_v3  ;;  %3286 = vmatprep.subr.bf16.mxu1 %v6288_v1  ;;  %v6279_v14 = vcombine.low %v237_v2, %v241_v3 }
  0x6f   :  { %v369_v5 = vld [vmem:[#allocation5 + $0x7e0] sm:$0xff]  ;;  %3287 = vmatpush1.bf16.msra.mxu1 %v6287_v7 }
  0x70   :  { %v6408_v9 = vcombine.high %v365_v4, %v369_v5  ;;  %v229_v10 = vld [vmem:[#allocation5 + $0x380] sm:$0xff]  ;;  %3247 = vmatprep.subr.bf16.mxu0 %v6280_v8  ;;  %v6407_v15 = vcombine.low %v365_v4, %v369_v5 }
  0x71   :  { %v233_v11 = vld [vmem:[#allocation5 + $0x3a0] sm:$0xff]  ;;  %3248 = vmatpush2.bf16.msra.mxu0 %v6279_v14 }
  0x72   :  { %v357_v12 = vld [vmem:[#allocation5 + $0x780] sm:$0xff]  ;;  %v6272_v16 = vcombine.high %v229_v10, %v233_v11  ;;  %3288 = vmatprep.subr.bf16.mxu1 %v6408_v9  ;;  %v6271_v22 = vcombine.low %v229_v10, %v233_v11  ;;  %v103_v11 = vld [vmem:[#allocation2 + $0x10] sm:$0xff] }
  0x73   :  { %v361_v13 = vld [vmem:[#allocation5 + $0x7a0] sm:$0xff]  ;;  %3289 = vmatpush2.bf16.msra.mxu1 %v6407_v15 }
  0x74   :  { %v6400_v17 = vcombine.high %v357_v12, %v361_v13  ;;  %v221_v18 = vld [vmem:[#allocation5 + $0x340] sm:$0xff]  ;;  %3249 = vmatprep.subr.bf16.mxu0 %v6272_v16  ;;  %v6399_v23 = vcombine.low %v357_v12, %v361_v13 }
  0x75   :  { %v225_v19 = vld [vmem:[#allocation5 + $0x360] sm:$0xff]  ;;  %3250 = vmatpush2.bf16.msra.mxu0 %v6271_v22  ;;  %v108_v22 = vld [vmem:[#allocation2 + $0x38] sm:$0xff] }
  0x76   :  { %v349_v20 = vld [vmem:[#allocation5 + $0x740] sm:$0xff]  ;;  %v6264_v24 = vcombine.high %v221_v18, %v225_v19  ;;  %3290 = vmatprep.subr.bf16.mxu1 %v6400_v17  ;;  %v6263_v30 = vcombine.low %v221_v18, %v225_v19  ;;  %v106_v19 = vld [vmem:[#allocation2 + $0x28] sm:$0xff] }
  0x77   :  { %v353_v21 = vld [vmem:[#allocation5 + $0x760] sm:$0xff]  ;;  %3291 = vmatpush2.bf16.msra.mxu1 %v6399_v23 }
  0x78   :  { %v6392_v25 = vcombine.high %v349_v20, %v353_v21  ;;  %v213_v26 = vld [vmem:[#allocation5 + $0x300] sm:$0xff]  ;;  %3251 = vmatprep.subr.bf16.mxu0 %v6264_v24  ;;  %v6391_v31 = vcombine.low %v349_v20, %v353_v21  ;;  %v7662_v20 = vpack.c.bf16 %v103_v11, %v103_v11 }
  0x79   :  { %v217_v27 = vld [vmem:[#allocation5 + $0x320] sm:$0xff]  ;;  %3252 = vmatpush2.bf16.msra.mxu0 %v6263_v30 }
  0x7a   :  { %v341_v28 = vld [vmem:[#allocation5 + $0x700] sm:$0xff]  ;;  %v6256_v32 = vcombine.high %v213_v26, %v217_v27  ;;  %3292 = vmatprep.subr.bf16.mxu1 %v6392_v25  ;;  %v6255_v38 = vcombine.low %v213_v26, %v217_v27 }
  0x7b   :  { %v345_v29 = vld [vmem:[#allocation5 + $0x720] sm:$0xff]  ;;  %3293 = vmatpush2.bf16.msra.mxu1 %v6391_v31  ;;  %v7667_v31 = vpack.c.bf16 %v108_v22, %v108_v22 }
  0x7c   :  { %v6384_v33 = vcombine.high %v341_v28, %v345_v29  ;;  %v205_v34 = vld [vmem:[#allocation5 + $0x2c0] sm:$0xff]  ;;  %3253 = vmatprep.subr.bf16.mxu0 %v6256_v32  ;;  %v6383_v39 = vcombine.low %v341_v28, %v345_v29  ;;  %v7664_v28 = vpack.c.bf16 %v106_v19, %v106_v19 }
  0x7d   :  { %v209_v35 = vld [vmem:[#allocation5 + $0x2e0] sm:$0xff]  ;;  %3254 = vmatpush2.bf16.msra.mxu0 %v6255_v38 }
  0x7e   :  { %v333_v36 = vld [vmem:[#allocation5 + $0x6c0] sm:$0xff]  ;;  %v6248_v40 = vcombine.high %v205_v34, %v209_v35  ;;  %3294 = vmatprep.subr.bf16.mxu1 %v6384_v33  ;;  %v6247_v46 = vcombine.low %v205_v34, %v209_v35 }
  0x7f   :  { %v337_v37 = vld [vmem:[#allocation5 + $0x6e0] sm:$0xff]  ;;  %3295 = vmatpush2.bf16.msra.mxu1 %v6383_v39 }
  0x80   :  { %v6376_v41 = vcombine.high %v333_v36, %v337_v37  ;;  %v197_v42 = vld [vmem:[#allocation5 + $0x280] sm:$0xff]  ;;  %3255 = vmatprep.subr.bf16.mxu0 %v6248_v40  ;;  %v6375_v47 = vcombine.low %v333_v36, %v337_v37 }
  0x81   :  { %v201_v43 = vld [vmem:[#allocation5 + $0x2a0] sm:$0xff]  ;;  %3256 = vmatpush2.bf16.msra.mxu0 %v6247_v46 }
  0x82   :  { %v325_v44 = vld [vmem:[#allocation5 + $0x680] sm:$0xff]  ;;  %v6240_v48 = vcombine.high %v197_v42, %v201_v43  ;;  %3296 = vmatprep.subr.bf16.mxu1 %v6376_v41  ;;  %v6239_v54 = vcombine.low %v197_v42, %v201_v43 }
  0x83   :  { %v329_v45 = vld [vmem:[#allocation5 + $0x6a0] sm:$0xff]  ;;  %3297 = vmatpush2.bf16.msra.mxu1 %v6375_v47 }
  0x84   :  { %v6368_v49 = vcombine.high %v325_v44, %v329_v45  ;;  %v189_v50 = vld [vmem:[#allocation5 + $0x240] sm:$0xff]  ;;  %3257 = vmatprep.subr.bf16.mxu0 %v6240_v48  ;;  %v6367_v55 = vcombine.low %v325_v44, %v329_v45 }
  0x85   :  { %v193_v51 = vld [vmem:[#allocation5 + $0x260] sm:$0xff]  ;;  %3258 = vmatpush2.bf16.msra.mxu0 %v6239_v54 }
  0x86   :  { %v317_v52 = vld [vmem:[#allocation5 + $0x640] sm:$0xff]  ;;  %v6232_v56 = vcombine.high %v189_v50, %v193_v51  ;;  %3298 = vmatprep.subr.bf16.mxu1 %v6368_v49  ;;  %v6231_v0 = vcombine.low %v189_v50, %v193_v51 }
  0x87   :  { %v321_v53 = vld [vmem:[#allocation5 + $0x660] sm:$0xff]  ;;  %3299 = vmatpush2.bf16.msra.mxu1 %v6367_v55 }
  0x88   :  { %v6360_v57 = vcombine.high %v317_v52, %v321_v53  ;;  %v181_v60 = vld [vmem:[#allocation5 + $0x200] sm:$0xff]  ;;  %3259 = vmatprep.subr.bf16.mxu0 %v6232_v56  ;;  %v6359_v1 = vcombine.low %v317_v52, %v321_v53 }
  0x89   :  { %v185_v61 = vld [vmem:[#allocation5 + $0x220] sm:$0xff]  ;;  %3260 = vmatpush2.bf16.msra.mxu0 %v6231_v0 }
  0x8a   :  { %v309_v62 = vld [vmem:[#allocation5 + $0x600] sm:$0xff]  ;;  %v6224_v2 = vcombine.high %v181_v60, %v185_v61  ;;  %3300 = vmatprep.subr.bf16.mxu1 %v6360_v57  ;;  %v6223_v8 = vcombine.low %v181_v60, %v185_v61 }
  0x8b   :  { %v313_v63 = vld [vmem:[#allocation5 + $0x620] sm:$0xff]  ;;  %3301 = vmatpush2.bf16.msra.mxu1 %v6359_v1 }
  0x8c   :  { %v6352_v3 = vcombine.high %v309_v62, %v313_v63  ;;  %v429_v4 = vld [vmem:[#allocation5 + $0x9c0] sm:$0xff]  ;;  %3261 = vmatprep.subr.bf16.mxu0 %v6224_v2  ;;  %v6351_v10 = vcombine.low %v309_v62, %v313_v63 }
  0x8d   :  { %v433_v5 = vld [vmem:[#allocation5 + $0x9e0] sm:$0xff]  ;;  %3262 = vmatpush2.bf16.msra.mxu0 %v6223_v8 }
  0x8e   :  { %v557_v6 = vld [vmem:[#allocation5 + $0xdc0] sm:$0xff]  ;;  %v6472_v12 = vcombine.high %v429_v4, %v433_v5  ;;  %3302 = vmatprep.subr.bf16.mxu1 %v6352_v3  ;;  %v6471_v21 = vcombine.low %v429_v4, %v433_v5 }
  0x8f   :  { %v561_v7 = vld [vmem:[#allocation5 + $0xde0] sm:$0xff]  ;;  %3303 = vmatpush2.bf16.msra.mxu1 %v6351_v10 }
  0x90   :  { %v101_v9 = vld [vmem:[#allocation2] sm:$0xff]  ;;  %v6600_v13 = vcombine.high %v557_v6, %v561_v7  ;;  %3313 = vmatprep.subr.bf16.mxu0 %v6472_v12  ;;  %v6599_v23 = vcombine.low %v557_v6, %v561_v7 }
  0x91   :  { %v421_v14 = vld [vmem:[#allocation5 + $0x980] sm:$0xff]  ;;  %v7660_v16 = vpack.c.bf16 %v101_v9, %v101_v9 }
  0x92   :  { %v425_v15 = vld [vmem:[#allocation5 + $0x9a0] sm:$0xff]  ;;  %3354 = vmatprep.subr.bf16.mxu1 %v6600_v13  ;;  %3305 = vmatmul.mubr.bf16.vlgmr.msra.gmra.mxu1 %v7662_v20 }
  0x93   :  { %v549_v17 = vld [vmem:[#allocation5 + $0xd80] sm:$0xff]  ;;  %v6464_v24 = vcombine.high %v421_v14, %v425_v15  ;;  %3264 = vmatmul.mubr.bf16.vlgmr.msra.gmra.mxu0 %v7660_v16  ;;  %v6463_v32 = vcombine.low %v421_v14, %v425_v15  ;;  %3355 = vmatpush1.bf16.msra.mxu1 %v6599_v23 }
  0x94   :  { %v553_v18 = vld [vmem:[#allocation5 + $0xda0] sm:$0xff]  ;;  %3314 = vmatpush1.bf16.msra.mxu0 %v6471_v21  ;;  %3345 = vmatprep.mubr.bf16.mxu0 %v7664_v28 }
  0x95   :  { %v6592_v25 = vcombine.high %v549_v17, %v553_v18  ;;  %v413_v26 = vld [vmem:[#allocation5 + $0x940] sm:$0xff]  ;;  %3315 = vmatprep.subr.bf16.mxu0 %v6464_v24  ;;  %v6591_v33 = vcombine.low %v549_v17, %v553_v18  ;;  %3386 = vmatprep.mubr.bf16.mxu1 %v7667_v31 }
  0x96   :  { %v417_v27 = vld [vmem:[#allocation5 + $0x960] sm:$0xff] }
  0x97   :  { %v541_v29 = vld [vmem:[#allocation5 + $0xd40] sm:$0xff]  ;;  %v6456_v34 = vcombine.high %v413_v26, %v417_v27  ;;  %3356 = vmatprep.subr.bf16.mxu1 %v6592_v25  ;;  %v6455_v40 = vcombine.low %v413_v26, %v417_v27 }
  0x98   :  { %v545_v30 = vld [vmem:[#allocation5 + $0xd60] sm:$0xff]  ;;  %3316 = vmatpush1.bf16.msra.mxu0 %v6463_v32  ;;  %3357 = vmatpush1.bf16.msra.mxu1 %v6591_v33 }
  0x99   :  { %v405_v35 = vld [vmem:[#allocation5 + $0x900] sm:$0xff]  ;;  %v6584_v38 = vcombine.high %v541_v29, %v545_v30  ;;  %3317 = vmatprep.subr.bf16.mxu0 %v6456_v34  ;;  %v6583_v41 = vcombine.low %v541_v29, %v545_v30 }
  0x9a   :  { %v409_v36 = vld [vmem:[#allocation5 + $0x920] sm:$0xff] }
  0x9b   :  { %v533_v37 = vld [vmem:[#allocation5 + $0xd00] sm:$0xff]  ;;  %v6448_v42 = vcombine.high %v405_v35, %v409_v36  ;;  %3358 = vmatprep.subr.bf16.mxu1 %v6584_v38  ;;  %v6447_v48 = vcombine.low %v405_v35, %v409_v36 }
  0x9c   :  { %v537_v39 = vld [vmem:[#allocation5 + $0xd20] sm:$0xff]  ;;  %3318 = vmatpush1.bf16.msra.mxu0 %v6455_v40  ;;  %3359 = vmatpush1.bf16.msra.mxu1 %v6583_v41 }
  0x9d   :  { %v397_v43 = vld [vmem:[#allocation5 + $0x8c0] sm:$0xff]  ;;  %v6576_v46 = vcombine.high %v533_v37, %v537_v39  ;;  %3319 = vmatprep.subr.bf16.mxu0 %v6448_v42  ;;  %v6575_v49 = vcombine.low %v533_v37, %v537_v39 }
  0x9e   :  { %v401_v44 = vld [vmem:[#allocation5 + $0x8e0] sm:$0xff] }
  0x9f   :  { %v525_v45 = vld [vmem:[#allocation5 + $0xcc0] sm:$0xff]  ;;  %v6440_v50 = vcombine.high %v397_v43, %v401_v44  ;;  %3360 = vmatprep.subr.bf16.mxu1 %v6576_v46  ;;  %v6439_v56 = vcombine.low %v397_v43, %v401_v44 }
  0xa0   :  { %v529_v47 = vld [vmem:[#allocation5 + $0xce0] sm:$0xff]  ;;  %3320 = vmatpush1.bf16.msra.mxu0 %v6447_v48  ;;  %3361 = vmatpush1.bf16.msra.mxu1 %v6575_v49 }
  0xa1   :  { %v389_v51 = vld [vmem:[#allocation5 + $0x880] sm:$0xff]  ;;  %v6568_v54 = vcombine.high %v525_v45, %v529_v47  ;;  %3321 = vmatprep.subr.bf16.mxu0 %v6440_v50  ;;  %v6567_v57 = vcombine.low %v525_v45, %v529_v47 }
  0xa2   :  { %v393_v52 = vld [vmem:[#allocation5 + $0x8a0] sm:$0xff] }
  0xa3   :  { %v517_v53 = vld [vmem:[#allocation5 + $0xc80] sm:$0xff]  ;;  %v6432_v60 = vcombine.high %v389_v51, %v393_v52  ;;  %3362 = vmatprep.subr.bf16.mxu1 %v6568_v54  ;;  %v6431_v2 = vcombine.low %v389_v51, %v393_v52 }
  0xa4   :  { %v521_v55 = vld [vmem:[#allocation5 + $0xca0] sm:$0xff]  ;;  %3322 = vmatpush1.bf16.msra.mxu0 %v6439_v56  ;;  %3363 = vmatpush1.bf16.msra.mxu1 %v6567_v57 }
  0xa5   :  { %v381_v61 = vld [vmem:[#allocation5 + $0x840] sm:$0xff]  ;;  %v6560_v0 = vcombine.high %v517_v53, %v521_v55  ;;  %3323 = vmatprep.subr.bf16.mxu0 %v6432_v60  ;;  %v6559_v3 = vcombine.low %v517_v53, %v521_v55 }
  0xa6   :  { %v385_v62 = vld [vmem:[#allocation5 + $0x860] sm:$0xff] }
  0xa7   :  { %v509_v63 = vld [vmem:[#allocation5 + $0xc40] sm:$0xff]  ;;  %v6424_v4 = vcombine.high %v381_v61, %v385_v62  ;;  %3364 = vmatprep.subr.bf16.mxu1 %v6560_v0  ;;  %v6423_v10 = vcombine.low %v381_v61, %v385_v62 }
  0xa8   :  { %v513_v1 = vld [vmem:[#allocation5 + $0xc60] sm:$0xff]  ;;  %3324 = vmatpush1.bf16.msra.mxu0 %v6431_v2  ;;  %3365 = vmatpush1.bf16.msra.mxu1 %v6559_v3 }
  0xa9   :  { %v373_v5 = vld [vmem:[#allocation5 + $0x800] sm:$0xff]  ;;  %v6552_v8 = vcombine.high %v509_v63, %v513_v1  ;;  %3325 = vmatprep.subr.bf16.mxu0 %v6424_v4  ;;  %v6551_v11 = vcombine.low %v509_v63, %v513_v1 }
  0xaa   :  { %v377_v6 = vld [vmem:[#allocation5 + $0x820] sm:$0xff] }
  0xab   :  { %v501_v7 = vld [vmem:[#allocation5 + $0xc00] sm:$0xff]  ;;  %v6416_v12 = vcombine.high %v373_v5, %v377_v6  ;;  %3366 = vmatprep.subr.bf16.mxu1 %v6552_v8  ;;  %v6415_v19 = vcombine.low %v373_v5, %v377_v6 }
  0xac   :  { %v505_v9 = vld [vmem:[#allocation5 + $0xc20] sm:$0xff]  ;;  %3326 = vmatpush1.bf16.msra.mxu0 %v6423_v10  ;;  %3367 = vmatpush1.bf16.msra.mxu1 %v6551_v11 }
  0xad   :  { %v493_v13 = vld [vmem:[#allocation5 + $0xbc0] sm:$0xff]  ;;  %v6544_v17 = vcombine.high %v501_v7, %v505_v9  ;;  %3327 = vmatprep.subr.bf16.mxu0 %v6416_v12  ;;  %v6543_v21 = vcombine.low %v501_v7, %v505_v9 }
  0xae   :  { %v497_v14 = vld [vmem:[#allocation5 + $0xbe0] sm:$0xff] }
  0xaf   :  { %v621_v15 = vld [vmem:[#allocation5 + $0xfc0] sm:$0xff]  ;;  %v6536_v22 = vcombine.high %v493_v13, %v497_v14  ;;  %3368 = vmatprep.subr.bf16.mxu1 %v6544_v17  ;;  %v6535_v29 = vcombine.low %v493_v13, %v497_v14 }
  0xb0   :  { %v625_v18 = vld [vmem:[#allocation5 + $0xfe0] sm:$0xff]  ;;  %3328 = vmatpush1.bf16.msra.mxu0 %v6415_v19  ;;  %3369 = vmatpush1.bf16.msra.mxu1 %v6543_v21  ;;  %v174_v21 = vld [vmem:[#allocation5 + $0x1c8] sm:$0xff] }
  0xb1   :  { %v485_v23 = vld [vmem:[#allocation5 + $0xb80] sm:$0xff]  ;;  %v6664_v26 = vcombine.high %v621_v15, %v625_v18  ;;  %3329 = vmatprep.subr.bf16.mxu0 %v6536_v22  ;;  %v6663_v30 = vcombine.low %v621_v15, %v625_v18  ;;  %v178_v22 = vld [vmem:[#allocation5 + $0x1e8] sm:$0xff] }
  0xb2   :  { %v489_v24 = vld [vmem:[#allocation5 + $0xba0] sm:$0xff] }
  0xb3   :  { %v613_v25 = vld [vmem:[#allocation5 + $0xf80] sm:$0xff]  ;;  %v6528_v32 = vcombine.high %v485_v23, %v489_v24  ;;  %3370 = vmatprep.subr.bf16.mxu1 %v6664_v26  ;;  %v6527_v38 = vcombine.low %v485_v23, %v489_v24  ;;  %v302_v23 = vld [vmem:[#allocation5 + $0x5c8] sm:$0xff] }
  0xb4   :  { %v617_v27 = vld [vmem:[#allocation5 + $0xfa0] sm:$0xff]  ;;  %3330 = vmatpush2.bf16.msra.mxu0 %v6535_v29  ;;  %3371 = vmatpush2.bf16.msra.mxu1 %v6663_v30  ;;  %v306_v26 = vld [vmem:[#allocation5 + $0x5e8] sm:$0xff] }
  0xb5   :  { %v477_v33 = vld [vmem:[#allocation5 + $0xb40] sm:$0xff]  ;;  %v6656_v36 = vcombine.high %v613_v25, %v617_v27  ;;  %3331 = vmatprep.subr.bf16.mxu0 %v6528_v32  ;;  %v6655_v39 = vcombine.low %v613_v25, %v617_v27  ;;  %v107_v27 = vld [vmem:[#allocation2 + $0x30] sm:$0xff]  ;;  %v6218_v32 = vcombine.high %v174_v21, %v178_v22 }
  0xb6   :  { %v481_v34 = vld [vmem:[#allocation5 + $0xb60] sm:$0xff] }
  0xb7   :  { %v605_v35 = vld [vmem:[#allocation5 + $0xf40] sm:$0xff]  ;;  %v6520_v40 = vcombine.high %v477_v33, %v481_v34  ;;  %3372 = vmatprep.subr.bf16.mxu1 %v6656_v36  ;;  %v6519_v46 = vcombine.low %v477_v33, %v481_v34  ;;  %v166_v33 = vld [vmem:[#allocation5 + $0x188] sm:$0xff]  ;;  %v6346_v36 = vcombine.high %v302_v23, %v306_v26 }
  0xb8   :  { %v609_v37 = vld [vmem:[#allocation5 + $0xf60] sm:$0xff]  ;;  %3332 = vmatpush2.bf16.msra.mxu0 %v6527_v38  ;;  %3373 = vmatpush2.bf16.msra.mxu1 %v6655_v39  ;;  %v170_v34 = vld [vmem:[#allocation5 + $0x1a8] sm:$0xff]  ;;  %v7674_v39 = vpack.c.bf16 %v107_v27, %v107_v27 }
  0xb9   :  { %v469_v41 = vld [vmem:[#allocation5 + $0xb00] sm:$0xff]  ;;  %v6648_v44 = vcombine.high %v605_v35, %v609_v37  ;;  %3333 = vmatprep.subr.bf16.mxu0 %v6520_v40  ;;  %v6647_v47 = vcombine.low %v605_v35, %v609_v37  ;;  %v294_v35 = vld [vmem:[#allocation5 + $0x588] sm:$0xff]  ;;  %v6217_v40 = vcombine.low %v174_v21, %v178_v22 }
  0xba   :  { %v473_v42 = vld [vmem:[#allocation5 + $0xb20] sm:$0xff]  ;;  %v298_v37 = vld [vmem:[#allocation5 + $0x5a8] sm:$0xff] }
  0xbb   :  { %v597_v43 = vld [vmem:[#allocation5 + $0xf00] sm:$0xff]  ;;  %v6512_v48 = vcombine.high %v469_v41, %v473_v42  ;;  %3374 = vmatprep.subr.bf16.mxu1 %v6648_v44  ;;  %v6511_v54 = vcombine.low %v469_v41, %v473_v42  ;;  %v6345_v41 = vcombine.low %v302_v23, %v306_v26  ;;  %v6210_v42 = vcombine.high %v166_v33, %v170_v34  ;;  %v162_v44 = vld [vmem:[#allocation5 + $0x168] sm:$0xff] }
  0xbc   :  { %v601_v45 = vld [vmem:[#allocation5 + $0xf20] sm:$0xff]  ;;  %3334 = vmatpush2.bf16.msra.mxu0 %v6519_v46  ;;  %3375 = vmatpush2.bf16.msra.mxu1 %v6647_v47  ;;  %v286_v46 = vld [vmem:[#allocation5 + $0x548] sm:$0xff] }
  0xbd   :  { %v461_v49 = vld [vmem:[#allocation5 + $0xac0] sm:$0xff]  ;;  %v6640_v52 = vcombine.high %v597_v43, %v601_v45  ;;  %3335 = vmatprep.subr.bf16.mxu0 %v6512_v48  ;;  %v6639_v55 = vcombine.low %v597_v43, %v601_v45  ;;  %v158_v43 = vld [vmem:[#allocation5 + $0x148] sm:$0xff]  ;;  %v6338_v45 = vcombine.high %v294_v35, %v298_v37  ;;  %v6209_v48 = vcombine.low %v166_v33, %v170_v34 }
  0xbe   :  { %v465_v50 = vld [vmem:[#allocation5 + $0xae0] sm:$0xff]  ;;  %v290_v47 = vld [vmem:[#allocation5 + $0x568] sm:$0xff] }
  0xbf   :  { %v589_v51 = vld [vmem:[#allocation5 + $0xec0] sm:$0xff]  ;;  %v6504_v56 = vcombine.high %v461_v49, %v465_v50  ;;  %3376 = vmatprep.subr.bf16.mxu1 %v6640_v52  ;;  %v6503_v0 = vcombine.low %v461_v49, %v465_v50  ;;  %v6337_v49 = vcombine.low %v294_v35, %v298_v37  ;;  %v6202_v50 = vcombine.high %v158_v43, %v162_v44  ;;  %v154_v52 = vld [vmem:[#allocation5 + $0x128] sm:$0xff] }
  0xc0   :  { %v593_v53 = vld [vmem:[#allocation5 + $0xee0] sm:$0xff]  ;;  %3336 = vmatpush2.bf16.msra.mxu0 %v6511_v54  ;;  %3377 = vmatpush2.bf16.msra.mxu1 %v6639_v55  ;;  %v6330_v54 = vcombine.high %v286_v46, %v290_v47  ;;  %v282_v55 = vld [vmem:[#allocation5 + $0x528] sm:$0xff] }
  0xc1   :  { %v453_v57 = vld [vmem:[#allocation5 + $0xa80] sm:$0xff]  ;;  %v6632_v62 = vcombine.high %v589_v51, %v593_v53  ;;  %3337 = vmatprep.subr.bf16.mxu0 %v6504_v56  ;;  %v6631_v1 = vcombine.low %v589_v51, %v593_v53  ;;  %v150_v51 = vld [vmem:[#allocation5 + $0x108] sm:$0xff]  ;;  %v6201_v56 = vcombine.low %v158_v43, %v162_v44 }
  0xc2   :  { %v457_v60 = vld [vmem:[#allocation5 + $0xaa0] sm:$0xff]  ;;  %v278_v53 = vld [vmem:[#allocation5 + $0x508] sm:$0xff] }
  0xc3   :  { %v581_v61 = vld [vmem:[#allocation5 + $0xe80] sm:$0xff]  ;;  %v6496_v2 = vcombine.high %v453_v57, %v457_v60  ;;  %3378 = vmatprep.subr.bf16.mxu1 %v6632_v62  ;;  %v6495_v8 = vcombine.low %v453_v57, %v457_v60  ;;  %v6329_v57 = vcombine.low %v286_v46, %v290_v47  ;;  %v6194_v60 = vcombine.high %v150_v51, %v154_v52  ;;  %v146_v62 = vld [vmem:[#allocation5 + $0xe8] sm:$0xff] }
  0xc4   :  { %v585_v63 = vld [vmem:[#allocation5 + $0xea0] sm:$0xff]  ;;  %3338 = vmatpush2.bf16.msra.mxu0 %v6503_v0  ;;  %3379 = vmatpush2.bf16.msra.mxu1 %v6631_v1  ;;  %v6322_v0 = vcombine.high %v278_v53, %v282_v55  ;;  %v274_v1 = vld [vmem:[#allocation5 + $0x4e8] sm:$0xff] }
  0xc5   :  { %v445_v3 = vld [vmem:[#allocation5 + $0xa40] sm:$0xff]  ;;  %v6624_v6 = vcombine.high %v581_v61, %v585_v63  ;;  %3339 = vmatprep.subr.bf16.mxu0 %v6496_v2  ;;  %v6623_v9 = vcombine.low %v581_v61, %v585_v63  ;;  %v142_v61 = vld [vmem:[#allocation5 + $0xc8] sm:$0xff]  ;;  %v6193_v2 = vcombine.low %v150_v51, %v154_v52 }
  0xc6   :  { %v449_v4 = vld [vmem:[#allocation5 + $0xa60] sm:$0xff]  ;;  %v270_v63 = vld [vmem:[#allocation5 + $0x4c8] sm:$0xff] }
  0xc7   :  { %v573_v5 = vld [vmem:[#allocation5 + $0xe40] sm:$0xff]  ;;  %v6488_v10 = vcombine.high %v445_v3, %v449_v4  ;;  %3380 = vmatprep.subr.bf16.mxu1 %v6624_v6  ;;  %v6487_v17 = vcombine.low %v445_v3, %v449_v4  ;;  %v6321_v3 = vcombine.low %v278_v53, %v282_v55  ;;  %v6186_v4 = vcombine.high %v142_v61, %v146_v62  ;;  %v138_v6 = vld [vmem:[#allocation5 + $0xa8] sm:$0xff] }
  0xc8   :  { %v577_v7 = vld [vmem:[#allocation5 + $0xe60] sm:$0xff]  ;;  %3340 = vmatpush2.bf16.msra.mxu0 %v6495_v8  ;;  %3381 = vmatpush2.bf16.msra.mxu1 %v6623_v9  ;;  %v6314_v8 = vcombine.high %v270_v63, %v274_v1  ;;  %v266_v9 = vld [vmem:[#allocation5 + $0x4a8] sm:$0xff] }
  0xc9   :  { %v437_v11 = vld [vmem:[#allocation5 + $0xa00] sm:$0xff]  ;;  %v6616_v14 = vcombine.high %v573_v5, %v577_v7  ;;  %3341 = vmatprep.subr.bf16.mxu0 %v6488_v10  ;;  %v6615_v18 = vcombine.low %v573_v5, %v577_v7  ;;  %v134_v5 = vld [vmem:[#allocation5 + $0x88] sm:$0xff]  ;;  %v6185_v10 = vcombine.low %v142_v61, %v146_v62 }
  0xca   :  { %v441_v12 = vld [vmem:[#allocation5 + $0xa20] sm:$0xff]  ;;  %v262_v7 = vld [vmem:[#allocation5 + $0x488] sm:$0xff] }
  0xcb   :  { %v565_v13 = vld [vmem:[#allocation5 + $0xe00] sm:$0xff]  ;;  %v6480_v19 = vcombine.high %v437_v11, %v441_v12  ;;  %3382 = vmatprep.subr.bf16.mxu1 %v6616_v14  ;;  %v6479_v29 = vcombine.low %v437_v11, %v441_v12  ;;  %v6313_v11 = vcombine.low %v270_v63, %v274_v1  ;;  %v6178_v12 = vcombine.high %v134_v5, %v138_v6  ;;  %v130_v14 = vld [vmem:[#allocation5 + $0x68] sm:$0xff] }
  0xcc   :  { %v569_v15 = vld [vmem:[#allocation5 + $0xe20] sm:$0xff]  ;;  %3342 = vmatpush2.bf16.msra.mxu0 %v6487_v17  ;;  %3383 = vmatpush2.bf16.msra.mxu1 %v6615_v18  ;;  %v6306_v17 = vcombine.high %v262_v7, %v266_v9  ;;  %v258_v18 = vld [vmem:[#allocation5 + $0x468] sm:$0xff]  ;;  %v6305_v21 = vcombine.low %v262_v7, %v266_v9 }
  0xcd   :  { %v6608_v24 = vcombine.high %v565_v13, %v569_v15  ;;  %v105_v25 = vld [vmem:[#allocation2 + $0x20] sm:$0xff]  ;;  %3343 = vmatprep.subr.bf16.mxu0 %v6480_v19  ;;  %v6607_v30 = vcombine.low %v565_v13, %v569_v15  ;;  %v126_v13 = vld [vmem:[#allocation5 + $0x48] sm:$0xff]  ;;  %v6177_v19 = vcombine.low %v134_v5, %v138_v6 }
  0xce   :  { %v7672_v38 = vpack.c.bf16 %v105_v25, %v105_v25  ;;  %v254_v15 = vld [vmem:[#allocation5 + $0x448] sm:$0xff]  ;;  %v6170_v22 = vcombine.high %v126_v13, %v130_v14 }
  0xcf   :  { %3384 = vmatprep.subr.bf16.mxu1 %v6608_v24  ;;  %v118_v23 = vld [vmem:[#allocation5 + $0x8] sm:$0xff]  ;;  %v6298_v26 = vcombine.high %v254_v15, %v258_v18 }
  0xd0   :  { %3344 = vmatpush2.bf16.msra.mxu0 %v6479_v29  ;;  %3385 = vmatpush2.bf16.msra.mxu1 %v6607_v30  ;;  %v122_v24 = vld [vmem:[#allocation5 + $0x28] sm:$0xff]  ;;  %v6169_v29 = vcombine.low %v126_v13, %v130_v14  ;;  %v6297_v30 = vcombine.low %v254_v15, %v258_v18 }
  0xd1   :  { %3395 = vmatprep.subr.bf16.mxu0 %v6218_v32  ;;  %3436 = vmatprep.subr.bf16.mxu1 %v6346_v36  ;;  %v246_v25 = vld [vmem:[#allocation5 + $0x408] sm:$0xff]  ;;  %v6162_v32 = vcombine.high %v118_v23, %v122_v24 }
  0xd2   :  { %v250_v27 = vld [vmem:[#allocation5 + $0x428] sm:$0xff] }
  0xd3   :  { %3346 = vmatmul.mubr.bf16.vlgmr.msra.gmra.mxu0 %v7672_v38  ;;  %3387 = vmatmul.mubr.bf16.vlgmr.msra.gmra.mxu1 %v7674_v39  ;;  %v238_v33 = vld [vmem:[#allocation5 + $0x3c8] sm:$0xff]  ;;  %v6290_v36 = vcombine.high %v246_v25, %v250_v27 }
  0xd4   :  { %3396 = vmatpush1.bf16.msra.mxu0 %v6217_v40  ;;  %3437 = vmatpush1.bf16.msra.mxu1 %v6345_v41  ;;  %v242_v34 = vld [vmem:[#allocation5 + $0x3e8] sm:$0xff]  ;;  %v6161_v40 = vcombine.low %v118_v23, %v122_v24  ;;  %v6289_v41 = vcombine.low %v246_v25, %v250_v27 }
  0xd5   :  { %3397 = vmatprep.subr.bf16.mxu0 %v6210_v42  ;;  %3438 = vmatprep.subr.bf16.mxu1 %v6338_v45  ;;  %v366_v35 = vld [vmem:[#allocation5 + $0x7c8] sm:$0xff]  ;;  %v6282_v42 = vcombine.high %v238_v33, %v242_v34 }
  0xd6   :  { %3427 = vmatprep.mubr.bf16.mxu0 %v7654_v58  ;;  %3468 = vmatprep.mubr.bf16.mxu1 %v7656_v59  ;;  %v370_v37 = vld [vmem:[#allocation5 + $0x7e8] sm:$0xff] }
  0xd7   :  { %v230_v43 = vld [vmem:[#allocation5 + $0x388] sm:$0xff]  ;;  %v6410_v46 = vcombine.high %v366_v35, %v370_v37 }
  0xd8   :  { %3398 = vmatpush1.bf16.msra.mxu0 %v6209_v48  ;;  %3439 = vmatpush1.bf16.msra.mxu1 %v6337_v49  ;;  %v234_v44 = vld [vmem:[#allocation5 + $0x3a8] sm:$0xff]  ;;  %v6281_v48 = vcombine.low %v238_v33, %v242_v34  ;;  %v6409_v49 = vcombine.low %v366_v35, %v370_v37 }
  0xd9   :  { %3399 = vmatprep.subr.bf16.mxu0 %v6202_v50  ;;  %3440 = vmatprep.subr.bf16.mxu1 %v6330_v54  ;;  %v358_v45 = vld [vmem:[#allocation5 + $0x788] sm:$0xff]  ;;  %v6274_v50 = vcombine.high %v230_v43, %v234_v44 }
  0xda   :  { %v362_v47 = vld [vmem:[#allocation5 + $0x7a8] sm:$0xff] }
  0xdb   :  { %v222_v51 = vld [vmem:[#allocation5 + $0x348] sm:$0xff]  ;;  %v6402_v54 = vcombine.high %v358_v45, %v362_v47 }
  0xdc   :  { %3400 = vmatpush1.bf16.msra.mxu0 %v6201_v56  ;;  %3441 = vmatpush1.bf16.msra.mxu1 %v6329_v57  ;;  %v226_v52 = vld [vmem:[#allocation5 + $0x368] sm:$0xff]  ;;  %v6273_v56 = vcombine.low %v230_v43, %v234_v44  ;;  %v6401_v57 = vcombine.low %v358_v45, %v362_v47 }
  0xdd   :  { %3401 = vmatprep.subr.bf16.mxu0 %v6194_v60  ;;  %3442 = vmatprep.subr.bf16.mxu1 %v6322_v0  ;;  %v350_v53 = vld [vmem:[#allocation5 + $0x748] sm:$0xff]  ;;  %v6266_v60 = vcombine.high %v222_v51, %v226_v52 }
  0xde   :  { %v354_v55 = vld [vmem:[#allocation5 + $0x768] sm:$0xff] }
  0xdf   :  { %v214_v61 = vld [vmem:[#allocation5 + $0x308] sm:$0xff]  ;;  %v6394_v0 = vcombine.high %v350_v53, %v354_v55 }
  0xe0   :  { %3402 = vmatpush1.bf16.msra.mxu0 %v6193_v2  ;;  %3443 = vmatpush1.bf16.msra.mxu1 %v6321_v3  ;;  %v218_v62 = vld [vmem:[#allocation5 + $0x328] sm:$0xff]  ;;  %v6265_v2 = vcombine.low %v222_v51, %v226_v52  ;;  %v6393_v3 = vcombine.low %v350_v53, %v354_v55 }
  0xe1   :  { %3403 = vmatprep.subr.bf16.mxu0 %v6186_v4  ;;  %3444 = vmatprep.subr.bf16.mxu1 %v6314_v8  ;;  %v342_v63 = vld [vmem:[#allocation5 + $0x708] sm:$0xff]  ;;  %v6258_v4 = vcombine.high %v214_v61, %v218_v62 }
  0xe2   :  { %v346_v1 = vld [vmem:[#allocation5 + $0x728] sm:$0xff] }
  0xe3   :  { %v206_v5 = vld [vmem:[#allocation5 + $0x2c8] sm:$0xff]  ;;  %v6386_v8 = vcombine.high %v342_v63, %v346_v1 }
  0xe4   :  { %3404 = vmatpush1.bf16.msra.mxu0 %v6185_v10  ;;  %3445 = vmatpush1.bf16.msra.mxu1 %v6313_v11  ;;  %v210_v6 = vld [vmem:[#allocation5 + $0x2e8] sm:$0xff]  ;;  %v6257_v10 = vcombine.low %v214_v61, %v218_v62  ;;  %v6385_v11 = vcombine.low %v342_v63, %v346_v1 }
  0xe5   :  { %3405 = vmatprep.subr.bf16.mxu0 %v6178_v12  ;;  %3446 = vmatprep.subr.bf16.mxu1 %v6306_v17  ;;  %v334_v7 = vld [vmem:[#allocation5 + $0x6c8] sm:$0xff]  ;;  %v6250_v12 = vcombine.high %v206_v5, %v210_v6 }
  0xe6   :  { %v338_v9 = vld [vmem:[#allocation5 + $0x6e8] sm:$0xff] }
  0xe7   :  { %v198_v13 = vld [vmem:[#allocation5 + $0x288] sm:$0xff]  ;;  %v6378_v17 = vcombine.high %v334_v7, %v338_v9 }
  0xe8   :  { %3406 = vmatpush1.bf16.msra.mxu0 %v6177_v19  ;;  %3447 = vmatpush1.bf16.msra.mxu1 %v6305_v21  ;;  %v202_v14 = vld [vmem:[#allocation5 + $0x2a8] sm:$0xff]  ;;  %v6249_v19 = vcombine.low %v206_v5, %v210_v6  ;;  %v6377_v21 = vcombine.low %v334_v7, %v338_v9 }
  0xe9   :  { %3407 = vmatprep.subr.bf16.mxu0 %v6170_v22  ;;  %3448 = vmatprep.subr.bf16.mxu1 %v6298_v26  ;;  %v326_v15 = vld [vmem:[#allocation5 + $0x688] sm:$0xff]  ;;  %v6242_v22 = vcombine.high %v198_v13, %v202_v14 }
  0xea   :  { %v330_v18 = vld [vmem:[#allocation5 + $0x6a8] sm:$0xff] }
  0xeb   :  { %v190_v23 = vld [vmem:[#allocation5 + $0x248] sm:$0xff]  ;;  %v6370_v26 = vcombine.high %v326_v15, %v330_v18 }
  0xec   :  { %3408 = vmatpush1.bf16.msra.mxu0 %v6169_v29  ;;  %3449 = vmatpush1.bf16.msra.mxu1 %v6297_v30  ;;  %v194_v24 = vld [vmem:[#allocation5 + $0x268] sm:$0xff]  ;;  %v6241_v29 = vcombine.low %v198_v13, %v202_v14  ;;  %v6369_v30 = vcombine.low %v326_v15, %v330_v18 }
  0xed   :  { %3409 = vmatprep.subr.bf16.mxu0 %v6162_v32  ;;  %3450 = vmatprep.subr.bf16.mxu1 %v6290_v36  ;;  %v318_v25 = vld [vmem:[#allocation5 + $0x648] sm:$0xff]  ;;  %v6234_v32 = vcombine.high %v190_v23, %v194_v24 }
  0xee   :  { %v322_v27 = vld [vmem:[#allocation5 + $0x668] sm:$0xff] }
  0xef   :  { %v182_v33 = vld [vmem:[#allocation5 + $0x208] sm:$0xff]  ;;  %v6362_v36 = vcombine.high %v318_v25, %v322_v27 }
  0xf0   :  { %3410 = vmatpush1.bf16.msra.mxu0 %v6161_v40  ;;  %3451 = vmatpush1.bf16.msra.mxu1 %v6289_v41  ;;  %v186_v34 = vld [vmem:[#allocation5 + $0x228] sm:$0xff]  ;;  %v6233_v40 = vcombine.low %v190_v23, %v194_v24  ;;  %v6361_v41 = vcombine.low %v318_v25, %v322_v27 }
  0xf1   :  { %3411 = vmatprep.subr.bf16.mxu0 %v6282_v42  ;;  %3452 = vmatprep.subr.bf16.mxu1 %v6410_v46  ;;  %v310_v35 = vld [vmem:[#allocation5 + $0x608] sm:$0xff]  ;;  %v6226_v42 = vcombine.high %v182_v33, %v186_v34 }
  0xf2   :  { %v314_v37 = vld [vmem:[#allocation5 + $0x628] sm:$0xff] }
  0xf3   :  { %v430_v43 = vld [vmem:[#allocation5 + $0x9c8] sm:$0xff]  ;;  %v6354_v46 = vcombine.high %v310_v35, %v314_v37 }
  0xf4   :  { %3412 = vmatpush2.bf16.msra.mxu0 %v6281_v48  ;;  %3453 = vmatpush2.bf16.msra.mxu1 %v6409_v49  ;;  %v434_v44 = vld [vmem:[#allocation5 + $0x9e8] sm:$0xff]  ;;  %v6225_v48 = vcombine.low %v182_v33, %v186_v34  ;;  %v6353_v49 = vcombine.low %v310_v35, %v314_v37 }
  0xf5   :  { %3413 = vmatprep.subr.bf16.mxu0 %v6274_v50  ;;  %3454 = vmatprep.subr.bf16.mxu1 %v6402_v54  ;;  %v558_v45 = vld [vmem:[#allocation5 + $0xdc8] sm:$0xff]  ;;  %v6474_v50 = vcombine.high %v430_v43, %v434_v44 }
  0xf6   :  { %v562_v47 = vld [vmem:[#allocation5 + $0xde8] sm:$0xff] }
  0xf7   :  { %v422_v51 = vld [vmem:[#allocation5 + $0x988] sm:$0xff]  ;;  %v6602_v54 = vcombine.high %v558_v45, %v562_v47 }
  0xf8   :  { %3414 = vmatpush2.bf16.msra.mxu0 %v6273_v56  ;;  %3455 = vmatpush2.bf16.msra.mxu1 %v6401_v57  ;;  %v426_v52 = vld [vmem:[#allocation5 + $0x9a8] sm:$0xff]  ;;  %v6473_v56 = vcombine.low %v430_v43, %v434_v44  ;;  %v6601_v57 = vcombine.low %v558_v45, %v562_v47 }
  0xf9   :  { %3415 = vmatprep.subr.bf16.mxu0 %v6266_v60  ;;  %3456 = vmatprep.subr.bf16.mxu1 %v6394_v0  ;;  %v550_v53 = vld [vmem:[#allocation5 + $0xd88] sm:$0xff]  ;;  %v6466_v60 = vcombine.high %v422_v51, %v426_v52 }
  0xfa   :  { %v554_v55 = vld [vmem:[#allocation5 + $0xda8] sm:$0xff] }
  0xfb   :  { %v414_v61 = vld [vmem:[#allocation5 + $0x948] sm:$0xff]  ;;  %v6594_v0 = vcombine.high %v550_v53, %v554_v55 }
  0xfc   :  { %3416 = vmatpush2.bf16.msra.mxu0 %v6265_v2  ;;  %3457 = vmatpush2.bf16.msra.mxu1 %v6393_v3  ;;  %v418_v62 = vld [vmem:[#allocation5 + $0x968] sm:$0xff]  ;;  %v6465_v2 = vcombine.low %v422_v51, %v426_v52  ;;  %v6593_v3 = vcombine.low %v550_v53, %v554_v55 }
  0xfd   :  { %3417 = vmatprep.subr.bf16.mxu0 %v6258_v4  ;;  %3458 = vmatprep.subr.bf16.mxu1 %v6386_v8  ;;  %v542_v63 = vld [vmem:[#allocation5 + $0xd48] sm:$0xff]  ;;  %v6458_v4 = vcombine.high %v414_v61, %v418_v62 }
  0xfe   :  { %v546_v1 = vld [vmem:[#allocation5 + $0xd68] sm:$0xff] }
  0xff   :  { %v406_v5 = vld [vmem:[#allocation5 + $0x908] sm:$0xff]  ;;  %v6586_v8 = vcombine.high %v542_v63, %v546_v1 }
 0x100   :  { %3418 = vmatpush2.bf16.msra.mxu0 %v6257_v10  ;;  %3459 = vmatpush2.bf16.msra.mxu1 %v6385_v11  ;;  %v410_v6 = vld [vmem:[#allocation5 + $0x928] sm:$0xff]  ;;  %v6457_v10 = vcombine.low %v414_v61, %v418_v62  ;;  %v6585_v11 = vcombine.low %v542_v63, %v546_v1 }
 0x101   :  { %3419 = vmatprep.subr.bf16.mxu0 %v6250_v12  ;;  %3460 = vmatprep.subr.bf16.mxu1 %v6378_v17  ;;  %v534_v7 = vld [vmem:[#allocation5 + $0xd08] sm:$0xff]  ;;  %v6450_v12 = vcombine.high %v406_v5, %v410_v6 }
 0x102   :  { %v538_v9 = vld [vmem:[#allocation5 + $0xd28] sm:$0xff] }
 0x103   :  { %v398_v13 = vld [vmem:[#allocation5 + $0x8c8] sm:$0xff]  ;;  %v6578_v17 = vcombine.high %v534_v7, %v538_v9 }
 0x104   :  { %3420 = vmatpush2.bf16.msra.mxu0 %v6249_v19  ;;  %3461 = vmatpush2.bf16.msra.mxu1 %v6377_v21  ;;  %v402_v14 = vld [vmem:[#allocation5 + $0x8e8] sm:$0xff]  ;;  %v6449_v19 = vcombine.low %v406_v5, %v410_v6  ;;  %v6577_v21 = vcombine.low %v534_v7, %v538_v9 }
 0x105   :  { %3421 = vmatprep.subr.bf16.mxu0 %v6242_v22  ;;  %3462 = vmatprep.subr.bf16.mxu1 %v6370_v26  ;;  %v526_v15 = vld [vmem:[#allocation5 + $0xcc8] sm:$0xff]  ;;  %v6442_v22 = vcombine.high %v398_v13, %v402_v14 }
 0x106   :  { %v530_v18 = vld [vmem:[#allocation5 + $0xce8] sm:$0xff] }
 0x107   :  { %v390_v23 = vld [vmem:[#allocation5 + $0x888] sm:$0xff]  ;;  %v6570_v26 = vcombine.high %v526_v15, %v530_v18 }
 0x108   :  { %3422 = vmatpush2.bf16.msra.mxu0 %v6241_v29  ;;  %3463 = vmatpush2.bf16.msra.mxu1 %v6369_v30  ;;  %v394_v24 = vld [vmem:[#allocation5 + $0x8a8] sm:$0xff]  ;;  %v6441_v29 = vcombine.low %v398_v13, %v402_v14  ;;  %v6569_v30 = vcombine.low %v526_v15, %v530_v18 }
 0x109   :  { %3423 = vmatprep.subr.bf16.mxu0 %v6234_v32  ;;  %3464 = vmatprep.subr.bf16.mxu1 %v6362_v36  ;;  %v518_v25 = vld [vmem:[#allocation5 + $0xc88] sm:$0xff]  ;;  %v6434_v32 = vcombine.high %v390_v23, %v394_v24 }
 0x10a   :  { %v522_v27 = vld [vmem:[#allocation5 + $0xca8] sm:$0xff] }
 0x10b   :  { %v382_v33 = vld [vmem:[#allocation5 + $0x848] sm:$0xff]  ;;  %v6562_v36 = vcombine.high %v518_v25, %v522_v27 }
 0x10c   :  { %3424 = vmatpush2.bf16.msra.mxu0 %v6233_v40  ;;  %3465 = vmatpush2.bf16.msra.mxu1 %v6361_v41  ;;  %v386_v34 = vld [vmem:[#allocation5 + $0x868] sm:$0xff]  ;;  %v6433_v40 = vcombine.low %v390_v23, %v394_v24  ;;  %v6561_v41 = vcombine.low %v518_v25, %v522_v27 }
 0x10d   :  { %3425 = vmatprep.subr.bf16.mxu0 %v6226_v42  ;;  %3466 = vmatprep.subr.bf16.mxu1 %v6354_v46  ;;  %v510_v35 = vld [vmem:[#allocation5 + $0xc48] sm:$0xff]  ;;  %v6426_v42 = vcombine.high %v382_v33, %v386_v34 }
 0x10e   :  { %v514_v37 = vld [vmem:[#allocation5 + $0xc68] sm:$0xff] }
 0x10f   :  { %v374_v43 = vld [vmem:[#allocation5 + $0x808] sm:$0xff]  ;;  %v6554_v46 = vcombine.high %v510_v35, %v514_v37 }
 0x110   :  { %3426 = vmatpush2.bf16.msra.mxu0 %v6225_v48  ;;  %3467 = vmatpush2.bf16.msra.mxu1 %v6353_v49  ;;  %v378_v44 = vld [vmem:[#allocation5 + $0x828] sm:$0xff]  ;;  %v6425_v48 = vcombine.low %v382_v33, %v386_v34  ;;  %v6553_v49 = vcombine.low %v510_v35, %v514_v37 }
 0x111   :  { %3477 = vmatprep.subr.bf16.mxu0 %v6474_v50  ;;  %3518 = vmatprep.subr.bf16.mxu1 %v6602_v54  ;;  %v502_v45 = vld [vmem:[#allocation5 + $0xc08] sm:$0xff]  ;;  %v6418_v50 = vcombine.high %v374_v43, %v378_v44 }
 0x112   :  { %v506_v47 = vld [vmem:[#allocation5 + $0xc28] sm:$0xff] }
 0x113   :  { %3428 = vmatmul.mubr.bf16.vlgmr.msra.gmra.mxu0 %v7660_v16  ;;  %3469 = vmatmul.mubr.bf16.vlgmr.msra.gmra.mxu1 %v7662_v20  ;;  %v494_v51 = vld [vmem:[#allocation5 + $0xbc8] sm:$0xff]  ;;  %v6546_v54 = vcombine.high %v502_v45, %v506_v47 }
 0x114   :  { %3478 = vmatpush1.bf16.msra.mxu0 %v6473_v56  ;;  %3519 = vmatpush1.bf16.msra.mxu1 %v6601_v57  ;;  %v498_v52 = vld [vmem:[#allocation5 + $0xbe8] sm:$0xff]  ;;  %v6417_v56 = vcombine.low %v374_v43, %v378_v44  ;;  %v6545_v57 = vcombine.low %v502_v45, %v506_v47 }
 0x115   :  { %3479 = vmatprep.subr.bf16.mxu0 %v6466_v60  ;;  %3520 = vmatprep.subr.bf16.mxu1 %v6594_v0  ;;  %v622_v53 = vld [vmem:[#allocation5 + $0xfc8] sm:$0xff]  ;;  %v6538_v60 = vcombine.high %v494_v51, %v498_v52 }
 0x116   :  { %3509 = vmatprep.mubr.bf16.mxu0 %v7664_v28  ;;  %3550 = vmatprep.mubr.bf16.mxu1 %v7667_v31  ;;  %v626_v55 = vld [vmem:[#allocation5 + $0xfe8] sm:$0xff] }
 0x117   :  { %v486_v61 = vld [vmem:[#allocation5 + $0xb88] sm:$0xff]  ;;  %v6666_v0 = vcombine.high %v622_v53, %v626_v55 }
 0x118   :  { %3480 = vmatpush1.bf16.msra.mxu0 %v6465_v2  ;;  %3521 = vmatpush1.bf16.msra.mxu1 %v6593_v3  ;;  %v490_v62 = vld [vmem:[#allocation5 + $0xba8] sm:$0xff]  ;;  %v6537_v2 = vcombine.low %v494_v51, %v498_v52  ;;  %v6665_v3 = vcombine.low %v622_v53, %v626_v55 }
 0x119   :  { %3481 = vmatprep.subr.bf16.mxu0 %v6458_v4  ;;  %3522 = vmatprep.subr.bf16.mxu1 %v6586_v8  ;;  %v614_v63 = vld [vmem:[#allocation5 + $0xf88] sm:$0xff]  ;;  %v6530_v4 = vcombine.high %v486_v61, %v490_v62 }
 0x11a   :  { %v618_v1 = vld [vmem:[#allocation5 + $0xfa8] sm:$0xff] }
 0x11b   :  { %v478_v5 = vld [vmem:[#allocation5 + $0xb48] sm:$0xff]  ;;  %v6658_v8 = vcombine.high %v614_v63, %v618_v1 }
 0x11c   :  { %3482 = vmatpush1.bf16.msra.mxu0 %v6457_v10  ;;  %3523 = vmatpush1.bf16.msra.mxu1 %v6585_v11  ;;  %v482_v6 = vld [vmem:[#allocation5 + $0xb68] sm:$0xff]  ;;  %v6529_v10 = vcombine.low %v486_v61, %v490_v62  ;;  %v6657_v11 = vcombine.low %v614_v63, %v618_v1  ;;  %v179_v1 = vld [vmem:[#allocation5 + $0x1f0] sm:$0xff] }
 0x11d   :  { %3483 = vmatprep.subr.bf16.mxu0 %v6450_v12  ;;  %3524 = vmatprep.subr.bf16.mxu1 %v6578_v17  ;;  %v606_v7 = vld [vmem:[#allocation5 + $0xf48] sm:$0xff]  ;;  %v6522_v12 = vcombine.high %v478_v5, %v482_v6 }
 0x11e   :  { %v610_v9 = vld [vmem:[#allocation5 + $0xf68] sm:$0xff] }
 0x11f   :  { %v6650_v13 = vcombine.high %v606_v7, %v610_v9  ;;  %v470_v14 = vld [vmem:[#allocation5 + $0xb08] sm:$0xff] }
 0x120   :  { %3484 = vmatpush1.bf16.msra.mxu0 %v6449_v19  ;;  %3525 = vmatpush1.bf16.msra.mxu1 %v6577_v21  ;;  %v474_v15 = vld [vmem:[#allocation5 + $0xb28] sm:$0xff]  ;;  %v6521_v19 = vcombine.low %v478_v5, %v482_v6  ;;  %v6649_v21 = vcombine.low %v606_v7, %v610_v9  ;;  %v7687_v7 = vld [vmem:[#allocation7] sm:$0xff] }
 0x121   :  { %3485 = vmatprep.subr.bf16.mxu0 %v6442_v22  ;;  %3526 = vmatprep.subr.bf16.mxu1 %v6570_v26  ;;  %v598_v17 = vld [vmem:[#allocation5 + $0xf08] sm:$0xff]  ;;  %v6514_v22 = vcombine.high %v470_v14, %v474_v15 }
 0x122   :  { %v602_v18 = vld [vmem:[#allocation5 + $0xf28] sm:$0xff] }
 0x123   :  { %v6642_v23 = vcombine.high %v598_v17, %v602_v18  ;;  %v462_v24 = vld [vmem:[#allocation5 + $0xac8] sm:$0xff] }
 0x124   :  { %3486 = vmatpush1.bf16.msra.mxu0 %v6441_v29  ;;  %3527 = vmatpush1.bf16.msra.mxu1 %v6569_v30  ;;  %v466_v25 = vld [vmem:[#allocation5 + $0xae8] sm:$0xff]  ;;  %v6513_v29 = vcombine.low %v470_v14, %v474_v15  ;;  %v6641_v30 = vcombine.low %v598_v17, %v602_v18  ;;  %v299_v14 = vld [vmem:[#allocation5 + $0x5b0] sm:$0xff] }
 0x125   :  { %3487 = vmatprep.subr.bf16.mxu0 %v6434_v32  ;;  %3528 = vmatprep.subr.bf16.mxu1 %v6562_v36  ;;  %v590_v26 = vld [vmem:[#allocation5 + $0xec8] sm:$0xff]  ;;  %v6506_v32 = vcombine.high %v462_v24, %v466_v25 }
 0x126   :  { %v594_v27 = vld [vmem:[#allocation5 + $0xee8] sm:$0xff] }
 0x127   :  { %v6634_v33 = vcombine.high %v590_v26, %v594_v27  ;;  %v454_v34 = vld [vmem:[#allocation5 + $0xa88] sm:$0xff] }
 0x128   :  { %3488 = vmatpush1.bf16.msra.mxu0 %v6433_v40  ;;  %3529 = vmatpush1.bf16.msra.mxu1 %v6561_v41  ;;  %v458_v35 = vld [vmem:[#allocation5 + $0xaa8] sm:$0xff]  ;;  %v6505_v40 = vcombine.low %v462_v24, %v466_v25  ;;  %v6633_v41 = vcombine.low %v590_v26, %v594_v27  ;;  %v163_v24 = vld [vmem:[#allocation5 + $0x170] sm:$0xff] }
 0x129   :  { %3489 = vmatprep.subr.bf16.mxu0 %v6426_v42  ;;  %3530 = vmatprep.subr.bf16.mxu1 %v6554_v46  ;;  %v582_v36 = vld [vmem:[#allocation5 + $0xe88] sm:$0xff]  ;;  %v6498_v42 = vcombine.high %v454_v34, %v458_v35  ;;  %v287_v26 = vld [vmem:[#allocation5 + $0x550] sm:$0xff] }
 0x12a   :  { %v586_v37 = vld [vmem:[#allocation5 + $0xea8] sm:$0xff]  ;;  %v291_v27 = vld [vmem:[#allocation5 + $0x570] sm:$0xff] }
 0x12b   :  { %v6626_v43 = vcombine.high %v582_v36, %v586_v37  ;;  %v446_v44 = vld [vmem:[#allocation5 + $0xa48] sm:$0xff] }
 0x12c   :  { %3490 = vmatpush1.bf16.msra.mxu0 %v6425_v48  ;;  %3531 = vmatpush1.bf16.msra.mxu1 %v6553_v49  ;;  %v450_v45 = vld [vmem:[#allocation5 + $0xa68] sm:$0xff]  ;;  %v6497_v48 = vcombine.low %v454_v34, %v458_v35  ;;  %v631_v49 = vlaneseq }
 0x12d   :  { %3491 = vmatprep.subr.bf16.mxu0 %v6418_v50  ;;  %3532 = vmatprep.subr.bf16.mxu1 %v6546_v54  ;;  %v574_v46 = vld [vmem:[#allocation5 + $0xe48] sm:$0xff]  ;;  %v6625_v50 = vcombine.low %v582_v36, %v586_v37  ;;  %v6490_v51 = vcombine.high %v446_v44, %v450_v45 }
 0x12e   :  { %v578_v47 = vld [vmem:[#allocation5 + $0xe68] sm:$0xff] }
 0x12f   :  { %v6618_v52 = vcombine.high %v574_v46, %v578_v47  ;;  %v438_v53 = vld [vmem:[#allocation5 + $0xa08] sm:$0xff]  ;;  %v6617_v61 = vcombine.low %v574_v46, %v578_v47  ;;  %v283_v46 = vld [vmem:[#allocation5 + $0x530] sm:$0xff] }
 0x130   :  { %3492 = vmatpush1.bf16.msra.mxu0 %v6417_v56  ;;  %3533 = vmatpush1.bf16.msra.mxu1 %v6545_v57  ;;  %v442_v54 = vld [vmem:[#allocation5 + $0xa28] sm:$0xff]  ;;  %v6489_v57 = vcombine.low %v446_v44, %v450_v45  ;;  %v279_v45 = vld [vmem:[#allocation5 + $0x510] sm:$0xff] }
 0x131   :  { %3493 = vmatprep.subr.bf16.mxu0 %v6538_v60  ;;  %3534 = vmatprep.subr.bf16.mxu1 %v6666_v0  ;;  %v566_v55 = vld [vmem:[#allocation5 + $0xe08] sm:$0xff]  ;;  %v7684_v60 = vshrl.u32 %v631_v49, 7  ;;  %v6482_v62 = vcombine.high %v438_v53, %v442_v54  ;;  %v175_v0 = vld [vmem:[#allocation5 + $0x1d0] sm:$0xff] }
 0x132   :  { %v570_v56 = vld [vmem:[#allocation5 + $0xe28] sm:$0xff]  ;;  %v6219_v17 = vcombine.low %v175_v0, %v179_v1 }
 0x133   :  { %v6610_v63 = vcombine.high %v566_v55, %v570_v56  ;;  %v633_v5 = vsub.s32 0, %v7684_v60  ;;  %v6609_v6 = vcombine.low %v566_v55, %v570_v56  ;;  %v143_v55 = vld [vmem:[#allocation5 + $0xd0] sm:$0xff] }
 0x134   :  { %3494 = vmatpush2.bf16.msra.mxu0 %v6537_v2  ;;  %3535 = vmatpush2.bf16.msra.mxu1 %v6665_v3  ;;  %v303_v2 = vld [vmem:[#allocation5 + $0x5d0] sm:$0xff] }
 0x135   :  { %3495 = vmatprep.subr.bf16.mxu0 %v6530_v4  ;;  %3536 = vmatprep.subr.bf16.mxu1 %v6658_v8  ;;  %v307_v3 = vld [vmem:[#allocation5 + $0x5f0] sm:$0xff]  ;;  %v6481_v4 = vcombine.low %v438_v53, %v442_v54  ;;  %v6220_v8 = vcombine.high %v175_v0, %v179_v1  ;;  %v634_v15 = vrot.slane %v7687_v7, %v633_v5 }
 0x136   :  { %v6348_v9 = vcombine.high %v303_v2, %v307_v3  ;;  %v6347_v18 = vcombine.low %v303_v2, %v307_v3  ;;  %v6324_v54 = vcombine.high %v279_v45, %v283_v46  ;;  %v147_v56 = vld [vmem:[#allocation5 + $0xf0] sm:$0xff] }
 0x137   :  { %v6188_v0 = vcombine.high %v143_v55, %v147_v56  ;;  %v135_v2 = vld [vmem:[#allocation5 + $0x90] sm:$0xff] }
 0x138   :  { %3496 = vmatpush2.bf16.msra.mxu0 %v6529_v10  ;;  %3537 = vmatpush2.bf16.msra.mxu1 %v6657_v11  ;;  %v637_v10 = vsub.s32 1, %v7684_v60  ;;  %v167_v11 = vld [vmem:[#allocation5 + $0x190] sm:$0xff] }
 0x139   :  { %3497 = vmatprep.subr.bf16.mxu0 %v6522_v12  ;;  %3538 = vmatprep.subr.bf16.mxu1 %v6650_v13  ;;  %v171_v12 = vld [vmem:[#allocation5 + $0x1b0] sm:$0xff] }
 0x13a   :  { %v295_v13 = vld [vmem:[#allocation5 + $0x590] sm:$0xff] }
 0x13b   :  { %v6339_v34 = vcombine.low %v295_v13, %v299_v14  ;;  %v139_v3 = vld [vmem:[#allocation5 + $0xb0] sm:$0xff] }
 0x13c   :  { %3498 = vmatpush2.bf16.msra.mxu0 %v6521_v19  ;;  %3539 = vmatpush2.bf16.msra.mxu1 %v6649_v21  ;;  %v6212_v19 = vcombine.high %v167_v11, %v171_v12  ;;  %v638_v21 = vrot.slane %v7687_v7, %v637_v10 }
 0x13d   :  { %3499 = vmatprep.subr.bf16.mxu0 %v6514_v22  ;;  %3540 = vmatprep.subr.bf16.mxu1 %v6642_v23  ;;  %v6340_v22 = vcombine.high %v295_v13, %v299_v14  ;;  %v159_v23 = vld [vmem:[#allocation5 + $0x150] sm:$0xff] }
 0x13e   :  { %v6204_v35 = vcombine.high %v159_v23, %v163_v24  ;;  %v6203_v49 = vcombine.low %v159_v23, %v163_v24  ;;  %v127_v13 = vld [vmem:[#allocation5 + $0x50] sm:$0xff] }
 0x13f   :  { %v131_v14 = vld [vmem:[#allocation5 + $0x70] sm:$0xff] }
 0x140   :  { %3500 = vmatpush2.bf16.msra.mxu0 %v6513_v29  ;;  %3541 = vmatpush2.bf16.msra.mxu1 %v6641_v30  ;;  %v119_v23 = vld [vmem:[#allocation5 + $0x10] sm:$0xff] }
 0x141   :  { %3501 = vmatprep.subr.bf16.mxu0 %v6506_v32  ;;  %3542 = vmatprep.subr.bf16.mxu1 %v6634_v33  ;;  %v6211_v32 = vcombine.low %v167_v11, %v171_v12  ;;  %v6180_v11 = vcombine.high %v135_v2, %v139_v3  ;;  %v123_v24 = vld [vmem:[#allocation5 + $0x30] sm:$0xff] }
 0x144   :  { %3502 = vmatpush2.bf16.msra.mxu0 %v6505_v40  ;;  %3543 = vmatpush2.bf16.msra.mxu1 %v6633_v41  ;;  %v6332_v41 = vcombine.high %v287_v26, %v291_v27 }
 0x145   :  { %3503 = vmatprep.subr.bf16.mxu0 %v6498_v42  ;;  %3544 = vmatprep.subr.bf16.mxu1 %v6626_v43  ;;  %v151_v42 = vld [vmem:[#allocation5 + $0x110] sm:$0xff] }
 0x146   :  { %v155_v43 = vld [vmem:[#allocation5 + $0x130] sm:$0xff] }
 0x148   :  { %3504 = vmatpush2.bf16.msra.mxu0 %v6497_v48  ;;  %3545 = vmatpush2.bf16.msra.mxu1 %v6625_v50 }
 0x149   :  { %3505 = vmatprep.subr.bf16.mxu0 %v6490_v51  ;;  %3546 = vmatprep.subr.bf16.mxu1 %v6618_v52  ;;  %v6331_v51 = vcombine.low %v287_v26, %v291_v27  ;;  %v6196_v52 = vcombine.high %v151_v42, %v155_v43  ;;  %v251_v26 = vld [vmem:[#allocation5 + $0x430] sm:$0xff]  ;;  %v6171_v27 = vcombine.low %v127_v13, %v131_v14 }
 0x14c   :  { %3506 = vmatpush2.bf16.msra.mxu0 %v6489_v57  ;;  %3547 = vmatpush2.bf16.msra.mxu1 %v6617_v61  ;;  %v271_v57 = vld [vmem:[#allocation5 + $0x4d0] sm:$0xff] }
 0x14d   :  { %3507 = vmatprep.subr.bf16.mxu0 %v6482_v62  ;;  %3548 = vmatprep.subr.bf16.mxu1 %v6610_v63  ;;  %v275_v61 = vld [vmem:[#allocation5 + $0x4f0] sm:$0xff]  ;;  %v6195_v62 = vcombine.low %v151_v42, %v155_v43  ;;  %v6323_v63 = vcombine.low %v279_v45, %v283_v46 }
 0x14e   :  { %v6316_v1 = vcombine.high %v271_v57, %v275_v61  ;;  %v235_v45 = vld [vmem:[#allocation5 + $0x3b0] sm:$0xff] }
 0x14f   :  { %v359_v46 = vld [vmem:[#allocation5 + $0x790] sm:$0xff] }
 0x150   :  { %3508 = vmatpush2.bf16.msra.mxu0 %v6481_v4  ;;  %3549 = vmatpush2.bf16.msra.mxu1 %v6609_v6  ;;  %v263_v4 = vld [vmem:[#allocation5 + $0x490] sm:$0xff] }
 0x151   :  { %3559 = vmatprep.subr.bf16.mxu0 %v6220_v8  ;;  %3600 = vmatprep.subr.bf16.mxu1 %v6348_v9  ;;  %v267_v6 = vld [vmem:[#allocation5 + $0x4b0] sm:$0xff]  ;;  %v6187_v8 = vcombine.low %v143_v55, %v147_v56  ;;  %v6315_v9 = vcombine.low %v271_v57, %v275_v61 }
 0x152   :  { %v3306_v30 = vpop.f32.mrf.mxu1  ;;  %v6308_v12 = vcombine.high %v263_v4, %v267_v6  ;;  %v351_v55 = vld [vmem:[#allocation5 + $0x750] sm:$0xff] }
 0x153   :  { %v3265_v25 = vpop.f32.mrf.mxu0  ;;  %3510 = vmatmul.mubr.bf16.vlgmr.msra.gmra.mxu0 %v7672_v38  ;;  %3551 = vmatmul.mubr.bf16.vlgmr.msra.gmra.mxu1 %v7674_v39  ;;  %v355_v56 = vld [vmem:[#allocation5 + $0x770] sm:$0xff] }
 0x154   :  { %v3266_v29 = vadd.f32 %v3265_v25, %v634_v15  ;;  %3560 = vmatpush1.bf16.msra.mxu0 %v6219_v17  ;;  %3601 = vmatpush1.bf16.msra.mxu1 %v6347_v18  ;;  %v3308_v40 = vpop.f32.mrf.mxu1  ;;  %v255_v15 = vld [vmem:[#allocation5 + $0x450] sm:$0xff]  ;;  %v6179_v18 = vcombine.low %v135_v2, %v139_v3 }
 0x155   :  { %v3267_v33 = vpop.f32.mrf.mxu0  ;;  %3561 = vmatprep.subr.bf16.mxu0 %v6212_v19  ;;  %3602 = vmatprep.subr.bf16.mxu1 %v6340_v22  ;;  %v259_v17 = vld [vmem:[#allocation5 + $0x470] sm:$0xff]  ;;  %v6307_v19 = vcombine.low %v263_v4, %v267_v6  ;;  %v6395_v6 = vcombine.low %v351_v55, %v355_v56 }
 0x156   :  { %v7698_v36 = vadd.f32 %v3306_v30, %v3266_v29  ;;  %v3268_v37 = vadd.f32 %v3267_v33, %v638_v21  ;;  %3591 = vmatprep.mubr.bf16.mxu0 %v7654_v58  ;;  %3632 = vmatprep.mubr.bf16.mxu1 %v7656_v59  ;;  %v3310_v48 = vpop.f32.mrf.mxu1  ;;  %v6172_v21 = vcombine.high %v127_v13, %v131_v14  ;;  %v247_v25 = vld [vmem:[#allocation5 + $0x410] sm:$0xff] }
 0x157   :  { %v3269_v44 = vpop.f32.mrf.mxu0  ;;  %v6300_v22 = vcombine.high %v255_v15, %v259_v17  ;;  %v6299_v29 = vcombine.low %v255_v15, %v259_v17  ;;  %v6164_v30 = vcombine.high %v119_v23, %v123_v24  ;;  %v239_v33 = vld [vmem:[#allocation5 + $0x3d0] sm:$0xff] }
 0x158   :  { %v7702_v47 = vadd.f32 %v3308_v40, %v3268_v37  ;;  %3562 = vmatpush1.bf16.msra.mxu0 %v6211_v32  ;;  %3603 = vmatpush1.bf16.msra.mxu1 %v6339_v34  ;;  %v3311_v53 = vpop.f32.mrf.mxu1  ;;  %v6292_v32 = vcombine.high %v247_v25, %v251_v26  ;;  %v243_v34 = vld [vmem:[#allocation5 + $0x3f0] sm:$0xff]  ;;  %v6163_v40 = vcombine.low %v119_v23, %v123_v24 }
 0x159   :  { %v3270_v50 = vpop.f32.mrf.mxu0  ;;  %3563 = vmatprep.subr.bf16.mxu0 %v6204_v35  ;;  %3604 = vmatprep.subr.bf16.mxu1 %v6332_v41  ;;  %v367_v35 = vld [vmem:[#allocation5 + $0x7d0] sm:$0xff]  ;;  %v6291_v41 = vcombine.low %v247_v25, %v251_v26  ;;  %v6284_v42 = vcombine.high %v239_v33, %v243_v34 }
 0x15a   :  { %v371_v37 = vld [vmem:[#allocation5 + $0x7f0] sm:$0xff] }
 0x15b   :  { %v6412_v43 = vcombine.high %v367_v35, %v371_v37  ;;  %v231_v44 = vld [vmem:[#allocation5 + $0x390] sm:$0xff]  ;;  %v6411_v50 = vcombine.low %v367_v35, %v371_v37 }
 0x15c   :  { %3564 = vmatpush1.bf16.msra.mxu0 %v6203_v49  ;;  %3605 = vmatpush1.bf16.msra.mxu1 %v6331_v51  ;;  %v363_v48 = vld [vmem:[#allocation5 + $0x7b0] sm:$0xff]  ;;  %v6283_v49 = vcombine.low %v239_v33, %v243_v34  ;;  %v6276_v51 = vcombine.high %v231_v44, %v235_v45  ;;  %v6275_v57 = vcombine.low %v231_v44, %v235_v45 }
 0x15d   :  { %3565 = vmatprep.subr.bf16.mxu0 %v6196_v52  ;;  %3606 = vmatprep.subr.bf16.mxu1 %v6324_v54  ;;  %v6404_v52 = vcombine.high %v359_v46, %v363_v48  ;;  %v223_v53 = vld [vmem:[#allocation5 + $0x350] sm:$0xff]  ;;  %v6403_v61 = vcombine.low %v359_v46, %v363_v48 }
 0x15e   :  { %v227_v54 = vld [vmem:[#allocation5 + $0x370] sm:$0xff] }
 0x15f   :  { %v343_v2 = vld [vmem:[#allocation5 + $0x710] sm:$0xff]  ;;  %v6267_v4 = vcombine.low %v223_v53, %v227_v54 }
 0x160   :  { %3566 = vmatpush1.bf16.msra.mxu0 %v6195_v62  ;;  %3607 = vmatpush1.bf16.msra.mxu1 %v6323_v63  ;;  %v6268_v62 = vcombine.high %v223_v53, %v227_v54  ;;  %v6396_v63 = vcombine.high %v351_v55, %v355_v56  ;;  %v347_v3 = vld [vmem:[#allocation5 + $0x730] sm:$0xff] }
 0x161   :  { %3567 = vmatprep.subr.bf16.mxu0 %v6188_v0  ;;  %3608 = vmatprep.subr.bf16.mxu1 %v6316_v1  ;;  %v215_v0 = vld [vmem:[#allocation5 + $0x310] sm:$0xff]  ;;  %v6387_v17 = vcombine.low %v343_v2, %v347_v3 }
 0x162   :  { %v219_v1 = vld [vmem:[#allocation5 + $0x330] sm:$0xff] }
 0x163   :  { %v335_v13 = vld [vmem:[#allocation5 + $0x6d0] sm:$0xff]  ;;  %v6259_v15 = vcombine.low %v215_v0, %v219_v1 }
 0x164   :  { %3568 = vmatpush1.bf16.msra.mxu0 %v6187_v8  ;;  %3609 = vmatpush1.bf16.msra.mxu1 %v6315_v9  ;;  %v6260_v8 = vcombine.high %v215_v0, %v219_v1  ;;  %v6388_v9 = vcombine.high %v343_v2, %v347_v3  ;;  %v339_v14 = vld [vmem:[#allocation5 + $0x6f0] sm:$0xff] }
 0x165   :  { %3569 = vmatprep.subr.bf16.mxu0 %v6180_v11  ;;  %3610 = vmatprep.subr.bf16.mxu1 %v6308_v12  ;;  %v207_v11 = vld [vmem:[#allocation5 + $0x2d0] sm:$0xff]  ;;  %v6379_v26 = vcombine.low %v335_v13, %v339_v14 }
 0x166   :  { %v211_v12 = vld [vmem:[#allocation5 + $0x2f0] sm:$0xff] }
 0x167   :  { %v327_v23 = vld [vmem:[#allocation5 + $0x690] sm:$0xff]  ;;  %v6251_v25 = vcombine.low %v207_v11, %v211_v12 }
 0x168   :  { %3570 = vmatpush1.bf16.msra.mxu0 %v6179_v18  ;;  %3611 = vmatpush1.bf16.msra.mxu1 %v6307_v19  ;;  %v6252_v18 = vcombine.high %v207_v11, %v211_v12  ;;  %v6380_v19 = vcombine.high %v335_v13, %v339_v14  ;;  %v331_v24 = vld [vmem:[#allocation5 + $0x6b0] sm:$0xff] }
 0x169   :  { %3571 = vmatprep.subr.bf16.mxu0 %v6172_v21  ;;  %3612 = vmatprep.subr.bf16.mxu1 %v6300_v22  ;;  %v199_v21 = vld [vmem:[#allocation5 + $0x290] sm:$0xff]  ;;  %v6371_v37 = vcombine.low %v327_v23, %v331_v24 }
 0x16a   :  { %v203_v22 = vld [vmem:[#allocation5 + $0x2b0] sm:$0xff] }
 0x16b   :  { %v319_v33 = vld [vmem:[#allocation5 + $0x650] sm:$0xff]  ;;  %v6243_v35 = vcombine.low %v199_v21, %v203_v22 }
 0x16c   :  { %3572 = vmatpush1.bf16.msra.mxu0 %v6171_v27  ;;  %3613 = vmatpush1.bf16.msra.mxu1 %v6299_v29  ;;  %v6244_v27 = vcombine.high %v199_v21, %v203_v22  ;;  %v6372_v29 = vcombine.high %v327_v23, %v331_v24  ;;  %v323_v34 = vld [vmem:[#allocation5 + $0x670] sm:$0xff] }
 0x16d   :  { %3573 = vmatprep.subr.bf16.mxu0 %v6164_v30  ;;  %3614 = vmatprep.subr.bf16.mxu1 %v6292_v32  ;;  %v191_v30 = vld [vmem:[#allocation5 + $0x250] sm:$0xff]  ;;  %v6363_v48 = vcombine.low %v319_v33, %v323_v34 }
 0x16e   :  { %v195_v32 = vld [vmem:[#allocation5 + $0x270] sm:$0xff] }
 0x16f   :  { %v311_v44 = vld [vmem:[#allocation5 + $0x610] sm:$0xff]  ;;  %v6235_v46 = vcombine.low %v191_v30, %v195_v32 }
 0x170   :  { %3574 = vmatpush1.bf16.msra.mxu0 %v6163_v40  ;;  %3615 = vmatpush1.bf16.msra.mxu1 %v6291_v41  ;;  %v6236_v40 = vcombine.high %v191_v30, %v195_v32  ;;  %v6364_v41 = vcombine.high %v319_v33, %v323_v34  ;;  %v315_v45 = vld [vmem:[#allocation5 + $0x630] sm:$0xff] }
 0x171   :  { %3575 = vmatprep.subr.bf16.mxu0 %v6284_v42  ;;  %3616 = vmatprep.subr.bf16.mxu1 %v6412_v43  ;;  %v183_v42 = vld [vmem:[#allocation5 + $0x210] sm:$0xff]  ;;  %v6355_v56 = vcombine.low %v311_v44, %v315_v45 }
 0x172   :  { %v187_v43 = vld [vmem:[#allocation5 + $0x230] sm:$0xff] }
 0x173   :  { %v559_v53 = vld [vmem:[#allocation5 + $0xdd0] sm:$0xff]  ;;  %v6227_v55 = vcombine.low %v183_v42, %v187_v43 }
 0x174   :  { %3576 = vmatpush2.bf16.msra.mxu0 %v6283_v49  ;;  %3617 = vmatpush2.bf16.msra.mxu1 %v6411_v50  ;;  %v6228_v49 = vcombine.high %v183_v42, %v187_v43  ;;  %v6356_v50 = vcombine.high %v311_v44, %v315_v45  ;;  %v563_v54 = vld [vmem:[#allocation5 + $0xdf0] sm:$0xff] }
 0x175   :  { %3577 = vmatprep.subr.bf16.mxu0 %v6276_v51  ;;  %3618 = vmatprep.subr.bf16.mxu1 %v6404_v52  ;;  %v431_v51 = vld [vmem:[#allocation5 + $0x9d0] sm:$0xff]  ;;  %v6603_v3 = vcombine.low %v559_v53, %v563_v54 }
 0x176   :  { %v435_v52 = vld [vmem:[#allocation5 + $0x9f0] sm:$0xff] }
 0x177   :  { %v551_v0 = vld [vmem:[#allocation5 + $0xd90] sm:$0xff]  ;;  %v6475_v2 = vcombine.low %v431_v51, %v435_v52 }
 0x178   :  { %3578 = vmatpush2.bf16.msra.mxu0 %v6275_v57  ;;  %3619 = vmatpush2.bf16.msra.mxu1 %v6403_v61  ;;  %v6476_v57 = vcombine.high %v431_v51, %v435_v52  ;;  %v6604_v61 = vcombine.high %v559_v53, %v563_v54  ;;  %v555_v1 = vld [vmem:[#allocation5 + $0xdb0] sm:$0xff] }
 0x179   :  { %3579 = vmatprep.subr.bf16.mxu0 %v6268_v62  ;;  %3620 = vmatprep.subr.bf16.mxu1 %v6396_v63  ;;  %v423_v62 = vld [vmem:[#allocation5 + $0x990] sm:$0xff] }
 0x17a   :  { %v427_v63 = vld [vmem:[#allocation5 + $0x9b0] sm:$0xff] }
 0x17b   :  { %v543_v12 = vld [vmem:[#allocation5 + $0xd50] sm:$0xff] }
 0x17c   :  { %3580 = vmatpush2.bf16.msra.mxu0 %v6267_v4  ;;  %3621 = vmatpush2.bf16.msra.mxu1 %v6395_v6  ;;  %v6468_v4 = vcombine.high %v423_v62, %v427_v63  ;;  %v6596_v6 = vcombine.high %v551_v0, %v555_v1  ;;  %v547_v13 = vld [vmem:[#allocation5 + $0xd70] sm:$0xff] }
 0x17d   :  { %3581 = vmatprep.subr.bf16.mxu0 %v6260_v8  ;;  %3622 = vmatprep.subr.bf16.mxu1 %v6388_v9  ;;  %v415_v8 = vld [vmem:[#allocation5 + $0x950] sm:$0xff] }
 0x17e   :  { %v419_v9 = vld [vmem:[#allocation5 + $0x970] sm:$0xff] }
 0x17f   :  { %v6460_v21 = vcombine.high %v415_v8, %v419_v9  ;;  %v539_v30 = vld [vmem:[#allocation5 + $0xd30] sm:$0xff]  ;;  %v6459_v34 = vcombine.low %v415_v8, %v419_v9 }
 0x180   :  { %3582 = vmatpush2.bf16.msra.mxu0 %v6259_v15  ;;  %3623 = vmatpush2.bf16.msra.mxu1 %v6387_v17  ;;  %v6467_v17 = vcombine.low %v423_v62, %v427_v63  ;;  %v399_v42 = vld [vmem:[#allocation5 + $0x8d0] sm:$0xff] }
 0x181   :  { %3583 = vmatprep.subr.bf16.mxu0 %v6252_v18  ;;  %3624 = vmatprep.subr.bf16.mxu1 %v6380_v19  ;;  %v6595_v19 = vcombine.low %v551_v0, %v555_v1  ;;  %v403_v43 = vld [vmem:[#allocation5 + $0x8f0] sm:$0xff] }
 0x182   :  { %v527_v44 = vld [vmem:[#allocation5 + $0xcd0] sm:$0xff] }
 0x183   :  { %v531_v45 = vld [vmem:[#allocation5 + $0xcf0] sm:$0xff] }
 0x184   :  { %3584 = vmatpush2.bf16.msra.mxu0 %v6251_v25  ;;  %3625 = vmatpush2.bf16.msra.mxu1 %v6379_v26  ;;  %v6588_v25 = vcombine.high %v543_v12, %v547_v13  ;;  %v407_v26 = vld [vmem:[#allocation5 + $0x910] sm:$0xff] }
 0x185   :  { %3585 = vmatprep.subr.bf16.mxu0 %v6244_v27  ;;  %3626 = vmatprep.subr.bf16.mxu1 %v6372_v29  ;;  %v411_v27 = vld [vmem:[#allocation5 + $0x930] sm:$0xff] }
 0x186   :  { %v535_v29 = vld [vmem:[#allocation5 + $0xd10] sm:$0xff] }
 0x187   :  { %v391_v51 = vld [vmem:[#allocation5 + $0x890] sm:$0xff] }
 0x188   :  { %3586 = vmatpush2.bf16.msra.mxu0 %v6243_v35  ;;  %3627 = vmatpush2.bf16.msra.mxu1 %v6371_v37  ;;  %v6452_v37 = vcombine.high %v407_v26, %v411_v27  ;;  %v395_v52 = vld [vmem:[#allocation5 + $0x8b0] sm:$0xff] }
 0x189   :  { %3587 = vmatprep.subr.bf16.mxu0 %v6236_v40  ;;  %3628 = vmatprep.subr.bf16.mxu1 %v6364_v41  ;;  %v6580_v41 = vcombine.high %v535_v29, %v539_v30  ;;  %v519_v53 = vld [vmem:[#allocation5 + $0xc90] sm:$0xff] }
 0x18a   :  { %v523_v54 = vld [vmem:[#allocation5 + $0xcb0] sm:$0xff] }
 0x18b   :  { %v383_v62 = vld [vmem:[#allocation5 + $0x850] sm:$0xff] }
 0x18c   :  { %3588 = vmatpush2.bf16.msra.mxu0 %v6235_v46  ;;  %3629 = vmatpush2.bf16.msra.mxu1 %v6363_v48  ;;  %v6451_v46 = vcombine.low %v407_v26, %v411_v27  ;;  %v6579_v48 = vcombine.low %v535_v29, %v539_v30  ;;  %v387_v63 = vld [vmem:[#allocation5 + $0x870] sm:$0xff] }
 0x18d   :  { %3589 = vmatprep.subr.bf16.mxu0 %v6228_v49  ;;  %3630 = vmatprep.subr.bf16.mxu1 %v6356_v50  ;;  %v6444_v49 = vcombine.high %v399_v42, %v403_v43  ;;  %v6572_v50 = vcombine.high %v527_v44, %v531_v45  ;;  %v511_v0 = vld [vmem:[#allocation5 + $0xc50] sm:$0xff] }
 0x18e   :  { %v515_v1 = vld [vmem:[#allocation5 + $0xc70] sm:$0xff] }
 0x18f   :  { %v375_v8 = vld [vmem:[#allocation5 + $0x810] sm:$0xff] }
 0x190   :  { %3590 = vmatpush2.bf16.msra.mxu0 %v6227_v55  ;;  %3631 = vmatpush2.bf16.msra.mxu1 %v6355_v56  ;;  %v6443_v55 = vcombine.low %v399_v42, %v403_v43  ;;  %v6571_v56 = vcombine.low %v527_v44, %v531_v45  ;;  %v379_v9 = vld [vmem:[#allocation5 + $0x830] sm:$0xff] }
 0x191   :  { %3641 = vmatprep.subr.bf16.mxu0 %v6476_v57  ;;  %3682 = vmatprep.subr.bf16.mxu1 %v6604_v61  ;;  %v6436_v57 = vcombine.high %v391_v51, %v395_v52  ;;  %v6564_v61 = vcombine.high %v519_v53, %v523_v54  ;;  %v491_v29 = vld [vmem:[#allocation5 + $0xbb0] sm:$0xff] }
 0x192   :  { %v615_v30 = vld [vmem:[#allocation5 + $0xf90] sm:$0xff] }
 0x193   :  { %v3347_v11 = vpop.f32.mrf.mxu0  ;;  %3592 = vmatmul.mubr.bf16.vlgmr.msra.gmra.mxu0 %v7660_v16  ;;  %v3388_v15 = vpop.f32.mrf.mxu1  ;;  %3633 = vmatmul.mubr.bf16.vlgmr.msra.gmra.mxu1 %v7662_v20  ;;  %v607_v42 = vld [vmem:[#allocation5 + $0xf50] sm:$0xff] }
 0x194   :  { %v3348_v14 = vadd.f32 %v3347_v11, %v7698_v36  ;;  %3642 = vmatpush1.bf16.msra.mxu0 %v6475_v2  ;;  %3683 = vmatpush1.bf16.msra.mxu1 %v6603_v3  ;;  %v6435_v2 = vcombine.low %v391_v51, %v395_v52  ;;  %v6563_v3 = vcombine.low %v519_v53, %v523_v54  ;;  %v503_v11 = vld [vmem:[#allocation5 + $0xc10] sm:$0xff] }
 0x195   :  { %v3349_v18 = vpop.f32.mrf.mxu0  ;;  %3643 = vmatprep.subr.bf16.mxu0 %v6468_v4  ;;  %v3390_v24 = vpop.f32.mrf.mxu1  ;;  %3684 = vmatprep.subr.bf16.mxu1 %v6596_v6  ;;  %v6428_v4 = vcombine.high %v383_v62, %v387_v63  ;;  %v6556_v6 = vcombine.high %v511_v0, %v515_v1  ;;  %v611_v43 = vld [vmem:[#allocation5 + $0xf70] sm:$0xff] }
 0x196   :  { %v7707_v22 = vadd.f32 %v3388_v15, %v3348_v14  ;;  %v3350_v23 = vadd.f32 %v3349_v18, %v7702_v47  ;;  %3673 = vmatprep.mubr.bf16.mxu0 %v7664_v28  ;;  %3714 = vmatprep.mubr.bf16.mxu1 %v7667_v31  ;;  %v6587_v47 = vcombine.low %v543_v12, %v547_v13  ;;  %v507_v12 = vld [vmem:[#allocation5 + $0xc30] sm:$0xff] }
 0x197   :  { %v3351_v36 = vpop.f32.mrf.mxu0  ;;  %v3392_v33 = vpop.f32.mrf.mxu1  ;;  %v6427_v13 = vcombine.low %v383_v62, %v387_v63  ;;  %v6555_v14 = vcombine.low %v511_v0, %v515_v1  ;;  %v6420_v15 = vcombine.high %v375_v8, %v379_v9  ;;  %v495_v18 = vld [vmem:[#allocation5 + $0xbd0] sm:$0xff]  ;;  %v6651_v54 = vcombine.low %v607_v42, %v611_v43 }
 0x198   :  { %v7712_v32 = vadd.f32 %v3390_v24, %v3350_v23  ;;  %3644 = vmatpush1.bf16.msra.mxu0 %v6467_v17  ;;  %3685 = vmatpush1.bf16.msra.mxu1 %v6595_v19  ;;  %v6548_v17 = vcombine.high %v503_v11, %v507_v12  ;;  %v499_v19 = vld [vmem:[#allocation5 + $0xbf0] sm:$0xff]  ;;  %v6419_v24 = vcombine.low %v375_v8, %v379_v9 }
 0x199   :  { %v3352_v35 = vpop.f32.mrf.mxu0  ;;  %3645 = vmatprep.subr.bf16.mxu0 %v6460_v21  ;;  %v3393_v40 = vpop.f32.mrf.mxu1  ;;  %3686 = vmatprep.subr.bf16.mxu1 %v6588_v25  ;;  %v623_v21 = vld [vmem:[#allocation5 + $0xfd0] sm:$0xff]  ;;  %v6547_v25 = vcombine.low %v503_v11, %v507_v12  ;;  %v6540_v26 = vcombine.high %v495_v18, %v499_v19 }
 0x19a   :  { %v627_v23 = vld [vmem:[#allocation5 + $0xff0] sm:$0xff] }
 0x19b   :  { %v6668_v27 = vcombine.high %v623_v21, %v627_v23  ;;  %v487_v36 = vld [vmem:[#allocation5 + $0xb90] sm:$0xff]  ;;  %v6667_v35 = vcombine.low %v623_v21, %v627_v23 }
 0x19c   :  { %3646 = vmatpush1.bf16.msra.mxu0 %v6459_v34  ;;  %3687 = vmatpush1.bf16.msra.mxu1 %v6587_v47  ;;  %v619_v33 = vld [vmem:[#allocation5 + $0xfb0] sm:$0xff]  ;;  %v6539_v34 = vcombine.low %v495_v18, %v499_v19  ;;  %v6532_v47 = vcombine.high %v487_v36, %v491_v29  ;;  %v6531_v44 = vcombine.low %v487_v36, %v491_v29 }
 0x19d   :  { %3647 = vmatprep.subr.bf16.mxu0 %v6452_v37  ;;  %3688 = vmatprep.subr.bf16.mxu1 %v6580_v41  ;;  %v6660_v37 = vcombine.high %v615_v30, %v619_v33  ;;  %v479_v40 = vld [vmem:[#allocation5 + $0xb50] sm:$0xff]  ;;  %v6659_v45 = vcombine.low %v615_v30, %v619_v33 }
 0x19e   :  { %v483_v41 = vld [vmem:[#allocation5 + $0xb70] sm:$0xff] }
 0x19f   :  { %v599_v51 = vld [vmem:[#allocation5 + $0xf10] sm:$0xff]  ;;  %v6523_v53 = vcombine.low %v479_v40, %v483_v41 }
 0x1a0   :  { %3648 = vmatpush1.bf16.msra.mxu0 %v6451_v46  ;;  %3689 = vmatpush1.bf16.msra.mxu1 %v6579_v48  ;;  %v6524_v46 = vcombine.high %v479_v40, %v483_v41  ;;  %v6652_v48 = vcombine.high %v607_v42, %v611_v43  ;;  %v603_v52 = vld [vmem:[#allocation5 + $0xf30] sm:$0xff]  ;;  %v304_v40 = vld [vmem:[#allocation5 + $0x5d8] sm:$0xff]  ;;  %v641_v43 = vsub.s32 2, %v7684_v60 }
 0x1a1   :  { %3649 = vmatprep.subr.bf16.mxu0 %v6444_v49  ;;  %3690 = vmatprep.subr.bf16.mxu1 %v6572_v50  ;;  %v471_v49 = vld [vmem:[#allocation5 + $0xb10] sm:$0xff]  ;;  %v6643_v1 = vcombine.low %v599_v51, %v603_v52  ;;  %v308_v41 = vld [vmem:[#allocation5 + $0x5f8] sm:$0xff] }
 0x1a2   :  { %v475_v50 = vld [vmem:[#allocation5 + $0xb30] sm:$0xff] }
 0x1a3   :  { %v591_v62 = vld [vmem:[#allocation5 + $0xed0] sm:$0xff]  ;;  %v6515_v0 = vcombine.low %v471_v49, %v475_v50 }
 0x1a4   :  { %3650 = vmatpush1.bf16.msra.mxu0 %v6443_v55  ;;  %3691 = vmatpush1.bf16.msra.mxu1 %v6571_v56  ;;  %v6516_v55 = vcombine.high %v471_v49, %v475_v50  ;;  %v6644_v56 = vcombine.high %v599_v51, %v603_v52  ;;  %v595_v63 = vld [vmem:[#allocation5 + $0xef0] sm:$0xff]  ;;  %v168_v49 = vld [vmem:[#allocation5 + $0x198] sm:$0xff] }
 0x1a5   :  { %3651 = vmatprep.subr.bf16.mxu0 %v6436_v57  ;;  %3692 = vmatprep.subr.bf16.mxu1 %v6564_v61  ;;  %v463_v57 = vld [vmem:[#allocation5 + $0xad0] sm:$0xff]  ;;  %v6635_v12 = vcombine.low %v591_v62, %v595_v63  ;;  %v172_v50 = vld [vmem:[#allocation5 + $0x1b8] sm:$0xff] }
 0x1a6   :  { %v467_v61 = vld [vmem:[#allocation5 + $0xaf0] sm:$0xff]  ;;  %v296_v51 = vld [vmem:[#allocation5 + $0x598] sm:$0xff] }
 0x1a7   :  { %v583_v8 = vld [vmem:[#allocation5 + $0xe90] sm:$0xff]  ;;  %v6507_v11 = vcombine.low %v463_v57, %v467_v61  ;;  %v300_v52 = vld [vmem:[#allocation5 + $0x5b8] sm:$0xff] }
 0x1a8   :  { %3652 = vmatpush1.bf16.msra.mxu0 %v6435_v2  ;;  %3693 = vmatpush1.bf16.msra.mxu1 %v6563_v3  ;;  %v6508_v2 = vcombine.high %v463_v57, %v467_v61  ;;  %v6636_v3 = vcombine.high %v591_v62, %v595_v63  ;;  %v587_v9 = vld [vmem:[#allocation5 + $0xeb0] sm:$0xff]  ;;  %v6342_v61 = vcombine.high %v296_v51, %v300_v52  ;;  %v160_v62 = vld [vmem:[#allocation5 + $0x158] sm:$0xff] }
 0x1a9   :  { %3653 = vmatprep.subr.bf16.mxu0 %v6428_v4  ;;  %3694 = vmatprep.subr.bf16.mxu1 %v6556_v6  ;;  %v455_v4 = vld [vmem:[#allocation5 + $0xa90] sm:$0xff]  ;;  %v6627_v23 = vcombine.low %v583_v8, %v587_v9  ;;  %v164_v63 = vld [vmem:[#allocation5 + $0x178] sm:$0xff] }
 0x1aa   :  { %v459_v6 = vld [vmem:[#allocation5 + $0xab0] sm:$0xff] }
 0x1ab   :  { %v575_v18 = vld [vmem:[#allocation5 + $0xe50] sm:$0xff]  ;;  %v6499_v21 = vcombine.low %v455_v4, %v459_v6 }
 0x1ac   :  { %3654 = vmatpush1.bf16.msra.mxu0 %v6427_v13  ;;  %3695 = vmatpush1.bf16.msra.mxu1 %v6555_v14  ;;  %v6500_v13 = vcombine.high %v455_v4, %v459_v6  ;;  %v6628_v14 = vcombine.high %v583_v8, %v587_v9  ;;  %v579_v19 = vld [vmem:[#allocation5 + $0xe70] sm:$0xff]  ;;  %v6213_v6 = vcombine.low %v168_v49, %v172_v50 }
 0x1ad   :  { %3655 = vmatprep.subr.bf16.mxu0 %v6420_v15  ;;  %3696 = vmatprep.subr.bf16.mxu1 %v6548_v17  ;;  %v447_v15 = vld [vmem:[#allocation5 + $0xa50] sm:$0xff]  ;;  %v6619_v33 = vcombine.low %v575_v18, %v579_v19  ;;  %v6341_v9 = vcombine.low %v296_v51, %v300_v52  ;;  %v128_v52 = vld [vmem:[#allocation5 + $0x58] sm:$0xff] }
 0x1ae   :  { %v451_v17 = vld [vmem:[#allocation5 + $0xa70] sm:$0xff] }
 0x1af   :  { %v567_v36 = vld [vmem:[#allocation5 + $0xe10] sm:$0xff]  ;;  %v6491_v30 = vcombine.low %v447_v15, %v451_v17 }
 0x1b0   :  { %3656 = vmatpush1.bf16.msra.mxu0 %v6419_v24  ;;  %3697 = vmatpush1.bf16.msra.mxu1 %v6547_v25  ;;  %v6492_v24 = vcombine.high %v447_v15, %v451_v17  ;;  %v6620_v25 = vcombine.high %v575_v18, %v579_v19  ;;  %v571_v29 = vld [vmem:[#allocation5 + $0xe30] sm:$0xff]  ;;  %v152_v15 = vld [vmem:[#allocation5 + $0x118] sm:$0xff] }
 0x1b1   :  { %3657 = vmatprep.subr.bf16.mxu0 %v6540_v26  ;;  %3698 = vmatprep.subr.bf16.mxu1 %v6668_v27  ;;  %v439_v26 = vld [vmem:[#allocation5 + $0xa10] sm:$0xff]  ;;  %v156_v17 = vld [vmem:[#allocation5 + $0x138] sm:$0xff] }
 0x1b2   :  { %v443_v27 = vld [vmem:[#allocation5 + $0xa30] sm:$0xff]  ;;  %v280_v19 = vld [vmem:[#allocation5 + $0x518] sm:$0xff] }
 0x1b3   :  { %v6483_v42 = vcombine.low %v439_v26, %v443_v27 }
 0x1b4   :  { %3658 = vmatpush2.bf16.msra.mxu0 %v6539_v34  ;;  %3699 = vmatpush2.bf16.msra.mxu1 %v6667_v35  ;;  %v6484_v34 = vcombine.high %v439_v26, %v443_v27  ;;  %v6612_v35 = vcombine.high %v567_v36, %v571_v29 }
 0x1b5   :  { %3659 = vmatprep.subr.bf16.mxu0 %v6532_v47  ;;  %3700 = vmatprep.subr.bf16.mxu1 %v6660_v37  ;;  %v176_v47 = vld [vmem:[#allocation5 + $0x1d8] sm:$0xff] }
 0x1b6   :  { %v180_v37 = vld [vmem:[#allocation5 + $0x1f8] sm:$0xff] }
 0x1b8   :  { %3660 = vmatpush2.bf16.msra.mxu0 %v6531_v44  ;;  %3701 = vmatpush2.bf16.msra.mxu1 %v6659_v45  ;;  %v6611_v44 = vcombine.low %v567_v36, %v571_v29  ;;  %v6222_v45 = vcombine.high %v176_v47, %v180_v37  ;;  %v6198_v36 = vcombine.high %v152_v15, %v156_v17 }
 0x1b9   :  { %3661 = vmatprep.subr.bf16.mxu0 %v6524_v46  ;;  %3702 = vmatprep.subr.bf16.mxu1 %v6652_v48  ;;  %v6350_v46 = vcombine.high %v304_v40, %v308_v41  ;;  %v645_v48 = vsub.s32 3, %v7684_v60 }
 0x1bb   :  { %v646_v57 = vrot.slane %v7687_v7, %v645_v48 }
 0x1bc   :  { %3662 = vmatpush2.bf16.msra.mxu0 %v6523_v53  ;;  %3703 = vmatpush2.bf16.msra.mxu1 %v6651_v54  ;;  %v642_v53 = vrot.slane %v7687_v7, %v641_v43  ;;  %v6221_v54 = vcombine.low %v176_v47, %v180_v37  ;;  %v6197_v47 = vcombine.low %v152_v15, %v156_v17 }
 0x1bd   :  { %3663 = vmatprep.subr.bf16.mxu0 %v6516_v55  ;;  %3704 = vmatprep.subr.bf16.mxu1 %v6644_v56  ;;  %v6349_v55 = vcombine.low %v304_v40, %v308_v41  ;;  %v6214_v56 = vcombine.high %v168_v49, %v172_v50  ;;  %v136_v41 = vld [vmem:[#allocation5 + $0x98] sm:$0xff] }
 0x1c0   :  { %3664 = vmatpush2.bf16.msra.mxu0 %v6515_v0  ;;  %3705 = vmatpush2.bf16.msra.mxu1 %v6643_v1  ;;  %v288_v1 = vld [vmem:[#allocation5 + $0x558] sm:$0xff] }
 0x1c1   :  { %3665 = vmatprep.subr.bf16.mxu0 %v6508_v2  ;;  %3706 = vmatprep.subr.bf16.mxu1 %v6636_v3  ;;  %v292_v2 = vld [vmem:[#allocation5 + $0x578] sm:$0xff] }
 0x1c2   :  { %v6333_v27 = vcombine.low %v288_v1, %v292_v2 }
 0x1c4   :  { %3666 = vmatpush2.bf16.msra.mxu0 %v6507_v11  ;;  %3707 = vmatpush2.bf16.msra.mxu1 %v6635_v12  ;;  %v6206_v11 = vcombine.high %v160_v62, %v164_v63 }
 0x1c5   :  { %3667 = vmatprep.subr.bf16.mxu0 %v6500_v13  ;;  %3708 = vmatprep.subr.bf16.mxu1 %v6628_v14  ;;  %v6334_v14 = vcombine.high %v288_v1, %v292_v2  ;;  %v248_v1 = vld [vmem:[#allocation5 + $0x418] sm:$0xff] }
 0x1c6   :  { %v252_v2 = vld [vmem:[#allocation5 + $0x438] sm:$0xff] }
 0x1c7   :  { %v6293_v15 = vcombine.low %v248_v1, %v252_v2 }
 0x1c8   :  { %3668 = vmatpush2.bf16.msra.mxu0 %v6499_v21  ;;  %3709 = vmatpush2.bf16.msra.mxu1 %v6627_v23  ;;  %v284_v21 = vld [vmem:[#allocation5 + $0x538] sm:$0xff] }
 0x1c9   :  { %3669 = vmatprep.subr.bf16.mxu0 %v6492_v24  ;;  %3710 = vmatprep.subr.bf16.mxu1 %v6620_v25  ;;  %v6205_v25 = vcombine.low %v160_v62, %v164_v63  ;;  %v120_v63 = vld [vmem:[#allocation5 + $0x18] sm:$0xff] }
 0x1cc   :  { %3670 = vmatpush2.bf16.msra.mxu0 %v6491_v30  ;;  %3711 = vmatpush2.bf16.msra.mxu1 %v6619_v33  ;;  %v6326_v30 = vcombine.high %v280_v19, %v284_v21  ;;  %v144_v33 = vld [vmem:[#allocation5 + $0xd8] sm:$0xff] }
 0x1cd   :  { %3671 = vmatprep.subr.bf16.mxu0 %v6484_v34  ;;  %3712 = vmatprep.subr.bf16.mxu1 %v6612_v35  ;;  %v272_v34 = vld [vmem:[#allocation5 + $0x4d8] sm:$0xff] }
 0x1ce   :  { %v276_v35 = vld [vmem:[#allocation5 + $0x4f8] sm:$0xff] }
 0x1cf   :  { %v6318_v40 = vcombine.high %v272_v34, %v276_v35  ;;  %v6317_v49 = vcombine.low %v272_v34, %v276_v35  ;;  %v356_v34 = vld [vmem:[#allocation5 + $0x778] sm:$0xff] }
 0x1d0   :  { %3672 = vmatpush2.bf16.msra.mxu0 %v6483_v42  ;;  %3713 = vmatpush2.bf16.msra.mxu1 %v6611_v44  ;;  %v140_v42 = vld [vmem:[#allocation5 + $0xb8] sm:$0xff] }
 0x1d1   :  { %3723 = vmatprep.subr.bf16.mxu0 %v6222_v45  ;;  %3764 = vmatprep.subr.bf16.mxu1 %v6350_v46  ;;  %v264_v44 = vld [vmem:[#allocation5 + $0x498] sm:$0xff]  ;;  %v6182_v50 = vcombine.high %v136_v41, %v140_v42 }
 0x1d2   :  { %v268_v45 = vld [vmem:[#allocation5 + $0x4b8] sm:$0xff] }
 0x1d3   :  { %v3429_v0 = vpop.f32.mrf.mxu0  ;;  %3674 = vmatmul.mubr.bf16.vlgmr.msra.gmra.mxu0 %v7672_v38  ;;  %v3470_v4 = vpop.f32.mrf.mxu1  ;;  %3715 = vmatmul.mubr.bf16.vlgmr.msra.gmra.mxu1 %v7674_v39  ;;  %v6310_v51 = vcombine.high %v264_v44, %v268_v45 }
 0x1d4   :  { %v3430_v3 = vadd.f32 %v3429_v0, %v642_v53  ;;  %3724 = vmatpush1.bf16.msra.mxu0 %v6221_v54  ;;  %3765 = vmatpush1.bf16.msra.mxu1 %v6349_v55  ;;  %v132_v53 = vld [vmem:[#allocation5 + $0x78] sm:$0xff] }
 0x1d5   :  { %v3431_v8 = vpop.f32.mrf.mxu0  ;;  %3725 = vmatprep.subr.bf16.mxu0 %v6214_v56  ;;  %v3472_v13 = vpop.f32.mrf.mxu1  ;;  %3766 = vmatprep.subr.bf16.mxu1 %v6342_v61  ;;  %v256_v54 = vld [vmem:[#allocation5 + $0x458] sm:$0xff]  ;;  %v6181_v56 = vcombine.low %v136_v41, %v140_v42  ;;  %v6174_v61 = vcombine.high %v128_v52, %v132_v53 }
 0x1d6   :  { %v7724_v7 = vadd.f32 %v3470_v4, %v3430_v3  ;;  %v3432_v12 = vadd.f32 %v3431_v8, %v646_v57  ;;  %3755 = vmatprep.mubr.bf16.mxu0 %v7654_v58  ;;  %3796 = vmatprep.mubr.bf16.mxu1 %v7656_v59  ;;  %v148_v58 = vld [vmem:[#allocation5 + $0xf8] sm:$0xff]  ;;  %v6325_v59 = vcombine.low %v280_v19, %v284_v21 }
 0x1d7   :  { %v3433_v18 = vpop.f32.mrf.mxu0  ;;  %v3474_v24 = vpop.f32.mrf.mxu1  ;;  %v6190_v37 = vcombine.high %v144_v33, %v148_v58  ;;  %v6189_v46 = vcombine.low %v144_v33, %v148_v58  ;;  %v260_v55 = vld [vmem:[#allocation5 + $0x478] sm:$0xff]  ;;  %v6309_v57 = vcombine.low %v264_v44, %v268_v45  ;;  %v6173_v3 = vcombine.low %v128_v52, %v132_v53 }
 0x1d8   :  { %v7728_v23 = vadd.f32 %v3472_v13, %v3432_v12  ;;  %3726 = vmatpush1.bf16.msra.mxu0 %v6213_v6  ;;  %3767 = vmatpush1.bf16.msra.mxu1 %v6341_v9  ;;  %v6302_v62 = vcombine.high %v256_v54, %v260_v55  ;;  %v124_v0 = vld [vmem:[#allocation5 + $0x38] sm:$0xff]  ;;  %v6301_v4 = vcombine.low %v256_v54, %v260_v55 }
 0x1d9   :  { %v3434_v26 = vpop.f32.mrf.mxu0  ;;  %3727 = vmatprep.subr.bf16.mxu0 %v6206_v11  ;;  %v3475_v29 = vpop.f32.mrf.mxu1  ;;  %3768 = vmatprep.subr.bf16.mxu1 %v6334_v14  ;;  %v6166_v6 = vcombine.high %v120_v63, %v124_v0  ;;  %v6294_v8 = vcombine.high %v248_v1, %v252_v2  ;;  %v240_v9 = vld [vmem:[#allocation5 + $0x3d8] sm:$0xff]  ;;  %v6165_v14 = vcombine.low %v120_v63, %v124_v0 }
 0x1da   :  { %v244_v11 = vld [vmem:[#allocation5 + $0x3f8] sm:$0xff] }
 0x1db   :  { %v368_v12 = vld [vmem:[#allocation5 + $0x7d8] sm:$0xff]  ;;  %v6286_v17 = vcombine.high %v240_v9, %v244_v11  ;;  %v6285_v26 = vcombine.low %v240_v9, %v244_v11 }
 0x1dc   :  { %3728 = vmatpush1.bf16.msra.mxu0 %v6205_v25  ;;  %3769 = vmatpush1.bf16.msra.mxu1 %v6333_v27  ;;  %v372_v13 = vld [vmem:[#allocation5 + $0x7f8] sm:$0xff] }
 0x1dd   :  { %3729 = vmatprep.subr.bf16.mxu0 %v6198_v36  ;;  %3770 = vmatprep.subr.bf16.mxu1 %v6326_v30  ;;  %v6414_v18 = vcombine.high %v368_v12, %v372_v13  ;;  %v232_v19 = vld [vmem:[#allocation5 + $0x398] sm:$0xff]  ;;  %v6413_v27 = vcombine.low %v368_v12, %v372_v13 }
 0x1de   :  { %v236_v21 = vld [vmem:[#allocation5 + $0x3b8] sm:$0xff] }
 0x1df   :  { %v360_v24 = vld [vmem:[#allocation5 + $0x798] sm:$0xff]  ;;  %v6278_v36 = vcombine.high %v232_v19, %v236_v21  ;;  %v6277_v35 = vcombine.low %v232_v19, %v236_v21 }
 0x1e0   :  { %3730 = vmatpush1.bf16.msra.mxu0 %v6197_v47  ;;  %3771 = vmatpush1.bf16.msra.mxu1 %v6325_v59  ;;  %v364_v25 = vld [vmem:[#allocation5 + $0x7b8] sm:$0xff] }
 0x1e1   :  { %3731 = vmatprep.subr.bf16.mxu0 %v6190_v37  ;;  %3772 = vmatprep.subr.bf16.mxu1 %v6318_v40  ;;  %v6406_v29 = vcombine.high %v360_v24, %v364_v25  ;;  %v224_v30 = vld [vmem:[#allocation5 + $0x358] sm:$0xff]  ;;  %v6405_v47 = vcombine.low %v360_v24, %v364_v25 }
 0x1e2   :  { %v228_v33 = vld [vmem:[#allocation5 + $0x378] sm:$0xff] }
 0x1e3   :  { %v352_v58 = vld [vmem:[#allocation5 + $0x758] sm:$0xff]  ;;  %v6270_v59 = vcombine.high %v224_v30, %v228_v33  ;;  %v6269_v45 = vcombine.low %v224_v30, %v228_v33 }
 0x1e4   :  { %3732 = vmatpush1.bf16.msra.mxu0 %v6189_v46  ;;  %3773 = vmatpush1.bf16.msra.mxu1 %v6317_v49  ;;  %v6398_v37 = vcombine.high %v352_v58, %v356_v34  ;;  %v216_v40 = vld [vmem:[#allocation5 + $0x318] sm:$0xff]  ;;  %v6397_v46 = vcombine.low %v352_v58, %v356_v34 }
 0x1e5   :  { %3733 = vmatprep.subr.bf16.mxu0 %v6182_v50  ;;  %3774 = vmatprep.subr.bf16.mxu1 %v6310_v51  ;;  %v220_v41 = vld [vmem:[#allocation5 + $0x338] sm:$0xff] }
 0x1e6   :  { %v344_v42 = vld [vmem:[#allocation5 + $0x718] sm:$0xff]  ;;  %v6262_v49 = vcombine.high %v216_v40, %v220_v41  ;;  %v6261_v55 = vcombine.low %v216_v40, %v220_v41 }
 0x1e7   :  { %v348_v44 = vld [vmem:[#allocation5 + $0x738] sm:$0xff] }
 0x1e8   :  { %3734 = vmatpush1.bf16.msra.mxu0 %v6181_v56  ;;  %3775 = vmatpush1.bf16.msra.mxu1 %v6309_v57  ;;  %v6390_v50 = vcombine.high %v344_v42, %v348_v44  ;;  %v208_v51 = vld [vmem:[#allocation5 + $0x2d8] sm:$0xff]  ;;  %v6389_v56 = vcombine.low %v344_v42, %v348_v44 }
 0x1e9   :  { %3735 = vmatprep.subr.bf16.mxu0 %v6174_v61  ;;  %3776 = vmatprep.subr.bf16.mxu1 %v6302_v62  ;;  %v212_v52 = vld [vmem:[#allocation5 + $0x2f8] sm:$0xff] }
 0x1ea   :  { %v336_v53 = vld [vmem:[#allocation5 + $0x6d8] sm:$0xff]  ;;  %v6254_v57 = vcombine.high %v208_v51, %v212_v52  ;;  %v6253_v2 = vcombine.low %v208_v51, %v212_v52 }
 0x1eb   :  { %v340_v54 = vld [vmem:[#allocation5 + $0x6f8] sm:$0xff] }
 0x1ec   :  { %3736 = vmatpush1.bf16.msra.mxu0 %v6173_v3  ;;  %3777 = vmatpush1.bf16.msra.mxu1 %v6301_v4  ;;  %v6382_v61 = vcombine.high %v336_v53, %v340_v54  ;;  %v200_v62 = vld [vmem:[#allocation5 + $0x298] sm:$0xff]  ;;  %v6381_v3 = vcombine.low %v336_v53, %v340_v54 }
 0x1ed   :  { %3737 = vmatprep.subr.bf16.mxu0 %v6166_v6  ;;  %3778 = vmatprep.subr.bf16.mxu1 %v6294_v8  ;;  %v204_v63 = vld [vmem:[#allocation5 + $0x2b8] sm:$0xff] }
 0x1ee   :  { %v328_v0 = vld [vmem:[#allocation5 + $0x698] sm:$0xff]  ;;  %v6246_v4 = vcombine.high %v200_v62, %v204_v63  ;;  %v6245_v13 = vcombine.low %v200_v62, %v204_v63 }
 0x1ef   :  { %v332_v1 = vld [vmem:[#allocation5 + $0x6b8] sm:$0xff] }
 0x1f0   :  { %3738 = vmatpush1.bf16.msra.mxu0 %v6165_v14  ;;  %3779 = vmatpush1.bf16.msra.mxu1 %v6293_v15  ;;  %v6374_v6 = vcombine.high %v328_v0, %v332_v1  ;;  %v192_v8 = vld [vmem:[#allocation5 + $0x258] sm:$0xff]  ;;  %v6373_v14 = vcombine.low %v328_v0, %v332_v1 }
 0x1f1   :  { %3739 = vmatprep.subr.bf16.mxu0 %v6286_v17  ;;  %3780 = vmatprep.subr.bf16.mxu1 %v6414_v18  ;;  %v196_v9 = vld [vmem:[#allocation5 + $0x278] sm:$0xff] }
 0x1f2   :  { %v320_v11 = vld [vmem:[#allocation5 + $0x658] sm:$0xff]  ;;  %v6238_v15 = vcombine.high %v192_v8, %v196_v9  ;;  %v6237_v25 = vcombine.low %v192_v8, %v196_v9 }
 0x1f3   :  { %v324_v12 = vld [vmem:[#allocation5 + $0x678] sm:$0xff] }
 0x1f4   :  { %3740 = vmatpush2.bf16.msra.mxu0 %v6285_v26  ;;  %3781 = vmatpush2.bf16.msra.mxu1 %v6413_v27  ;;  %v6366_v17 = vcombine.high %v320_v11, %v324_v12  ;;  %v184_v18 = vld [vmem:[#allocation5 + $0x218] sm:$0xff]  ;;  %v6365_v26 = vcombine.low %v320_v11, %v324_v12 }
 0x1f5   :  { %3741 = vmatprep.subr.bf16.mxu0 %v6278_v36  ;;  %3782 = vmatprep.subr.bf16.mxu1 %v6406_v29  ;;  %v188_v19 = vld [vmem:[#allocation5 + $0x238] sm:$0xff] }
 0x1f6   :  { %v312_v21 = vld [vmem:[#allocation5 + $0x618] sm:$0xff]  ;;  %v6230_v27 = vcombine.high %v184_v18, %v188_v19  ;;  %v6229_v34 = vcombine.low %v184_v18, %v188_v19 }
 0x1f7   :  { %v316_v24 = vld [vmem:[#allocation5 + $0x638] sm:$0xff] }
 0x1f8   :  { %3742 = vmatpush2.bf16.msra.mxu0 %v6277_v35  ;;  %3783 = vmatpush2.bf16.msra.mxu1 %v6405_v47  ;;  %v6358_v36 = vcombine.high %v312_v21, %v316_v24  ;;  %v432_v29 = vld [vmem:[#allocation5 + $0x9d8] sm:$0xff]  ;;  %v6357_v35 = vcombine.low %v312_v21, %v316_v24 }
 0x1f9   :  { %3743 = vmatprep.subr.bf16.mxu0 %v6270_v59  ;;  %3784 = vmatprep.subr.bf16.mxu1 %v6398_v37  ;;  %v436_v30 = vld [vmem:[#allocation5 + $0x9f8] sm:$0xff] }
 0x1fa   :  { %v560_v33 = vld [vmem:[#allocation5 + $0xdd8] sm:$0xff]  ;;  %v6478_v47 = vcombine.high %v432_v29, %v436_v30  ;;  %v6477_v44 = vcombine.low %v432_v29, %v436_v30 }
 0x1fb   :  { %v564_v58 = vld [vmem:[#allocation5 + $0xdf8] sm:$0xff] }
 0x1fc   :  { %3744 = vmatpush2.bf16.msra.mxu0 %v6269_v45  ;;  %3785 = vmatpush2.bf16.msra.mxu1 %v6397_v46  ;;  %v6606_v59 = vcombine.high %v560_v33, %v564_v58  ;;  %v424_v37 = vld [vmem:[#allocation5 + $0x998] sm:$0xff]  ;;  %v6605_v45 = vcombine.low %v560_v33, %v564_v58 }
 0x1fd   :  { %3745 = vmatprep.subr.bf16.mxu0 %v6262_v49  ;;  %3786 = vmatprep.subr.bf16.mxu1 %v6390_v50  ;;  %v428_v40 = vld [vmem:[#allocation5 + $0x9b8] sm:$0xff] }
 0x1fe   :  { %v552_v41 = vld [vmem:[#allocation5 + $0xd98] sm:$0xff]  ;;  %v6470_v46 = vcombine.high %v424_v37, %v428_v40 }
 0x1ff   :  { %v556_v42 = vld [vmem:[#allocation5 + $0xdb8] sm:$0xff] }
 0x200   :  { %3746 = vmatpush2.bf16.msra.mxu0 %v6261_v55  ;;  %3787 = vmatpush2.bf16.msra.mxu1 %v6389_v56  ;;  %v6598_v49 = vcombine.high %v552_v41, %v556_v42  ;;  %v416_v50 = vld [vmem:[#allocation5 + $0x958] sm:$0xff]  ;;  %v6597_v62 = vcombine.low %v552_v41, %v556_v42 }
 0x201   :  { %3747 = vmatprep.subr.bf16.mxu0 %v6254_v57  ;;  %3788 = vmatprep.subr.bf16.mxu1 %v6382_v61  ;;  %v420_v51 = vld [vmem:[#allocation5 + $0x978] sm:$0xff]  ;;  %v6469_v57 = vcombine.low %v424_v37, %v428_v40 }
 0x202   :  { %v544_v53 = vld [vmem:[#allocation5 + $0xd58] sm:$0xff]  ;;  %v6462_v63 = vcombine.high %v416_v50, %v420_v51  ;;  %v6461_v8 = vcombine.low %v416_v50, %v420_v51 }
 0x203   :  { %v548_v54 = vld [vmem:[#allocation5 + $0xd78] sm:$0xff] }
 0x204   :  { %3748 = vmatpush2.bf16.msra.mxu0 %v6253_v2  ;;  %3789 = vmatpush2.bf16.msra.mxu1 %v6381_v3  ;;  %v408_v2 = vld [vmem:[#allocation5 + $0x918] sm:$0xff]  ;;  %v6589_v11 = vcombine.low %v544_v53, %v548_v54 }
 0x205   :  { %3749 = vmatprep.subr.bf16.mxu0 %v6246_v4  ;;  %3790 = vmatprep.subr.bf16.mxu1 %v6374_v6  ;;  %v412_v3 = vld [vmem:[#allocation5 + $0x938] sm:$0xff] }
 0x206   :  { %v540_v4 = vld [vmem:[#allocation5 + $0xd38] sm:$0xff]  ;;  %v6454_v12 = vcombine.high %v408_v2, %v412_v3  ;;  %v6453_v19 = vcombine.low %v408_v2, %v412_v3 }
 0x207   :  { %v528_v18 = vld [vmem:[#allocation5 + $0xcd8] sm:$0xff] }
 0x208   :  { %3750 = vmatpush2.bf16.msra.mxu0 %v6245_v13  ;;  %3791 = vmatpush2.bf16.msra.mxu1 %v6373_v14  ;;  %v488_v3 = vld [vmem:[#allocation5 + $0xb98] sm:$0xff] }
 0x209   :  { %3751 = vmatprep.subr.bf16.mxu0 %v6238_v15  ;;  %3792 = vmatprep.subr.bf16.mxu1 %v6366_v17  ;;  %v400_v15 = vld [vmem:[#allocation5 + $0x8d8] sm:$0xff] }
 0x20a   :  { %v404_v17 = vld [vmem:[#allocation5 + $0x8f8] sm:$0xff] }
 0x20b   :  { %v6446_v21 = vcombine.high %v400_v15, %v404_v17  ;;  %v6445_v29 = vcombine.low %v400_v15, %v404_v17  ;;  %v612_v15 = vld [vmem:[#allocation5 + $0xf78] sm:$0xff] }
 0x20c   :  { %3752 = vmatpush2.bf16.msra.mxu0 %v6237_v25  ;;  %3793 = vmatpush2.bf16.msra.mxu1 %v6365_v26  ;;  %v392_v25 = vld [vmem:[#allocation5 + $0x898] sm:$0xff] }
 0x20d   :  { %3753 = vmatprep.subr.bf16.mxu0 %v6230_v27  ;;  %3794 = vmatprep.subr.bf16.mxu1 %v6358_v36  ;;  %v396_v26 = vld [vmem:[#allocation5 + $0x8b8] sm:$0xff] }
 0x20e   :  { %v520_v27 = vld [vmem:[#allocation5 + $0xc98] sm:$0xff]  ;;  %v6438_v33 = vcombine.high %v392_v25, %v396_v26  ;;  %v6437_v37 = vcombine.low %v392_v25, %v396_v26 }
 0x20f   :  { %v524_v36 = vld [vmem:[#allocation5 + $0xcb8] sm:$0xff] }
 0x210   :  { %3754 = vmatpush2.bf16.msra.mxu0 %v6229_v34  ;;  %3795 = vmatpush2.bf16.msra.mxu1 %v6357_v35  ;;  %v6566_v58 = vcombine.high %v520_v27, %v524_v36  ;;  %v384_v34 = vld [vmem:[#allocation5 + $0x858] sm:$0xff]  ;;  %v6565_v40 = vcombine.low %v520_v27, %v524_v36 }
 0x211   :  { %3805 = vmatprep.subr.bf16.mxu0 %v6478_v47  ;;  %3846 = vmatprep.subr.bf16.mxu1 %v6606_v59  ;;  %v388_v35 = vld [vmem:[#allocation5 + $0x878] sm:$0xff] }
 0x212   :  { %v512_v47 = vld [vmem:[#allocation5 + $0xc58] sm:$0xff]  ;;  %v6430_v41 = vcombine.high %v384_v34, %v388_v35  ;;  %v6429_v50 = vcombine.low %v384_v34, %v388_v35 }
 0x213   :  { %v3511_v52 = vpop.f32.mrf.mxu0  ;;  %3756 = vmatmul.mubr.bf16.vlgmr.msra.gmra.mxu0 %v7660_v16  ;;  %v3552_v56 = vpop.f32.mrf.mxu1  ;;  %3797 = vmatmul.mubr.bf16.vlgmr.msra.gmra.mxu1 %v7662_v20  ;;  %v6590_v16 = vcombine.high %v544_v53, %v548_v54  ;;  %v536_v20 = vld [vmem:[#allocation5 + $0xd18] sm:$0xff] }
 0x214   :  { %v3512_v55 = vadd.f32 %v3511_v52, %v7724_v7  ;;  %3806 = vmatpush1.bf16.msra.mxu0 %v6477_v44  ;;  %3847 = vmatpush1.bf16.msra.mxu1 %v6605_v45  ;;  %v6582_v14 = vcombine.high %v536_v20, %v540_v4  ;;  %v516_v59 = vld [vmem:[#allocation5 + $0xc78] sm:$0xff] }
 0x215   :  { %v7733_v61 = vpop.f32.mrf.mxu0  ;;  %3807 = vmatprep.subr.bf16.mxu0 %v6470_v46  ;;  %v7737_v1 = vpop.f32.mrf.mxu1  ;;  %3848 = vmatprep.subr.bf16.mxu1 %v6598_v49  ;;  %v6558_v42 = vcombine.high %v512_v47, %v516_v59  ;;  %v376_v44 = vld [vmem:[#allocation5 + $0x818] sm:$0xff]  ;;  %v6557_v51 = vcombine.low %v512_v47, %v516_v59 }
 0x216   :  { %v7735_v0 = vadd.f32 %v3552_v56, %v3512_v55  ;;  %3837 = vmatprep.mubr.bf16.mxu0 %v7664_v28  ;;  %3878 = vmatprep.mubr.bf16.mxu1 %v7667_v31  ;;  %v532_v28 = vld [vmem:[#allocation5 + $0xcf8] sm:$0xff]  ;;  %v6581_v31 = vcombine.low %v536_v20, %v540_v4 }
 0x217   :  { %v3515_v7 = vpop.f32.mrf.mxu0  ;;  %v3556_v6 = vpop.f32.mrf.mxu1  ;;  %v6574_v24 = vcombine.high %v528_v18, %v532_v28  ;;  %v6573_v30 = vcombine.low %v528_v18, %v532_v28  ;;  %v380_v45 = vld [vmem:[#allocation5 + $0x838] sm:$0xff] }
 0x218   :  { %3808 = vmatpush1.bf16.msra.mxu0 %v6469_v57  ;;  %3849 = vmatpush1.bf16.msra.mxu1 %v6597_v62  ;;  %v504_v46 = vld [vmem:[#allocation5 + $0xc18] sm:$0xff]  ;;  %v6422_v52 = vcombine.high %v376_v44, %v380_v45  ;;  %v6421_v62 = vcombine.low %v376_v44, %v380_v45 }
 0x219   :  { %v3516_v9 = vpop.f32.mrf.mxu0  ;;  %3809 = vmatprep.subr.bf16.mxu0 %v6462_v63  ;;  %v3557_v13 = vpop.f32.mrf.mxu1  ;;  %3850 = vmatprep.subr.bf16.mxu1 %v6590_v16  ;;  %v508_v49 = vld [vmem:[#allocation5 + $0xc38] sm:$0xff] }
 0x21a   :  { %v6550_v53 = vcombine.high %v504_v46, %v508_v49  ;;  %v496_v54 = vld [vmem:[#allocation5 + $0xbd8] sm:$0xff]  ;;  %v6549_v63 = vcombine.low %v504_v46, %v508_v49 }
 0x21b   :  { %v500_v55 = vld [vmem:[#allocation5 + $0xbf8] sm:$0xff] }
 0x21c   :  { %3810 = vmatpush1.bf16.msra.mxu0 %v6461_v8  ;;  %3851 = vmatpush1.bf16.msra.mxu1 %v6589_v11  ;;  %v624_v56 = vld [vmem:[#allocation5 + $0xfd8] sm:$0xff]  ;;  %v6542_v16 = vcombine.high %v496_v54, %v500_v55  ;;  %v6541_v6 = vcombine.low %v496_v54, %v500_v55 }
 0x21d   :  { %3811 = vmatprep.subr.bf16.mxu0 %v6454_v12  ;;  %3852 = vmatprep.subr.bf16.mxu1 %v6582_v14  ;;  %v628_v57 = vld [vmem:[#allocation5 + $0xff8] sm:$0xff] }
 0x21e   :  { %v6670_v2 = vcombine.high %v624_v56, %v628_v57  ;;  %v492_v7 = vld [vmem:[#allocation5 + $0xbb8] sm:$0xff]  ;;  %v6669_v8 = vcombine.low %v624_v56, %v628_v57 }
 0x21f   :  { %v616_v20 = vld [vmem:[#allocation5 + $0xf98] sm:$0xff]  ;;  %v6534_v9 = vcombine.high %v488_v3, %v492_v7  ;;  %v6533_v17 = vcombine.low %v488_v3, %v492_v7  ;;  %v3514_v7 = vadd.f32 %v7733_v61, %v7728_v23  ;;  %v3888_v61 = vmax.f32 %v7712_v32, 0.0 }
 0x220   :  { %3812 = vmatpush1.bf16.msra.mxu0 %v6453_v19  ;;  %3853 = vmatpush1.bf16.msra.mxu1 %v6581_v31  ;;  %v620_v4 = vld [vmem:[#allocation5 + $0xfb8] sm:$0xff] }
 0x221   :  { %3813 = vmatprep.subr.bf16.mxu0 %v6446_v21  ;;  %3854 = vmatprep.subr.bf16.mxu1 %v6574_v24  ;;  %v6662_v11 = vcombine.high %v616_v20, %v620_v4  ;;  %v480_v12 = vld [vmem:[#allocation5 + $0xb58] sm:$0xff]  ;;  %v6661_v18 = vcombine.low %v616_v20, %v620_v4 }
 0x222   :  { %v484_v13 = vld [vmem:[#allocation5 + $0xb78] sm:$0xff] }
 0x223   :  { %v608_v14 = vld [vmem:[#allocation5 + $0xf58] sm:$0xff]  ;;  %v6526_v28 = vcombine.high %v480_v12, %v484_v13  ;;  %v6525_v26 = vcombine.low %v480_v12, %v484_v13  ;;  %v649_v12 = vsub.s32 4, %v7684_v60 }
 0x224   :  { %3814 = vmatpush1.bf16.msra.mxu0 %v6445_v29  ;;  %3855 = vmatpush1.bf16.msra.mxu1 %v6573_v30  ;;  %v6654_v19 = vcombine.high %v608_v14, %v612_v15  ;;  %v472_v31 = vld [vmem:[#allocation5 + $0xb18] sm:$0xff]  ;;  %v6653_v27 = vcombine.low %v608_v14, %v612_v15 }
 0x225   :  { %3815 = vmatprep.subr.bf16.mxu0 %v6438_v33  ;;  %3856 = vmatprep.subr.bf16.mxu1 %v6566_v58  ;;  %v476_v21 = vld [vmem:[#allocation5 + $0xb38] sm:$0xff] }
 0x226   :  { %v600_v24 = vld [vmem:[#allocation5 + $0xf18] sm:$0xff]  ;;  %v6518_v36 = vcombine.high %v472_v31, %v476_v21  ;;  %v6517_v35 = vcombine.low %v472_v31, %v476_v21  ;;  %v7749_v31 = vpack.c.bf16 %v3888_v61, %v3888_v61 }
 0x227   :  { %v604_v25 = vld [vmem:[#allocation5 + $0xf38] sm:$0xff] }
 0x228   :  { %3816 = vmatpush1.bf16.msra.mxu0 %v6437_v37  ;;  %3857 = vmatpush1.bf16.msra.mxu1 %v6565_v40  ;;  %v6646_v29 = vcombine.high %v600_v24, %v604_v25  ;;  %v464_v30 = vld [vmem:[#allocation5 + $0xad8] sm:$0xff]  ;;  %v6645_v47 = vcombine.low %v600_v24, %v604_v25 }
 0x229   :  { %3817 = vmatprep.subr.bf16.mxu0 %v6430_v41  ;;  %3858 = vmatprep.subr.bf16.mxu1 %v6558_v42  ;;  %v468_v33 = vld [vmem:[#allocation5 + $0xaf8] sm:$0xff] }
 0x22a   :  { %v592_v58 = vld [vmem:[#allocation5 + $0xed8] sm:$0xff]  ;;  %v6510_v59 = vcombine.high %v464_v30, %v468_v33  ;;  %v6509_v45 = vcombine.low %v464_v30, %v468_v33 }
 0x22b   :  { %v596_v34 = vld [vmem:[#allocation5 + $0xef8] sm:$0xff] }
 0x22c   :  { %3818 = vmatpush1.bf16.msra.mxu0 %v6429_v50  ;;  %3859 = vmatpush1.bf16.msra.mxu1 %v6557_v51  ;;  %v6638_v37 = vcombine.high %v592_v58, %v596_v34  ;;  %v456_v40 = vld [vmem:[#allocation5 + $0xa98] sm:$0xff]  ;;  %v6637_v46 = vcombine.low %v592_v58, %v596_v34 }
 0x22d   :  { %3819 = vmatprep.subr.bf16.mxu0 %v6422_v52  ;;  %3860 = vmatprep.subr.bf16.mxu1 %v6550_v53  ;;  %v460_v41 = vld [vmem:[#allocation5 + $0xab8] sm:$0xff] }
 0x22e   :  { %v584_v42 = vld [vmem:[#allocation5 + $0xe98] sm:$0xff]  ;;  %v6502_v49 = vcombine.high %v456_v40, %v460_v41  ;;  %v6501_v55 = vcombine.low %v456_v40, %v460_v41 }
 0x22f   :  { %v588_v44 = vld [vmem:[#allocation5 + $0xeb8] sm:$0xff] }
 0x230   :  { %3820 = vmatpush1.bf16.msra.mxu0 %v6421_v62  ;;  %3861 = vmatpush1.bf16.msra.mxu1 %v6549_v63  ;;  %v6630_v50 = vcombine.high %v584_v42, %v588_v44  ;;  %v448_v51 = vld [vmem:[#allocation5 + $0xa58] sm:$0xff]  ;;  %v6629_v56 = vcombine.low %v584_v42, %v588_v44 }
 0x231   :  { %3821 = vmatprep.subr.bf16.mxu0 %v6542_v16  ;;  %3862 = vmatprep.subr.bf16.mxu1 %v6670_v2  ;;  %v452_v52 = vld [vmem:[#allocation5 + $0xa78] sm:$0xff] }
 0x232   :  { %v576_v53 = vld [vmem:[#allocation5 + $0xe58] sm:$0xff]  ;;  %v6494_v57 = vcombine.high %v448_v51, %v452_v52  ;;  %v6493_v20 = vcombine.low %v448_v51, %v452_v52 }
 0x233   :  { %v580_v54 = vld [vmem:[#allocation5 + $0xe78] sm:$0xff] }
 0x234   :  { %3822 = vmatpush2.bf16.msra.mxu0 %v6541_v6  ;;  %3863 = vmatpush2.bf16.msra.mxu1 %v6669_v8  ;;  %v6622_v62 = vcombine.high %v576_v53, %v580_v54  ;;  %v440_v63 = vld [vmem:[#allocation5 + $0xa18] sm:$0xff]  ;;  %v6621_v4 = vcombine.low %v576_v53, %v580_v54 }
 0x235   :  { %3823 = vmatprep.subr.bf16.mxu0 %v6534_v9  ;;  %3864 = vmatprep.subr.bf16.mxu1 %v6662_v11  ;;  %v444_v16 = vld [vmem:[#allocation5 + $0xa38] sm:$0xff]  ;;  %v3555_v9 = vadd.f32 %v7737_v1, %v3514_v7 }
 0x236   :  { %v568_v2 = vld [vmem:[#allocation5 + $0xe18] sm:$0xff]  ;;  %v6486_v6 = vcombine.high %v440_v63, %v444_v16  ;;  %v6485_v11 = vcombine.low %v440_v63, %v444_v16 }
 0x237   :  { %v572_v3 = vld [vmem:[#allocation5 + $0xe38] sm:$0xff]  ;;  %v3890_v15 = vmax.f32 %v3555_v9, 0.0 }
 0x238   :  { %3824 = vmatpush2.bf16.msra.mxu0 %v6533_v17  ;;  %3865 = vmatpush2.bf16.msra.mxu1 %v6661_v18  ;;  %v6614_v8 = vcombine.high %v568_v2, %v572_v3  ;;  %v6613_v13 = vcombine.low %v568_v2, %v572_v3  ;;  %v7019_v14 = vld [vmem:[#allocation8 + $0xe4] ss:$16 sps:$4 sm:$0xff]   ;;  %v7746_v17 = vld [vmem:[#allocation7] sm:$0xff]  ;;  %v7020_v1 = vld [vmem:[#allocation8 + $0x2e0] ss:$16 sps:$4 sm:$0xff]  }
 0x239   :  { %3825 = vmatprep.subr.bf16.mxu0 %v6526_v28  ;;  %3866 = vmatprep.subr.bf16.mxu1 %v6654_v19  ;;  %v7022_v23 = vld [vmem:[#allocation8 + $0x2e4] ss:$16 sps:$4 sm:$0xff]   ;;  %v650_v18 = vrot.slane %v7746_v17, %v649_v12  ;;  %v7017_v28 = vld [vmem:[#allocation8 + $0xe0] ss:$16 sps:$4 sm:$0xff]   ;;  %v7752_v25 = vpack.c.bf16 %v3890_v15, %v3890_v15 }
 0x23a   :  { %v7025_v19 = vld [vmem:[#allocation8 + $0xc4] ss:$16 sps:$4 sm:$0xff]   ;;  %v7035_v42 = vld [vmem:[#allocation8 + $0x80] ss:$16 sps:$4 sm:$0xff]  }
 0x23b   :  { %v7028_v24 = vld [vmem:[#allocation8 + $0x2c4] ss:$16 sps:$4 sm:$0xff]   ;;  %v7038_v44 = vld [vmem:[#allocation8 + $0x280] ss:$16 sps:$4 sm:$0xff]  }
 0x23c   :  { %3826 = vmatpush2.bf16.msra.mxu0 %v6525_v26  ;;  %3867 = vmatpush2.bf16.msra.mxu1 %v6653_v27  ;;  %v7023_v27 = vld [vmem:[#allocation8 + $0xc0] ss:$16 sps:$4 sm:$0xff]   ;;  %v7031_v30 = vld [vmem:[#allocation8 + $0xa4] ss:$16 sps:$4 sm:$0xff]  }
 0x23d   :  { %3827 = vmatprep.subr.bf16.mxu0 %v6518_v36  ;;  %3868 = vmatprep.subr.bf16.mxu1 %v6646_v29  ;;  %v7026_v29 = vld [vmem:[#allocation8 + $0x2c0] ss:$16 sps:$4 sm:$0xff]   ;;  %v7034_v58 = vld [vmem:[#allocation8 + $0x2a4] ss:$16 sps:$4 sm:$0xff]  }
 0x23e   :  { %v7040_v41 = vld [vmem:[#allocation8 + $0x284] ss:$16 sps:$4 sm:$0xff]   ;;  %v7047_v53 = vld [vmem:[#allocation8 + $0x40] ss:$16 sps:$4 sm:$0xff]  }
 0x23f   :  { %v7049_v51 = vld [vmem:[#allocation8 + $0x44] ss:$16 sps:$4 sm:$0xff]   ;;  %v7050_v54 = vld [vmem:[#allocation8 + $0x240] ss:$16 sps:$4 sm:$0xff]  }
 0x240   :  { %3828 = vmatpush2.bf16.msra.mxu0 %v6517_v35  ;;  %3869 = vmatpush2.bf16.msra.mxu1 %v6645_v47  ;;  %v7029_v35 = vld [vmem:[#allocation8 + $0xa0] ss:$16 sps:$4 sm:$0xff]   ;;  %v7052_v52 = vld [vmem:[#allocation8 + $0x244] ss:$16 sps:$4 sm:$0xff]  }
 0x241   :  { %3829 = vmatprep.subr.bf16.mxu0 %v6510_v59  ;;  %3870 = vmatprep.subr.bf16.mxu1 %v6638_v37  ;;  %v7032_v59 = vld [vmem:[#allocation8 + $0x2a0] ss:$16 sps:$4 sm:$0xff]   ;;  %v7037_v37 = vld [vmem:[#allocation8 + $0x84] ss:$16 sps:$4 sm:$0xff]  }
 0x242   :  { %v7061_v63 = vld [vmem:[#allocation8 + $0x4] ss:$16 sps:$4 sm:$0xff]   ;;  %v7059_v2 = vld [vmem:[#allocation8] ss:$16 sps:$4 sm:$0xff]  }
 0x243   :  { %v7064_v16 = vld [vmem:[#allocation8 + $0x204] ss:$16 sps:$4 sm:$0xff]   ;;  %v7062_v3 = vld [vmem:[#allocation8 + $0x200] ss:$16 sps:$4 sm:$0xff]  }
 0x244   :  { %3830 = vmatpush2.bf16.msra.mxu0 %v6509_v45  ;;  %3871 = vmatpush2.bf16.msra.mxu1 %v6637_v46  ;;  %v7043_v45 = vld [vmem:[#allocation8 + $0x64] ss:$16 sps:$4 sm:$0xff]   ;;  %v7074_v12 = vld [vmem:[#allocation8 + $0x3c0] ss:$16 sps:$4 sm:$0xff]  }
 0x245   :  { %3831 = vmatprep.subr.bf16.mxu0 %v6502_v49  ;;  %3872 = vmatprep.subr.bf16.mxu1 %v6630_v50  ;;  %v7046_v46 = vld [vmem:[#allocation8 + $0x264] ss:$16 sps:$4 sm:$0xff]   ;;  %v7041_v49 = vld [vmem:[#allocation8 + $0x60] ss:$16 sps:$4 sm:$0xff]  }
 0x246   :  { %v7044_v50 = vld [vmem:[#allocation8 + $0x260] ss:$16 sps:$4 sm:$0xff]   ;;  %v7067_v7 = vld [vmem:[#allocation8 + $0x1e4] ss:$16 sps:$4 sm:$0xff]  }
 0x247   :  { %v7076_v9 = vld [vmem:[#allocation8 + $0x3c4] ss:$16 sps:$4 sm:$0xff]   ;;  %v7080_v61 = vld [vmem:[#allocation8 + $0x3a0] ss:$16 sps:$4 sm:$0xff]  }
 0x248   :  { %3832 = vmatpush2.bf16.msra.mxu0 %v6501_v55  ;;  %3873 = vmatpush2.bf16.msra.mxu1 %v6629_v56  ;;  %v7055_v55 = vld [vmem:[#allocation8 + $0x24] ss:$16 sps:$4 sm:$0xff]  }
 0x249   :  { %3833 = vmatprep.subr.bf16.mxu0 %v6494_v57  ;;  %3874 = vmatprep.subr.bf16.mxu1 %v6622_v62  ;;  %v7058_v56 = vld [vmem:[#allocation8 + $0x224] ss:$16 sps:$4 sm:$0xff]   ;;  %v7053_v57 = vld [vmem:[#allocation8 + $0x20] ss:$16 sps:$4 sm:$0xff]  }
 0x24a   :  { %v7056_v62 = vld [vmem:[#allocation8 + $0x220] ss:$16 sps:$4 sm:$0xff]   ;;  %v7085_v15 = vld [vmem:[#allocation8 + $0x184] ss:$16 sps:$4 sm:$0xff]  }
 0x24c   :  { %3834 = vmatpush2.bf16.msra.mxu0 %v6493_v20  ;;  %3875 = vmatpush2.bf16.msra.mxu1 %v6621_v4  ;;  %v7070_v20 = vld [vmem:[#allocation8 + $0x3e4] ss:$16 sps:$4 sm:$0xff]   ;;  %v7065_v4 = vld [vmem:[#allocation8 + $0x1e0] ss:$16 sps:$4 sm:$0xff]  }
 0x24d   :  { %3835 = vmatprep.subr.bf16.mxu0 %v6486_v6  ;;  %3876 = vmatprep.subr.bf16.mxu1 %v6614_v8  ;;  %v7068_v6 = vld [vmem:[#allocation8 + $0x3e0] ss:$16 sps:$4 sm:$0xff]   ;;  %v7073_v8 = vld [vmem:[#allocation8 + $0x1c4] ss:$16 sps:$4 sm:$0xff]  }
 0x250   :  { %3836 = vmatpush2.bf16.msra.mxu0 %v6485_v11  ;;  %3877 = vmatpush2.bf16.msra.mxu1 %v6613_v13  ;;  %v7071_v11 = vld [vmem:[#allocation8 + $0x1c0] ss:$16 sps:$4 sm:$0xff]   ;;  %v7079_v13 = vld [vmem:[#allocation8 + $0x1a4] ss:$16 sps:$4 sm:$0xff]  }
 0x251   :  { %5461 = vmatprep.subr.bf16.mxu0 %v7019_v14  ;;  %5502 = vmatprep.subr.bf16.mxu1 %v7022_v23  ;;  %v7082_v14 = vld [vmem:[#allocation8 + $0x3a4] ss:$16 sps:$4 sm:$0xff]   ;;  %v7077_v23 = vld [vmem:[#allocation8 + $0x1a0] ss:$16 sps:$4 sm:$0xff]  }
 0x253   :  { %v3593_v21 = vpop.f32.mrf.mxu0  ;;  %3838 = vmatmul.mubr.bf16.vlgmr.msra.gmra.mxu0 %v7672_v38  ;;  %v3634_v26 = vpop.f32.mrf.mxu1  ;;  %3879 = vmatmul.mubr.bf16.vlgmr.msra.gmra.mxu1 %v7674_v39 }
 0x254   :  { %v3594_v32 = vadd.f32 %v3593_v21, %v650_v18  ;;  %5462 = vmatpush1.bf16.msra.mxu0 %v7017_v28  ;;  %5493 = vmatprep.mubr.bf16.mxu0 %v7749_v31  ;;  %v7088_v18 = vld [vmem:[#allocation8 + $0x384] ss:$16 sps:$4 sm:$0xff]   ;;  %v7083_v28 = vld [vmem:[#allocation8 + $0x180] ss:$16 sps:$4 sm:$0xff]  }
 0x255   :  { %5503 = vmatpush1.bf16.msra.mxu1 %v7020_v1  ;;  %v7756_v36 = vpop.f32.mrf.mxu0  ;;  %5534 = vmatprep.mubr.bf16.mxu1 %v7752_v25  ;;  %v7761_v38 = vpop.f32.mrf.mxu1  ;;  %v7086_v1 = vld [vmem:[#allocation8 + $0x380] ss:$16 sps:$4 sm:$0xff]   ;;  %v7094_v21 = vld [vmem:[#allocation8 + $0x364] ss:$16 sps:$4 sm:$0xff]  }
 0x256   :  { %v7758_v33 = vadd.f32 %v3634_v26, %v3594_v32  ;;  %5463 = vmatprep.subr.bf16.mxu0 %v7025_v19  ;;  %5504 = vmatprep.subr.bf16.mxu1 %v7028_v24  ;;  %v7091_v19 = vld [vmem:[#allocation8 + $0x164] ss:$16 sps:$4 sm:$0xff]   ;;  %v7089_v24 = vld [vmem:[#allocation8 + $0x160] ss:$16 sps:$4 sm:$0xff]  }
 0x257   :  { %v3597_v34 = vpop.f32.mrf.mxu0  ;;  %v3638_v39 = vpop.f32.mrf.mxu1  ;;  %v7092_v32 = vld [vmem:[#allocation8 + $0x360] ss:$16 sps:$4 sm:$0xff]   ;;  %v7097_v26 = vld [vmem:[#allocation8 + $0x144] ss:$16 sps:$4 sm:$0xff]  }
 0x258   :  { %5464 = vmatpush1.bf16.msra.mxu0 %v7023_v27  ;;  %v7100_v27 = vld [vmem:[#allocation8 + $0x344] ss:$16 sps:$4 sm:$0xff]   ;;  %v653_v39 = vsub.s32 5, %v7684_v60 }
 0x259   :  { %5505 = vmatpush1.bf16.msra.mxu1 %v7026_v29  ;;  %v3598_v47 = vpop.f32.mrf.mxu0  ;;  %5465 = vmatprep.subr.bf16.mxu0 %v7031_v30  ;;  %v3639_v40 = vpop.f32.mrf.mxu1  ;;  %v7095_v29 = vld [vmem:[#allocation8 + $0x140] ss:$16 sps:$4 sm:$0xff]   ;;  %v7106_v34 = vld [vmem:[#allocation8 + $0x324] ss:$16 sps:$4 sm:$0xff]  }
 0x25a   :  { %5506 = vmatprep.subr.bf16.mxu1 %v7034_v58  ;;  %v7098_v30 = vld [vmem:[#allocation8 + $0x340] ss:$16 sps:$4 sm:$0xff]   ;;  %v7103_v58 = vld [vmem:[#allocation8 + $0x124] ss:$16 sps:$4 sm:$0xff]   ;;  %v654_v40 = vrot.slane %v7746_v17, %v653_v39 }
 0x25b   :  { %v7104_v47 = vld [vmem:[#allocation8 + $0x320] ss:$16 sps:$4 sm:$0xff]   ;;  %v7214_v39 = vld [vmem:[#allocation8 + $0x604] ss:$16 sps:$4 sm:$0xff]  }
 0x25c   :  { %5466 = vmatpush1.bf16.msra.mxu0 %v7029_v35  ;;  %v7101_v35 = vld [vmem:[#allocation8 + $0x120] ss:$16 sps:$4 sm:$0xff]  }
 0x25d   :  { %5507 = vmatpush1.bf16.msra.mxu1 %v7032_v59  ;;  %5467 = vmatprep.subr.bf16.mxu0 %v7037_v37  ;;  %v7109_v59 = vld [vmem:[#allocation8 + $0x104] ss:$16 sps:$4 sm:$0xff]  }
 0x25e   :  { %5508 = vmatprep.subr.bf16.mxu1 %v7040_v41  ;;  %v7112_v37 = vld [vmem:[#allocation8 + $0x304] ss:$16 sps:$4 sm:$0xff]   ;;  %v7107_v41 = vld [vmem:[#allocation8 + $0x100] ss:$16 sps:$4 sm:$0xff]  }
 0x260   :  { %5468 = vmatpush1.bf16.msra.mxu0 %v7035_v42  ;;  %v3887_v42 = vmax.f32 %v7707_v22, 0.0  ;;  %v7178_v22 = vld [vmem:[#allocation8 + $0x6c4] ss:$16 sps:$4 sm:$0xff]  }
 0x261   :  { %5509 = vmatpush1.bf16.msra.mxu1 %v7038_v44  ;;  %5469 = vmatprep.subr.bf16.mxu0 %v7043_v45  ;;  %v7110_v44 = vld [vmem:[#allocation8 + $0x300] ss:$16 sps:$4 sm:$0xff]   ;;  %v7115_v45 = vld [vmem:[#allocation8 + $0x4e4] ss:$16 sps:$4 sm:$0xff]  }
 0x262   :  { %5510 = vmatprep.subr.bf16.mxu1 %v7046_v46  ;;  %v3889_v46 = vmax.f32 %v7735_v0, 0.0 }
 0x264   :  { %5470 = vmatpush1.bf16.msra.mxu0 %v7041_v49  ;;  %v7172_v49 = vld [vmem:[#allocation8 + $0x6e4] ss:$16 sps:$4 sm:$0xff]  }
 0x265   :  { %5511 = vmatpush1.bf16.msra.mxu1 %v7044_v50  ;;  %5471 = vmatprep.subr.bf16.mxu0 %v7049_v51  ;;  %v3596_v50 = vadd.f32 %v7756_v36, %v654_v40  ;;  %v7113_v51 = vld [vmem:[#allocation8 + $0x4e0] ss:$16 sps:$4 sm:$0xff]  }
 0x266   :  { %5512 = vmatprep.subr.bf16.mxu1 %v7052_v52  ;;  %v7768_v52 = vpack.c.bf16 %v3887_v42, %v3887_v42  ;;  %v7116_v36 = vld [vmem:[#allocation8 + $0x4c0] ss:$16 sps:$4 sm:$0xff]  }
 0x267   :  { %v3637_v0 = vadd.f32 %v7761_v38, %v3596_v50  ;;  %v7119_v38 = vld [vmem:[#allocation8 + $0x4a0] ss:$16 sps:$4 sm:$0xff]   ;;  %v7232_v50 = vld [vmem:[#allocation8 + $0x7a4] ss:$16 sps:$4 sm:$0xff]  }
 0x268   :  { %5472 = vmatpush1.bf16.msra.mxu0 %v7047_v53  ;;  %v7118_v53 = vld [vmem:[#allocation8 + $0x4c4] ss:$16 sps:$4 sm:$0xff]   ;;  %v7137_v40 = vld [vmem:[#allocation8 + $0x5e0] ss:$16 sps:$4 sm:$0xff]  }
 0x269   :  { %5513 = vmatpush1.bf16.msra.mxu1 %v7050_v54  ;;  %5473 = vmatprep.subr.bf16.mxu0 %v7055_v55  ;;  %v7170_v54 = vld [vmem:[#allocation8 + $0x6e0] ss:$16 sps:$4 sm:$0xff]   ;;  %v7770_v55 = vpack.c.bf16 %v3889_v46, %v3889_v46  ;;  %v7145_v46 = vld [vmem:[#allocation8 + $0x5a4] ss:$16 sps:$4 sm:$0xff]  }
 0x26a   :  { %5514 = vmatprep.subr.bf16.mxu1 %v7058_v56  ;;  %v7218_v42 = vld [vmem:[#allocation8 + $0x7e0] ss:$16 sps:$4 sm:$0xff]  }
 0x26c   :  { %5474 = vmatpush1.bf16.msra.mxu0 %v7053_v57 }
 0x26d   :  { %5515 = vmatpush1.bf16.msra.mxu1 %v7056_v62  ;;  %5475 = vmatprep.subr.bf16.mxu0 %v7061_v63  ;;  %v7121_v63 = vld [vmem:[#allocation8 + $0x4a4] ss:$16 sps:$4 sm:$0xff]  }
 0x26e   :  { %5516 = vmatprep.subr.bf16.mxu1 %v7064_v16  ;;  %v7176_v16 = vld [vmem:[#allocation8 + $0x6c0] ss:$16 sps:$4 sm:$0xff]  }
 0x270   :  { %5476 = vmatpush1.bf16.msra.mxu0 %v7059_v2 }
 0x271   :  { %5517 = vmatpush1.bf16.msra.mxu1 %v7062_v3  ;;  %5477 = vmatprep.subr.bf16.mxu0 %v7067_v7  ;;  %v7184_v7 = vld [vmem:[#allocation8 + $0x6a4] ss:$16 sps:$4 sm:$0xff]  }
 0x272   :  { %5518 = vmatprep.subr.bf16.mxu1 %v7070_v20 }
 0x274   :  { %5478 = vmatpush2.bf16.msra.mxu0 %v7065_v4 }
 0x275   :  { %5519 = vmatpush2.bf16.msra.mxu1 %v7068_v6  ;;  %5479 = vmatprep.subr.bf16.mxu0 %v7073_v8 }
 0x276   :  { %5520 = vmatprep.subr.bf16.mxu1 %v7076_v9  ;;  %v7124_v9 = vld [vmem:[#allocation8 + $0x484] ss:$16 sps:$4 sm:$0xff]  }
 0x278   :  { %5480 = vmatpush2.bf16.msra.mxu0 %v7071_v11  ;;  %v7182_v11 = vld [vmem:[#allocation8 + $0x6a0] ss:$16 sps:$4 sm:$0xff]  }
 0x279   :  { %5521 = vmatpush2.bf16.msra.mxu1 %v7074_v12  ;;  %5481 = vmatprep.subr.bf16.mxu0 %v7079_v13 }
 0x27a   :  { %5522 = vmatprep.subr.bf16.mxu1 %v7082_v14  ;;  %v7190_v14 = vld [vmem:[#allocation8 + $0x684] ss:$16 sps:$4 sm:$0xff]  }
 0x27c   :  { %5482 = vmatpush2.bf16.msra.mxu0 %v7077_v23 }
 0x27d   :  { %5523 = vmatpush2.bf16.msra.mxu1 %v7080_v61  ;;  %5483 = vmatprep.subr.bf16.mxu0 %v7085_v15  ;;  %v7122_v61 = vld [vmem:[#allocation8 + $0x480] ss:$16 sps:$4 sm:$0xff]   ;;  %v7127_v15 = vld [vmem:[#allocation8 + $0x464] ss:$16 sps:$4 sm:$0xff]  }
 0x27e   :  { %5524 = vmatprep.subr.bf16.mxu1 %v7088_v18  ;;  %v7188_v18 = vld [vmem:[#allocation8 + $0x680] ss:$16 sps:$4 sm:$0xff]  }
 0x280   :  { %5484 = vmatpush2.bf16.msra.mxu0 %v7083_v28  ;;  %v7196_v28 = vld [vmem:[#allocation8 + $0x664] ss:$16 sps:$4 sm:$0xff]  }
 0x281   :  { %5525 = vmatpush2.bf16.msra.mxu1 %v7086_v1  ;;  %5485 = vmatprep.subr.bf16.mxu0 %v7091_v19  ;;  %v7125_v1 = vld [vmem:[#allocation8 + $0x460] ss:$16 sps:$4 sm:$0xff]   ;;  %v7130_v19 = vld [vmem:[#allocation8 + $0x444] ss:$16 sps:$4 sm:$0xff]  }
 0x282   :  { %5526 = vmatprep.subr.bf16.mxu1 %v7094_v21  ;;  %v7194_v21 = vld [vmem:[#allocation8 + $0x660] ss:$16 sps:$4 sm:$0xff]  }
 0x284   :  { %5486 = vmatpush2.bf16.msra.mxu0 %v7089_v24  ;;  %v7202_v24 = vld [vmem:[#allocation8 + $0x644] ss:$16 sps:$4 sm:$0xff]  }
 0x285   :  { %5527 = vmatpush2.bf16.msra.mxu1 %v7092_v32  ;;  %5487 = vmatprep.subr.bf16.mxu0 %v7097_v26  ;;  %v7128_v32 = vld [vmem:[#allocation8 + $0x440] ss:$16 sps:$4 sm:$0xff]   ;;  %v7133_v26 = vld [vmem:[#allocation8 + $0x424] ss:$16 sps:$4 sm:$0xff]  }
 0x286   :  { %5528 = vmatprep.subr.bf16.mxu1 %v7100_v27  ;;  %v7200_v27 = vld [vmem:[#allocation8 + $0x640] ss:$16 sps:$4 sm:$0xff]  }
 0x288   :  { %5488 = vmatpush2.bf16.msra.mxu0 %v7095_v29  ;;  %v7208_v29 = vld [vmem:[#allocation8 + $0x624] ss:$16 sps:$4 sm:$0xff]  }
 0x289   :  { %5529 = vmatpush2.bf16.msra.mxu1 %v7098_v30  ;;  %5489 = vmatprep.subr.bf16.mxu0 %v7103_v58  ;;  %v7131_v30 = vld [vmem:[#allocation8 + $0x420] ss:$16 sps:$4 sm:$0xff]   ;;  %v7136_v58 = vld [vmem:[#allocation8 + $0x404] ss:$16 sps:$4 sm:$0xff]  }
 0x28a   :  { %5530 = vmatprep.subr.bf16.mxu1 %v7106_v34  ;;  %v7206_v34 = vld [vmem:[#allocation8 + $0x620] ss:$16 sps:$4 sm:$0xff]  }
 0x28c   :  { %5490 = vmatpush2.bf16.msra.mxu0 %v7101_v35  ;;  %v7134_v35 = vld [vmem:[#allocation8 + $0x400] ss:$16 sps:$4 sm:$0xff]  }
 0x28d   :  { %5531 = vmatpush2.bf16.msra.mxu1 %v7104_v47  ;;  %5491 = vmatprep.subr.bf16.mxu0 %v7109_v59  ;;  %v7139_v47 = vld [vmem:[#allocation8 + $0x5e4] ss:$16 sps:$4 sm:$0xff]   ;;  %v7212_v59 = vld [vmem:[#allocation8 + $0x600] ss:$16 sps:$4 sm:$0xff]  }
 0x28e   :  { %5532 = vmatprep.subr.bf16.mxu1 %v7112_v37  ;;  %v7220_v37 = vld [vmem:[#allocation8 + $0x7e4] ss:$16 sps:$4 sm:$0xff]  }
 0x290   :  { %5492 = vmatpush2.bf16.msra.mxu0 %v7107_v41  ;;  %v7142_v41 = vld [vmem:[#allocation8 + $0x5c4] ss:$16 sps:$4 sm:$0xff]  }
 0x291   :  { %5533 = vmatpush2.bf16.msra.mxu1 %v7110_v44  ;;  %5543 = vmatprep.subr.bf16.mxu0 %v7115_v45  ;;  %v7226_v44 = vld [vmem:[#allocation8 + $0x7c4] ss:$16 sps:$4 sm:$0xff]   ;;  %v7140_v45 = vld [vmem:[#allocation8 + $0x5c0] ss:$16 sps:$4 sm:$0xff]  }
 0x292   :  { %5584 = vmatprep.subr.bf16.mxu1 %v7172_v49  ;;  %v7224_v49 = vld [vmem:[#allocation8 + $0x7c0] ss:$16 sps:$4 sm:$0xff]  }
 0x293   :  { %v7772_v56 = vpop.f32.mrf.mxu0  ;;  %5494 = vmatmul.mubr.bf16.vlgmr.msra.gmra.mxu0 %v7768_v52  ;;  %v7776_v57 = vpop.f32.mrf.mxu1 }
 0x294   :  { %5535 = vmatmul.mubr.bf16.vlgmr.msra.gmra.mxu1 %v7770_v55  ;;  %5544 = vmatpush1.bf16.msra.mxu0 %v7113_v51  ;;  %v7143_v51 = vld [vmem:[#allocation8 + $0x5a0] ss:$16 sps:$4 sm:$0xff]  }
 0x295   :  { %v3677_v62 = vpop.f32.mrf.mxu0  ;;  %5545 = vmatprep.subr.bf16.mxu0 %v7118_v53  ;;  %5585 = vmatpush1.bf16.msra.mxu1 %v7170_v54  ;;  %v3718_v3 = vpop.f32.mrf.mxu1  ;;  %v7148_v53 = vld [vmem:[#allocation8 + $0x584] ss:$16 sps:$4 sm:$0xff]   ;;  %v7230_v54 = vld [vmem:[#allocation8 + $0x7a0] ss:$16 sps:$4 sm:$0xff]  }
 0x296   :  { %v3678_v2 = vadd.f32 %v3677_v62, %v3637_v0  ;;  %5586 = vmatprep.subr.bf16.mxu1 %v7178_v22  ;;  %v7238_v22 = vld [vmem:[#allocation8 + $0x784] ss:$16 sps:$4 sm:$0xff]   ;;  %v7146_v0 = vld [vmem:[#allocation8 + $0x580] ss:$16 sps:$4 sm:$0xff]  }
 0x297   :  { %v3679_v20 = vpop.f32.mrf.mxu0  ;;  %v3720_v6 = vpop.f32.mrf.mxu1  ;;  %v7236_v62 = vld [vmem:[#allocation8 + $0x780] ss:$16 sps:$4 sm:$0xff]  }
 0x298   :  { %v3719_v4 = vadd.f32 %v3718_v3, %v3678_v2  ;;  %5546 = vmatpush1.bf16.msra.mxu0 %v7116_v36  ;;  %v7151_v36 = vld [vmem:[#allocation8 + $0x564] ss:$16 sps:$4 sm:$0xff]   ;;  %v7242_v3 = vld [vmem:[#allocation8 + $0x760] ss:$16 sps:$4 sm:$0xff]  }
 0x299   :  { %v3680_v8 = vpop.f32.mrf.mxu0  ;;  %5547 = vmatprep.subr.bf16.mxu0 %v7121_v63  ;;  %5587 = vmatpush1.bf16.msra.mxu1 %v7176_v16  ;;  %v3721_v13 = vpop.f32.mrf.mxu1  ;;  %v7244_v63 = vld [vmem:[#allocation8 + $0x764] ss:$16 sps:$4 sm:$0xff]   ;;  %v7149_v16 = vld [vmem:[#allocation8 + $0x560] ss:$16 sps:$4 sm:$0xff]  }
 0x29a   :  { %v3892_v12 = vmax.f32 %v3719_v4, 0.0  ;;  %5588 = vmatprep.subr.bf16.mxu1 %v7184_v7  ;;  %v7154_v2 = vld [vmem:[#allocation8 + $0x544] ss:$16 sps:$4 sm:$0xff]   ;;  %v7152_v20 = vld [vmem:[#allocation8 + $0x540] ss:$16 sps:$4 sm:$0xff]   ;;  %v3676_v4 = vadd.f32 %v7772_v56, %v7758_v33 }
 0x29b   :  { %v7250_v7 = vld [vmem:[#allocation8 + $0x744] ss:$16 sps:$4 sm:$0xff]   ;;  %v7254_v13 = vld [vmem:[#allocation8 + $0x720] ss:$16 sps:$4 sm:$0xff]   ;;  %v7163_v33 = vld [vmem:[#allocation8 + $0xec] ss:$16 sps:$4 sm:$0xff]  }
 0x29c   :  { %v7779_v23 = vpack.c.bf16 %v3892_v12, %v3892_v12  ;;  %5548 = vmatpush1.bf16.msra.mxu0 %v7119_v38  ;;  %v7157_v6 = vld [vmem:[#allocation8 + $0x524] ss:$16 sps:$4 sm:$0xff]   ;;  %v7248_v38 = vld [vmem:[#allocation8 + $0x740] ss:$16 sps:$4 sm:$0xff]  }
 0x29d   :  { %5549 = vmatprep.subr.bf16.mxu0 %v7124_v9  ;;  %5589 = vmatpush1.bf16.msra.mxu1 %v7182_v11  ;;  %v7256_v8 = vld [vmem:[#allocation8 + $0x724] ss:$16 sps:$4 sm:$0xff]   ;;  %v7155_v9 = vld [vmem:[#allocation8 + $0x520] ss:$16 sps:$4 sm:$0xff]   ;;  %v3717_v11 = vadd.f32 %v7776_v57, %v3676_v4  ;;  %v7166_v57 = vld [vmem:[#allocation8 + $0xcc] ss:$16 sps:$4 sm:$0xff]  }
 0x29e   :  { %5575 = vmatprep.mubr.bf16.mxu0 %v7779_v23  ;;  %5590 = vmatprep.subr.bf16.mxu1 %v7190_v14  ;;  %v7160_v12 = vld [vmem:[#allocation8 + $0x504] ss:$16 sps:$4 sm:$0xff]   ;;  %v7260_v56 = vld [vmem:[#allocation8 + $0x700] ss:$16 sps:$4 sm:$0xff]   ;;  %v7247_v4 = vld [vmem:[#allocation8 + $0x10c] ss:$16 sps:$4 sm:$0xff]  }
 0x29f   :  { %v7262_v14 = vld [vmem:[#allocation8 + $0x704] ss:$16 sps:$4 sm:$0xff]  }
 0x2a0   :  { %5550 = vmatpush1.bf16.msra.mxu0 %v7122_v61  ;;  %v7158_v61 = vld [vmem:[#allocation8 + $0x500] ss:$16 sps:$4 sm:$0xff]  }
 0x2a1   :  { %5551 = vmatprep.subr.bf16.mxu0 %v7127_v15  ;;  %5591 = vmatpush1.bf16.msra.mxu1 %v7188_v18  ;;  %v3891_v15 = vmax.f32 %v3717_v11, 0.0  ;;  %v7268_v18 = vld [vmem:[#allocation8 + $0x2ec] ss:$16 sps:$4 sm:$0xff]  }
 0x2a2   :  { %5592 = vmatprep.subr.bf16.mxu1 %v7196_v28  ;;  %v7161_v28 = vld [vmem:[#allocation8 + $0xe8] ss:$16 sps:$4 sm:$0xff]  }
 0x2a4   :  { %5552 = vmatpush1.bf16.msra.mxu0 %v7125_v1  ;;  %v7785_v1 = vpack.c.bf16 %v3891_v15, %v3891_v15 }
 0x2a5   :  { %5553 = vmatprep.subr.bf16.mxu0 %v7130_v19  ;;  %5593 = vmatpush1.bf16.msra.mxu1 %v7194_v21 }
 0x2a6   :  { %5594 = vmatprep.subr.bf16.mxu1 %v7202_v24  ;;  %v7164_v24 = vld [vmem:[#allocation8 + $0xc8] ss:$16 sps:$4 sm:$0xff]  }
 0x2a8   :  { %5554 = vmatpush1.bf16.msra.mxu0 %v7128_v32 }
 0x2a9   :  { %5555 = vmatprep.subr.bf16.mxu0 %v7133_v26  ;;  %5595 = vmatpush1.bf16.msra.mxu1 %v7200_v27  ;;  %v7169_v26 = vld [vmem:[#allocation8 + $0xac] ss:$16 sps:$4 sm:$0xff]  }
 0x2aa   :  { %5596 = vmatprep.subr.bf16.mxu1 %v7208_v29 }
 0x2ac   :  { %5556 = vmatpush1.bf16.msra.mxu0 %v7131_v30 }
 0x2ad   :  { %5557 = vmatprep.subr.bf16.mxu0 %v7136_v58  ;;  %5597 = vmatpush1.bf16.msra.mxu1 %v7206_v34  ;;  %v7167_v58 = vld [vmem:[#allocation8 + $0xa8] ss:$16 sps:$4 sm:$0xff]  }
 0x2ae   :  { %5598 = vmatprep.subr.bf16.mxu1 %v7214_v39  ;;  %v7175_v39 = vld [vmem:[#allocation8 + $0x8c] ss:$16 sps:$4 sm:$0xff]  }
 0x2b0   :  { %5558 = vmatpush1.bf16.msra.mxu0 %v7134_v35 }
 0x2b1   :  { %5559 = vmatprep.subr.bf16.mxu0 %v7139_v47  ;;  %5599 = vmatpush1.bf16.msra.mxu1 %v7212_v59  ;;  %v7173_v47 = vld [vmem:[#allocation8 + $0x88] ss:$16 sps:$4 sm:$0xff]   ;;  %v7181_v59 = vld [vmem:[#allocation8 + $0x6c] ss:$16 sps:$4 sm:$0xff]  }
 0x2b2   :  { %5600 = vmatprep.subr.bf16.mxu1 %v7220_v37  ;;  %v7187_v37 = vld [vmem:[#allocation8 + $0x4c] ss:$16 sps:$4 sm:$0xff]  }
 0x2b4   :  { %5560 = vmatpush2.bf16.msra.mxu0 %v7137_v40  ;;  %v7185_v40 = vld [vmem:[#allocation8 + $0x48] ss:$16 sps:$4 sm:$0xff]  }
 0x2b5   :  { %5561 = vmatprep.subr.bf16.mxu0 %v7142_v41  ;;  %5601 = vmatpush2.bf16.msra.mxu1 %v7218_v42  ;;  %v7193_v41 = vld [vmem:[#allocation8 + $0x2c] ss:$16 sps:$4 sm:$0xff]   ;;  %v7191_v42 = vld [vmem:[#allocation8 + $0x28] ss:$16 sps:$4 sm:$0xff]  }
 0x2b6   :  { %5602 = vmatprep.subr.bf16.mxu1 %v7226_v44  ;;  %v7199_v44 = vld [vmem:[#allocation8 + $0xc] ss:$16 sps:$4 sm:$0xff]  }
 0x2b8   :  { %5562 = vmatpush2.bf16.msra.mxu0 %v7140_v45  ;;  %v7197_v45 = vld [vmem:[#allocation8 + $0x8] ss:$16 sps:$4 sm:$0xff]  }
 0x2b9   :  { %5563 = vmatprep.subr.bf16.mxu0 %v7145_v46  ;;  %5603 = vmatpush2.bf16.msra.mxu1 %v7224_v49  ;;  %v7205_v46 = vld [vmem:[#allocation8 + $0x1ec] ss:$16 sps:$4 sm:$0xff]   ;;  %v7203_v49 = vld [vmem:[#allocation8 + $0x1e8] ss:$16 sps:$4 sm:$0xff]  }
 0x2ba   :  { %5604 = vmatprep.subr.bf16.mxu1 %v7232_v50  ;;  %v7211_v50 = vld [vmem:[#allocation8 + $0x1cc] ss:$16 sps:$4 sm:$0xff]  }
 0x2bc   :  { %5564 = vmatpush2.bf16.msra.mxu0 %v7143_v51  ;;  %v7209_v51 = vld [vmem:[#allocation8 + $0x1c8] ss:$16 sps:$4 sm:$0xff]  }
 0x2bd   :  { %5565 = vmatprep.subr.bf16.mxu0 %v7148_v53  ;;  %5605 = vmatpush2.bf16.msra.mxu1 %v7230_v54  ;;  %v7217_v53 = vld [vmem:[#allocation8 + $0x1ac] ss:$16 sps:$4 sm:$0xff]   ;;  %v7215_v54 = vld [vmem:[#allocation8 + $0x1a8] ss:$16 sps:$4 sm:$0xff]  }
 0x2be   :  { %5606 = vmatprep.subr.bf16.mxu1 %v7238_v22  ;;  %v7223_v22 = vld [vmem:[#allocation8 + $0x18c] ss:$16 sps:$4 sm:$0xff]  }
 0x2c0   :  { %5566 = vmatpush2.bf16.msra.mxu0 %v7146_v0  ;;  %v7221_v0 = vld [vmem:[#allocation8 + $0x188] ss:$16 sps:$4 sm:$0xff]  }
 0x2c1   :  { %5567 = vmatprep.subr.bf16.mxu0 %v7151_v36  ;;  %5607 = vmatpush2.bf16.msra.mxu1 %v7236_v62  ;;  %v7229_v36 = vld [vmem:[#allocation8 + $0x16c] ss:$16 sps:$4 sm:$0xff]   ;;  %v7227_v62 = vld [vmem:[#allocation8 + $0x168] ss:$16 sps:$4 sm:$0xff]  }
 0x2c2   :  { %5608 = vmatprep.subr.bf16.mxu1 %v7244_v63  ;;  %v7235_v63 = vld [vmem:[#allocation8 + $0x14c] ss:$16 sps:$4 sm:$0xff]  }
 0x2c4   :  { %5568 = vmatpush2.bf16.msra.mxu0 %v7149_v16  ;;  %v7233_v16 = vld [vmem:[#allocation8 + $0x148] ss:$16 sps:$4 sm:$0xff]  }
 0x2c5   :  { %5569 = vmatprep.subr.bf16.mxu0 %v7154_v2  ;;  %5609 = vmatpush2.bf16.msra.mxu1 %v7242_v3  ;;  %v7241_v2 = vld [vmem:[#allocation8 + $0x12c] ss:$16 sps:$4 sm:$0xff]   ;;  %v657_v3 = vsub.s32 6, %v7684_v60 }
 0x2c6   :  { %5610 = vmatprep.subr.bf16.mxu1 %v7250_v7  ;;  %v661_v7 = vsub.s32 7, %v7684_v60 }
 0x2c8   :  { %5570 = vmatpush2.bf16.msra.mxu0 %v7152_v20  ;;  %v7239_v20 = vld [vmem:[#allocation8 + $0x128] ss:$16 sps:$4 sm:$0xff]  }
 0x2c9   :  { %5571 = vmatprep.subr.bf16.mxu0 %v7157_v6  ;;  %5611 = vmatpush2.bf16.msra.mxu1 %v7248_v38  ;;  %v658_v6 = vrot.slane %v7746_v17, %v657_v3  ;;  %v662_v38 = vrot.slane %v7746_v17, %v661_v7  ;;  %v7307_v3 = vld [vmem:[#allocation8 + $0x5cc] ss:$16 sps:$4 sm:$0xff]   ;;  %v7302_v7 = vld [vmem:[#allocation8 + $0x228] ss:$16 sps:$4 sm:$0xff]  }
 0x2ca   :  { %5612 = vmatprep.subr.bf16.mxu1 %v7256_v8  ;;  %v7245_v8 = vld [vmem:[#allocation8 + $0x108] ss:$16 sps:$4 sm:$0xff]  }
 0x2cc   :  { %5572 = vmatpush2.bf16.msra.mxu0 %v7155_v9  ;;  %v7253_v9 = vld [vmem:[#allocation8 + $0x4ec] ss:$16 sps:$4 sm:$0xff]  }
 0x2cd   :  { %5573 = vmatprep.subr.bf16.mxu0 %v7160_v12  ;;  %5613 = vmatpush2.bf16.msra.mxu1 %v7254_v13  ;;  %v7251_v13 = vld [vmem:[#allocation8 + $0x4e8] ss:$16 sps:$4 sm:$0xff]  }
 0x2ce   :  { %5614 = vmatprep.subr.bf16.mxu1 %v7262_v14  ;;  %v7259_v14 = vld [vmem:[#allocation8 + $0x4cc] ss:$16 sps:$4 sm:$0xff]  }
 0x2d0   :  { %5574 = vmatpush2.bf16.msra.mxu0 %v7158_v61 }
 0x2d1   :  { %5625 = vmatprep.subr.bf16.mxu0 %v7163_v33  ;;  %5615 = vmatpush2.bf16.msra.mxu1 %v7260_v56 }
 0x2d2   :  { %5666 = vmatprep.subr.bf16.mxu1 %v7268_v18  ;;  %v7257_v18 = vld [vmem:[#allocation8 + $0x4c8] ss:$16 sps:$4 sm:$0xff]  }
 0x2d3   :  { %v7787_v19 = vpop.f32.mrf.mxu0  ;;  %5576 = vmatmul.mubr.bf16.vlgmr.msra.gmra.mxu0 %v7785_v1  ;;  %v7790_v21 = vpop.f32.mrf.mxu1 }
 0x2d4   :  { %5626 = vmatpush1.bf16.msra.mxu0 %v7161_v28  ;;  %5657 = vmatprep.mubr.bf16.mxu0 %v7749_v31  ;;  %v7179_v31 = vld [vmem:[#allocation8 + $0x68] ss:$16 sps:$4 sm:$0xff]   ;;  %v3758_v11 = vadd.f32 %v7787_v19, %v658_v6  ;;  %v7313_v6 = vld [vmem:[#allocation8 + $0x5ac] ss:$16 sps:$4 sm:$0xff]  }
 0x2d5   :  { %v7793_v32 = vpop.f32.mrf.mxu0  ;;  %5627 = vmatprep.subr.bf16.mxu0 %v7166_v57  ;;  %v7795_v27 = vpop.f32.mrf.mxu1  ;;  %v7265_v57 = vld [vmem:[#allocation8 + $0x4ac] ss:$16 sps:$4 sm:$0xff]  }
 0x2d6   :  { %v3760_v12 = vadd.f32 %v7793_v32, %v662_v38  ;;  %v3799_v61 = vadd.f32 %v7790_v21, %v3758_v11  ;;  %v7308_v38 = vld [vmem:[#allocation8 + $0x208] ss:$16 sps:$4 sm:$0xff]   ;;  %v7319_v11 = vld [vmem:[#allocation8 + $0x58c] ss:$16 sps:$4 sm:$0xff]  }
 0x2d7   :  { %v3761_v29 = vpop.f32.mrf.mxu0  ;;  %v3802_v30 = vpop.f32.mrf.mxu1 }
 0x2d8   :  { %5628 = vmatpush1.bf16.msra.mxu0 %v7164_v24  ;;  %v3801_v33 = vadd.f32 %v7795_v27, %v3760_v12  ;;  %v7263_v30 = vld [vmem:[#allocation8 + $0x4a8] ss:$16 sps:$4 sm:$0xff]   ;;  %v7271_v27 = vld [vmem:[#allocation8 + $0x48c] ss:$16 sps:$4 sm:$0xff]  }
 0x2d9   :  { %v3762_v34 = vpop.f32.mrf.mxu0  ;;  %5629 = vmatprep.subr.bf16.mxu0 %v7169_v26  ;;  %v3803_v35 = vpop.f32.mrf.mxu1  ;;  %v7314_v12 = vld [vmem:[#allocation8 + $0x3e8] ss:$16 sps:$4 sm:$0xff]  }
 0x2dc   :  { %5630 = vmatpush1.bf16.msra.mxu0 %v7167_v58 }
 0x2dd   :  { %5631 = vmatprep.subr.bf16.mxu0 %v7175_v39 }
 0x2e0   :  { %5632 = vmatpush1.bf16.msra.mxu0 %v7173_v47 }
 0x2e1   :  { %5633 = vmatprep.subr.bf16.mxu0 %v7181_v59  ;;  %v7269_v59 = vld [vmem:[#allocation8 + $0x488] ss:$16 sps:$4 sm:$0xff]  }
 0x2e4   :  { %5634 = vmatpush1.bf16.msra.mxu0 %v7179_v31  ;;  %v7274_v31 = vld [vmem:[#allocation8 + $0x2cc] ss:$16 sps:$4 sm:$0xff]  }
 0x2e5   :  { %5635 = vmatprep.subr.bf16.mxu0 %v7187_v37  ;;  %v7277_v37 = vld [vmem:[#allocation8 + $0x46c] ss:$16 sps:$4 sm:$0xff]  }
 0x2e8   :  { %5636 = vmatpush1.bf16.msra.mxu0 %v7185_v40  ;;  %v7272_v40 = vld [vmem:[#allocation8 + $0x2c8] ss:$16 sps:$4 sm:$0xff]  }
 0x2e9   :  { %5637 = vmatprep.subr.bf16.mxu0 %v7193_v41  ;;  %v7275_v41 = vld [vmem:[#allocation8 + $0x468] ss:$16 sps:$4 sm:$0xff]  }
 0x2ec   :  { %5638 = vmatpush1.bf16.msra.mxu0 %v7191_v42  ;;  %v7280_v42 = vld [vmem:[#allocation8 + $0x2ac] ss:$16 sps:$4 sm:$0xff]  }
 0x2ed   :  { %5639 = vmatprep.subr.bf16.mxu0 %v7199_v44  ;;  %v7283_v44 = vld [vmem:[#allocation8 + $0x44c] ss:$16 sps:$4 sm:$0xff]  }
 0x2f0   :  { %5640 = vmatpush1.bf16.msra.mxu0 %v7197_v45  ;;  %v7278_v45 = vld [vmem:[#allocation8 + $0x2a8] ss:$16 sps:$4 sm:$0xff]  }
 0x2f1   :  { %5641 = vmatprep.subr.bf16.mxu0 %v7205_v46  ;;  %v7281_v46 = vld [vmem:[#allocation8 + $0x448] ss:$16 sps:$4 sm:$0xff]  }
 0x2f4   :  { %5642 = vmatpush2.bf16.msra.mxu0 %v7203_v49  ;;  %v7286_v49 = vld [vmem:[#allocation8 + $0x28c] ss:$16 sps:$4 sm:$0xff]  }
 0x2f5   :  { %5643 = vmatprep.subr.bf16.mxu0 %v7211_v50  ;;  %v7289_v50 = vld [vmem:[#allocation8 + $0x42c] ss:$16 sps:$4 sm:$0xff]  }
 0x2f8   :  { %5644 = vmatpush2.bf16.msra.mxu0 %v7209_v51  ;;  %v7284_v51 = vld [vmem:[#allocation8 + $0x288] ss:$16 sps:$4 sm:$0xff]  }
 0x2f9   :  { %5645 = vmatprep.subr.bf16.mxu0 %v7217_v53  ;;  %v7292_v53 = vld [vmem:[#allocation8 + $0x26c] ss:$16 sps:$4 sm:$0xff]  }
 0x2fc   :  { %5646 = vmatpush2.bf16.msra.mxu0 %v7215_v54  ;;  %v7295_v54 = vld [vmem:[#allocation8 + $0x40c] ss:$16 sps:$4 sm:$0xff]  }
 0x2fd   :  { %5647 = vmatprep.subr.bf16.mxu0 %v7223_v22  ;;  %v7290_v22 = vld [vmem:[#allocation8 + $0x268] ss:$16 sps:$4 sm:$0xff]  }
 0x300   :  { %5648 = vmatpush2.bf16.msra.mxu0 %v7221_v0  ;;  %v7293_v0 = vld [vmem:[#allocation8 + $0x408] ss:$16 sps:$4 sm:$0xff]  }
 0x301   :  { %5649 = vmatprep.subr.bf16.mxu0 %v7229_v36  ;;  %v7298_v36 = vld [vmem:[#allocation8 + $0x24c] ss:$16 sps:$4 sm:$0xff]  }
 0x304   :  { %5650 = vmatpush2.bf16.msra.mxu0 %v7227_v62  ;;  %v7301_v62 = vld [vmem:[#allocation8 + $0x5ec] ss:$16 sps:$4 sm:$0xff]  }
 0x305   :  { %5651 = vmatprep.subr.bf16.mxu0 %v7235_v63  ;;  %v7296_v63 = vld [vmem:[#allocation8 + $0x248] ss:$16 sps:$4 sm:$0xff]  }
 0x308   :  { %5652 = vmatpush2.bf16.msra.mxu0 %v7233_v16  ;;  %v7299_v16 = vld [vmem:[#allocation8 + $0x5e8] ss:$16 sps:$4 sm:$0xff]  }
 0x309   :  { %5653 = vmatprep.subr.bf16.mxu0 %v7241_v2  ;;  %v7304_v2 = vld [vmem:[#allocation8 + $0x22c] ss:$16 sps:$4 sm:$0xff]  }
 0x30c   :  { %5654 = vmatpush2.bf16.msra.mxu0 %v7239_v20  ;;  %v7305_v20 = vld [vmem:[#allocation8 + $0x5c8] ss:$16 sps:$4 sm:$0xff]  }
 0x30d   :  { %5655 = vmatprep.subr.bf16.mxu0 %v7247_v4  ;;  %v7310_v4 = vld [vmem:[#allocation8 + $0x20c] ss:$16 sps:$4 sm:$0xff]  }
 0x310   :  { %5656 = vmatpush2.bf16.msra.mxu0 %v7245_v8  ;;  %v7311_v8 = vld [vmem:[#allocation8 + $0x5a8] ss:$16 sps:$4 sm:$0xff]  }
 0x311   :  { %5707 = vmatprep.subr.bf16.mxu0 %v7253_v9  ;;  %v7316_v9 = vld [vmem:[#allocation8 + $0x3ec] ss:$16 sps:$4 sm:$0xff]  }
 0x313   :  { %v3839_v15 = vpop.f32.mrf.mxu0  ;;  %5658 = vmatmul.mubr.bf16.vlgmr.msra.gmra.mxu0 %v7768_v52  ;;  %v3880_v56 = vpop.f32.mrf.mxu1 }
 0x314   :  { %v3840_v17 = vadd.f32 %v3839_v15, %v3799_v61  ;;  %5708 = vmatpush1.bf16.msra.mxu0 %v7251_v13  ;;  %5739 = vmatprep.mubr.bf16.mxu0 %v7779_v23  ;;  %v7266_v23 = vld [vmem:[#allocation8 + $0x2e8] ss:$16 sps:$4 sm:$0xff]   ;;  %v7325_v61 = vld [vmem:[#allocation8 + $0x56c] ss:$16 sps:$4 sm:$0xff]  }
 0x315   :  { %v3841_v28 = vpop.f32.mrf.mxu0  ;;  %5709 = vmatprep.subr.bf16.mxu0 %v7259_v14  ;;  %v3882_v32 = vpop.f32.mrf.mxu1  ;;  %v7317_v13 = vld [vmem:[#allocation8 + $0x588] ss:$16 sps:$4 sm:$0xff]   ;;  %v7322_v14 = vld [vmem:[#allocation8 + $0x3cc] ss:$16 sps:$4 sm:$0xff]  }
 0x316   :  { %v3881_v19 = vadd.f32 %v3880_v56, %v3840_v17  ;;  %v3842_v24 = vadd.f32 %v3841_v28, %v3801_v33  ;;  %v7320_v15 = vld [vmem:[#allocation8 + $0x3c8] ss:$16 sps:$4 sm:$0xff]   ;;  %v7328_v17 = vld [vmem:[#allocation8 + $0x3ac] ss:$16 sps:$4 sm:$0xff]  }
 0x317   :  { %v3843_v26 = vpop.f32.mrf.mxu0  ;;  %v3884_v21 = vpop.f32.mrf.mxu1  ;;  %v7323_v33 = vld [vmem:[#allocation8 + $0x568] ss:$16 sps:$4 sm:$0xff]   ;;  %v7331_v56 = vld [vmem:[#allocation8 + $0x54c] ss:$16 sps:$4 sm:$0xff]  }
 0x318   :  { %v3883_v29 = vadd.f32 %v3882_v32, %v3842_v24  ;;  %5710 = vmatpush1.bf16.msra.mxu0 %v7257_v18  ;;  %v3893_v52 = vmax.f32 %v3881_v19, 0.0  ;;  %v7326_v18 = vld [vmem:[#allocation8 + $0x3a8] ss:$16 sps:$4 sm:$0xff]   ;;  %v7337_v19 = vld [vmem:[#allocation8 + $0x52c] ss:$16 sps:$4 sm:$0xff]  }
 0x319   :  { %v3844_v58 = vpop.f32.mrf.mxu0  ;;  %5711 = vmatprep.subr.bf16.mxu0 %v7265_v57  ;;  %v3885_v39 = vpop.f32.mrf.mxu1  ;;  %v7329_v28 = vld [vmem:[#allocation8 + $0x548] ss:$16 sps:$4 sm:$0xff]   ;;  %v7334_v57 = vld [vmem:[#allocation8 + $0x38c] ss:$16 sps:$4 sm:$0xff]  }
 0x31a   :  { %v3894_v34 = vmax.f32 %v3883_v29, 0.0  ;;  %v7809_v47 = vpack.c.bf16 %v3893_v52, %v3893_v52  ;;  %v7332_v24 = vld [vmem:[#allocation8 + $0x388] ss:$16 sps:$4 sm:$0xff]   ;;  %v7340_v26 = vld [vmem:[#allocation8 + $0x36c] ss:$16 sps:$4 sm:$0xff]  }
 0x31b   :  { %v7335_v32 = vld [vmem:[#allocation8 + $0x528] ss:$16 sps:$4 sm:$0xff]   ;;  %v7343_v29 = vld [vmem:[#allocation8 + $0x50c] ss:$16 sps:$4 sm:$0xff]   ;;  %v7814_v58 = vld [vmem:[#allocation10] sm:$0xf] }
 0x31c   :  { %v7807_v35 = vpack.c.bf16 %v3894_v34, %v3894_v34  ;;  %5712 = vmatpush1.bf16.msra.mxu0 %v7263_v30  ;;  %v7338_v21 = vld [vmem:[#allocation8 + $0x368] ss:$16 sps:$4 sm:$0xff]   ;;  %v7346_v52 = vld [vmem:[#allocation8 + $0x34c] ss:$16 sps:$4 sm:$0xff]   ;;  %v4164_v39 = vrot.slane %v7814_v58, %v633_v5 }
 0x31d   :  { %5713 = vmatprep.subr.bf16.mxu0 %v7271_v27  ;;  %v7341_v30 = vld [vmem:[#allocation8 + $0x508] ss:$16 sps:$4 sm:$0xff]   ;;  %v7401_v27 = vld [vmem:[#allocation11 + $0x78] sm:$0xff]  }
 0x31e   :  { %5616 = vmatprep.mubr.bf16.mxu1 %v7807_v35  ;;  %v7344_v34 = vld [vmem:[#allocation8 + $0x348] ss:$16 sps:$4 sm:$0xff]   ;;  %v7352_v5 = vld [vmem:[#allocation8 + $0x30c] ss:$16 sps:$4 sm:$0xff]  }
 0x31f   :  { %5617 = vmatmul.mubr.bf16.vlgmr.msra.gmra.mxu1 %v7809_v47 }
 0x320   :  { %5667 = vmatpush1.bf16.msra.mxu1 %v7266_v23  ;;  %5698 = vmatprep.mubr.bf16.mxu1 %v7752_v25  ;;  %v7287_v25 = vld [vmem:[#allocation8 + $0x428] ss:$16 sps:$4 sm:$0xff]   ;;  %v7349_v23 = vld [vmem:[#allocation8 + $0x32c] ss:$16 sps:$4 sm:$0xff]  }
 0x321   :  { %5714 = vmatpush1.bf16.msra.mxu0 %v7269_v59  ;;  %5668 = vmatprep.subr.bf16.mxu1 %v7274_v31  ;;  %v7402_v59 = vld [vmem:[#allocation11 + $0x38] sm:$0xff]   ;;  %v4168_v31 = vrot.slane %v7814_v58, %v637_v10  ;;  %v7405_v10 = vld [vmem:[#allocation11 + $0x68] sm:$0xff]  }
 0x322   :  { %5715 = vmatprep.subr.bf16.mxu0 %v7277_v37  ;;  %v7403_v37 = vld [vmem:[#allocation11 + $0x70] sm:$0xff]  }
 0x324   :  { %5669 = vmatpush1.bf16.msra.mxu1 %v7272_v40 }
 0x325   :  { %5716 = vmatpush1.bf16.msra.mxu0 %v7275_v41  ;;  %5670 = vmatprep.subr.bf16.mxu1 %v7280_v42 }
 0x326   :  { %5717 = vmatprep.subr.bf16.mxu0 %v7283_v44  ;;  %v7347_v44 = vld [vmem:[#allocation8 + $0x328] ss:$16 sps:$4 sm:$0xff]  }
 0x328   :  { %5671 = vmatpush1.bf16.msra.mxu1 %v7278_v45 }
 0x329   :  { %5718 = vmatpush1.bf16.msra.mxu0 %v7281_v46  ;;  %5672 = vmatprep.subr.bf16.mxu1 %v7286_v49  ;;  %v7404_v46 = vld [vmem:[#allocation11 + $0x30] sm:$0xff]  }
 0x32a   :  { %5719 = vmatprep.subr.bf16.mxu0 %v7289_v50 }
 0x32c   :  { %5673 = vmatpush1.bf16.msra.mxu1 %v7284_v51 }
 0x32d   :  { %5720 = vmatpush1.bf16.msra.mxu0 %v7287_v25  ;;  %5674 = vmatprep.subr.bf16.mxu1 %v7292_v53 }
 0x32e   :  { %5721 = vmatprep.subr.bf16.mxu0 %v7295_v54 }
 0x330   :  { %5675 = vmatpush1.bf16.msra.mxu1 %v7290_v22  ;;  %v7350_v22 = vld [vmem:[#allocation8 + $0x308] ss:$16 sps:$4 sm:$0xff]  }
 0x331   :  { %5722 = vmatpush1.bf16.msra.mxu0 %v7293_v0  ;;  %5676 = vmatprep.subr.bf16.mxu1 %v7298_v36  ;;  %v7406_v36 = vld [vmem:[#allocation11 + $0x28] sm:$0xff]  }
 0x332   :  { %5723 = vmatprep.subr.bf16.mxu0 %v7301_v62 }
 0x334   :  { %5677 = vmatpush1.bf16.msra.mxu1 %v7296_v63  ;;  %v7407_v63 = vld [vmem:[#allocation11 + $0x60] sm:$0xff]  }
 0x335   :  { %5724 = vmatpush2.bf16.msra.mxu0 %v7299_v16  ;;  %5678 = vmatprep.subr.bf16.mxu1 %v7304_v2  ;;  %v7353_v16 = vld [vmem:[#allocation8 + $0x6e8] ss:$16 sps:$4 sm:$0xff]   ;;  %v7358_v2 = vld [vmem:[#allocation8 + $0x6cc] ss:$16 sps:$4 sm:$0xff]  }
 0x336   :  { %5725 = vmatprep.subr.bf16.mxu0 %v7307_v3  ;;  %v7408_v3 = vld [vmem:[#allocation11 + $0x20] sm:$0xff]  }
 0x338   :  { %5679 = vmatpush1.bf16.msra.mxu1 %v7302_v7  ;;  %v7409_v7 = vld [vmem:[#allocation11 + $0x58] sm:$0xff]  }
 0x339   :  { %5726 = vmatpush2.bf16.msra.mxu0 %v7305_v20  ;;  %5680 = vmatprep.subr.bf16.mxu1 %v7310_v4  ;;  %v7356_v20 = vld [vmem:[#allocation8 + $0x6c8] ss:$16 sps:$4 sm:$0xff]   ;;  %v7361_v4 = vld [vmem:[#allocation8 + $0x6ac] ss:$16 sps:$4 sm:$0xff]  }
 0x33a   :  { %5727 = vmatprep.subr.bf16.mxu0 %v7313_v6  ;;  %v7410_v6 = vld [vmem:[#allocation11 + $0x18] sm:$0xff]  }
 0x33c   :  { %5681 = vmatpush1.bf16.msra.mxu1 %v7308_v38  ;;  %v7411_v38 = vld [vmem:[#allocation11 + $0x50] sm:$0xff]  }
 0x33d   :  { %5728 = vmatpush2.bf16.msra.mxu0 %v7311_v8  ;;  %5682 = vmatprep.subr.bf16.mxu1 %v7316_v9  ;;  %v7359_v8 = vld [vmem:[#allocation8 + $0x6a8] ss:$16 sps:$4 sm:$0xff]   ;;  %v7364_v9 = vld [vmem:[#allocation8 + $0x68c] ss:$16 sps:$4 sm:$0xff]  }
 0x33e   :  { %5729 = vmatprep.subr.bf16.mxu0 %v7319_v11  ;;  %v7412_v11 = vld [vmem:[#allocation11 + $0x10] sm:$0xff]  }
 0x340   :  { %5683 = vmatpush2.bf16.msra.mxu1 %v7314_v12  ;;  %v7413_v12 = vld [vmem:[#allocation11 + $0x48] sm:$0xff]  }
 0x341   :  { %5730 = vmatpush2.bf16.msra.mxu0 %v7317_v13  ;;  %5684 = vmatprep.subr.bf16.mxu1 %v7322_v14  ;;  %v7367_v13 = vld [vmem:[#allocation8 + $0x66c] ss:$16 sps:$4 sm:$0xff]   ;;  %v7415_v14 = vld [vmem:[#allocation11 + $0x40] sm:$0xff]  }
 0x342   :  { %5731 = vmatprep.subr.bf16.mxu0 %v7325_v61  ;;  %v7365_v61 = vld [vmem:[#allocation8 + $0x668] ss:$16 sps:$4 sm:$0xff]  }
 0x344   :  { %5685 = vmatpush2.bf16.msra.mxu1 %v7320_v15  ;;  %v7370_v15 = vld [vmem:[#allocation8 + $0x64c] ss:$16 sps:$4 sm:$0xff]  }
 0x345   :  { %5732 = vmatpush2.bf16.msra.mxu0 %v7323_v33  ;;  %5686 = vmatprep.subr.bf16.mxu1 %v7328_v17  ;;  %v7416_v33 = vld [vmem:[#allocation11] sm:$0xff]  }
 0x346   :  { %5733 = vmatprep.subr.bf16.mxu0 %v7331_v56  ;;  %v7368_v17 = vld [vmem:[#allocation8 + $0x648] ss:$16 sps:$4 sm:$0xff]   ;;  %v7373_v56 = vld [vmem:[#allocation8 + $0x62c] ss:$16 sps:$4 sm:$0xff]  }
 0x348   :  { %5687 = vmatpush2.bf16.msra.mxu1 %v7326_v18  ;;  %v7371_v18 = vld [vmem:[#allocation8 + $0x628] ss:$16 sps:$4 sm:$0xff]  }
 0x349   :  { %5734 = vmatpush2.bf16.msra.mxu0 %v7329_v28  ;;  %5688 = vmatprep.subr.bf16.mxu1 %v7334_v57  ;;  %v7376_v28 = vld [vmem:[#allocation8 + $0x60c] ss:$16 sps:$4 sm:$0xff]   ;;  %v7374_v57 = vld [vmem:[#allocation8 + $0x608] ss:$16 sps:$4 sm:$0xff]  }
 0x34a   :  { %5735 = vmatprep.subr.bf16.mxu0 %v7337_v19  ;;  %v7379_v19 = vld [vmem:[#allocation8 + $0x7ec] ss:$16 sps:$4 sm:$0xff]  }
 0x34c   :  { %5689 = vmatpush2.bf16.msra.mxu1 %v7332_v24  ;;  %v7377_v24 = vld [vmem:[#allocation8 + $0x7e8] ss:$16 sps:$4 sm:$0xff]  }
 0x34d   :  { %5736 = vmatpush2.bf16.msra.mxu0 %v7335_v32  ;;  %5690 = vmatprep.subr.bf16.mxu1 %v7340_v26  ;;  %v7382_v32 = vld [vmem:[#allocation8 + $0x7cc] ss:$16 sps:$4 sm:$0xff]   ;;  %v7380_v26 = vld [vmem:[#allocation8 + $0x7c8] ss:$16 sps:$4 sm:$0xff]  }
 0x34e   :  { %5737 = vmatprep.subr.bf16.mxu0 %v7343_v29  ;;  %v7385_v29 = vld [vmem:[#allocation8 + $0x7ac] ss:$16 sps:$4 sm:$0xff]  }
 0x350   :  { %5691 = vmatpush2.bf16.msra.mxu1 %v7338_v21  ;;  %v7383_v21 = vld [vmem:[#allocation8 + $0x7a8] ss:$16 sps:$4 sm:$0xff]  }
 0x351   :  { %5738 = vmatpush2.bf16.msra.mxu0 %v7341_v30  ;;  %5692 = vmatprep.subr.bf16.mxu1 %v7346_v52  ;;  %v7388_v30 = vld [vmem:[#allocation8 + $0x78c] ss:$16 sps:$4 sm:$0xff]   ;;  %v7386_v52 = vld [vmem:[#allocation8 + $0x788] ss:$16 sps:$4 sm:$0xff]  }
 0x352   :  { %6960 = vmatprep.subr.bf16.mxu0 %v7401_v27  ;;  %v7391_v27 = vld [vmem:[#allocation8 + $0x76c] ss:$16 sps:$4 sm:$0xff]  }
 0x353   :  { %v5495_v40 = vpop.f32.mrf.mxu0 }
 0x354   :  { %v5496_v41 = vadd.f32 %v5495_v40, %v4164_v39  ;;  %v5536_v42 = vpop.f32.mrf.mxu1  ;;  %5693 = vmatpush2.bf16.msra.mxu1 %v7344_v34  ;;  %5740 = vmatmul.mubr.bf16.vlgmr.msra.gmra.mxu0 %v7785_v1  ;;  %v7355_v1 = vld [vmem:[#allocation8 + $0x6ec] ss:$16 sps:$4 sm:$0xff]   ;;  %v7389_v34 = vld [vmem:[#allocation8 + $0x768] ss:$16 sps:$4 sm:$0xff]  }
 0x355   :  { %v5497_v45 = vpop.f32.mrf.mxu0  ;;  %5694 = vmatprep.subr.bf16.mxu1 %v7349_v23  ;;  %6961 = vmatpush3.bf16.msra.mxu0 %v7402_v59  ;;  %v7394_v39 = vld [vmem:[#allocation8 + $0x74c] ss:$16 sps:$4 sm:$0xff]   ;;  %v7392_v23 = vld [vmem:[#allocation8 + $0x748] ss:$16 sps:$4 sm:$0xff]  }
 0x356   :  { %v7823_v49 = vadd.f32 %v5536_v42, %v5496_v41  ;;  %v5498_v50 = vadd.f32 %v5497_v45, %v4168_v31  ;;  %v5538_v51 = vpop.f32.mrf.mxu1  ;;  %6962 = vmatprep.subr.bf16.mxu0 %v7403_v37  ;;  %v7397_v59 = vld [vmem:[#allocation8 + $0x72c] ss:$16 sps:$4 sm:$0xff]   ;;  %v7395_v40 = vld [vmem:[#allocation8 + $0x728] ss:$16 sps:$4 sm:$0xff]  }
 0x357   :  { %v5499_v25 = vpop.f32.mrf.mxu0  ;;  %v7400_v42 = vld [vmem:[#allocation8 + $0x70c] ss:$16 sps:$4 sm:$0xff]  }
 0x358   :  { %v7825_v53 = vadd.f32 %v5538_v51, %v5498_v50  ;;  %v5540_v54 = vpop.f32.mrf.mxu1  ;;  %5695 = vmatpush2.bf16.msra.mxu1 %v7347_v44  ;;  %v7417_v50 = vld [vmem:[#allocation11 + $0xf8] sm:$0xff]   ;;  %v7421_v25 = vld [vmem:[#allocation11 + $0xe8] sm:$0xff]  }
 0x359   :  { %v5500_v0 = vpop.f32.mrf.mxu0  ;;  %5696 = vmatprep.subr.bf16.mxu1 %v7352_v5  ;;  %6963 = vmatpush3.bf16.msra.mxu0 %v7404_v46  ;;  %v7398_v5 = vld [vmem:[#allocation8 + $0x708] ss:$16 sps:$4 sm:$0xff]   ;;  %v7418_v51 = vld [vmem:[#allocation11 + $0xb8] sm:$0xff]   ;;  %v7422_v54 = vld [vmem:[#allocation11 + $0xa8] sm:$0xff]  }
 0x35a   :  { %v5541_v62 = vpop.f32.mrf.mxu1  ;;  %6964 = vmatprep.subr.bf16.mxu0 %v7405_v10  ;;  %v7419_v10 = vld [vmem:[#allocation11 + $0xf0] sm:$0xff]   ;;  %v7425_v0 = vld [vmem:[#allocation11 + $0xd8] sm:$0xff]  }
 0x35c   :  { %5697 = vmatpush2.bf16.msra.mxu1 %v7350_v22  ;;  %v7424_v22 = vld [vmem:[#allocation11 + $0xa0] sm:$0xff]  }
 0x35d   :  { %5748 = vmatprep.subr.bf16.mxu1 %v7355_v1  ;;  %6965 = vmatpush3.bf16.msra.mxu0 %v7406_v36  ;;  %v7426_v1 = vld [vmem:[#allocation11 + $0x98] sm:$0xff]   ;;  %v7428_v36 = vld [vmem:[#allocation11 + $0x90] sm:$0xff]  }
 0x35e   :  { %6966 = vmatprep.subr.bf16.mxu0 %v7407_v63 }
 0x35f   :  { %5699 = vmatmul.mubr.bf16.vlgmr.msra.gmra.mxu1 %v7770_v55  ;;  %v7362_v55 = vld [vmem:[#allocation8 + $0x688] ss:$16 sps:$4 sm:$0xff]  }
 0x360   :  { %5749 = vmatpush1.bf16.msra.mxu1 %v7353_v16  ;;  %5780 = vmatprep.mubr.bf16.mxu1 %v7807_v35  ;;  %v7414_v35 = vld [vmem:[#allocation11 + $0x8] sm:$0xff]  }
 0x361   :  { %5750 = vmatprep.subr.bf16.mxu1 %v7358_v2  ;;  %6967 = vmatpush3.bf16.msra.mxu0 %v7408_v3 }
 0x362   :  { %6968 = vmatprep.subr.bf16.mxu0 %v7409_v7 }
 0x364   :  { %5751 = vmatpush1.bf16.msra.mxu1 %v7356_v20  ;;  %v7429_v20 = vld [vmem:[#allocation11 + $0xc8] sm:$0xff]  }
 0x365   :  { %5752 = vmatprep.subr.bf16.mxu1 %v7361_v4  ;;  %6969 = vmatpush3.bf16.msra.mxu0 %v7410_v6  ;;  %v7430_v6 = vld [vmem:[#allocation11 + $0x88] sm:$0xff]  }
 0x366   :  { %6970 = vmatprep.subr.bf16.mxu0 %v7411_v38 }
 0x368   :  { %5753 = vmatpush1.bf16.msra.mxu1 %v7359_v8 }
 0x369   :  { %5754 = vmatprep.subr.bf16.mxu1 %v7364_v9  ;;  %6971 = vmatpush3.bf16.msra.mxu0 %v7412_v11 }
 0x36a   :  { %6972 = vmatprep.subr.bf16.mxu0 %v7413_v12  ;;  %v7431_v12 = vld [vmem:[#allocation11 + $0xc0] sm:$0xff]  }
 0x36c   :  { %5755 = vmatpush1.bf16.msra.mxu1 %v7362_v55 }
 0x36d   :  { %5756 = vmatprep.subr.bf16.mxu1 %v7367_v13  ;;  %6973 = vmatpush3.bf16.msra.mxu0 %v7414_v35  ;;  %v7432_v13 = vld [vmem:[#allocation11 + $0x80] sm:$0xff]  }
 0x36e   :  { %6974 = vmatprep.subr.bf16.mxu0 %v7415_v14 }
 0x370   :  { %5757 = vmatpush1.bf16.msra.mxu1 %v7365_v61 }
 0x371   :  { %5758 = vmatprep.subr.bf16.mxu1 %v7370_v15  ;;  %6975 = vmatpush3.bf16.msra.mxu0 %v7416_v33 }
 0x374   :  { %5759 = vmatpush1.bf16.msra.mxu1 %v7368_v17  ;;  %v4172_v17 = vrot.slane %v7814_v58, %v641_v43 }
 0x375   :  { %5760 = vmatprep.subr.bf16.mxu1 %v7373_v56 }
 0x378   :  { %5761 = vmatpush1.bf16.msra.mxu1 %v7371_v18  ;;  %v4176_v18 = vrot.slane %v7814_v58, %v645_v48 }
 0x379   :  { %5762 = vmatprep.subr.bf16.mxu1 %v7376_v28 }
 0x37c   :  { %5763 = vmatpush1.bf16.msra.mxu1 %v7374_v57 }
 0x37d   :  { %5764 = vmatprep.subr.bf16.mxu1 %v7379_v19 }
 0x380   :  { %5765 = vmatpush2.bf16.msra.mxu1 %v7377_v24 }
 0x381   :  { %5766 = vmatprep.subr.bf16.mxu1 %v7382_v32 }
 0x384   :  { %5767 = vmatpush2.bf16.msra.mxu1 %v7380_v26 }
 0x385   :  { %5768 = vmatprep.subr.bf16.mxu1 %v7385_v29 }
 0x388   :  { %5769 = vmatpush2.bf16.msra.mxu1 %v7383_v21 }
 0x389   :  { %5770 = vmatprep.subr.bf16.mxu1 %v7388_v30 }
 0x38c   :  { %5771 = vmatpush2.bf16.msra.mxu1 %v7386_v52 }
 0x38d   :  { %5772 = vmatprep.subr.bf16.mxu1 %v7391_v27 }
 0x390   :  { %5773 = vmatpush2.bf16.msra.mxu1 %v7389_v34 }
 0x391   :  { %5774 = vmatprep.subr.bf16.mxu1 %v7394_v39 }
 0x393   :  { %v5577_v31 = vpop.f32.mrf.mxu0 }
 0x394   :  { %v5578_v37 = vadd.f32 %v5577_v31, %v7823_v49  ;;  %5775 = vmatpush2.bf16.msra.mxu1 %v7392_v23  ;;  %v7420_v49 = vld [vmem:[#allocation11 + $0xb0] sm:$0xff]  }
 0x395   :  { %v5579_v41 = vpop.f32.mrf.mxu0  ;;  %5776 = vmatprep.subr.bf16.mxu1 %v7397_v59 }
 0x396   :  { %v5580_v44 = vadd.f32 %v5579_v41, %v7825_v53  ;;  %v7423_v53 = vld [vmem:[#allocation11 + $0xe0] sm:$0xff]  }
 0x397   :  { %v5581_v45 = vpop.f32.mrf.mxu0 }
 0x398   :  { %5777 = vmatpush2.bf16.msra.mxu1 %v7395_v40 }
 0x399   :  { %v5582_v46 = vpop.f32.mrf.mxu0  ;;  %5778 = vmatprep.subr.bf16.mxu1 %v7400_v42 }
 0x39c   :  { %5779 = vmatpush2.bf16.msra.mxu1 %v7398_v5 }
 0x39d   :  { %6982 = vmatprep.subr.bf16.mxu1 %v7417_v50 }
 0x39f   :  { %5781 = vmatmul.mubr.bf16.vlgmr.msra.gmra.mxu1 %v7809_v47  ;;  %v7427_v47 = vld [vmem:[#allocation11 + $0xd0] sm:$0xff]  }
 0x3a0   :  { %6983 = vmatpush3.bf16.msra.mxu1 %v7418_v51 }
 0x3a1   :  { %6984 = vmatprep.subr.bf16.mxu1 %v7419_v10 }
 0x3a4   :  { %6985 = vmatpush3.bf16.msra.mxu1 %v7420_v49 }
 0x3a5   :  { %6986 = vmatprep.subr.bf16.mxu1 %v7421_v25 }
 0x3a8   :  { %6987 = vmatpush3.bf16.msra.mxu1 %v7422_v54 }
 0x3a9   :  { %6988 = vmatprep.subr.bf16.mxu1 %v7423_v53 }
 0x3ac   :  { %6989 = vmatpush3.bf16.msra.mxu1 %v7424_v22 }
 0x3ad   :  { %6990 = vmatprep.subr.bf16.mxu1 %v7425_v0 }
 0x3b0   :  { %6991 = vmatpush3.bf16.msra.mxu1 %v7426_v1 }
 0x3b1   :  { %6992 = vmatprep.subr.bf16.mxu1 %v7427_v47 }
 0x3b4   :  { %6993 = vmatpush3.bf16.msra.mxu1 %v7428_v36 }
 0x3b5   :  { %6994 = vmatprep.subr.bf16.mxu1 %v7429_v20 }
 0x3b8   :  { %6995 = vmatpush3.bf16.msra.mxu1 %v7430_v6 }
 0x3b9   :  { %6996 = vmatprep.subr.bf16.mxu1 %v7431_v12 }
 0x3bc   :  { %6997 = vmatpush3.bf16.msra.mxu1 %v7432_v13 }
 0x3d3   :  { %v5659_v62 = vpop.f32.mrf.mxu0 }
 0x3d4   :  { %v5660_v28 = vadd.f32 %v5659_v62, %v4172_v17 }
 0x3d5   :  { %v5661_v63 = vpop.f32.mrf.mxu0 }
 0x3d6   :  { %v5662_v19 = vadd.f32 %v5661_v63, %v4176_v18 }
 0x3d7   :  { %v5663_v16 = vpop.f32.mrf.mxu0 }
 0x3d9   :  { %v5664_v2 = vpop.f32.mrf.mxu0 }
 0x3df   :  { %v5618_v3 = vpop.f32.mrf.mxu1 }
 0x3e0   :  { %v5619_v7 = vadd.f32 %v5618_v3, %v5578_v37 }
 0x3e1   :  { %v5620_v4 = vpop.f32.mrf.mxu1 }
 0x3e2   :  { %v5621_v38 = vadd.f32 %v5620_v4, %v5580_v44  ;;  %v5789_v8 = vmax.f32 %v5619_v7, 0.0 }
 0x3e3   :  { %v5622_v9 = vpop.f32.mrf.mxu1 }
 0x3e4   :  { %v5790_v11 = vmax.f32 %v5621_v38, 0.0  ;;  %v5793_v14 = vpack.c.bf16 %v5789_v8, %v5789_v8 }
 0x3e5   :  { %v5623_v55 = vpop.f32.mrf.mxu1 }
 0x3e6   :  { %v5794_v35 = vpack.c.bf16 %v5790_v11, %v5790_v11 }
 0x3e8   :  { %6085 = vmatprep.mubr.bf16.mxu0 %v5794_v35 }
 0x3e9   :  { %6086 = vmatmul.mubr.bf16.vlgmr.msra.gmra.mxu0 %v5793_v14 }
 0x414   :  { %v5741_v61 = vpop.f32.mrf.mxu0 }
 0x416   :  { %v5743_v15 = vpop.f32.mrf.mxu0 }
 0x418   :  { %v5745_v33 = vpop.f32.mrf.mxu0 }
 0x41a   :  { %v5746_v56 = vpop.f32.mrf.mxu0 }
 0x41f   :  { %v5700_v57 = vpop.f32.mrf.mxu1 }
 0x420   :  { %v5701_v24 = vadd.f32 %v5700_v57, %v5660_v28 }
 0x421   :  { %v5702_v32 = vpop.f32.mrf.mxu1 }
 0x422   :  { %v5703_v26 = vadd.f32 %v5702_v32, %v5662_v19  ;;  %v5742_v29 = vadd.f32 %v5741_v61, %v5701_v24 }
 0x423   :  { %v5704_v21 = vpop.f32.mrf.mxu1 }
 0x424   :  { %v5744_v30 = vadd.f32 %v5743_v15, %v5703_v26 }
 0x425   :  { %v5705_v52 = vpop.f32.mrf.mxu1 }
 0x45f   :  { %v5782_v27 = vpop.f32.mrf.mxu1 }
 0x460   :  { %v5783_v34 = vadd.f32 %v5782_v27, %v5742_v29 }
 0x461   :  { %v5784_v39 = vpop.f32.mrf.mxu1 }
 0x462   :  { %v5785_v23 = vadd.f32 %v5784_v39, %v5744_v30  ;;  %v5791_v43 = vmax.f32 %v5783_v34, 0.0 }
 0x463   :  { %v5786_v59 = vpop.f32.mrf.mxu1 }
 0x464   :  { %v5792_v31 = vmax.f32 %v5785_v23, 0.0  ;;  %v5795_v48 = vpack.c.bf16 %v5791_v43, %v5791_v43 }
 0x465   :  { %v5787_v60 = vpop.f32.mrf.mxu1 }
 0x466   :  { %v5796_v37 = vpack.c.bf16 %v5792_v31, %v5792_v31 }
 0x468   :  { %6125 = vmatprep.mubr.bf16.mxu1 %v5796_v37 }
 0x469   :  { %6126 = vmatmul.mubr.bf16.vlgmr.msra.gmra.mxu1 %v5795_v48 }
 0x4a9   :  { %v6976_v58 = vpop.f32.mrf.mxu0 }
 0x4ab   :  { %v6977_v40 = vpop.f32.mrf.mxu0 }
 0x4ac   :  { %v6978_v41 = vadd.f32 %v6977_v40, %v6976_v58 }
 0x4ad   :  { %v6979_v42 = vpop.f32.mrf.mxu0 }
 0x4af   :  { %v6980_v44 = vpop.f32.mrf.mxu0 }
 0x529   :  { %v6998_v45 = vpop.f32.mrf.mxu1 }
 0x52b   :  { %v6999_v5 = vpop.f32.mrf.mxu1 }
 0x52c   :  { %v7000_v46 = vadd.f32 %v6999_v5, %v6998_v45 }
 0x52d   :  { %v7001_v50 = vpop.f32.mrf.mxu1 }
 0x52e   :  { %v6128_v51 = vadd.f32 %v7000_v46, %v6978_v41 }
 0x52f   :  { %v7002_v10 = vpop.f32.mrf.mxu1 }
 0x530   :  { %v6959_v49 = vmul.f32 -1.442695, %v6128_v51 }
 0x532   :  { %7433 = vpow2.f32 %v6959_v49 }
 0x53f   :  { %v7434_v25 = vpop.eup %7433 }
 0x540   :  { %v6136_v54 = vadd.f32 1.0, %v7434_v25 }
 0x542   :  { %7435 = vrcp.f32 %v6136_v54 }
 0x54f   :  { %v7436_v53 = vpop.eup %7435 }
 0x550   :  { %v6139_v22 = vpack.c.bf16 %v7436_v53, %v7436_v53 }
 0x552   :  { %6140 = vst [vmem:[#allocation13] sm:$0xf] %v6139_v22 }
 0x553   :  { %7569 = shalt.err (!%p7566_p6)
}
 0x554   :  { %6150 = dma.vmem_to_hbm [thread:$0]  %s6148_s5, 64, %s7847_s6, [#allocation4]  }
 0x555   :  { %7586 = dma.done.wait [#allocation4], 64  }
 0x556   :  { %7587 = vsyncadd [#allocation4], 4294967232 }
 0x557   :  { %6154 = vsyncpa [#allocation3], 1 }
 0x558   :  { %6155 = vsyncpa [#allocation6], 1 }
 0x559   :  { %6156 = vsyncpa [#allocation9], 1 }
 0x55a   :  { %6157 = vsyncpa [#allocation12], 1 }
 0x55b   :  { %6158 = vsyncpa [#allocation4], 1 }

</bundles_post_ra>
